<compile_context>
chip_gen: v7x
topology: tpu7x:2x2x1
jax: 0.10.0
libtpu: 0.0.40
codegen_flags: <defaults>
</compile_context>

<pallas_src>
import functools
import math

import jax
import jax.numpy as jnp
from jax.experimental import pallas as pl
from jax.experimental.pallas import tpu as pltpu


# ----------------------------------------------------------------------------
# Kernel 1: one ConvLSTM direction (T timesteps) per grid step.
# ----------------------------------------------------------------------------
def _convlstm_dir_kernel(xfirst_ref, xsecond_ref, wconv_ref, bconv_ref, mask_ref,
                         hfin_ref, hpad_ref, *, Hc, Cin, K, Wp, Npix, margin, T):
    """Transposed (channels, pixels) ConvLSTM direction.

    hpad_ref: (Cpad, TOT) bf16 scratch holding the zero-padded cat(h, x) image.
      rows [0, Hc)        : hidden channels  (sublane-aligned for the h writeback)
      rows [Hc, Hc+Cin)   : input channels
      remaining rows      : zero channel padding (keeps the matmul K dim aligned)
    Pixels are flattened as b*Hp*Wp + y*Wp + x, offset by `margin` lanes, so the
    conv window for tap (dy, dx) is the contiguous lane slice starting at
    margin + (dy-pad)*Wp + (dx-pad).
    """
    Cpad, TOT = hpad_ref.shape
    pad = (K - 1) // 2
    four_hc = 4 * Hc

    # Fresh state for this direction / grid step (scratch persists across grid
    # steps on a core): h0 = 0 and all halo / margin lanes = 0.
    hpad_ref[...] = jnp.zeros_like(hpad_ref)

    mask = mask_ref[...]          # (1, Npix) f32: 1 on interior pixels, 0 on the halo
    bvec = bconv_ref[0]           # (4*Hc, 1)  f32
    c = jnp.zeros((Hc, Npix), jnp.float32)
    h = jnp.zeros((Hc, Npix), jnp.float32)

    for t in range(T):
        # Write this timestep's input channels (full-width rows, halo zeros baked in).
        x_t = xfirst_ref[0] if t == 0 else xsecond_ref[...]
        hpad_ref[Hc:Hc + Cin, :] = x_t

        # KxK conv over cat(h, x): K*K shifted-window matmuls, f32 accumulation.
        acc = jnp.zeros((four_hc, Npix), jnp.float32)
        for kk in range(K * K):
            dy, dx = kk // K, kk % K
            off = margin + (dy - pad) * Wp + (dx - pad)
            w_tap = wconv_ref[0, :, kk * Cpad:(kk + 1) * Cpad]     # (4Hc, Cpad) bf16
            win = hpad_ref[:, off:off + Npix]                      # (Cpad, Npix) bf16
            acc = acc + jnp.dot(w_tap, win, preferred_element_type=jnp.float32)
        A = acc + bvec                                             # (4Hc, Npix) f32

        # Fused gate activations, full lane width, sublane-aligned row blocks.
        ifo = jax.nn.sigmoid(A[0:3 * Hc, :])
        g = jnp.tanh(A[3 * Hc:4 * Hc, :])
        i = ifo[0:Hc, :]
        f = ifo[Hc:2 * Hc, :]
        o = ifo[2 * Hc:3 * Hc, :]
        c = c * f + i * g
        h = o * jnp.tanh(c)

        if t + 1 < T:
            # Feed h back for the next step; mask halo pixels so the conv's zero
            # padding (and batch separation) stays intact.
            hpad_ref[0:Hc, margin:margin + Npix] = (h * mask).astype(hpad_ref.dtype)

    hfin_ref[0] = h


# ----------------------------------------------------------------------------
# Kernel 2: 1x1-conv head + Softmax2d over classes, lane-dense output.
# ----------------------------------------------------------------------------
def _head_kernel(hfin_ref, whead_ref, bhead_ref, out_ref, *, Hc, NC):
    hf = hfin_ref[0]                           # (Hc, Npix) f32, forward direction
    hr = hfin_ref[1]                           # (Hc, Npix) f32, reverse direction
    w = whead_ref[...]                         # (NCpad, 2*Hc) f32 (rows >= NC are zero)
    logits = (jnp.dot(w[:, :Hc], hf, preferred_element_type=jnp.float32)
              + jnp.dot(w[:, Hc:], hr, preferred_element_type=jnp.float32)
              + bhead_ref[...])[:NC, :]        # (NC, Npix)
    m = jnp.max(logits, axis=0, keepdims=True)
    e = jnp.exp(logits - m)
    s = jnp.sum(e, axis=0, keepdims=True)
    out_ref[...] = e * pl.reciprocal(s, approx=True)


# ----------------------------------------------------------------------------
# Wrapper: one-time layout work (pad + flatten pixels, repack weights), two
# pallas_calls, cheap slice/transpose back to NCHW.
# ----------------------------------------------------------------------------
def bdclstm_forward(params, x1, x2, x3):
    """x1, x2, x3: NCHW (B, Cin, H, W). Returns NCHW (B, num_classes, H, W)."""
    B, Cin, H, W = x1.shape
    KK, Cfull, four_hc = params["fwd_w"].shape
    K = int(round(math.sqrt(KK)))
    Hc = four_hc // 4
    NC = params["head_w"].shape[1]
    assert Cfull == Cin + Hc
    T = 2
    pad = (K - 1) // 2
    Hp, Wp = H + 2 * pad, W + 2 * pad
    Npix = B * Hp * Wp                      # flattened padded pixels (lane axis)
    MARGIN = 128                            # >= pad*Wp + pad; keeps interior stores lane-aligned
    assert MARGIN >= pad * Wp + pad
    TOT = MARGIN + Npix + MARGIN
    Cpad = -(-Cfull // 8) * 8               # conv contraction dim padded to a sublane granule
    NCpad = -(-NC // 8) * 8                 # head output rows padded to a sublane granule

    def to_flat(x):  # NCHW -> (Cin, TOT) bf16, zero spatial halo + lane margins baked in
        xp = jnp.pad(x.astype(jnp.float32), ((0, 0), (0, 0), (pad, pad), (pad, pad)))
        xf = jnp.transpose(xp, (1, 0, 2, 3)).reshape(Cin, Npix)
        return jnp.pad(xf, ((0, 0), (MARGIN, TOT - MARGIN - Npix))).astype(jnp.bfloat16)

    xfirst = jnp.stack([to_flat(x1), to_flat(x3)])     # (2, Cin, TOT): per-direction first frame
    xsecond = to_flat(x2)                              # (Cin, TOT): shared second frame

    def pack_w(w):  # (KK, Cfull[x,h], 4Hc) -> (4Hc, KK*Cpad) bf16, channel order [h, x, 0-pad]
        w_hx = jnp.concatenate([w[:, Cin:, :], w[:, :Cin, :]], axis=1)   # -> [h, x]
        w_hx = jnp.pad(w_hx, ((0, 0), (0, Cpad - Cfull), (0, 0)))        # (KK, Cpad, 4Hc)
        return jnp.transpose(w_hx, (2, 0, 1)).reshape(four_hc, KK * Cpad).astype(jnp.bfloat16)

    wconv = jnp.stack([pack_w(params["fwd_w"]), pack_w(params["rev_w"])])   # (2, 4Hc, KK*Cpad)
    bconv = jnp.stack([params["fwd_b"].reshape(four_hc, 1),
                       params["rev_b"].reshape(four_hc, 1)]).astype(jnp.float32)  # (2, 4Hc, 1)

    # Interior-pixel mask over the flattened padded pixel axis.
    mask = jnp.pad(jnp.ones((B, H, W), jnp.float32),
                   ((0, 0), (pad, pad), (pad, pad))).reshape(1, Npix)

    conv_kernel = functools.partial(_convlstm_dir_kernel, Hc=Hc, Cin=Cin, K=K,
                                    Wp=Wp, Npix=Npix, margin=MARGIN, T=T)
    hfin = pl.pallas_call(
        conv_kernel,
        out_shape=jax.ShapeDtypeStruct((2, Hc, Npix), jnp.float32),
        grid_spec=pltpu.PrefetchScalarGridSpec(
            num_scalar_prefetch=0,
            grid=(2,),                                               # one direction per grid step
            in_specs=[
                pl.BlockSpec((1, Cin, TOT), lambda d: (d, 0, 0)),    # first frame of direction d
                pl.BlockSpec((Cin, TOT), lambda d: (0, 0)),          # shared second frame (x2)
                pl.BlockSpec((1, four_hc, KK * Cpad), lambda d: (d, 0, 0)),
                pl.BlockSpec((1, four_hc, 1), lambda d: (d, 0, 0)),
                pl.BlockSpec((1, Npix), lambda d: (0, 0)),
            ],
            out_specs=pl.BlockSpec((1, Hc, Npix), lambda d: (d, 0, 0)),
            scratch_shapes=[pltpu.VMEM((Cpad, TOT), jnp.bfloat16)],  # padded x|h image
        ),
        compiler_params=pltpu.CompilerParams(
            dimension_semantics=("parallel",),        # v7x: one direction per TensorCore
            vmem_limit_bytes=16 * 1024 * 1024),
    )(xfirst, xsecond, wconv, bconv, mask)

    whead = jnp.zeros((NCpad, 2 * Hc), jnp.float32).at[:NC].set(
        params["head_w"].T.astype(jnp.float32))
    bhead = jnp.zeros((NCpad, 1), jnp.float32).at[:NC].set(
        params["head_b"].reshape(NC, 1).astype(jnp.float32))

    vmem = pl.BlockSpec(memory_space=pltpu.MemorySpace.VMEM)
    out = pl.pallas_call(
        functools.partial(_head_kernel, Hc=Hc, NC=NC),
        out_shape=jax.ShapeDtypeStruct((NC, Npix), jnp.float32),
        in_specs=[vmem, vmem, vmem],
        out_specs=vmem,
        compiler_params=pltpu.CompilerParams(vmem_limit_bytes=16 * 1024 * 1024),
    )(hfin, whead, bhead)

    # (NC, B*Hp*Wp) -> crop halo -> (B, NC, H, W); cheap XLA slice/transpose.
    y = out.reshape(NC, B, Hp, Wp)[:, :, pad:pad + H, pad:pad + W]
    return jnp.transpose(y, (1, 0, 2, 3))


# ----------------------------------------------------------------------------
# Pure-JAX reference (correctness check only).
# ----------------------------------------------------------------------------
def _ref_cell(x, h, c, w, b, K, Hc):
    xh = jnp.concatenate([x, h], axis=-1)
    wk = w.reshape(K, K, xh.shape[-1], 4 * Hc)
    A = jax.lax.conv_general_dilated(
        xh, wk, window_strides=(1, 1), padding="SAME",
        dimension_numbers=("NHWC", "HWIO", "NHWC")) + b[0]
    i = jax.nn.sigmoid(A[..., 0 * Hc:1 * Hc])
    f = jax.nn.sigmoid(A[..., 1 * Hc:2 * Hc])
    o = jax.nn.sigmoid(A[..., 2 * Hc:3 * Hc])
    g = jnp.tanh(A[..., 3 * Hc:4 * Hc])
    c_new = c * f + i * g
    return o * jnp.tanh(c_new), c_new


def bdclstm_reference(params, x1, x2, x3):
    B, Cin, H, W = x1.shape
    KK, Cfull, four_hc = params["fwd_w"].shape
    K = int(round(math.sqrt(KK)))
    Hc = four_hc // 4
    to_nhwc = lambda t: jnp.transpose(t, (0, 2, 3, 1)).astype(jnp.float32)
    x1n, x2n, x3n = to_nhwc(x1), to_nhwc(x2), to_nhwc(x3)

    def run(seq, w, b):
        h = jnp.zeros((B, H, W, Hc), jnp.float32)
        c = jnp.zeros((B, H, W, Hc), jnp.float32)
        for x in seq:
            h, c = _ref_cell(x, h, c, w, b, K, Hc)
        return h

    hf = run([x1n, x2n], params["fwd_w"], params["fwd_b"])
    hr = run([x3n, x2n], params["rev_w"], params["rev_b"])
    ycat = jnp.concatenate([hf, hr], axis=-1)
    logits = jnp.einsum("bhwc,cn->bhwn", ycat, params["head_w"]) + params["head_b"][0]
    y = jax.nn.softmax(logits, axis=-1)
    return jnp.transpose(y, (0, 3, 1, 2))


# ----------------------------------------------------------------------------
if __name__ == "__main__":
    # Small shapes consistent with the module (hidden_channels must be even).
    B, Cin, H, W = 2, 4, 16, 16
    Hc, K, NC = 8, 5, 2

    key = jax.random.PRNGKey(0)
    k1, k2, k3, k4, k5, k6, kx1, kx2, kx3 = jax.random.split(key, 9)

    params = {
        "fwd_w": 0.1 * jax.random.normal(k1, (K * K, Cin + Hc, 4 * Hc), jnp.float32),
        "fwd_b": 0.1 * jax.random.normal(k2, (1, 4 * Hc), jnp.float32),
        "rev_w": 0.1 * jax.random.normal(k3, (K * K, Cin + Hc, 4 * Hc), jnp.float32),
        "rev_b": 0.1 * jax.random.normal(k4, (1, 4 * Hc), jnp.float32),
        "head_w": 0.1 * jax.random.normal(k5, (2 * Hc, NC), jnp.float32),
        "head_b": 0.1 * jax.random.normal(k6, (1, NC), jnp.float32),
    }

    x1 = jax.random.normal(kx1, (B, Cin, H, W), jnp.float32)
    x2 = jax.random.normal(kx2, (B, Cin, H, W), jnp.float32)
    x3 = jax.random.normal(kx3, (B, Cin, H, W), jnp.float32)

    fwd = jax.jit(bdclstm_forward)
    y = jax.block_until_ready(fwd(params, x1, x2, x3))
    y_ref = jax.block_until_ready(bdclstm_reference(params, x1, x2, x3))

    assert y.shape == (B, NC, H, W), y.shape
    max_err = float(jnp.max(jnp.abs(y - y_ref)))
    # bf16 conv operands (f32 accumulation) -> observed error ~1e-3 on softmax
    # probabilities; 1e-2 tolerance leaves headroom.
    assert jnp.allclose(y, y_ref, atol=1e-2, rtol=1e-2), max_err

    print("KERNEL_OK")
</pallas_src>

<mosaic_0001>
module attributes {stable_mosaic.version = 11 : i64} {
  func.func @_convlstm_dir_kernel(%arg0: i32, %arg1: memref<1x4x1056xbf16, #tpu.memory_space<vmem>>, %arg2: memref<4x1056xbf16, #tpu.memory_space<vmem>>, %arg3: memref<1x32x400xbf16, #tpu.memory_space<vmem>>, %arg4: memref<1x32x1xf32, #tpu.memory_space<vmem>>, %arg5: memref<1x800xf32, #tpu.memory_space<vmem>>, %arg6: memref<1x8x800xf32, #tpu.memory_space<vmem>>, %arg7: memref<16x1056xbf16, #tpu.memory_space<vmem>>) attributes {dimension_semantics = [#tpu.dimension_semantics<parallel>], iteration_bounds = array<i64: 2>, scalar_prefetch = 0 : i64, scratch_operands = 1 : i64, tpu.core_type = #tpu.core_type<tc>, window_params = [{transform_indices = @transform_0, window_bounds = array<i64: 1, 4, 1056>}, {pipeline_mode = #tpu.pipeline_mode<synchronous>, transform_indices = @transform_1, window_bounds = array<i64: 4, 1056>}, {transform_indices = @transform_2, window_bounds = array<i64: 1, 32, 400>}, {transform_indices = @transform_3, window_bounds = array<i64: 1, 32, 1>}, {pipeline_mode = #tpu.pipeline_mode<synchronous>, transform_indices = @transform_4, window_bounds = array<i64: 1, 800>}, {transform_indices = @transform_5, window_bounds = array<i64: 1, 8, 800>}]} {
    %cst = arith.constant 0.000000e+00 : bf16
    %0 = vector.broadcast %cst : bf16 to vector<16x1056xbf16>
    %c0 = arith.constant 0 : index
    %c0_0 = arith.constant 0 : index
    %1 = vector.load %arg7[%c0, %c0_0] : memref<16x1056xbf16, #tpu.memory_space<vmem>>, vector<16x1056xbf16>
    tpu.vector_store %arg7[%c0, %c0_0], %0 {strides = array<i32>} : memref<16x1056xbf16, #tpu.memory_space<vmem>>, vector<16x1056xbf16>,
    %c0_1 = arith.constant 0 : index
    %c0_2 = arith.constant 0 : index
    %2 = vector.load %arg5[%c0_1, %c0_2] : memref<1x800xf32, #tpu.memory_space<vmem>>, vector<1x800xf32>
    %c0_3 = arith.constant 0 : index
    %c0_4 = arith.constant 0 : index
    %c0_5 = arith.constant 0 : index
    %3 = vector.load %arg4[%c0_3, %c0_4, %c0_5] : memref<1x32x1xf32, #tpu.memory_space<vmem>>, vector<1x32x1xf32>
    %4 = vector.shape_cast %3 : vector<1x32x1xf32> to vector<32x1xf32>
    %cst_6 = arith.constant 0.000000e+00 : f32
    %5 = vector.broadcast %cst_6 : f32 to vector<8x800xf32>
    %c0_7 = arith.constant 0 : index
    %c0_8 = arith.constant 0 : index
    %c0_9 = arith.constant 0 : index
    %6 = vector.load %arg1[%c0_7, %c0_8, %c0_9] : memref<1x4x1056xbf16, #tpu.memory_space<vmem>>, vector<1x4x1056xbf16>
    %7 = vector.shape_cast %6 : vector<1x4x1056xbf16> to vector<4x1056xbf16>
    %c8 = arith.constant 8 : index
    %c0_10 = arith.constant 0 : index
    %8 = vector.load %arg7[%c8, %c0_10] : memref<16x1056xbf16, #tpu.memory_space<vmem>>, vector<4x1056xbf16>
    tpu.vector_store %arg7[%c8, %c0_10], %7 {strides = array<i32>} : memref<16x1056xbf16, #tpu.memory_space<vmem>>, vector<4x1056xbf16>,
    %cst_11 = arith.constant 0.000000e+00 : f32
    %9 = vector.broadcast %cst_11 : f32 to vector<32x800xf32>
    %c0_12 = arith.constant 0 : index
    %c0_13 = arith.constant 0 : index
    %c0_14 = arith.constant 0 : index
    %10 = vector.load %arg3[%c0_12, %c0_13, %c0_14] : memref<1x32x400xbf16, #tpu.memory_space<vmem>>, vector<1x32x16xbf16>
    %11 = vector.shape_cast %10 : vector<1x32x16xbf16> to vector<32x16xbf16>
    %c0_15 = arith.constant 0 : index
    %c86 = arith.constant 86 : index
    %12 = vector.load %arg7[%c0_15, %c86] : memref<16x1056xbf16, #tpu.memory_space<vmem>>, vector<16x800xbf16>
    %cst_16 = arith.constant dense<0.000000e+00> : vector<32x800xf32>
    %13 = tpu.matmul %11, %12, %cst_16 {dimension_numbers = #tpu.dot_dimension_numbers<[1], [0], [0], [1], [0, 0, 1, 1], [], []>} : vector<32x16xbf16>, vector<16x800xbf16>, vector<32x800xf32> -> vector<32x800xf32>
    %14 = arith.addf %9, %13 : vector<32x800xf32>
    %c0_17 = arith.constant 0 : index
    %c0_18 = arith.constant 0 : index
    %c16 = arith.constant 16 : index
    %15 = vector.load %arg3[%c0_17, %c0_18, %c16] : memref<1x32x400xbf16, #tpu.memory_space<vmem>>, vector<1x32x16xbf16>
    %16 = vector.shape_cast %15 : vector<1x32x16xbf16> to vector<32x16xbf16>
    %c0_19 = arith.constant 0 : index
    %c87 = arith.constant 87 : index
    %17 = vector.load %arg7[%c0_19, %c87] : memref<16x1056xbf16, #tpu.memory_space<vmem>>, vector<16x800xbf16>
    %cst_20 = arith.constant dense<0.000000e+00> : vector<32x800xf32>
    %18 = tpu.matmul %16, %17, %cst_20 {dimension_numbers = #tpu.dot_dimension_numbers<[1], [0], [0], [1], [0, 0, 1, 1], [], []>} : vector<32x16xbf16>, vector<16x800xbf16>, vector<32x800xf32> -> vector<32x800xf32>
    %19 = arith.addf %14, %18 : vector<32x800xf32>
    %c0_21 = arith.constant 0 : index
    %c0_22 = arith.constant 0 : index
    %c32 = arith.constant 32 : index
    %20 = vector.load %arg3[%c0_21, %c0_22, %c32] : memref<1x32x400xbf16, #tpu.memory_space<vmem>>, vector<1x32x16xbf16>
    %21 = vector.shape_cast %20 : vector<1x32x16xbf16> to vector<32x16xbf16>
    %c0_23 = arith.constant 0 : index
    %c88 = arith.constant 88 : index
    %22 = vector.load %arg7[%c0_23, %c88] : memref<16x1056xbf16, #tpu.memory_space<vmem>>, vector<16x800xbf16>
    %cst_24 = arith.constant dense<0.000000e+00> : vector<32x800xf32>
    %23 = tpu.matmul %21, %22, %cst_24 {dimension_numbers = #tpu.dot_dimension_numbers<[1], [0], [0], [1], [0, 0, 1, 1], [], []>} : vector<32x16xbf16>, vector<16x800xbf16>, vector<32x800xf32> -> vector<32x800xf32>
    %24 = arith.addf %19, %23 : vector<32x800xf32>
    %c0_25 = arith.constant 0 : index
    %c0_26 = arith.constant 0 : index
    %c48 = arith.constant 48 : index
    %25 = vector.load %arg3[%c0_25, %c0_26, %c48] : memref<1x32x400xbf16, #tpu.memory_space<vmem>>, vector<1x32x16xbf16>
    %26 = vector.shape_cast %25 : vector<1x32x16xbf16> to vector<32x16xbf16>
    %c0_27 = arith.constant 0 : index
    %c89 = arith.constant 89 : index
    %27 = vector.load %arg7[%c0_27, %c89] : memref<16x1056xbf16, #tpu.memory_space<vmem>>, vector<16x800xbf16>
    %cst_28 = arith.constant dense<0.000000e+00> : vector<32x800xf32>
    %28 = tpu.matmul %26, %27, %cst_28 {dimension_numbers = #tpu.dot_dimension_numbers<[1], [0], [0], [1], [0, 0, 1, 1], [], []>} : vector<32x16xbf16>, vector<16x800xbf16>, vector<32x800xf32> -> vector<32x800xf32>
    %29 = arith.addf %24, %28 : vector<32x800xf32>
    %c0_29 = arith.constant 0 : index
    %c0_30 = arith.constant 0 : index
    %c64 = arith.constant 64 : index
    %30 = vector.load %arg3[%c0_29, %c0_30, %c64] : memref<1x32x400xbf16, #tpu.memory_space<vmem>>, vector<1x32x16xbf16>
    %31 = vector.shape_cast %30 : vector<1x32x16xbf16> to vector<32x16xbf16>
    %c0_31 = arith.constant 0 : index
    %c90 = arith.constant 90 : index
    %32 = vector.load %arg7[%c0_31, %c90] : memref<16x1056xbf16, #tpu.memory_space<vmem>>, vector<16x800xbf16>
    %cst_32 = arith.constant dense<0.000000e+00> : vector<32x800xf32>
    %33 = tpu.matmul %31, %32, %cst_32 {dimension_numbers = #tpu.dot_dimension_numbers<[1], [0], [0], [1], [0, 0, 1, 1], [], []>} : vector<32x16xbf16>, vector<16x800xbf16>, vector<32x800xf32> -> vector<32x800xf32>
    %34 = arith.addf %29, %33 : vector<32x800xf32>
    %c0_33 = arith.constant 0 : index
    %c0_34 = arith.constant 0 : index
    %c80 = arith.constant 80 : index
    %35 = vector.load %arg3[%c0_33, %c0_34, %c80] : memref<1x32x400xbf16, #tpu.memory_space<vmem>>, vector<1x32x16xbf16>
    %36 = vector.shape_cast %35 : vector<1x32x16xbf16> to vector<32x16xbf16>
    %c0_35 = arith.constant 0 : index
    %c106 = arith.constant 106 : index
    %37 = vector.load %arg7[%c0_35, %c106] : memref<16x1056xbf16, #tpu.memory_space<vmem>>, vector<16x800xbf16>
    %cst_36 = arith.constant dense<0.000000e+00> : vector<32x800xf32>
    %38 = tpu.matmul %36, %37, %cst_36 {dimension_numbers = #tpu.dot_dimension_numbers<[1], [0], [0], [1], [0, 0, 1, 1], [], []>} : vector<32x16xbf16>, vector<16x800xbf16>, vector<32x800xf32> -> vector<32x800xf32>
    %39 = arith.addf %34, %38 : vector<32x800xf32>
    %c0_37 = arith.constant 0 : index
    %c0_38 = arith.constant 0 : index
    %c96 = arith.constant 96 : index
    %40 = vector.load %arg3[%c0_37, %c0_38, %c96] : memref<1x32x400xbf16, #tpu.memory_space<vmem>>, vector<1x32x16xbf16>
    %41 = vector.shape_cast %40 : vector<1x32x16xbf16> to vector<32x16xbf16>
    %c0_39 = arith.constant 0 : index
    %c107 = arith.constant 107 : index
    %42 = vector.load %arg7[%c0_39, %c107] : memref<16x1056xbf16, #tpu.memory_space<vmem>>, vector<16x800xbf16>
    %cst_40 = arith.constant dense<0.000000e+00> : vector<32x800xf32>
    %43 = tpu.matmul %41, %42, %cst_40 {dimension_numbers = #tpu.dot_dimension_numbers<[1], [0], [0], [1], [0, 0, 1, 1], [], []>} : vector<32x16xbf16>, vector<16x800xbf16>, vector<32x800xf32> -> vector<32x800xf32>
    %44 = arith.addf %39, %43 : vector<32x800xf32>
    %c0_41 = arith.constant 0 : index
    %c0_42 = arith.constant 0 : index
    %c112 = arith.constant 112 : index
    %45 = vector.load %arg3[%c0_41, %c0_42, %c112] : memref<1x32x400xbf16, #tpu.memory_space<vmem>>, vector<1x32x16xbf16>
    %46 = vector.shape_cast %45 : vector<1x32x16xbf16> to vector<32x16xbf16>
    %c0_43 = arith.constant 0 : index
    %c108 = arith.constant 108 : index
    %47 = vector.load %arg7[%c0_43, %c108] : memref<16x1056xbf16, #tpu.memory_space<vmem>>, vector<16x800xbf16>
    %cst_44 = arith.constant dense<0.000000e+00> : vector<32x800xf32>
    %48 = tpu.matmul %46, %47, %cst_44 {dimension_numbers = #tpu.dot_dimension_numbers<[1], [0], [0], [1], [0, 0, 1, 1], [], []>} : vector<32x16xbf16>, vector<16x800xbf16>, vector<32x800xf32> -> vector<32x800xf32>
    %49 = arith.addf %44, %48 : vector<32x800xf32>
    %c0_45 = arith.constant 0 : index
    %c0_46 = arith.constant 0 : index
    %c128 = arith.constant 128 : index
    %50 = vector.load %arg3[%c0_45, %c0_46, %c128] : memref<1x32x400xbf16, #tpu.memory_space<vmem>>, vector<1x32x16xbf16>
    %51 = vector.shape_cast %50 : vector<1x32x16xbf16> to vector<32x16xbf16>
    %c0_47 = arith.constant 0 : index
    %c109 = arith.constant 109 : index
    %52 = vector.load %arg7[%c0_47, %c109] : memref<16x1056xbf16, #tpu.memory_space<vmem>>, vector<16x800xbf16>
    %cst_48 = arith.constant dense<0.000000e+00> : vector<32x800xf32>
    %53 = tpu.matmul %51, %52, %cst_48 {dimension_numbers = #tpu.dot_dimension_numbers<[1], [0], [0], [1], [0, 0, 1, 1], [], []>} : vector<32x16xbf16>, vector<16x800xbf16>, vector<32x800xf32> -> vector<32x800xf32>
    %54 = arith.addf %49, %53 : vector<32x800xf32>
    %c0_49 = arith.constant 0 : index
    %c0_50 = arith.constant 0 : index
    %c144 = arith.constant 144 : index
    %55 = vector.load %arg3[%c0_49, %c0_50, %c144] : memref<1x32x400xbf16, #tpu.memory_space<vmem>>, vector<1x32x16xbf16>
    %56 = vector.shape_cast %55 : vector<1x32x16xbf16> to vector<32x16xbf16>
    %c0_51 = arith.constant 0 : index
    %c110 = arith.constant 110 : index
    %57 = vector.load %arg7[%c0_51, %c110] : memref<16x1056xbf16, #tpu.memory_space<vmem>>, vector<16x800xbf16>
    %cst_52 = arith.constant dense<0.000000e+00> : vector<32x800xf32>
    %58 = tpu.matmul %56, %57, %cst_52 {dimension_numbers = #tpu.dot_dimension_numbers<[1], [0], [0], [1], [0, 0, 1, 1], [], []>} : vector<32x16xbf16>, vector<16x800xbf16>, vector<32x800xf32> -> vector<32x800xf32>
    %59 = arith.addf %54, %58 : vector<32x800xf32>
    %c0_53 = arith.constant 0 : index
    %c0_54 = arith.constant 0 : index
    %c160 = arith.constant 160 : index
    %60 = vector.load %arg3[%c0_53, %c0_54, %c160] : memref<1x32x400xbf16, #tpu.memory_space<vmem>>, vector<1x32x16xbf16>
    %61 = vector.shape_cast %60 : vector<1x32x16xbf16> to vector<32x16xbf16>
    %c0_55 = arith.constant 0 : index
    %c126 = arith.constant 126 : index
    %62 = vector.load %arg7[%c0_55, %c126] : memref<16x1056xbf16, #tpu.memory_space<vmem>>, vector<16x800xbf16>
    %cst_56 = arith.constant dense<0.000000e+00> : vector<32x800xf32>
    %63 = tpu.matmul %61, %62, %cst_56 {dimension_numbers = #tpu.dot_dimension_numbers<[1], [0], [0], [1], [0, 0, 1, 1], [], []>} : vector<32x16xbf16>, vector<16x800xbf16>, vector<32x800xf32> -> vector<32x800xf32>
    %64 = arith.addf %59, %63 : vector<32x800xf32>
    %c0_57 = arith.constant 0 : index
    %c0_58 = arith.constant 0 : index
    %c176 = arith.constant 176 : index
    %65 = vector.load %arg3[%c0_57, %c0_58, %c176] : memref<1x32x400xbf16, #tpu.memory_space<vmem>>, vector<1x32x16xbf16>
    %66 = vector.shape_cast %65 : vector<1x32x16xbf16> to vector<32x16xbf16>
    %c0_59 = arith.constant 0 : index
    %c127 = arith.constant 127 : index
    %67 = vector.load %arg7[%c0_59, %c127] : memref<16x1056xbf16, #tpu.memory_space<vmem>>, vector<16x800xbf16>
    %cst_60 = arith.constant dense<0.000000e+00> : vector<32x800xf32>
    %68 = tpu.matmul %66, %67, %cst_60 {dimension_numbers = #tpu.dot_dimension_numbers<[1], [0], [0], [1], [0, 0, 1, 1], [], []>} : vector<32x16xbf16>, vector<16x800xbf16>, vector<32x800xf32> -> vector<32x800xf32>
    %69 = arith.addf %64, %68 : vector<32x800xf32>
    %c0_61 = arith.constant 0 : index
    %c0_62 = arith.constant 0 : index
    %c192 = arith.constant 192 : index
    %70 = vector.load %arg3[%c0_61, %c0_62, %c192] : memref<1x32x400xbf16, #tpu.memory_space<vmem>>, vector<1x32x16xbf16>
    %71 = vector.shape_cast %70 : vector<1x32x16xbf16> to vector<32x16xbf16>
    %c0_63 = arith.constant 0 : index
    %c128_64 = arith.constant 128 : index
    %72 = vector.load %arg7[%c0_63, %c128_64] : memref<16x1056xbf16, #tpu.memory_space<vmem>>, vector<16x800xbf16>
    %cst_65 = arith.constant dense<0.000000e+00> : vector<32x800xf32>
    %73 = tpu.matmul %71, %72, %cst_65 {dimension_numbers = #tpu.dot_dimension_numbers<[1], [0], [0], [1], [0, 0, 1, 1], [], []>} : vector<32x16xbf16>, vector<16x800xbf16>, vector<32x800xf32> -> vector<32x800xf32>
    %74 = arith.addf %69, %73 : vector<32x800xf32>
    %c0_66 = arith.constant 0 : index
    %c0_67 = arith.constant 0 : index
    %c208 = arith.constant 208 : index
    %75 = vector.load %arg3[%c0_66, %c0_67, %c208] : memref<1x32x400xbf16, #tpu.memory_space<vmem>>, vector<1x32x16xbf16>
    %76 = vector.shape_cast %75 : vector<1x32x16xbf16> to vector<32x16xbf16>
    %c0_68 = arith.constant 0 : index
    %c129 = arith.constant 129 : index
    %77 = vector.load %arg7[%c0_68, %c129] : memref<16x1056xbf16, #tpu.memory_space<vmem>>, vector<16x800xbf16>
    %cst_69 = arith.constant dense<0.000000e+00> : vector<32x800xf32>
    %78 = tpu.matmul %76, %77, %cst_69 {dimension_numbers = #tpu.dot_dimension_numbers<[1], [0], [0], [1], [0, 0, 1, 1], [], []>} : vector<32x16xbf16>, vector<16x800xbf16>, vector<32x800xf32> -> vector<32x800xf32>
    %79 = arith.addf %74, %78 : vector<32x800xf32>
    %c0_70 = arith.constant 0 : index
    %c0_71 = arith.constant 0 : index
    %c224 = arith.constant 224 : index
    %80 = vector.load %arg3[%c0_70, %c0_71, %c224] : memref<1x32x400xbf16, #tpu.memory_space<vmem>>, vector<1x32x16xbf16>
    %81 = vector.shape_cast %80 : vector<1x32x16xbf16> to vector<32x16xbf16>
    %c0_72 = arith.constant 0 : index
    %c130 = arith.constant 130 : index
    %82 = vector.load %arg7[%c0_72, %c130] : memref<16x1056xbf16, #tpu.memory_space<vmem>>, vector<16x800xbf16>
    %cst_73 = arith.constant dense<0.000000e+00> : vector<32x800xf32>
    %83 = tpu.matmul %81, %82, %cst_73 {dimension_numbers = #tpu.dot_dimension_numbers<[1], [0], [0], [1], [0, 0, 1, 1], [], []>} : vector<32x16xbf16>, vector<16x800xbf16>, vector<32x800xf32> -> vector<32x800xf32>
    %84 = arith.addf %79, %83 : vector<32x800xf32>
    %c0_74 = arith.constant 0 : index
    %c0_75 = arith.constant 0 : index
    %c240 = arith.constant 240 : index
    %85 = vector.load %arg3[%c0_74, %c0_75, %c240] : memref<1x32x400xbf16, #tpu.memory_space<vmem>>, vector<1x32x16xbf16>
    %86 = vector.shape_cast %85 : vector<1x32x16xbf16> to vector<32x16xbf16>
    %c0_76 = arith.constant 0 : index
    %c146 = arith.constant 146 : index
    %87 = vector.load %arg7[%c0_76, %c146] : memref<16x1056xbf16, #tpu.memory_space<vmem>>, vector<16x800xbf16>
    %cst_77 = arith.constant dense<0.000000e+00> : vector<32x800xf32>
    %88 = tpu.matmul %86, %87, %cst_77 {dimension_numbers = #tpu.dot_dimension_numbers<[1], [0], [0], [1], [0, 0, 1, 1], [], []>} : vector<32x16xbf16>, vector<16x800xbf16>, vector<32x800xf32> -> vector<32x800xf32>
    %89 = arith.addf %84, %88 : vector<32x800xf32>
    %c0_78 = arith.constant 0 : index
    %c0_79 = arith.constant 0 : index
    %c256 = arith.constant 256 : index
    %90 = vector.load %arg3[%c0_78, %c0_79, %c256] : memref<1x32x400xbf16, #tpu.memory_space<vmem>>, vector<1x32x16xbf16>
    %91 = vector.shape_cast %90 : vector<1x32x16xbf16> to vector<32x16xbf16>
    %c0_80 = arith.constant 0 : index
    %c147 = arith.constant 147 : index
    %92 = vector.load %arg7[%c0_80, %c147] : memref<16x1056xbf16, #tpu.memory_space<vmem>>, vector<16x800xbf16>
    %cst_81 = arith.constant dense<0.000000e+00> : vector<32x800xf32>
    %93 = tpu.matmul %91, %92, %cst_81 {dimension_numbers = #tpu.dot_dimension_numbers<[1], [0], [0], [1], [0, 0, 1, 1], [], []>} : vector<32x16xbf16>, vector<16x800xbf16>, vector<32x800xf32> -> vector<32x800xf32>
    %94 = arith.addf %89, %93 : vector<32x800xf32>
    %c0_82 = arith.constant 0 : index
    %c0_83 = arith.constant 0 : index
    %c272 = arith.constant 272 : index
    %95 = vector.load %arg3[%c0_82, %c0_83, %c272] : memref<1x32x400xbf16, #tpu.memory_space<vmem>>, vector<1x32x16xbf16>
    %96 = vector.shape_cast %95 : vector<1x32x16xbf16> to vector<32x16xbf16>
    %c0_84 = arith.constant 0 : index
    %c148 = arith.constant 148 : index
    %97 = vector.load %arg7[%c0_84, %c148] : memref<16x1056xbf16, #tpu.memory_space<vmem>>, vector<16x800xbf16>
    %cst_85 = arith.constant dense<0.000000e+00> : vector<32x800xf32>
    %98 = tpu.matmul %96, %97, %cst_85 {dimension_numbers = #tpu.dot_dimension_numbers<[1], [0], [0], [1], [0, 0, 1, 1], [], []>} : vector<32x16xbf16>, vector<16x800xbf16>, vector<32x800xf32> -> vector<32x800xf32>
    %99 = arith.addf %94, %98 : vector<32x800xf32>
    %c0_86 = arith.constant 0 : index
    %c0_87 = arith.constant 0 : index
    %c288 = arith.constant 288 : index
    %100 = vector.load %arg3[%c0_86, %c0_87, %c288] : memref<1x32x400xbf16, #tpu.memory_space<vmem>>, vector<1x32x16xbf16>
    %101 = vector.shape_cast %100 : vector<1x32x16xbf16> to vector<32x16xbf16>
    %c0_88 = arith.constant 0 : index
    %c149 = arith.constant 149 : index
    %102 = vector.load %arg7[%c0_88, %c149] : memref<16x1056xbf16, #tpu.memory_space<vmem>>, vector<16x800xbf16>
    %cst_89 = arith.constant dense<0.000000e+00> : vector<32x800xf32>
    %103 = tpu.matmul %101, %102, %cst_89 {dimension_numbers = #tpu.dot_dimension_numbers<[1], [0], [0], [1], [0, 0, 1, 1], [], []>} : vector<32x16xbf16>, vector<16x800xbf16>, vector<32x800xf32> -> vector<32x800xf32>
    %104 = arith.addf %99, %103 : vector<32x800xf32>
    %c0_90 = arith.constant 0 : index
    %c0_91 = arith.constant 0 : index
    %c304 = arith.constant 304 : index
    %105 = vector.load %arg3[%c0_90, %c0_91, %c304] : memref<1x32x400xbf16, #tpu.memory_space<vmem>>, vector<1x32x16xbf16>
    %106 = vector.shape_cast %105 : vector<1x32x16xbf16> to vector<32x16xbf16>
    %c0_92 = arith.constant 0 : index
    %c150 = arith.constant 150 : index
    %107 = vector.load %arg7[%c0_92, %c150] : memref<16x1056xbf16, #tpu.memory_space<vmem>>, vector<16x800xbf16>
    %cst_93 = arith.constant dense<0.000000e+00> : vector<32x800xf32>
    %108 = tpu.matmul %106, %107, %cst_93 {dimension_numbers = #tpu.dot_dimension_numbers<[1], [0], [0], [1], [0, 0, 1, 1], [], []>} : vector<32x16xbf16>, vector<16x800xbf16>, vector<32x800xf32> -> vector<32x800xf32>
    %109 = arith.addf %104, %108 : vector<32x800xf32>
    %c0_94 = arith.constant 0 : index
    %c0_95 = arith.constant 0 : index
    %c320 = arith.constant 320 : index
    %110 = vector.load %arg3[%c0_94, %c0_95, %c320] : memref<1x32x400xbf16, #tpu.memory_space<vmem>>, vector<1x32x16xbf16>
    %111 = vector.shape_cast %110 : vector<1x32x16xbf16> to vector<32x16xbf16>
    %c0_96 = arith.constant 0 : index
    %c166 = arith.constant 166 : index
    %112 = vector.load %arg7[%c0_96, %c166] : memref<16x1056xbf16, #tpu.memory_space<vmem>>, vector<16x800xbf16>
    %cst_97 = arith.constant dense<0.000000e+00> : vector<32x800xf32>
    %113 = tpu.matmul %111, %112, %cst_97 {dimension_numbers = #tpu.dot_dimension_numbers<[1], [0], [0], [1], [0, 0, 1, 1], [], []>} : vector<32x16xbf16>, vector<16x800xbf16>, vector<32x800xf32> -> vector<32x800xf32>
    %114 = arith.addf %109, %113 : vector<32x800xf32>
    %c0_98 = arith.constant 0 : index
    %c0_99 = arith.constant 0 : index
    %c336 = arith.constant 336 : index
    %115 = vector.load %arg3[%c0_98, %c0_99, %c336] : memref<1x32x400xbf16, #tpu.memory_space<vmem>>, vector<1x32x16xbf16>
    %116 = vector.shape_cast %115 : vector<1x32x16xbf16> to vector<32x16xbf16>
    %c0_100 = arith.constant 0 : index
    %c167 = arith.constant 167 : index
    %117 = vector.load %arg7[%c0_100, %c167] : memref<16x1056xbf16, #tpu.memory_space<vmem>>, vector<16x800xbf16>
    %cst_101 = arith.constant dense<0.000000e+00> : vector<32x800xf32>
    %118 = tpu.matmul %116, %117, %cst_101 {dimension_numbers = #tpu.dot_dimension_numbers<[1], [0], [0], [1], [0, 0, 1, 1], [], []>} : vector<32x16xbf16>, vector<16x800xbf16>, vector<32x800xf32> -> vector<32x800xf32>
    %119 = arith.addf %114, %118 : vector<32x800xf32>
    %c0_102 = arith.constant 0 : index
    %c0_103 = arith.constant 0 : index
    %c352 = arith.constant 352 : index
    %120 = vector.load %arg3[%c0_102, %c0_103, %c352] : memref<1x32x400xbf16, #tpu.memory_space<vmem>>, vector<1x32x16xbf16>
    %121 = vector.shape_cast %120 : vector<1x32x16xbf16> to vector<32x16xbf16>
    %c0_104 = arith.constant 0 : index
    %c168 = arith.constant 168 : index
    %122 = vector.load %arg7[%c0_104, %c168] : memref<16x1056xbf16, #tpu.memory_space<vmem>>, vector<16x800xbf16>
    %cst_105 = arith.constant dense<0.000000e+00> : vector<32x800xf32>
    %123 = tpu.matmul %121, %122, %cst_105 {dimension_numbers = #tpu.dot_dimension_numbers<[1], [0], [0], [1], [0, 0, 1, 1], [], []>} : vector<32x16xbf16>, vector<16x800xbf16>, vector<32x800xf32> -> vector<32x800xf32>
    %124 = arith.addf %119, %123 : vector<32x800xf32>
    %c0_106 = arith.constant 0 : index
    %c0_107 = arith.constant 0 : index
    %c368 = arith.constant 368 : index
    %125 = vector.load %arg3[%c0_106, %c0_107, %c368] : memref<1x32x400xbf16, #tpu.memory_space<vmem>>, vector<1x32x16xbf16>
    %126 = vector.shape_cast %125 : vector<1x32x16xbf16> to vector<32x16xbf16>
    %c0_108 = arith.constant 0 : index
    %c169 = arith.constant 169 : index
    %127 = vector.load %arg7[%c0_108, %c169] : memref<16x1056xbf16, #tpu.memory_space<vmem>>, vector<16x800xbf16>
    %cst_109 = arith.constant dense<0.000000e+00> : vector<32x800xf32>
    %128 = tpu.matmul %126, %127, %cst_109 {dimension_numbers = #tpu.dot_dimension_numbers<[1], [0], [0], [1], [0, 0, 1, 1], [], []>} : vector<32x16xbf16>, vector<16x800xbf16>, vector<32x800xf32> -> vector<32x800xf32>
    %129 = arith.addf %124, %128 : vector<32x800xf32>
    %c0_110 = arith.constant 0 : index
    %c0_111 = arith.constant 0 : index
    %c384 = arith.constant 384 : index
    %130 = vector.load %arg3[%c0_110, %c0_111, %c384] : memref<1x32x400xbf16, #tpu.memory_space<vmem>>, vector<1x32x16xbf16>
    %131 = vector.shape_cast %130 : vector<1x32x16xbf16> to vector<32x16xbf16>
    %c0_112 = arith.constant 0 : index
    %c170 = arith.constant 170 : index
    %132 = vector.load %arg7[%c0_112, %c170] : memref<16x1056xbf16, #tpu.memory_space<vmem>>, vector<16x800xbf16>
    %cst_113 = arith.constant dense<0.000000e+00> : vector<32x800xf32>
    %133 = tpu.matmul %131, %132, %cst_113 {dimension_numbers = #tpu.dot_dimension_numbers<[1], [0], [0], [1], [0, 0, 1, 1], [], []>} : vector<32x16xbf16>, vector<16x800xbf16>, vector<32x800xf32> -> vector<32x800xf32>
    %134 = arith.addf %129, %133 : vector<32x800xf32>
    %135 = vector.broadcast %4 : vector<32x1xf32> to vector<32x800xf32>
    %136 = arith.addf %134, %135 : vector<32x800xf32>
    %137 = vector.extract_strided_slice %136 {offsets = [0, 0], sizes = [24, 800], strides = [1, 1]} : vector<32x800xf32> to vector<24x800xf32>
    %138 = arith.negf %137 : vector<24x800xf32>
    %139 = math.exp %138 : vector<24x800xf32>
    %cst_114 = arith.constant 1.000000e+00 : f32
    %140 = vector.broadcast %cst_114 : f32 to vector<24x800xf32>
    %141 = arith.addf %140, %139 : vector<24x800xf32>
    %142 = arith.divf %140, %141 : vector<24x800xf32>
    %143 = vector.extract_strided_slice %136 {offsets = [24, 0], sizes = [8, 800], strides = [1, 1]} : vector<32x800xf32> to vector<8x800xf32>
    %144 = math.tanh %143 : vector<8x800xf32>
    %145 = vector.extract_strided_slice %142 {offsets = [0, 0], sizes = [8, 800], strides = [1, 1]} : vector<24x800xf32> to vector<8x800xf32>
    %146 = vector.extract_strided_slice %142 {offsets = [8, 0], sizes = [8, 800], strides = [1, 1]} : vector<24x800xf32> to vector<8x800xf32>
    %147 = vector.extract_strided_slice %142 {offsets = [16, 0], sizes = [8, 800], strides = [1, 1]} : vector<24x800xf32> to vector<8x800xf32>
    %148 = arith.mulf %5, %146 : vector<8x800xf32>
    %149 = arith.mulf %145, %144 : vector<8x800xf32>
    %150 = arith.addf %148, %149 : vector<8x800xf32>
    %151 = math.tanh %150 : vector<8x800xf32>
    %152 = arith.mulf %147, %151 : vector<8x800xf32>
    %153 = vector.broadcast %2 : vector<1x800xf32> to vector<8x800xf32>
    %154 = arith.mulf %152, %153 : vector<8x800xf32>
    %155 = arith.truncf %154 : vector<8x800xf32> to vector<8x800xbf16>
    %c0_115 = arith.constant 0 : index
    %c128_116 = arith.constant 128 : index
    %156 = vector.load %arg7[%c0_115, %c128_116] : memref<16x1056xbf16, #tpu.memory_space<vmem>>, vector<8x800xbf16>
    tpu.vector_store %arg7[%c0_115, %c128_116], %155 {strides = array<i32>} : memref<16x1056xbf16, #tpu.memory_space<vmem>>, vector<8x800xbf16>,
    %c0_117 = arith.constant 0 : index
    %c0_118 = arith.constant 0 : index
    %157 = vector.load %arg2[%c0_117, %c0_118] : memref<4x1056xbf16, #tpu.memory_space<vmem>>, vector<4x1056xbf16>
    %c8_119 = arith.constant 8 : index
    %c0_120 = arith.constant 0 : index
    %158 = vector.load %arg7[%c8_119, %c0_120] : memref<16x1056xbf16, #tpu.memory_space<vmem>>, vector<4x1056xbf16>
    tpu.vector_store %arg7[%c8_119, %c0_120], %157 {strides = array<i32>} : memref<16x1056xbf16, #tpu.memory_space<vmem>>, vector<4x1056xbf16>,
    %cst_121 = arith.constant 0.000000e+00 : f32
    %159 = vector.broadcast %cst_121 : f32 to vector<32x800xf32>
    %c0_122 = arith.constant 0 : index
    %c0_123 = arith.constant 0 : index
    %c0_124 = arith.constant 0 : index
    %160 = vector.load %arg3[%c0_122, %c0_123, %c0_124] : memref<1x32x400xbf16, #tpu.memory_space<vmem>>, vector<1x32x16xbf16>
    %161 = vector.shape_cast %160 : vector<1x32x16xbf16> to vector<32x16xbf16>
    %c0_125 = arith.constant 0 : index
    %c86_126 = arith.constant 86 : index
    %162 = vector.load %arg7[%c0_125, %c86_126] : memref<16x1056xbf16, #tpu.memory_space<vmem>>, vector<16x800xbf16>
    %cst_127 = arith.constant dense<0.000000e+00> : vector<32x800xf32>
    %163 = tpu.matmul %161, %162, %cst_127 {dimension_numbers = #tpu.dot_dimension_numbers<[1], [0], [0], [1], [0, 0, 1, 1], [], []>} : vector<32x16xbf16>, vector<16x800xbf16>, vector<32x800xf32> -> vector<32x800xf32>
    %164 = arith.addf %159, %163 : vector<32x800xf32>
    %c0_128 = arith.constant 0 : index
    %c0_129 = arith.constant 0 : index
    %c16_130 = arith.constant 16 : index
    %165 = vector.load %arg3[%c0_128, %c0_129, %c16_130] : memref<1x32x400xbf16, #tpu.memory_space<vmem>>, vector<1x32x16xbf16>
    %166 = vector.shape_cast %165 : vector<1x32x16xbf16> to vector<32x16xbf16>
    %c0_131 = arith.constant 0 : index
    %c87_132 = arith.constant 87 : index
    %167 = vector.load %arg7[%c0_131, %c87_132] : memref<16x1056xbf16, #tpu.memory_space<vmem>>, vector<16x800xbf16>
    %cst_133 = arith.constant dense<0.000000e+00> : vector<32x800xf32>
    %168 = tpu.matmul %166, %167, %cst_133 {dimension_numbers = #tpu.dot_dimension_numbers<[1], [0], [0], [1], [0, 0, 1, 1], [], []>} : vector<32x16xbf16>, vector<16x800xbf16>, vector<32x800xf32> -> vector<32x800xf32>
    %169 = arith.addf %164, %168 : vector<32x800xf32>
    %c0_134 = arith.constant 0 : index
    %c0_135 = arith.constant 0 : index
    %c32_136 = arith.constant 32 : index
    %170 = vector.load %arg3[%c0_134, %c0_135, %c32_136] : memref<1x32x400xbf16, #tpu.memory_space<vmem>>, vector<1x32x16xbf16>
    %171 = vector.shape_cast %170 : vector<1x32x16xbf16> to vector<32x16xbf16>
    %c0_137 = arith.constant 0 : index
    %c88_138 = arith.constant 88 : index
    %172 = vector.load %arg7[%c0_137, %c88_138] : memref<16x1056xbf16, #tpu.memory_space<vmem>>, vector<16x800xbf16>
    %cst_139 = arith.constant dense<0.000000e+00> : vector<32x800xf32>
    %173 = tpu.matmul %171, %172, %cst_139 {dimension_numbers = #tpu.dot_dimension_numbers<[1], [0], [0], [1], [0, 0, 1, 1], [], []>} : vector<32x16xbf16>, vector<16x800xbf16>, vector<32x800xf32> -> vector<32x800xf32>
    %174 = arith.addf %169, %173 : vector<32x800xf32>
    %c0_140 = arith.constant 0 : index
    %c0_141 = arith.constant 0 : index
    %c48_142 = arith.constant 48 : index
    %175 = vector.load %arg3[%c0_140, %c0_141, %c48_142] : memref<1x32x400xbf16, #tpu.memory_space<vmem>>, vector<1x32x16xbf16>
    %176 = vector.shape_cast %175 : vector<1x32x16xbf16> to vector<32x16xbf16>
    %c0_143 = arith.constant 0 : index
    %c89_144 = arith.constant 89 : index
    %177 = vector.load %arg7[%c0_143, %c89_144] : memref<16x1056xbf16, #tpu.memory_space<vmem>>, vector<16x800xbf16>
    %cst_145 = arith.constant dense<0.000000e+00> : vector<32x800xf32>
    %178 = tpu.matmul %176, %177, %cst_145 {dimension_numbers = #tpu.dot_dimension_numbers<[1], [0], [0], [1], [0, 0, 1, 1], [], []>} : vector<32x16xbf16>, vector<16x800xbf16>, vector<32x800xf32> -> vector<32x800xf32>
    %179 = arith.addf %174, %178 : vector<32x800xf32>
    %c0_146 = arith.constant 0 : index
    %c0_147 = arith.constant 0 : index
    %c64_148 = arith.constant 64 : index
    %180 = vector.load %arg3[%c0_146, %c0_147, %c64_148] : memref<1x32x400xbf16, #tpu.memory_space<vmem>>, vector<1x32x16xbf16>
    %181 = vector.shape_cast %180 : vector<1x32x16xbf16> to vector<32x16xbf16>
    %c0_149 = arith.constant 0 : index
    %c90_150 = arith.constant 90 : index
    %182 = vector.load %arg7[%c0_149, %c90_150] : memref<16x1056xbf16, #tpu.memory_space<vmem>>, vector<16x800xbf16>
    %cst_151 = arith.constant dense<0.000000e+00> : vector<32x800xf32>
    %183 = tpu.matmul %181, %182, %cst_151 {dimension_numbers = #tpu.dot_dimension_numbers<[1], [0], [0], [1], [0, 0, 1, 1], [], []>} : vector<32x16xbf16>, vector<16x800xbf16>, vector<32x800xf32> -> vector<32x800xf32>
    %184 = arith.addf %179, %183 : vector<32x800xf32>
    %c0_152 = arith.constant 0 : index
    %c0_153 = arith.constant 0 : index
    %c80_154 = arith.constant 80 : index
    %185 = vector.load %arg3[%c0_152, %c0_153, %c80_154] : memref<1x32x400xbf16, #tpu.memory_space<vmem>>, vector<1x32x16xbf16>
    %186 = vector.shape_cast %185 : vector<1x32x16xbf16> to vector<32x16xbf16>
    %c0_155 = arith.constant 0 : index
    %c106_156 = arith.constant 106 : index
    %187 = vector.load %arg7[%c0_155, %c106_156] : memref<16x1056xbf16, #tpu.memory_space<vmem>>, vector<16x800xbf16>
    %cst_157 = arith.constant dense<0.000000e+00> : vector<32x800xf32>
    %188 = tpu.matmul %186, %187, %cst_157 {dimension_numbers = #tpu.dot_dimension_numbers<[1], [0], [0], [1], [0, 0, 1, 1], [], []>} : vector<32x16xbf16>, vector<16x800xbf16>, vector<32x800xf32> -> vector<32x800xf32>
    %189 = arith.addf %184, %188 : vector<32x800xf32>
    %c0_158 = arith.constant 0 : index
    %c0_159 = arith.constant 0 : index
    %c96_160 = arith.constant 96 : index
    %190 = vector.load %arg3[%c0_158, %c0_159, %c96_160] : memref<1x32x400xbf16, #tpu.memory_space<vmem>>, vector<1x32x16xbf16>
    %191 = vector.shape_cast %190 : vector<1x32x16xbf16> to vector<32x16xbf16>
    %c0_161 = arith.constant 0 : index
    %c107_162 = arith.constant 107 : index
    %192 = vector.load %arg7[%c0_161, %c107_162] : memref<16x1056xbf16, #tpu.memory_space<vmem>>, vector<16x800xbf16>
    %cst_163 = arith.constant dense<0.000000e+00> : vector<32x800xf32>
    %193 = tpu.matmul %191, %192, %cst_163 {dimension_numbers = #tpu.dot_dimension_numbers<[1], [0], [0], [1], [0, 0, 1, 1], [], []>} : vector<32x16xbf16>, vector<16x800xbf16>, vector<32x800xf32> -> vector<32x800xf32>
    %194 = arith.addf %189, %193 : vector<32x800xf32>
    %c0_164 = arith.constant 0 : index
    %c0_165 = arith.constant 0 : index
    %c112_166 = arith.constant 112 : index
    %195 = vector.load %arg3[%c0_164, %c0_165, %c112_166] : memref<1x32x400xbf16, #tpu.memory_space<vmem>>, vector<1x32x16xbf16>
    %196 = vector.shape_cast %195 : vector<1x32x16xbf16> to vector<32x16xbf16>
    %c0_167 = arith.constant 0 : index
    %c108_168 = arith.constant 108 : index
    %197 = vector.load %arg7[%c0_167, %c108_168] : memref<16x1056xbf16, #tpu.memory_space<vmem>>, vector<16x800xbf16>
    %cst_169 = arith.constant dense<0.000000e+00> : vector<32x800xf32>
    %198 = tpu.matmul %196, %197, %cst_169 {dimension_numbers = #tpu.dot_dimension_numbers<[1], [0], [0], [1], [0, 0, 1, 1], [], []>} : vector<32x16xbf16>, vector<16x800xbf16>, vector<32x800xf32> -> vector<32x800xf32>
    %199 = arith.addf %194, %198 : vector<32x800xf32>
    %c0_170 = arith.constant 0 : index
    %c0_171 = arith.constant 0 : index
    %c128_172 = arith.constant 128 : index
    %200 = vector.load %arg3[%c0_170, %c0_171, %c128_172] : memref<1x32x400xbf16, #tpu.memory_space<vmem>>, vector<1x32x16xbf16>
    %201 = vector.shape_cast %200 : vector<1x32x16xbf16> to vector<32x16xbf16>
    %c0_173 = arith.constant 0 : index
    %c109_174 = arith.constant 109 : index
    %202 = vector.load %arg7[%c0_173, %c109_174] : memref<16x1056xbf16, #tpu.memory_space<vmem>>, vector<16x800xbf16>
    %cst_175 = arith.constant dense<0.000000e+00> : vector<32x800xf32>
    %203 = tpu.matmul %201, %202, %cst_175 {dimension_numbers = #tpu.dot_dimension_numbers<[1], [0], [0], [1], [0, 0, 1, 1], [], []>} : vector<32x16xbf16>, vector<16x800xbf16>, vector<32x800xf32> -> vector<32x800xf32>
    %204 = arith.addf %199, %203 : vector<32x800xf32>
    %c0_176 = arith.constant 0 : index
    %c0_177 = arith.constant 0 : index
    %c144_178 = arith.constant 144 : index
    %205 = vector.load %arg3[%c0_176, %c0_177, %c144_178] : memref<1x32x400xbf16, #tpu.memory_space<vmem>>, vector<1x32x16xbf16>
    %206 = vector.shape_cast %205 : vector<1x32x16xbf16> to vector<32x16xbf16>
    %c0_179 = arith.constant 0 : index
    %c110_180 = arith.constant 110 : index
    %207 = vector.load %arg7[%c0_179, %c110_180] : memref<16x1056xbf16, #tpu.memory_space<vmem>>, vector<16x800xbf16>
    %cst_181 = arith.constant dense<0.000000e+00> : vector<32x800xf32>
    %208 = tpu.matmul %206, %207, %cst_181 {dimension_numbers = #tpu.dot_dimension_numbers<[1], [0], [0], [1], [0, 0, 1, 1], [], []>} : vector<32x16xbf16>, vector<16x800xbf16>, vector<32x800xf32> -> vector<32x800xf32>
    %209 = arith.addf %204, %208 : vector<32x800xf32>
    %c0_182 = arith.constant 0 : index
    %c0_183 = arith.constant 0 : index
    %c160_184 = arith.constant 160 : index
    %210 = vector.load %arg3[%c0_182, %c0_183, %c160_184] : memref<1x32x400xbf16, #tpu.memory_space<vmem>>, vector<1x32x16xbf16>
    %211 = vector.shape_cast %210 : vector<1x32x16xbf16> to vector<32x16xbf16>
    %c0_185 = arith.constant 0 : index
    %c126_186 = arith.constant 126 : index
    %212 = vector.load %arg7[%c0_185, %c126_186] : memref<16x1056xbf16, #tpu.memory_space<vmem>>, vector<16x800xbf16>
    %cst_187 = arith.constant dense<0.000000e+00> : vector<32x800xf32>
    %213 = tpu.matmul %211, %212, %cst_187 {dimension_numbers = #tpu.dot_dimension_numbers<[1], [0], [0], [1], [0, 0, 1, 1], [], []>} : vector<32x16xbf16>, vector<16x800xbf16>, vector<32x800xf32> -> vector<32x800xf32>
    %214 = arith.addf %209, %213 : vector<32x800xf32>
    %c0_188 = arith.constant 0 : index
    %c0_189 = arith.constant 0 : index
    %c176_190 = arith.constant 176 : index
    %215 = vector.load %arg3[%c0_188, %c0_189, %c176_190] : memref<1x32x400xbf16, #tpu.memory_space<vmem>>, vector<1x32x16xbf16>
    %216 = vector.shape_cast %215 : vector<1x32x16xbf16> to vector<32x16xbf16>
    %c0_191 = arith.constant 0 : index
    %c127_192 = arith.constant 127 : index
    %217 = vector.load %arg7[%c0_191, %c127_192] : memref<16x1056xbf16, #tpu.memory_space<vmem>>, vector<16x800xbf16>
    %cst_193 = arith.constant dense<0.000000e+00> : vector<32x800xf32>
    %218 = tpu.matmul %216, %217, %cst_193 {dimension_numbers = #tpu.dot_dimension_numbers<[1], [0], [0], [1], [0, 0, 1, 1], [], []>} : vector<32x16xbf16>, vector<16x800xbf16>, vector<32x800xf32> -> vector<32x800xf32>
    %219 = arith.addf %214, %218 : vector<32x800xf32>
    %c0_194 = arith.constant 0 : index
    %c0_195 = arith.constant 0 : index
    %c192_196 = arith.constant 192 : index
    %220 = vector.load %arg3[%c0_194, %c0_195, %c192_196] : memref<1x32x400xbf16, #tpu.memory_space<vmem>>, vector<1x32x16xbf16>
    %221 = vector.shape_cast %220 : vector<1x32x16xbf16> to vector<32x16xbf16>
    %c0_197 = arith.constant 0 : index
    %c128_198 = arith.constant 128 : index
    %222 = vector.load %arg7[%c0_197, %c128_198] : memref<16x1056xbf16, #tpu.memory_space<vmem>>, vector<16x800xbf16>
    %cst_199 = arith.constant dense<0.000000e+00> : vector<32x800xf32>
    %223 = tpu.matmul %221, %222, %cst_199 {dimension_numbers = #tpu.dot_dimension_numbers<[1], [0], [0], [1], [0, 0, 1, 1], [], []>} : vector<32x16xbf16>, vector<16x800xbf16>, vector<32x800xf32> -> vector<32x800xf32>
    %224 = arith.addf %219, %223 : vector<32x800xf32>
    %c0_200 = arith.constant 0 : index
    %c0_201 = arith.constant 0 : index
    %c208_202 = arith.constant 208 : index
    %225 = vector.load %arg3[%c0_200, %c0_201, %c208_202] : memref<1x32x400xbf16, #tpu.memory_space<vmem>>, vector<1x32x16xbf16>
    %226 = vector.shape_cast %225 : vector<1x32x16xbf16> to vector<32x16xbf16>
    %c0_203 = arith.constant 0 : index
    %c129_204 = arith.constant 129 : index
    %227 = vector.load %arg7[%c0_203, %c129_204] : memref<16x1056xbf16, #tpu.memory_space<vmem>>, vector<16x800xbf16>
    %cst_205 = arith.constant dense<0.000000e+00> : vector<32x800xf32>
    %228 = tpu.matmul %226, %227, %cst_205 {dimension_numbers = #tpu.dot_dimension_numbers<[1], [0], [0], [1], [0, 0, 1, 1], [], []>} : vector<32x16xbf16>, vector<16x800xbf16>, vector<32x800xf32> -> vector<32x800xf32>
    %229 = arith.addf %224, %228 : vector<32x800xf32>
    %c0_206 = arith.constant 0 : index
    %c0_207 = arith.constant 0 : index
    %c224_208 = arith.constant 224 : index
    %230 = vector.load %arg3[%c0_206, %c0_207, %c224_208] : memref<1x32x400xbf16, #tpu.memory_space<vmem>>, vector<1x32x16xbf16>
    %231 = vector.shape_cast %230 : vector<1x32x16xbf16> to vector<32x16xbf16>
    %c0_209 = arith.constant 0 : index
    %c130_210 = arith.constant 130 : index
    %232 = vector.load %arg7[%c0_209, %c130_210] : memref<16x1056xbf16, #tpu.memory_space<vmem>>, vector<16x800xbf16>
    %cst_211 = arith.constant dense<0.000000e+00> : vector<32x800xf32>
    %233 = tpu.matmul %231, %232, %cst_211 {dimension_numbers = #tpu.dot_dimension_numbers<[1], [0], [0], [1], [0, 0, 1, 1], [], []>} : vector<32x16xbf16>, vector<16x800xbf16>, vector<32x800xf32> -> vector<32x800xf32>
    %234 = arith.addf %229, %233 : vector<32x800xf32>
    %c0_212 = arith.constant 0 : index
    %c0_213 = arith.constant 0 : index
    %c240_214 = arith.constant 240 : index
    %235 = vector.load %arg3[%c0_212, %c0_213, %c240_214] : memref<1x32x400xbf16, #tpu.memory_space<vmem>>, vector<1x32x16xbf16>
    %236 = vector.shape_cast %235 : vector<1x32x16xbf16> to vector<32x16xbf16>
    %c0_215 = arith.constant 0 : index
    %c146_216 = arith.constant 146 : index
    %237 = vector.load %arg7[%c0_215, %c146_216] : memref<16x1056xbf16, #tpu.memory_space<vmem>>, vector<16x800xbf16>
    %cst_217 = arith.constant dense<0.000000e+00> : vector<32x800xf32>
    %238 = tpu.matmul %236, %237, %cst_217 {dimension_numbers = #tpu.dot_dimension_numbers<[1], [0], [0], [1], [0, 0, 1, 1], [], []>} : vector<32x16xbf16>, vector<16x800xbf16>, vector<32x800xf32> -> vector<32x800xf32>
    %239 = arith.addf %234, %238 : vector<32x800xf32>
    %c0_218 = arith.constant 0 : index
    %c0_219 = arith.constant 0 : index
    %c256_220 = arith.constant 256 : index
    %240 = vector.load %arg3[%c0_218, %c0_219, %c256_220] : memref<1x32x400xbf16, #tpu.memory_space<vmem>>, vector<1x32x16xbf16>
    %241 = vector.shape_cast %240 : vector<1x32x16xbf16> to vector<32x16xbf16>
    %c0_221 = arith.constant 0 : index
    %c147_222 = arith.constant 147 : index
    %242 = vector.load %arg7[%c0_221, %c147_222] : memref<16x1056xbf16, #tpu.memory_space<vmem>>, vector<16x800xbf16>
    %cst_223 = arith.constant dense<0.000000e+00> : vector<32x800xf32>
    %243 = tpu.matmul %241, %242, %cst_223 {dimension_numbers = #tpu.dot_dimension_numbers<[1], [0], [0], [1], [0, 0, 1, 1], [], []>} : vector<32x16xbf16>, vector<16x800xbf16>, vector<32x800xf32> -> vector<32x800xf32>
    %244 = arith.addf %239, %243 : vector<32x800xf32>
    %c0_224 = arith.constant 0 : index
    %c0_225 = arith.constant 0 : index
    %c272_226 = arith.constant 272 : index
    %245 = vector.load %arg3[%c0_224, %c0_225, %c272_226] : memref<1x32x400xbf16, #tpu.memory_space<vmem>>, vector<1x32x16xbf16>
    %246 = vector.shape_cast %245 : vector<1x32x16xbf16> to vector<32x16xbf16>
    %c0_227 = arith.constant 0 : index
    %c148_228 = arith.constant 148 : index
    %247 = vector.load %arg7[%c0_227, %c148_228] : memref<16x1056xbf16, #tpu.memory_space<vmem>>, vector<16x800xbf16>
    %cst_229 = arith.constant dense<0.000000e+00> : vector<32x800xf32>
    %248 = tpu.matmul %246, %247, %cst_229 {dimension_numbers = #tpu.dot_dimension_numbers<[1], [0], [0], [1], [0, 0, 1, 1], [], []>} : vector<32x16xbf16>, vector<16x800xbf16>, vector<32x800xf32> -> vector<32x800xf32>
    %249 = arith.addf %244, %248 : vector<32x800xf32>
    %c0_230 = arith.constant 0 : index
    %c0_231 = arith.constant 0 : index
    %c288_232 = arith.constant 288 : index
    %250 = vector.load %arg3[%c0_230, %c0_231, %c288_232] : memref<1x32x400xbf16, #tpu.memory_space<vmem>>, vector<1x32x16xbf16>
    %251 = vector.shape_cast %250 : vector<1x32x16xbf16> to vector<32x16xbf16>
    %c0_233 = arith.constant 0 : index
    %c149_234 = arith.constant 149 : index
    %252 = vector.load %arg7[%c0_233, %c149_234] : memref<16x1056xbf16, #tpu.memory_space<vmem>>, vector<16x800xbf16>
    %cst_235 = arith.constant dense<0.000000e+00> : vector<32x800xf32>
    %253 = tpu.matmul %251, %252, %cst_235 {dimension_numbers = #tpu.dot_dimension_numbers<[1], [0], [0], [1], [0, 0, 1, 1], [], []>} : vector<32x16xbf16>, vector<16x800xbf16>, vector<32x800xf32> -> vector<32x800xf32>
    %254 = arith.addf %249, %253 : vector<32x800xf32>
    %c0_236 = arith.constant 0 : index
    %c0_237 = arith.constant 0 : index
    %c304_238 = arith.constant 304 : index
    %255 = vector.load %arg3[%c0_236, %c0_237, %c304_238] : memref<1x32x400xbf16, #tpu.memory_space<vmem>>, vector<1x32x16xbf16>
    %256 = vector.shape_cast %255 : vector<1x32x16xbf16> to vector<32x16xbf16>
    %c0_239 = arith.constant 0 : index
    %c150_240 = arith.constant 150 : index
    %257 = vector.load %arg7[%c0_239, %c150_240] : memref<16x1056xbf16, #tpu.memory_space<vmem>>, vector<16x800xbf16>
    %cst_241 = arith.constant dense<0.000000e+00> : vector<32x800xf32>
    %258 = tpu.matmul %256, %257, %cst_241 {dimension_numbers = #tpu.dot_dimension_numbers<[1], [0], [0], [1], [0, 0, 1, 1], [], []>} : vector<32x16xbf16>, vector<16x800xbf16>, vector<32x800xf32> -> vector<32x800xf32>
    %259 = arith.addf %254, %258 : vector<32x800xf32>
    %c0_242 = arith.constant 0 : index
    %c0_243 = arith.constant 0 : index
    %c320_244 = arith.constant 320 : index
    %260 = vector.load %arg3[%c0_242, %c0_243, %c320_244] : memref<1x32x400xbf16, #tpu.memory_space<vmem>>, vector<1x32x16xbf16>
    %261 = vector.shape_cast %260 : vector<1x32x16xbf16> to vector<32x16xbf16>
    %c0_245 = arith.constant 0 : index
    %c166_246 = arith.constant 166 : index
    %262 = vector.load %arg7[%c0_245, %c166_246] : memref<16x1056xbf16, #tpu.memory_space<vmem>>, vector<16x800xbf16>
    %cst_247 = arith.constant dense<0.000000e+00> : vector<32x800xf32>
    %263 = tpu.matmul %261, %262, %cst_247 {dimension_numbers = #tpu.dot_dimension_numbers<[1], [0], [0], [1], [0, 0, 1, 1], [], []>} : vector<32x16xbf16>, vector<16x800xbf16>, vector<32x800xf32> -> vector<32x800xf32>
    %264 = arith.addf %259, %263 : vector<32x800xf32>
    %c0_248 = arith.constant 0 : index
    %c0_249 = arith.constant 0 : index
    %c336_250 = arith.constant 336 : index
    %265 = vector.load %arg3[%c0_248, %c0_249, %c336_250] : memref<1x32x400xbf16, #tpu.memory_space<vmem>>, vector<1x32x16xbf16>
    %266 = vector.shape_cast %265 : vector<1x32x16xbf16> to vector<32x16xbf16>
    %c0_251 = arith.constant 0 : index
    %c167_252 = arith.constant 167 : index
    %267 = vector.load %arg7[%c0_251, %c167_252] : memref<16x1056xbf16, #tpu.memory_space<vmem>>, vector<16x800xbf16>
    %cst_253 = arith.constant dense<0.000000e+00> : vector<32x800xf32>
    %268 = tpu.matmul %266, %267, %cst_253 {dimension_numbers = #tpu.dot_dimension_numbers<[1], [0], [0], [1], [0, 0, 1, 1], [], []>} : vector<32x16xbf16>, vector<16x800xbf16>, vector<32x800xf32> -> vector<32x800xf32>
    %269 = arith.addf %264, %268 : vector<32x800xf32>
    %c0_254 = arith.constant 0 : index
    %c0_255 = arith.constant 0 : index
    %c352_256 = arith.constant 352 : index
    %270 = vector.load %arg3[%c0_254, %c0_255, %c352_256] : memref<1x32x400xbf16, #tpu.memory_space<vmem>>, vector<1x32x16xbf16>
    %271 = vector.shape_cast %270 : vector<1x32x16xbf16> to vector<32x16xbf16>
    %c0_257 = arith.constant 0 : index
    %c168_258 = arith.constant 168 : index
    %272 = vector.load %arg7[%c0_257, %c168_258] : memref<16x1056xbf16, #tpu.memory_space<vmem>>, vector<16x800xbf16>
    %cst_259 = arith.constant dense<0.000000e+00> : vector<32x800xf32>
    %273 = tpu.matmul %271, %272, %cst_259 {dimension_numbers = #tpu.dot_dimension_numbers<[1], [0], [0], [1], [0, 0, 1, 1], [], []>} : vector<32x16xbf16>, vector<16x800xbf16>, vector<32x800xf32> -> vector<32x800xf32>
    %274 = arith.addf %269, %273 : vector<32x800xf32>
    %c0_260 = arith.constant 0 : index
    %c0_261 = arith.constant 0 : index
    %c368_262 = arith.constant 368 : index
    %275 = vector.load %arg3[%c0_260, %c0_261, %c368_262] : memref<1x32x400xbf16, #tpu.memory_space<vmem>>, vector<1x32x16xbf16>
    %276 = vector.shape_cast %275 : vector<1x32x16xbf16> to vector<32x16xbf16>
    %c0_263 = arith.constant 0 : index
    %c169_264 = arith.constant 169 : index
    %277 = vector.load %arg7[%c0_263, %c169_264] : memref<16x1056xbf16, #tpu.memory_space<vmem>>, vector<16x800xbf16>
    %cst_265 = arith.constant dense<0.000000e+00> : vector<32x800xf32>
    %278 = tpu.matmul %276, %277, %cst_265 {dimension_numbers = #tpu.dot_dimension_numbers<[1], [0], [0], [1], [0, 0, 1, 1], [], []>} : vector<32x16xbf16>, vector<16x800xbf16>, vector<32x800xf32> -> vector<32x800xf32>
    %279 = arith.addf %274, %278 : vector<32x800xf32>
    %c0_266 = arith.constant 0 : index
    %c0_267 = arith.constant 0 : index
    %c384_268 = arith.constant 384 : index
    %280 = vector.load %arg3[%c0_266, %c0_267, %c384_268] : memref<1x32x400xbf16, #tpu.memory_space<vmem>>, vector<1x32x16xbf16>
    %281 = vector.shape_cast %280 : vector<1x32x16xbf16> to vector<32x16xbf16>
    %c0_269 = arith.constant 0 : index
    %c170_270 = arith.constant 170 : index
    %282 = vector.load %arg7[%c0_269, %c170_270] : memref<16x1056xbf16, #tpu.memory_space<vmem>>, vector<16x800xbf16>
    %cst_271 = arith.constant dense<0.000000e+00> : vector<32x800xf32>
    %283 = tpu.matmul %281, %282, %cst_271 {dimension_numbers = #tpu.dot_dimension_numbers<[1], [0], [0], [1], [0, 0, 1, 1], [], []>} : vector<32x16xbf16>, vector<16x800xbf16>, vector<32x800xf32> -> vector<32x800xf32>
    %284 = arith.addf %279, %283 : vector<32x800xf32>
    %285 = vector.broadcast %4 : vector<32x1xf32> to vector<32x800xf32>
    %286 = arith.addf %284, %285 : vector<32x800xf32>
    %287 = vector.extract_strided_slice %286 {offsets = [0, 0], sizes = [24, 800], strides = [1, 1]} : vector<32x800xf32> to vector<24x800xf32>
    %288 = arith.negf %287 : vector<24x800xf32>
    %289 = math.exp %288 : vector<24x800xf32>
    %cst_272 = arith.constant 1.000000e+00 : f32
    %290 = vector.broadcast %cst_272 : f32 to vector<24x800xf32>
    %291 = arith.addf %290, %289 : vector<24x800xf32>
    %292 = arith.divf %290, %291 : vector<24x800xf32>
    %293 = vector.extract_strided_slice %286 {offsets = [24, 0], sizes = [8, 800], strides = [1, 1]} : vector<32x800xf32> to vector<8x800xf32>
    %294 = math.tanh %293 : vector<8x800xf32>
    %295 = vector.extract_strided_slice %292 {offsets = [0, 0], sizes = [8, 800], strides = [1, 1]} : vector<24x800xf32> to vector<8x800xf32>
    %296 = vector.extract_strided_slice %292 {offsets = [8, 0], sizes = [8, 800], strides = [1, 1]} : vector<24x800xf32> to vector<8x800xf32>
    %297 = vector.extract_strided_slice %292 {offsets = [16, 0], sizes = [8, 800], strides = [1, 1]} : vector<24x800xf32> to vector<8x800xf32>
    %298 = arith.mulf %150, %296 : vector<8x800xf32>
    %299 = arith.mulf %295, %294 : vector<8x800xf32>
    %300 = arith.addf %298, %299 : vector<8x800xf32>
    %301 = math.tanh %300 : vector<8x800xf32>
    %302 = arith.mulf %297, %301 : vector<8x800xf32>
    %c0_273 = arith.constant 0 : index
    %c0_274 = arith.constant 0 : index
    %c0_275 = arith.constant 0 : index
    %303 = vector.load %arg6[%c0_273, %c0_274, %c0_275] : memref<1x8x800xf32, #tpu.memory_space<vmem>>, vector<1x8x800xf32>
    %304 = vector.shape_cast %303 : vector<1x8x800xf32> to vector<8x800xf32>
    %305 = vector.shape_cast %302 : vector<8x800xf32> to vector<1x8x800xf32>
    tpu.vector_store %arg6[%c0_273, %c0_274, %c0_275], %305 {strides = array<i32>} : memref<1x8x800xf32, #tpu.memory_space<vmem>>, vector<1x8x800xf32>,
    return
  }
  func.func @transform_0(%arg0: i32) -> (i32, i32, i32) {
    %c0_i32 = arith.constant 0 : i32
    %c0_i32_0 = arith.constant 0 : i32
    %c0_i32_1 = arith.constant 0 : i32
    return %arg0, %c0_i32, %c0_i32_0 : i32, i32, i32
  }
  func.func @transform_1(%arg0: i32) -> (i32, i32) {
    %c0_i32 = arith.constant 0 : i32
    %c0_i32_0 = arith.constant 0 : i32
    %c0_i32_1 = arith.constant 0 : i32
    return %c0_i32, %c0_i32_0 : i32, i32
  }
  func.func @transform_2(%arg0: i32) -> (i32, i32, i32) {
    %c0_i32 = arith.constant 0 : i32
    %c0_i32_0 = arith.constant 0 : i32
    %c0_i32_1 = arith.constant 0 : i32
    return %arg0, %c0_i32, %c0_i32_0 : i32, i32, i32
  }
  func.func @transform_3(%arg0: i32) -> (i32, i32, i32) {
    %c0_i32 = arith.constant 0 : i32
    %c0_i32_0 = arith.constant 0 : i32
    %c0_i32_1 = arith.constant 0 : i32
    return %arg0, %c0_i32, %c0_i32_0 : i32, i32, i32
  }
  func.func @transform_4(%arg0: i32) -> (i32, i32) {
    %c0_i32 = arith.constant 0 : i32
    %c0_i32_0 = arith.constant 0 : i32
    %c0_i32_1 = arith.constant 0 : i32
    return %c0_i32, %c0_i32_0 : i32, i32
  }
  func.func @transform_5(%arg0: i32) -> (i32, i32, i32) {
    %c0_i32 = arith.constant 0 : i32
    %c0_i32_0 = arith.constant 0 : i32
    %c0_i32_1 = arith.constant 0 : i32
    return %arg0, %c0_i32, %c0_i32_0 : i32, i32, i32
  }
}

module attributes {stable_mosaic.version = 11 : i64} {
  func.func @_head_kernel(%arg0: memref<2x8x800xf32, #tpu.memory_space<vmem>>, %arg1: memref<8x16xf32, #tpu.memory_space<vmem>>, %arg2: memref<8x1xf32, #tpu.memory_space<vmem>>, %arg3: memref<2x800xf32, #tpu.memory_space<vmem>>) attributes {dimension_semantics = [], scalar_prefetch = 0 : i64, scratch_operands = 0 : i64, tpu.core_type = #tpu.core_type<tc>} {
    %c0 = arith.constant 0 : index
    %c0_0 = arith.constant 0 : index
    %c0_1 = arith.constant 0 : index
    %0 = vector.load %arg0[%c0, %c0_0, %c0_1] : memref<2x8x800xf32, #tpu.memory_space<vmem>>, vector<1x8x800xf32>
    %1 = vector.shape_cast %0 : vector<1x8x800xf32> to vector<8x800xf32>
    %c1 = arith.constant 1 : index
    %c0_2 = arith.constant 0 : index
    %c0_3 = arith.constant 0 : index
    %2 = vector.load %arg0[%c1, %c0_2, %c0_3] : memref<2x8x800xf32, #tpu.memory_space<vmem>>, vector<1x8x800xf32>
    %3 = vector.shape_cast %2 : vector<1x8x800xf32> to vector<8x800xf32>
    %c0_4 = arith.constant 0 : index
    %c0_5 = arith.constant 0 : index
    %4 = vector.load %arg1[%c0_4, %c0_5] : memref<8x16xf32, #tpu.memory_space<vmem>>, vector<8x16xf32>
    %5 = vector.extract_strided_slice %4 {offsets = [0, 0], sizes = [8, 8], strides = [1, 1]} : vector<8x16xf32> to vector<8x8xf32>
    %cst = arith.constant dense<0.000000e+00> : vector<8x800xf32>
    %6 = tpu.matmul %5, %1, %cst {dimension_numbers = #tpu.dot_dimension_numbers<[1], [0], [0], [1], [0, 0, 1, 1], [], []>} : vector<8x8xf32>, vector<8x800xf32>, vector<8x800xf32> -> vector<8x800xf32>
    %7 = vector.extract_strided_slice %4 {offsets = [0, 8], sizes = [8, 8], strides = [1, 1]} : vector<8x16xf32> to vector<8x8xf32>
    %cst_6 = arith.constant dense<0.000000e+00> : vector<8x800xf32>
    %8 = tpu.matmul %7, %3, %cst_6 {dimension_numbers = #tpu.dot_dimension_numbers<[1], [0], [0], [1], [0, 0, 1, 1], [], []>} : vector<8x8xf32>, vector<8x800xf32>, vector<8x800xf32> -> vector<8x800xf32>
    %9 = arith.addf %6, %8 : vector<8x800xf32>
    %c0_7 = arith.constant 0 : index
    %c0_8 = arith.constant 0 : index
    %10 = vector.load %arg2[%c0_7, %c0_8] : memref<8x1xf32, #tpu.memory_space<vmem>>, vector<8x1xf32>
    %11 = vector.broadcast %10 : vector<8x1xf32> to vector<8x800xf32>
    %12 = arith.addf %9, %11 : vector<8x800xf32>
    %13 = vector.extract_strided_slice %12 {offsets = [0, 0], sizes = [2, 800], strides = [1, 1]} : vector<8x800xf32> to vector<2x800xf32>
    %cst_9 = arith.constant dense<0xFF800000> : vector<800xf32>
    %14 = vector.multi_reduction <maximumf>, %13, %cst_9 [0] : vector<2x800xf32> to vector<800xf32>
    %15 = vector.shape_cast %14 : vector<800xf32> to vector<1x800xf32>
    %16 = vector.broadcast %15 : vector<1x800xf32> to vector<2x800xf32>
    %17 = arith.subf %13, %16 : vector<2x800xf32>
    %18 = math.exp %17 : vector<2x800xf32>
    %cst_10 = arith.constant dense<0.000000e+00> : vector<800xf32>
    %19 = vector.multi_reduction <add>, %18, %cst_10 [0] : vector<2x800xf32> to vector<800xf32>
    %20 = vector.shape_cast %19 : vector<800xf32> to vector<1x800xf32>
    %21 = tpu.reciprocal %20 {approx = true} : vector<1x800xf32> -> vector<1x800xf32>
    %22 = vector.broadcast %21 : vector<1x800xf32> to vector<2x800xf32>
    %23 = arith.mulf %18, %22 : vector<2x800xf32>
    %c0_11 = arith.constant 0 : index
    %c0_12 = arith.constant 0 : index
    %24 = vector.load %arg3[%c0_11, %c0_12] : memref<2x800xf32, #tpu.memory_space<vmem>>, vector<2x800xf32>
    tpu.vector_store %arg3[%c0_11, %c0_12], %23 {strides = array<i32>} : memref<2x800xf32, #tpu.memory_space<vmem>>, vector<2x800xf32>,
    return
  }
}

</mosaic_0001>

<bundles_post_ra>
// kernel: bdclstm_forward.3
= control target key start
LH: loop header
LB: loop body
LE: loop exit
PB: predicated region body
PF: predicated region fallthrough
CT: control target
= control target key end

     0   :  { %v873_v3 = vmov 0.0   ;;  %s874_s18 = smov 120   ;;  %v875_v7 = vmov 0   ;;  %vm33_vm0 = vcmask 64512   ;;  %vm876_vm1 = vmmov 0   ;;  %s1021_s1 = inlined_call_operand.vmem [shape: f32[8,16], index: 1, kind: input, shape index: {}]   ;;  %s1022_s0 = inlined_call_operand.vmem [shape: f32[2,8,800], index: 0, kind: input, shape index: {}]   ;;  %s1023_s2 = inlined_call_operand.vmem [shape: f32[8,1], index: 2, kind: input, shape index: {}]   ;;  %s1024_s3 = inlined_call_operand.vmem [shape: f32[2,800], index: 3, kind: output, shape index: {}]  }
   0x1   :  { %v29_v0 = vld [vmem:[%s1021_s1] sm:$0xff]  ;;  %v804_v2 = vld [vmem:[%s1022_s0 + $0x38] sm:$0xff]  ;;  %100 = vmatprep.mubr.f32.mxu0 %v873_v3  ;;  %171 = vmatprep.mubr.f32.mxu1 %v873_v3  ;;  %v807_v4 = vld [vmem:[%s1022_s0 + $0x50] sm:$0xff]  ;;  %vm617_vm2 = vcmask 1041408   ;;  %vm660_vm3 = vcmask 254976   ;;  %vm795_vm4 = vcmask 1043458  }
   0x2   :  { %v805_v1 = vld [vmem:[%s1022_s0 + $0x40] sm:$0xff]  ;;  %31 = vrot.lane.b32.xlu0 %v29_v0, %s874_s18  ;;  %v806_v5 = vld [vmem:[%s1022_s0 + $0x48] sm:$0xff]  ;;  %107 = vmatprep.subr.mxu1 %v807_v4  ;;  %v808_v9 = vld [vmem:[%s1022_s0 + $0x58] sm:$0xff]  ;;  %vm797_vm6 = vcmask 259076  }
   0x3   :  { %36 = vmatprep.subr.mxu0 %v805_v1  ;;  %v809_v6 = vld [vmem:[%s1022_s0 + $0x60] sm:$0xff]  ;;  %108 = vmatpush1.msra.mxu1 %v806_v5  ;;  %v810_v10 = vld [vmem:[%s1022_s0 + $0x68] sm:$0xff]  ;;  %v17_v13 = vld [vmem:[%s1022_s0 + $0x18] sm:$0xff] }
   0x4   :  { %37 = vmatpush1.msra.mxu0 %v804_v2  ;;  %823 = vmatprep.subr.mxu1 %v873_v3  ;;  %v604_v8 = vld [vmem:[%s1023_s2] sm:$0xff]  ;;  %v15_v12 = vld [vmem:[%s1022_s0 + $0x8] sm:$0xff]  ;;  %v16_v15 = vld [vmem:[%s1022_s0 + $0x10] sm:$0xff] }
   0x5   :  { %178 = vmatprep.subr.mxu0 %v809_v6  ;;  %844 = vset.pattern.permute.xlu0 %v875_v7  ;;  %v14_v14 = vld [vmem:[%s1022_s0] sm:$0xff]  ;;  %v19_v16 = vld [vmem:[%s1022_s0 + $0x28] sm:$0xff]  ;;  %v20_v18 = vld [vmem:[%s1022_s0 + $0x30] sm:$0xff] }
   0x6   :  { %607 = vperm.xlu0 %844, %v604_v8   ;;  %v18_v17 = vld [vmem:[%s1022_s0 + $0x20] sm:$0xff]  ;;  %vm796_vm5 = vmor %vm795_vm4, %vm617_vm2 }
   0x7   :  { %vm798_vm7 = vmor %vm797_vm6, %vm796_vm5 }
  0x74   :  { %v32_v11 = vpop.permute.xlu0 %31 }
  0x75   :  { %811 = vmatmul.mubr.msk.f32.vlgmr.msra.gmra.mrb[0].mxu0 %vm33_vm0, %v32_v11  ;;  %812 = vmatmul.mubr.msk.f32.vlgmr.msra.gmra.mrb[0].mxu1 %vm33_vm0, %v32_v11 }
  0x76   :  { %179 = vmatpush1.msra.mxu0 %v808_v9  ;;  %824 = vmatpush3.msra.mxu1 %v810_v10 }
  0x77   :  { %242 = vmatprep.mubr.f32.mxu0 %v873_v3  ;;  %825 = vmatprep.mubr.msk.f32.mxu1 %vm876_vm1, %v873_v3 }
  0x78   :  { %321 = vmatprep.subr.mxu0 %v15_v12  ;;  %392 = vmatprep.subr.mxu1 %v17_v13 }
  0x79   :  { %813 = vmatmul.mubr.msk.f32.vlgmr.msra.gmra.mrb[2].mxu0 %vm33_vm0, %v32_v11  ;;  %826 = vmatmul.mubr.msk.f32.vlgmr.msra.gmra.mrb[2].mxu1 %vm33_vm0, %v32_v11 }
  0x7a   :  { %322 = vmatpush1.msra.mxu0 %v14_v14  ;;  %393 = vmatpush1.msra.mxu1 %v16_v15 }
  0x7b   :  { %385 = vmatprep.mubr.f32.mxu0 %v873_v3  ;;  %456 = vmatprep.mubr.f32.mxu1 %v873_v3 }
  0x7c   :  { %463 = vmatprep.subr.mxu0 %v19_v16  ;;  %828 = vmatprep.subr.mxu1 %v873_v3 }
  0x7d   :  { %815 = vmatmul.mubr.msk.f32.vlgmr.msra.gmra.mrb[0].mxu0 %vm33_vm0, %v29_v0  ;;  %816 = vmatmul.mubr.msk.f32.vlgmr.msra.gmra.mrb[0].mxu1 %vm33_vm0, %v29_v0 }
  0x7e   :  { %464 = vmatpush1.msra.mxu0 %v18_v17  ;;  %829 = vmatpush3.msra.mxu1 %v20_v18 }
  0x7f   :  { %527 = vmatprep.mubr.f32.mxu0 %v873_v3  ;;  %830 = vmatprep.mubr.msk.f32.mxu1 %vm876_vm1, %v873_v3 }
  0x81   :  { %817 = vmatmul.mubr.msk.f32.vlgmr.msra.gmra.mrb[2].mxu0 %vm33_vm0, %v29_v0  ;;  %831 = vmatmul.mubr.msk.f32.vlgmr.msra.gmra.mrb[4].mxu1 %vm33_vm0, %v29_v0 }
  0x85   :  { %v608_v21 = vpop.permute.xlu0 %607 }
 0x14c   :  { %v315_v19 = vpop.f32.mrb[2].mxu1 }
 0x14d   :  { %v827_v20 = vpop.f32.mrb[3].mxu1 }
 0x150   :  { %v387_v22 = vpop.f32.mrb[0].mxu0  ;;  %v458_v23 = vpop.f32.mrb[0].mxu1 }
 0x151   :  { %v956_v24 = vadd.f32 %v608_v21, %v387_v22  ;;  %v958_v25 = vadd.f32 %v608_v21, %v458_v23  ;;  %v389_v26 = vpop.f32.mrb[1].mxu0  ;;  %v460_v27 = vpop.f32.mrb[1].mxu1 }
 0x152   :  { %v960_v28 = vadd.f32 %v608_v21, %v389_v26  ;;  %v962_v29 = vadd.f32 %v608_v21, %v460_v27 }
 0x153   :  { %v618_v30 = vsel %vm617_vm2, %v956_v24, -inf  ;;  %v632_v31 = vsel %vm617_vm2, %v958_v25, -inf }
 0x154   :  { %v619_v32 = vrot.slane %v618_v30, 4  ;;  %v633_v33 = vrot.slane %v632_v31, 4  ;;  %v625_v34 = vsel %vm617_vm2, %v960_v28, -inf  ;;  %v639_v35 = vsel %vm617_vm2, %v962_v29, -inf  ;;  %v529_v36 = vpop.f32.mrb[2].mxu0  ;;  %v600_v37 = vpop.f32.mrb[4].mxu1 }
 0x155   :  { %v626_v38 = vrot.slane %v625_v34, 4  ;;  %v640_v39 = vrot.slane %v639_v35, 4  ;;  %v614_v40 = vadd.f32 %v608_v21, %v529_v36  ;;  %v601_v41 = vadd.f32 %v600_v37, %v315_v19  ;;  %v531_v42 = vpop.f32.mrb[3].mxu0  ;;  %v832_v43 = vpop.f32.mrb[5].mxu1 }
 0x156   :  { %v620_v44 = vmax.f32 %v618_v30, %v619_v32  ;;  %v634_v45 = vmax.f32 %v632_v31, %v633_v33  ;;  %v615_v46 = vadd.f32 %v608_v21, %v531_v42 }
 0x157   :  { %v627_v47 = vmax.f32 %v625_v34, %v626_v38  ;;  %v641_v48 = vmax.f32 %v639_v35, %v640_v39  ;;  %v646_v49 = vsel %vm617_vm2, %v614_v40, -inf  ;;  %v616_v50 = vadd.f32 %v608_v21, %v601_v41 }
 0x158   :  { %v621_v51 = vrot.slane %v620_v44, 2  ;;  %v635_v52 = vrot.slane %v634_v45, 2  ;;  %v647_v53 = vrot.slane %v646_v49, 4  ;;  %v653_v54 = vsel %vm617_vm2, %v615_v46, -inf }
 0x159   :  { %v628_v55 = vrot.slane %v627_v47, 2  ;;  %v642_v56 = vrot.slane %v641_v48, 2  ;;  %v661_v57 = vsel %vm660_vm3, %v616_v50, -inf  ;;  %v654_v58 = vrot.slane %v653_v54, 4 }
 0x15a   :  { %v622_v59 = vmax.f32 %v620_v44, %v621_v51  ;;  %v636_v60 = vmax.f32 %v634_v45, %v635_v52  ;;  %v648_v61 = vmax.f32 %v646_v49, %v647_v53  ;;  %v662_v62 = vrot.slane %v661_v57, 4 }
 0x15b   :  { %v629_v63 = vmax.f32 %v627_v47, %v628_v55  ;;  %v643_v0 = vmax.f32 %v641_v48, %v642_v56  ;;  %v655_v1 = vmax.f32 %v653_v54, %v654_v58 }
 0x15c   :  { %v623_v2 = vrot.slane %v622_v59, 1  ;;  %v637_v3 = vrot.slane %v636_v60, 1  ;;  %v649_v4 = vrot.slane %v648_v61, 2  ;;  %v663_v5 = vmax.f32 %v661_v57, %v662_v62 }
 0x15d   :  { %v630_v6 = vrot.slane %v629_v63, 1  ;;  %v644_v7 = vrot.slane %v643_v0, 1  ;;  %v656_v8 = vrot.slane %v655_v1, 2 }
 0x15e   :  { %v624_v9 = vmax.f32 %v622_v59, %v623_v2  ;;  %v638_v10 = vmax.f32 %v636_v60, %v637_v3  ;;  %v650_v11 = vmax.f32 %v648_v61, %v649_v4  ;;  %v664_v12 = vrot.slane %v663_v5, 2 }
 0x15f   :  { %v631_v13 = vmax.f32 %v629_v63, %v630_v6  ;;  %v645_v14 = vmax.f32 %v643_v0, %v644_v7  ;;  %v657_v15 = vmax.f32 %v655_v1, %v656_v8 }
 0x160   :  { %v668_v16 = vsub.f32 %v956_v24, %v624_v9  ;;  %v670_v17 = vsub.f32 %v958_v25, %v638_v10  ;;  %v651_v18 = vrot.slane %v650_v11, 1  ;;  %v665_v19 = vmax.f32 %v663_v5, %v664_v12 }
 0x161   :  { %v669_v20 = vsub.f32 %v960_v28, %v631_v13  ;;  %v671_v21 = vsub.f32 %v962_v29, %v645_v14  ;;  %v658_v22 = vrot.slane %v657_v15, 1 }
 0x162   :  { %v675_v23 = vmul.f32 1.442695, %v668_v16  ;;  %v679_v26 = vmul.f32 1.442695, %v670_v17  ;;  %v652_v27 = vmax.f32 %v650_v11, %v651_v18  ;;  %v666_v30 = vrot.slane %v665_v19, 1 }
 0x163   :  { %v677_v31 = vmul.f32 1.442695, %v669_v20  ;;  %v681_v32 = vmul.f32 1.442695, %v671_v21  ;;  %v659_v33 = vmax.f32 %v657_v15, %v658_v22 }
 0x164   :  { %845 = vpow2.f32 %v675_v23  ;;  %v672_v34 = vsub.f32 %v614_v40, %v652_v27  ;;  %v667_v35 = vmax.f32 %v665_v19, %v666_v30 }
 0x165   :  { %847 = vpow2.f32 %v679_v26  ;;  %v673_v24 = vsub.f32 %v615_v46, %v659_v33  ;;  %v877_v33 = vmov 1983009808  }
 0x166   :  { %849 = vpow2.f32 %v677_v31  ;;  %v683_v25 = vmul.f32 1.442695, %v672_v34  ;;  %v674_v36 = vsub.f32 %v616_v50, %v667_v35  ;;  %v762_v34 = vunpack.c.l.s4 %v877_v33 }
 0x167   :  { %851 = vpow2.f32 %v681_v32  ;;  %v685_v28 = vmul.f32 1.442695, %v673_v24  ;;  %v764_v35 = vlaneseq }
 0x168   :  { %853 = vpow2.f32 %v683_v25  ;;  %v687_v29 = vmul.f32 1.442695, %v674_v36  ;;  %v763_v24 = vunpack.c.0.s8 %v762_v34 }
 0x169   :  { %855 = vpow2.f32 %v685_v28  ;;  %v765_v25 = vshrl.u32 %v764_v35, 7 }
 0x16a   :  { %857 = vpow2.f32 %v687_v29 }
 0x16e   :  { %v979_v37 = vpop.eup %845 }
 0x16f   :  { %v981_v38 = vpop.eup %847  ;;  %v689_v39 = vsel %vm617_vm2, %v979_v37, 0.0 }
 0x170   :  { %v985_v40 = vpop.eup %849  ;;  %v690_v41 = vrot.slane %v689_v39, 4  ;;  %v703_v42 = vsel %vm617_vm2, %v981_v38, 0.0 }
 0x171   :  { %v989_v43 = vpop.eup %851  ;;  %v704_v44 = vrot.slane %v703_v42, 4  ;;  %v696_v45 = vsel %vm617_vm2, %v985_v40, 0.0 }
 0x172   :  { %v993_v46 = vpop.eup %853  ;;  %v691_v47 = vadd.f32 %v690_v41, %v689_v39  ;;  %v697_v48 = vrot.slane %v696_v45, 4  ;;  %v710_v49 = vsel %vm617_vm2, %v989_v43, 0.0 }
 0x173   :  { %v997_v50 = vpop.eup %855  ;;  %v705_v51 = vadd.f32 %v704_v44, %v703_v42  ;;  %v711_v52 = vrot.slane %v710_v49, 4  ;;  %v717_v53 = vsel %vm617_vm2, %v993_v46, 0.0 }
 0x174   :  { %v1001_v54 = vpop.eup %857  ;;  %v692_v55 = vrot.slane %v691_v47, 2  ;;  %v698_v56 = vadd.f32 %v697_v48, %v696_v45  ;;  %v718_v57 = vrot.slane %v717_v53, 4  ;;  %v724_v58 = vsel %vm617_vm2, %v997_v50, 0.0 }
 0x175   :  { %v706_v59 = vrot.slane %v705_v51, 2  ;;  %v712_v60 = vadd.f32 %v711_v52, %v710_v49  ;;  %v731_v61 = vsel %vm660_vm3, %v1001_v54, 0.0  ;;  %v725_v62 = vrot.slane %v724_v58, 4 }
 0x176   :  { %v693_v63 = vadd.f32 %v692_v55, %v691_v47  ;;  %v699_v0 = vrot.slane %v698_v56, 2  ;;  %v719_v1 = vadd.f32 %v718_v57, %v717_v53  ;;  %v732_v2 = vrot.slane %v731_v61, 4 }
 0x177   :  { %v707_v3 = vadd.f32 %v706_v59, %v705_v51  ;;  %v713_v4 = vrot.slane %v712_v60, 2  ;;  %v726_v5 = vadd.f32 %v725_v62, %v724_v58  ;;  %v766_v45 = vsub.s32 %v763_v24, %v765_v25 }
 0x178   :  { %v694_v6 = vrot.slane %v693_v63, 1  ;;  %v700_v7 = vadd.f32 %v699_v0, %v698_v56  ;;  %v720_v8 = vrot.slane %v719_v1, 2  ;;  %v733_v9 = vadd.f32 %v732_v2, %v731_v61 }
 0x179   :  { %v708_v10 = vrot.slane %v707_v3, 1  ;;  %v714_v11 = vadd.f32 %v713_v4, %v712_v60  ;;  %v727_v12 = vrot.slane %v726_v5, 2 }
 0x17a   :  { %v695_v13 = vadd.f32 %v694_v6, %v693_v63  ;;  %v701_v14 = vrot.slane %v700_v7, 1  ;;  %v721_v15 = vadd.f32 %v720_v8, %v719_v1  ;;  %v734_v16 = vrot.slane %v733_v9, 2 }
 0x17b   :  { %v709_v17 = vadd.f32 %v708_v10, %v707_v3  ;;  %v715_v18 = vrot.slane %v714_v11, 1  ;;  %v728_v19 = vadd.f32 %v727_v12, %v726_v5 }
 0x17c   :  { %859 = vrcp.f32 %v695_v13  ;;  %v702_v20 = vadd.f32 %v701_v14, %v700_v7  ;;  %v722_v21 = vrot.slane %v721_v15, 1  ;;  %v735_v22 = vadd.f32 %v734_v16, %v733_v9 }
 0x17d   :  { %861 = vrcp.f32 %v709_v17  ;;  %v716_v23 = vadd.f32 %v715_v18, %v714_v11  ;;  %v729_v26 = vrot.slane %v728_v19, 1 }
 0x17e   :  { %863 = vrcp.f32 %v702_v20  ;;  %v723_v27 = vadd.f32 %v722_v21, %v721_v15  ;;  %v736_v30 = vrot.slane %v735_v22, 1 }
 0x17f   :  { %865 = vrcp.f32 %v716_v23  ;;  %v730_v31 = vadd.f32 %v729_v26, %v728_v19 }
 0x180   :  { %867 = vrcp.f32 %v723_v27  ;;  %v737_v32 = vadd.f32 %v736_v30, %v735_v22 }
 0x181   :  { %869 = vrcp.f32 %v730_v31 }
 0x182   :  { %871 = vrcp.f32 %v737_v32 }
 0x186   :  { %v860_v36 = vpop.eup %859 }
 0x187   :  { %v862_v28 = vpop.eup %861  ;;  %v745_v29 = vmul.f32 %v860_v36, %v979_v37 }
 0x188   :  { %v864_v39 = vpop.eup %863  ;;  %v747_v41 = vmul.f32 %v862_v28, %v981_v38 }
 0x189   :  { %v866_v42 = vpop.eup %865  ;;  %v746_v44 = vmul.f32 %v864_v39, %v985_v40 }
 0x18a   :  { %v868_v47 = vpop.eup %867  ;;  %v748_v48 = vmul.f32 %v866_v42, %v989_v43 }
 0x18b   :  { %v870_v49 = vpop.eup %869  ;;  %v759_v51 = vcombine.low %v745_v29, %v746_v44  ;;  %v749_v52 = vmul.f32 %v868_v47, %v993_v46 }
 0x18c   :  { %v872_v53 = vpop.eup %871  ;;  %v760_v55 = vcombine.low %v747_v41, %v748_v48  ;;  %v750_v56 = vmul.f32 %v870_v49, %v997_v50 }
 0x18d   :  { %v767_v37 = vrot.slane %v759_v51, %v766_v45  ;;  %v751_v57 = vmul.f32 %v872_v53, %v1001_v54 }
 0x18e   :  { %v774_v38 = vrot.slane %v760_v55, %v766_v45  ;;  %v776_v58 = vcombine.low %v749_v52, %v750_v56 }
 0x18f   :  { %v790_v40 = vrot.slane %v751_v57, %v766_v45 }
 0x190   :  { %v775_v59 = vcombine.low %v767_v37, %v774_v38  ;;  %v783_v43 = vrot.slane %v776_v58, %v766_v45 }
 0x192   :  { %794 = vst [vmem:[%s1024_s3] sm:$0xff] %v775_v59  ;;  %v791_v46 = vcombine.low %v783_v43, %v790_v40 }
 0x194   :  { %799 = vst.msk [vmem:[%s1024_s3 + $0x8] sm:$0x3f] %vm798_vm7, %v791_v46 }

// kernel: bdclstm_forward.2
= control target key start
LH: loop header
LB: loop body
LE: loop exit
PB: predicated region body
PF: predicated region fallthrough
CT: control target
= control target key end

     0   :  { %s17311_s18 = smov 0   ;;  %s21288_s0 = inlined_call_operand.vmem [shape: bf16[2,4,1056], index: 0, kind: input, shape index: {}]   ;;  %s21289_s1 = inlined_call_operand.vmem [shape: bf16[4,1056], index: 1, kind: input, shape index: {}]   ;;  %s21290_s2 = inlined_call_operand.vmem [shape: bf16[2,32,400], index: 2, kind: input, shape index: {}]   ;;  %s21291_s3 = inlined_call_operand.vmem [shape: f32[2,32,1], index: 3, kind: input, shape index: {}]   ;;  %s21292_s4 = inlined_call_operand.vmem [shape: f32[1,800], index: 4, kind: input, shape index: {}]   ;;  %s21293_s5 = inlined_call_operand.vmem [shape: f32[2,8,800], index: 5, kind: output, shape index: {}]  }
   0x1 LB: > { %s14661_s19 = sadd.s32 4294967295, %s17246_s18   ;;  %p14665_p0 = scmp.ge.s32.totalorder %s17246_s18, 1  ;;  %s17246_s18 = sphi %s17311_s18, %s15_s18  }
   0x2   : > { %p207_p1 = scmp.lt.s32.totalorder %s17246_s18, 3 }
   0x4   : > { %p208_p2 = pnand %p14665_p0, %p207_p1 }
   0x6   : > { %211 = sbr.rel (%p208_p2) target bundleno = 3224 (0xc98), region = 40 }
   0xd   : > { %p17319_p3 = scmp.lt.s32.totalorder %s14661_s19, 1  ;;  %v291_v0 = vlaneseq  ;;  %v21296_v1 = vmov 0   ;;  %v17249_v2 = vmov 1983009808   ;;  %v7480_v8 = vld [vmem:[%s21289_s1] sm:$0xff]  ;;  %v7481_v18 = vld [vmem:[%s21289_s1 + $0x8] sm:$0xff] }
   0xe   : > { %266 = vst [vmem:[#allocation2] sm:$0xff] %v21296_v1  ;;  %267 = vst [vmem:[#allocation2 + $0x8] sm:$0xff] %v21296_v1  ;;  %v289_v3 = vunpack.c.l.s4 %v17249_v2  ;;  %447 = vmatprep.mubr.bf16.mxu0 %v21296_v1  ;;  %16981 = vset.pattern.permute.xlu1 %v21296_v1  ;;  %v7486_v14 = vcombine.high %v7480_v8, %v7480_v8  ;;  %v7503_v25 = vcombine.high %v7481_v18, %v7481_v18  ;;  %vm408_vm0 = vcmask 130048   ;;  %s17250_s8 = smov 41   ;;  %s17251_s9 = smov 112  }
   0xf   : > { %268 = vst [vmem:[#allocation2 + $0x10] sm:$0xff] %v21296_v1  ;;  %269 = vst [vmem:[#allocation2 + $0x18] sm:$0xff] %v21296_v1  ;;  %s21944_s19 = smov (!%p17319_p3, %s14661_s19), 1  ;;  %v17337_v4 = vshrl.u32 %v291_v0, 7  ;;  %16982 = vset.pattern.permute.xlu0 %v21296_v1  ;;  %s17252_s10 = smov 42   ;;  %vm394_vm1 = vcmask 334848  }
  0x10   : > { %270 = vst [vmem:[#allocation2 + $0x20] sm:$0xff] %v21296_v1  ;;  %271 = vst [vmem:[#allocation2 + $0x28] sm:$0xff] %v21296_v1  ;;  %v290_v5 = vunpack.c.0.s8 %v289_v3  ;;  %s16938_s21 = smul.u32 18, %s21944_s19  ;;  %s15142_s22 = sshll.u32 %s21944_s19, 6  ;;  %vm21403_vm2 = vcmask 343040   ;;  %vm21402_vm3 = vcmask 326656  }
  0x11   : > { %272 = vst [vmem:[#allocation2 + $0x30] sm:$0xff] %v21296_v1  ;;  %273 = vst [vmem:[#allocation2 + $0x38] sm:$0xff] %v21296_v1  ;;  %s17345_s25 = scalar_lea.vmem %s21290_s2, %s15142_s22  ;;  %s17253_s11 = smov 40   ;;  %vm21400_vm4 = vcmask 318464   ;;  %vm1431_vm5 = vcmask 310272   ;;  %vm1723_vm6 = vcmask 179200  }
  0x12   : > { %21486 = vst [vmem:[#allocation3_spill] sm:$0xff] %v17337_v4  ;;  %v293_v6 = vsub.s32 %v290_v5, %v17337_v4  ;;  %s249_s28 = scalar_lea.vmem %s21288_s0, %s16938_s21  ;;  %v17358_v22 = vld [vmem:[%s17345_s25] ss:$16 sps:$4 sm:$0xff]   ;;  %s17254_s12 = smov 96   ;;  %vm2000_vm7 = vcmask 171008   ;;  %vm2277_vm8 = vcmask 162816  }
  0x13   : > { %v281_v7 = vld [vmem:[%s249_s28] sm:$0xff]  ;;  %v282_v9 = vld [vmem:[%s249_s28 + $0x8] sm:$0xff]  ;;  %15302 = vmatprep.mubr.msk.bf16.mxu1 %vm408_vm0, %v17358_v22  ;;  %s17255_s13 = smov 39   ;;  %s17256_s14 = smov 80   ;;  %vm2564_vm9 = vcmask 154624   ;;  %vm2841_vm10 = vcmask 146432  }
  0x14   : > { %14673 = vst.sshfl [vmem:[#allocation2 + $0x8] sm:$0xc pattern:$0x76325410] %v281_v7  ;;  %v294_v10 = vrot.slane %v281_v7, %v293_v6  ;;  %v287_v11 = vcombine.high %v281_v7, %v281_v7  ;;  %v311_v12 = vrot.slane %v282_v9, %v293_v6  ;;  %v304_v13 = vcombine.high %v282_v9, %v282_v9  ;;  %v17379_v38 = vld [vmem:[%s17345_s25 + $0x20] ss:$16 sps:$4 sm:$0xff]  }
  0x15   : > { %14675 = vst.sshfl [vmem:[#allocation2 + $0x28] sm:$0xc pattern:$0x76325410] %v282_v9  ;;  %v7493_v20 = vrot.slane %v7480_v8, %v293_v6  ;;  %v7510_v23 = vrot.slane %v7481_v18, %v293_v6  ;;  %v7500_v26 = vrot.slane %v7486_v14, %v293_v6  ;;  %v7517_v29 = vrot.slane %v7503_v25, %v293_v6  ;;  %s17257_s15 = smov 38   ;;  %s17258_s16 = smov 64  }
  0x16   : > { %v302_v15 = vcombine.low %v294_v10, %v294_v10  ;;  %v301_v16 = vrot.slane %v287_v11, %v293_v6  ;;  %14674 = vst.sshfl [vmem:[#allocation2 + $0x18] sm:$0xc pattern:$0x76325410] %v287_v11  ;;  %v319_v17 = vcombine.low %v311_v12, %v311_v12  ;;  %v318_v19 = vrot.slane %v304_v13, %v293_v6  ;;  %s17259_s17 = smov 22   ;;  %s17260_s20 = smov 48  }
  0x17   : > { %14676 = vst.sshfl [vmem:[#allocation2 + $0x38] sm:$0xc pattern:$0x76325410] %v304_v13  ;;  %v7501_v30 = vcombine.low %v7493_v20, %v7493_v20  ;;  %v7518_v31 = vcombine.low %v7510_v23, %v7510_v23  ;;  %v7502_v33 = vcombine.low %v7500_v26, %v7500_v26  ;;  %v7519_v37 = vcombine.low %v7517_v29, %v7517_v29  ;;  %s17261_s21 = smov 21   ;;  %s17262_s22 = smov 32  }
  0x18   : > { %338 = vst [vmem:[#allocation2] sm:$0x30] %v302_v15  ;;  %v303_v21 = vcombine.low %v301_v16, %v301_v16  ;;  %342 = vst [vmem:[#allocation2 + $0x20] sm:$0x30] %v319_v17  ;;  %v320_v24 = vcombine.low %v318_v19, %v318_v19  ;;  %s17263_s23 = smov 20   ;;  %s17264_s24 = smov 16  }
  0x19   : > { %s17265_s26 = smov 19   ;;  %s17266_s27 = smov 18   ;;  %v17605_v10 = vld [vmem:[%s17345_s25 + $0x24] ss:$16 sps:$4 sm:$0xff]   ;;  %vm21404_vm11 = vcmask 15360   ;;  %vm21401_vm12 = vcmask 7168  }
  0x1a   : > { %340 = vst [vmem:[#allocation2 + $0x10] sm:$0x30] %v303_v21  ;;  %344 = vst [vmem:[#allocation2 + $0x30] sm:$0x30] %v320_v24  ;;  %s17267_s28 = smov 2   ;;  %s21395_s29 = smov 1  }
  0x1b   : > { %v17362_v27 = vld [vmem:[#allocation2 + $0x8] sm:$0xff]  ;;  %s21393_s30 = smov 127   ;;  %s21294_s6 = smov 126   ;;  %vm21399_vm13 = vcmask 1039360   ;;  %vm21397_vm14 = vcmask 1031168   ;;  %vm21398_vm15 = vcmask 900096  }
  0x1c   : > { %v17364_v28 = vld [vmem:[#allocation2 + $0x28] sm:$0xff]  ;;  %382 = vrot.lane.b32.xlu0 %v17362_v27, %s17250_s8  ;;  %14907 = vst.sshfl [vmem:[#allocation2 + $0x8] sm:$0xc pattern:$0x76325410] %v7480_v8  ;;  %s21301_s7 = smov 110  }
  0x1d   : > { %21487 = vst [vmem:[#allocation4_spill] sm:$0xff] %v17364_v28  ;;  %14909 = vst.sshfl [vmem:[#allocation2 + $0x28] sm:$0xc pattern:$0x76325410] %v7481_v18  ;;  %v17368_v32 = vld [vmem:[#allocation2 + $0x18] sm:$0xff] }
  0x1e   : > { %21488 = vst [vmem:[#allocation5_spill] sm:$0xff] %v17368_v32  ;;  %14908 = vst.sshfl [vmem:[#allocation2 + $0x18] sm:$0xc pattern:$0x76325410] %v7486_v14  ;;  %v17370_v34 = vld [vmem:[#allocation2 + $0x38] sm:$0xff] }
  0x1f   : > { %v17372_v35 = vld [vmem:[#allocation2] sm:$0xff]  ;;  %14910 = vst.sshfl [vmem:[#allocation2 + $0x38] sm:$0xc pattern:$0x76325410] %v7503_v25 }
  0x20   : > { %v17374_v36 = vld [vmem:[#allocation2 + $0x20] sm:$0xff]  ;;  %380 = vrot.lane.b32.xlu1 %v17372_v35, %s17250_s8  ;;  %7537 = vst [vmem:[#allocation2] sm:$0x30] %v7501_v30 }
  0x21   : > { %7541 = vst [vmem:[#allocation2 + $0x20] sm:$0x30] %v7518_v31  ;;  %v17381_v39 = vld [vmem:[#allocation2 + $0x10] sm:$0xff] }
  0x22   : > { %384 = vrot.lane.b32.xlu0 %v17381_v39, %s17250_s8  ;;  %7539 = vst [vmem:[#allocation2 + $0x10] sm:$0x30] %v7502_v33  ;;  %v17385_v40 = vld [vmem:[#allocation2 + $0x30] sm:$0xff] }
  0x23   : > { %21489 = vst [vmem:[#allocation6_spill] sm:$0xff] %v17385_v40  ;;  %7543 = vst [vmem:[#allocation2 + $0x30] sm:$0x30] %v7519_v37  ;;  %v17597_v8 = vld [vmem:[%s17345_s25 + $0x4] ss:$16 sps:$4 sm:$0xff]  }
  0x24   : > { %369 = vrot.lane.b32.xlu1 %v17358_v22, %s17251_s9 }
  0x26   : > { %371 = vrot.lane.b32.xlu0 %v17379_v38, %s17251_s9 }
  0x28   : > { %386 = vrot.lane.b32.xlu1 %v17368_v32, %s17250_s8 }
  0x2a   : > { %388 = vrot.lane.b32.xlu0 %v17374_v36, %s17250_s8 }
  0x2c   : > { %390 = vrot.lane.b32.xlu1 %v17364_v28, %s17250_s8 }
  0x2e   : > { %392 = vrot.lane.b32.xlu0 %v17385_v40, %s17250_s8 }
  0x30   : > { %625 = vrot.lane.b32.xlu1 %v17362_v27, %s17252_s10 }
  0x32   : > { %627 = vrot.lane.b32.xlu0 %v17381_v39, %s17252_s10 }
  0x34   : > { %623 = vrot.lane.b32.xlu1 %v17372_v35, %s17252_s10 }
  0x36   : > { %629 = vrot.lane.b32.xlu0 %v17368_v32, %s17252_s10 }
  0x38   : > { %631 = vrot.lane.b32.xlu1 %v17374_v36, %s17252_s10 }
  0x3a   : > { %633 = vrot.lane.b32.xlu0 %v17364_v28, %s17252_s10 }
  0x3c   : > { %635 = vrot.lane.b32.xlu1 %v17385_v40, %s17252_s10 }
  0x3e   : > { %871 = vrot.lane.b32.xlu0 %v17362_v27, %s17253_s11 }
  0x40   : > { %873 = vrot.lane.b32.xlu1 %v17381_v39, %s17253_s11 }
  0x42   : > { %869 = vrot.lane.b32.xlu0 %v17372_v35, %s17253_s11 }
  0x44   : > { %865 = vrot.lane.b32.xlu1 %v17358_v22, %s17254_s12 }
  0x46   : > { %867 = vrot.lane.b32.xlu0 %v17379_v38, %s17254_s12 }
  0x48   : > { %875 = vrot.lane.b32.xlu1 %v17368_v32, %s17253_s11 }
  0x4a   : > { %877 = vrot.lane.b32.xlu0 %v17374_v36, %s17253_s11 }
  0x4c   : > { %879 = vrot.lane.b32.xlu1 %v17364_v28, %s17253_s11 }
  0x4e   : > { %881 = vrot.lane.b32.xlu0 %v17385_v40, %s17253_s11 }
  0x50   : > { %1145 = vrot.lane.b32.xlu1 %v17362_v27, %s17255_s13 }
  0x52   : > { %1147 = vrot.lane.b32.xlu0 %v17381_v39, %s17255_s13 }
  0x54   : > { %1143 = vrot.lane.b32.xlu1 %v17372_v35, %s17255_s13 }
  0x56   : > { %1139 = vrot.lane.b32.xlu0 %v17358_v22, %s17256_s14 }
  0x58   : > { %1141 = vrot.lane.b32.xlu1 %v17379_v38, %s17256_s14 }
  0x5a   : > { %1149 = vrot.lane.b32.xlu0 %v17368_v32, %s17255_s13 }
  0x5c   : > { %1151 = vrot.lane.b32.xlu1 %v17374_v36, %s17255_s13 }
  0x5e   : > { %1153 = vrot.lane.b32.xlu0 %v17364_v28, %s17255_s13 }
  0x60   : > { %1155 = vrot.lane.b32.xlu1 %v17385_v40, %s17255_s13 }
  0x62   : > { %1419 = vrot.lane.b32.xlu0 %v17362_v27, %s17257_s15 }
  0x64   : > { %1421 = vrot.lane.b32.xlu1 %v17381_v39, %s17257_s15 }
  0x66   : > { %1417 = vrot.lane.b32.xlu0 %v17372_v35, %s17257_s15 }
  0x68   : > { %1413 = vrot.lane.b32.xlu1 %v17358_v22, %s17258_s16 }
  0x6a   : > { %1415 = vrot.lane.b32.xlu0 %v17379_v38, %s17258_s16 }
  0x6c   : > { %1423 = vrot.lane.b32.xlu1 %v17368_v32, %s17257_s15 }
  0x6e   : > { %1425 = vrot.lane.b32.xlu0 %v17374_v36, %s17257_s15 }
  0x70   : > { %1427 = vrot.lane.b32.xlu1 %v17364_v28, %s17257_s15 }
  0x72   : > { %1429 = vrot.lane.b32.xlu0 %v17385_v40, %s17257_s15 }
  0x74   : > { %1709 = vrot.lane.b32.xlu1 %v17362_v27, %s17259_s17 }
  0x76   : > { %1711 = vrot.lane.b32.xlu0 %v17381_v39, %s17259_s17 }
  0x78   : > { %1707 = vrot.lane.b32.xlu1 %v17372_v35, %s17259_s17 }
  0x7a   : > { %1695 = vrot.lane.b32.xlu0 %v17358_v22, %s17260_s20 }
  0x7c   : > { %1697 = vrot.lane.b32.xlu1 %v17379_v38, %s17260_s20 }
  0x7e   : > { %1713 = vrot.lane.b32.xlu0 %v17368_v32, %s17259_s17 }
  0x80   : > { %1715 = vrot.lane.b32.xlu1 %v17374_v36, %s17259_s17 }
  0x82   : > { %1717 = vrot.lane.b32.xlu0 %v17364_v28, %s17259_s17 }
  0x84   : > { %1719 = vrot.lane.b32.xlu1 %v17385_v40, %s17259_s17 }
  0x86   : > { %1986 = vrot.lane.b32.xlu0 %v17362_v27, %s17261_s21 }
  0x88   : > { %1988 = vrot.lane.b32.xlu1 %v17381_v39, %s17261_s21 }
  0x8a   : > { %1984 = vrot.lane.b32.xlu0 %v17372_v35, %s17261_s21 }
  0x8c   : > { %1980 = vrot.lane.b32.xlu1 %v17358_v22, %s17262_s22 }
  0x8e   : > { %1982 = vrot.lane.b32.xlu0 %v17379_v38, %s17262_s22  ;;  %v383_v41 = vpop.permute.xlu0 %382 }
  0x90   : > { %1990 = vrot.lane.b32.xlu1 %v17368_v32, %s17261_s21 }
  0x92   : > { %v381_v42 = vpop.permute.xlu1 %380  ;;  %1992 = vrot.lane.b32.xlu0 %v17374_v36, %s17261_s21 }
  0x93   : > { %v395_v46 = vsel %vm394_vm1, %v381_v42, %v383_v41 }
  0x94   : > { %1994 = vrot.lane.b32.xlu1 %v17364_v28, %s17261_s21  ;;  %v385_v43 = vpop.permute.xlu0 %384 }
  0x95   : > { %v396_v44 = vsel %vm394_vm1, %v383_v41, %v385_v43 }
  0x96   : > { %v17502_v45 = vpop.permute.xlu1 %369  ;;  %1996 = vrot.lane.b32.xlu0 %v17385_v40, %s17261_s21  ;;  %415 = vmatprep.subr.bf16.mxu0 %v396_v44 }
  0x97   : > { %416 = vmatpush1.bf16.msra.mxu0 %v395_v46 }
  0x98   : > { %2263 = vrot.lane.b32.xlu1 %v17362_v27, %s17263_s23  ;;  %v17509_v47 = vpop.permute.xlu0 %371 }
  0x9a   : > { %v387_v48 = vpop.permute.xlu1 %386  ;;  %2265 = vrot.lane.b32.xlu0 %v17381_v39, %s17263_s23  ;;  %14679 = vmatmul.mubr.msk.bf16.vlgmr.msra.gmra.mrb[0].mxu0 %vm408_vm0, %v17502_v45 }
  0x9b   : > { %457 = vmatprep.mubr.bf16.mxu0 %v21296_v1  ;;  %v397_v52 = vsel %vm394_vm1, %v385_v43, %v387_v48 }
  0x9c   : > { %2261 = vrot.lane.b32.xlu1 %v17372_v35, %s17263_s23  ;;  %v389_v49 = vpop.permute.xlu0 %388 }
  0x9d   : > { %v398_v50 = vsel %vm394_vm1, %v387_v48, %v389_v49 }
  0x9e   : > { %v391_v51 = vpop.permute.xlu1 %390  ;;  %2257 = vrot.lane.b32.xlu0 %v17358_v22, %s17264_s24  ;;  %468 = vmatprep.subr.bf16.mxu0 %v398_v50 }
  0x9f   : > { %469 = vmatpush1.bf16.msra.mxu0 %v397_v52  ;;  %v399_v60 = vsel %vm394_vm1, %v389_v49, %v391_v51 }
  0xa0   : > { %2259 = vrot.lane.b32.xlu1 %v17379_v38, %s17264_s24  ;;  %v393_v53 = vpop.permute.xlu0 %392 }
  0xa1   : > { %v400_v54 = vsel %vm394_vm1, %v391_v51, %v393_v53 }
  0xa2   : > { %v17525_v55 = vpop.permute.xlu1 %625  ;;  %2267 = vrot.lane.b32.xlu0 %v17368_v32, %s17263_s23  ;;  %14680 = vmatmul.mubr.msk.bf16.gmra.mrb[4].mxu0 %vm408_vm0, %v17509_v47 }
  0xa3   : > { %500 = vmatprep.mubr.bf16.mxu0 %v21296_v1  ;;  %521 = vmatprep.subr.bf16.mxu0 %v400_v54 }
  0xa4   : > { %2269 = vrot.lane.b32.xlu1 %v17374_v36, %s17263_s23  ;;  %v17534_v56 = vpop.permute.xlu0 %627 }
  0xa5   : > { %v639_v6 = vsel %vm21403_vm2, %v17525_v55, %v17534_v56 }
  0xa6   : > { %v624_v57 = vpop.permute.xlu1 %623  ;;  %2271 = vrot.lane.b32.xlu0 %v17364_v28, %s17263_s23 }
  0xa7   : > { %v638_v16 = vsel %vm21403_vm2, %v624_v57, %v17525_v55 }
  0xa8   : > { %2273 = vrot.lane.b32.xlu1 %v17385_v40, %s17263_s23  ;;  %v17540_v58 = vpop.permute.xlu0 %629 }
  0xa9   : > { %v640_v26 = vsel %vm21403_vm2, %v17534_v56, %v17540_v58 }
  0xaa   : > { %v17542_v59 = vpop.permute.xlu1 %631  ;;  %2550 = vrot.lane.b32.xlu0 %v17362_v27, %s17265_s26  ;;  %14681 = vmatmul.mubr.msk.bf16.vlgmr.msra.gmra.mrb[8].mxu0 %vm408_vm0, %v17502_v45 }
  0xab   : > { %522 = vmatpush1.bf16.msra.mxu0 %v399_v60  ;;  %510 = vmatprep.mubr.bf16.mxu0 %v21296_v1  ;;  %v641_v18 = vsel %vm21403_vm2, %v17540_v58, %v17542_v59 }
  0xac   : > { %2552 = vrot.lane.b32.xlu1 %v17381_v39, %s17265_s26  ;;  %v17552_v61 = vpop.permute.xlu0 %633  ;;  %15294 = vmatprep.subr.bf16.mxu0 %v393_v53 }
  0xae   : > { %v17554_v62 = vpop.permute.xlu1 %635  ;;  %2548 = vrot.lane.b32.xlu0 %v17372_v35, %s17265_s26 }
  0xaf   : > { %15300 = vmatprep.subr.bf16.mxu1 %v17554_v62  ;;  %v643_v24 = vsel %vm21403_vm2, %v17552_v61, %v17554_v62 }
  0xb0   : > { %2554 = vrot.lane.b32.xlu1 %v17368_v32, %s17265_s26  ;;  %v17561_v63 = vpop.permute.xlu0 %871  ;;  %15301 = vmatpush3.bf16.msra.mxu1 %v17554_v62 }
  0xb2   : > { %v17564_v0 = vpop.permute.xlu1 %873  ;;  %2556 = vrot.lane.b32.xlu0 %v17374_v36, %s17265_s26  ;;  %14682 = vmatmul.mubr.msk.bf16.gmra.mrb[12].mxu0 %vm408_vm0, %v17509_v47 }
  0xb3   : > { %553 = vmatprep.mubr.bf16.mxu0 %v21296_v1  ;;  %15303 = vmatmul.mubr.msk.bf16.vlgmr.msra.gmra.mrb[0].mxu1 %vm408_vm0, %v17379_v38  ;;  %v885_v43 = vsel %vm21402_vm3, %v17561_v63, %v17564_v0 }
  0xb4   : > { %2558 = vrot.lane.b32.xlu1 %v17364_v28, %s17265_s26  ;;  %v17575_v2 = vpop.permute.xlu0 %869 }
  0xb5   : > { %v884_v51 = vsel %vm21402_vm3, %v17575_v2, %v17561_v63 }
  0xb6   : > { %v17577_v3 = vpop.permute.xlu1 %865  ;;  %2560 = vrot.lane.b32.xlu0 %v17385_v40, %s17265_s26 }
  0xb7   : > { %15308 = vmatprep.mubr.msk.bf16.mxu1 %vm408_vm0, %v17577_v3 }
  0xb8   : > { %2827 = vrot.lane.b32.xlu1 %v17362_v27, %s17266_s27  ;;  %v17585_v5 = vpop.permute.xlu0 %867 }
  0xba   : > { %v17590_v7 = vpop.permute.xlu1 %875  ;;  %2829 = vrot.lane.b32.xlu0 %v17381_v39, %s17266_s27  ;;  %14683 = vmatmul.mubr.msk.bf16.vlgmr.msra.gmra.mrb[16].mxu0 %vm408_vm0, %v17502_v45 }
  0xbb   : > { %15295 = vmatpush3.bf16.msra.mxu0 %v393_v53  ;;  %563 = vmatprep.mubr.bf16.mxu0 %v21296_v1  ;;  %v886_v62 = vsel %vm21402_vm3, %v17564_v0, %v17590_v7 }
  0xbc   : > { %2825 = vrot.lane.b32.xlu1 %v17372_v35, %s17266_s27  ;;  %v17602_v9 = vpop.permute.xlu0 %877  ;;  %657 = vmatprep.subr.bf16.mxu0 %v639_v6 }
  0xbd   : > { %v887_v53 = vsel %vm21402_vm3, %v17590_v7, %v17602_v9 }
  0xbe   : > { %v17607_v11 = vpop.permute.xlu1 %879  ;;  %2821 = vrot.lane.b32.xlu0 %v17597_v8, %s17251_s9 }
  0xc0   : > { %2823 = vrot.lane.b32.xlu1 %v17605_v10, %s17251_s9  ;;  %v17613_v12 = vpop.permute.xlu0 %881 }
  0xc1   : > { %15306 = vmatprep.subr.bf16.mxu1 %v17613_v12 }
  0xc2   : > { %v17616_v13 = vpop.permute.xlu1 %1145  ;;  %2831 = vrot.lane.b32.xlu0 %v17368_v32, %s17266_s27  ;;  %14684 = vmatmul.mubr.msk.bf16.gmra.mrb[20].mxu0 %vm408_vm0, %v17509_v47 }
  0xc3   : > { %15296 = vmatprep.mubr.msk.bf16.mxu0 %vm408_vm0, %v17502_v45  ;;  %15307 = vmatpush3.bf16.msra.mxu1 %v17613_v12  ;;  %v642_v45 = vsel %vm21403_vm2, %v17542_v59, %v17552_v61  ;;  %vm21405_vm2 = vcmask 719872  }
  0xc4   : > { %2833 = vrot.lane.b32.xlu1 %v17374_v36, %s17266_s27  ;;  %v17627_v14 = vpop.permute.xlu0 %1147 }
  0xc6   : > { %v17629_v15 = vpop.permute.xlu1 %1143  ;;  %2835 = vrot.lane.b32.xlu0 %v17364_v28, %s17266_s27  ;;  %15309 = vmatmul.mubr.msk.bf16.vlgmr.msra.gmra.mrb[0].mxu1 %vm408_vm0, %v17585_v5 }
  0xc8   : > { %2837 = vrot.lane.b32.xlu1 %v17385_v40, %s17266_s27  ;;  %v17639_v17 = vpop.permute.xlu0 %1139 }
  0xc9   : > { %15314 = vmatprep.mubr.msk.bf16.mxu1 %vm408_vm0, %v17639_v17 }
  0xca   : > { %v17646_v19 = vpop.permute.xlu1 %1141  ;;  %3104 = vrot.lane.b32.xlu0 %v17362_v27, %s17267_s28  ;;  %15297 = vmatmul.mubr.msk.bf16.vlgmr.msra.gmra.mrb[24].mxu0 %vm408_vm0, %v17509_v47 }
  0xcb   : > { %658 = vmatpush1.bf16.msra.mxu0 %v638_v16  ;;  %689 = vmatprep.mubr.bf16.mxu0 %v21296_v1 }
  0xcc   : > { %3106 = vrot.lane.b32.xlu1 %v17381_v39, %s17267_s28  ;;  %v17655_v20 = vpop.permute.xlu0 %1149  ;;  %710 = vmatprep.subr.bf16.mxu0 %v641_v18  ;;  %v1159_v18 = vsel %vm21400_vm4, %v17616_v13, %v17627_v14 }
  0xcd   : > { %v1160_v4 = vsel %vm21400_vm4, %v17627_v14, %v17655_v20 }
  0xce   : > { %v17657_v21 = vpop.permute.xlu1 %1151  ;;  %3102 = vrot.lane.b32.xlu0 %v17372_v35, %s17267_s28 }
  0xd0   : > { %3098 = vrot.lane.b32.xlu1 %v17597_v8, %s17254_s12  ;;  %v17663_v23 = vpop.permute.xlu0 %1153 }
  0xd2   : > { %v17668_v25 = vpop.permute.xlu1 %1155  ;;  %3100 = vrot.lane.b32.xlu0 %v17605_v10, %s17254_s12  ;;  %14687 = vmatmul.mubr.msk.bf16.vlgmr.msra.gmra.mrb[0].mxu0 %vm408_vm0, %v17358_v22 }
  0xd3   : > { %711 = vmatpush1.bf16.msra.mxu0 %v640_v26  ;;  %699 = vmatprep.mubr.bf16.mxu0 %v21296_v1  ;;  %v888_v26 = vsel %vm21402_vm3, %v17602_v9, %v17607_v11 }
  0xd4   : > { %3108 = vrot.lane.b32.xlu1 %v17368_v32, %s17267_s28  ;;  %v17680_v29 = vpop.permute.xlu0 %1419  ;;  %763 = vmatprep.subr.bf16.mxu0 %v643_v24 }
  0xd5   : > { %15312 = vmatprep.subr.bf16.mxu1 %v17668_v25 }
  0xd6   : > { %v17683_v30 = vpop.permute.xlu1 %1421  ;;  %3110 = vrot.lane.b32.xlu0 %v17374_v36, %s17267_s28  ;;  %15313 = vmatpush3.bf16.msra.mxu1 %v17668_v25 }
  0xd8   : > { %3112 = vrot.lane.b32.xlu1 %v17364_v28, %s17267_s28  ;;  %v17690_v31 = vpop.permute.xlu0 %1417 }
  0xd9   : > { %15315 = vmatmul.mubr.msk.bf16.vlgmr.msra.gmra.mrb[0].mxu1 %vm408_vm0, %v17646_v19 }
  0xda   : > { %v17694_v33 = vpop.permute.xlu1 %1413  ;;  %3114 = vrot.lane.b32.xlu0 %v17385_v40, %s17267_s28  ;;  %14688 = vmatmul.mubr.msk.bf16.gmra.mrb[4].mxu0 %vm408_vm0, %v17379_v38 }
  0xdb   : > { %742 = vmatprep.mubr.bf16.mxu0 %v21296_v1  ;;  %15320 = vmatprep.mubr.msk.bf16.mxu1 %vm408_vm0, %v17694_v33 }
  0xdc   : > { %3381 = vrot.lane.b32.xlu1 %v17362_v27, %s21395_s29  ;;  %v17705_v37 = vpop.permute.xlu0 %1415 }
  0xde   : > { %v17707_v41 = vpop.permute.xlu1 %1423  ;;  %3383 = vrot.lane.b32.xlu0 %v17381_v39, %s21395_s29 }
  0xe0   : > { %3379 = vrot.lane.b32.xlu1 %v17372_v35, %s21395_s29  ;;  %v17713_v42 = vpop.permute.xlu0 %1425 }
  0xe2   : > { %v17718_v44 = vpop.permute.xlu1 %1427  ;;  %3375 = vrot.lane.b32.xlu0 %v17597_v8, %s17256_s14  ;;  %14689 = vmatmul.mubr.msk.bf16.vlgmr.msra.gmra.mrb[8].mxu0 %vm408_vm0, %v17358_v22 }
  0xe3   : > { %764 = vmatpush1.bf16.msra.mxu0 %v642_v45  ;;  %752 = vmatprep.mubr.bf16.mxu0 %v21296_v1 }
  0xe4   : > { %3377 = vrot.lane.b32.xlu1 %v17605_v10, %s17256_s14  ;;  %v17730_v35 = vpop.permute.xlu0 %1429  ;;  %903 = vmatprep.subr.bf16.mxu0 %v885_v43 }
  0xe5   : > { %15318 = vmatprep.subr.bf16.mxu1 %v17730_v35 }
  0xe6   : > { %v17733_v46 = vpop.permute.xlu1 %1709  ;;  %3385 = vrot.lane.b32.xlu0 %v17368_v32, %s21395_s29  ;;  %15319 = vmatpush3.bf16.msra.mxu1 %v17730_v35 }
  0xe8   : > { %3387 = vrot.lane.b32.xlu1 %v17374_v36, %s21395_s29  ;;  %v17740_v47 = vpop.permute.xlu0 %1711 }
  0xe9   : > { %15321 = vmatmul.mubr.msk.bf16.vlgmr.msra.gmra.mrb[0].mxu1 %vm408_vm0, %v17705_v37 }
  0xea   : > { %v17744_v48 = vpop.permute.xlu1 %1707  ;;  %3389 = vrot.lane.b32.xlu0 %v17364_v28, %s21395_s29  ;;  %14690 = vmatmul.mubr.msk.bf16.gmra.mrb[12].mxu0 %vm408_vm0, %v17379_v38 }
  0xeb   : > { %795 = vmatprep.mubr.bf16.mxu0 %v21296_v1 }
  0xec   : > { %3391 = vrot.lane.b32.xlu1 %v17385_v40, %s21395_s29  ;;  %v17753_v49 = vpop.permute.xlu0 %1695 }
  0xed   : > { %15326 = vmatprep.mubr.msk.bf16.mxu1 %vm408_vm0, %v17753_v49 }
  0xee   : > { %v17757_v50 = vpop.permute.xlu1 %1697  ;;  %3652 = vrot.lane.b32.xlu0 %v17597_v8, %s17258_s16 }
  0xf0   : > { %3654 = vrot.lane.b32.xlu1 %v17605_v10, %s17258_s16  ;;  %v17766_v52 = vpop.permute.xlu0 %1713 }
  0xf2   : > { %v17771_v54 = vpop.permute.xlu1 %1715  ;;  %3904 = vrot.lane.b32.xlu0 %v17381_v39, %s21393_s30  ;;  %14691 = vmatmul.mubr.msk.bf16.vlgmr.msra.gmra.mrb[16].mxu0 %vm408_vm0, %v17358_v22 }
  0xf3   : > { %904 = vmatpush1.bf16.msra.mxu0 %v884_v51  ;;  %805 = vmatprep.mubr.bf16.mxu0 %v21296_v1 }
  0xf4   : > { %3906 = vrot.lane.b32.xlu1 %v17368_v32, %s21393_s30  ;;  %v17780_v55 = vpop.permute.xlu0 %1717  ;;  %956 = vmatprep.subr.bf16.mxu0 %v887_v53 }
  0xf6   : > { %v17782_v56 = vpop.permute.xlu1 %1719  ;;  %3902 = vrot.lane.b32.xlu0 %v17362_v27, %s21393_s30 }
  0xf8   : > { %3898 = vrot.lane.b32.xlu1 %v17597_v8, %s17260_s20  ;;  %v17788_v57 = vpop.permute.xlu0 %1986 }
  0xfa   : > { %v17790_v22 = vpop.permute.xlu1 %1988  ;;  %3900 = vrot.lane.b32.xlu0 %v17605_v10, %s17260_s20  ;;  %14692 = vmatmul.mubr.msk.bf16.gmra.mrb[20].mxu0 %vm408_vm0, %v17379_v38  ;;  %v889_v38 = vsel %vm21402_vm3, %v17607_v11, %v17613_v12  ;;  %vm6118_vm3 = vcmask 728064  }
  0xfb   : > { %935 = vmatprep.mubr.bf16.mxu0 %v21296_v1 }
  0xfc   : > { %3908 = vrot.lane.b32.xlu1 %v17374_v36, %s21393_s30  ;;  %v17799_v58 = vpop.permute.xlu0 %1984 }
  0xfe   : > { %v17801_v59 = vpop.permute.xlu1 %1980  ;;  %3910 = vrot.lane.b32.xlu0 %v17364_v28, %s21393_s30 }
 0x100   : > { %3912 = vrot.lane.b32.xlu1 %v17385_v40, %s21393_s30  ;;  %v17807_v60 = vpop.permute.xlu0 %1982 }
 0x102   : > { %v17812_v61 = vpop.permute.xlu1 %1990  ;;  %3914 = vrot.lane.b32.xlu0 %v17370_v34, %s21393_s30  ;;  %14695 = vmatmul.mubr.msk.bf16.vlgmr.msra.gmra.mrb[0].mxu0 %vm408_vm0, %v17577_v3 }
 0x103   : > { %957 = vmatpush1.bf16.msra.mxu0 %v886_v62  ;;  %945 = vmatprep.mubr.bf16.mxu0 %v21296_v1 }
 0x104   : > { %4178 = vrot.lane.b32.xlu1 %v17381_v39, %s21294_s6  ;;  %v17824_v63 = vpop.permute.xlu0 %1992  ;;  %1009 = vmatprep.subr.bf16.mxu0 %v889_v38  ;;  %v1158_v38 = vsel %vm21400_vm4, %v17629_v15, %v17616_v13 }
 0x106   : > { %v17826_v2 = vpop.permute.xlu1 %1994  ;;  %4180 = vrot.lane.b32.xlu0 %v17368_v32, %s21294_s6 }
 0x108   : > { %4176 = vrot.lane.b32.xlu1 %v17362_v27, %s21294_s6  ;;  %v17832_v6 = vpop.permute.xlu0 %1996 }
 0x10a   : > { %v17834_v0 = vpop.permute.xlu1 %2263  ;;  %14696 = vmatmul.mubr.msk.bf16.gmra.mrb[4].mxu0 %vm408_vm0, %v17585_v5  ;;  %4172 = vrot.lane.b32.xlu0 %v17597_v8, %s17262_s22 }
 0x10b   : > { %988 = vmatprep.mubr.bf16.mxu0 %v21296_v1 }
 0x10c   : > { %4174 = vrot.lane.b32.xlu1 %v17605_v10, %s17262_s22  ;;  %v17843_v7 = vpop.permute.xlu0 %2265 }
 0x10e   : > { %v17845_v12 = vpop.permute.xlu1 %2261  ;;  %4182 = vrot.lane.b32.xlu0 %v17374_v36, %s21294_s6 }
 0x110   : > { %4184 = vrot.lane.b32.xlu1 %v17364_v28, %s21294_s6  ;;  %v17851_v16 = vpop.permute.xlu0 %2257 }
 0x112   : > { %v17856_v24 = vpop.permute.xlu1 %2259  ;;  %14697 = vmatmul.mubr.msk.bf16.vlgmr.msra.gmra.mrb[8].mxu0 %vm408_vm0, %v17577_v3  ;;  %4186 = vrot.lane.b32.xlu0 %v17385_v40, %s21294_s6 }
 0x113   : > { %1010 = vmatpush1.bf16.msra.mxu0 %v888_v26  ;;  %998 = vmatprep.mubr.bf16.mxu0 %v21296_v1 }
 0x114   : > { %4188 = vrot.lane.b32.xlu1 %v17370_v34, %s21294_s6  ;;  %v17868_v43 = vpop.permute.xlu0 %2267  ;;  %1177 = vmatprep.subr.bf16.mxu0 %v1159_v18  ;;  %s21310_s6 = smov 109  }
 0x116   : > { %v17870_v45 = vpop.permute.xlu1 %2269  ;;  %4452 = vrot.lane.b32.xlu0 %v17381_v39, %s21301_s7 }
 0x118   : > { %4454 = vrot.lane.b32.xlu1 %v17368_v32, %s21301_s7  ;;  %v17876_v9 = vpop.permute.xlu0 %2271 }
 0x11a   : > { %v17878_v11 = vpop.permute.xlu1 %2273  ;;  %14698 = vmatmul.mubr.msk.bf16.gmra.mrb[12].mxu0 %vm408_vm0, %v17585_v5  ;;  %4450 = vrot.lane.b32.xlu0 %v17362_v27, %s21301_s7 }
 0x11b   : > { %1041 = vmatprep.mubr.bf16.mxu0 %v21296_v1 }
 0x11c   : > { %4446 = vrot.lane.b32.xlu1 %v17597_v8, %s17264_s24  ;;  %v17887_v51 = vpop.permute.xlu0 %2550  ;;  %v1161_v8 = vsel %vm21400_vm4, %v17655_v20, %v17657_v21 }
 0x11e   : > { %v17889_v53 = vpop.permute.xlu1 %2552  ;;  %4448 = vrot.lane.b32.xlu0 %v17605_v10, %s17264_s24 }
 0x120   : > { %4456 = vrot.lane.b32.xlu1 %v17374_v36, %s21301_s7  ;;  %v17898_v62 = vpop.permute.xlu0 %2548 }
 0x122   : > { %v17903_v18 = vpop.permute.xlu1 %2554  ;;  %14699 = vmatmul.mubr.msk.bf16.vlgmr.msra.gmra.mrb[16].mxu0 %vm408_vm0, %v17577_v3  ;;  %4458 = vrot.lane.b32.xlu0 %v17364_v28, %s21301_s7 }
 0x123   : > { %1178 = vmatpush1.bf16.msra.mxu0 %v1158_v38  ;;  %1051 = vmatprep.mubr.bf16.mxu0 %v21296_v1 }
 0x124   : > { %4460 = vrot.lane.b32.xlu1 %v17385_v40, %s21301_s7  ;;  %v17912_v10 = vpop.permute.xlu0 %2556  ;;  %1230 = vmatprep.subr.bf16.mxu0 %v1161_v8 }
 0x126   : > { %v17914_v13 = vpop.permute.xlu1 %2558  ;;  %4462 = vrot.lane.b32.xlu0 %v17370_v34, %s21301_s7  ;;  %s21316_s7 = smov 108  }
 0x128   : > { %4736 = vrot.lane.b32.xlu1 %v17381_v39, %s21310_s6  ;;  %v17920_v3 = vpop.permute.xlu0 %2560 }
 0x12a   : > { %v17922_v15 = vpop.permute.xlu1 %2827  ;;  %14700 = vmatmul.mubr.msk.bf16.gmra.mrb[20].mxu0 %vm408_vm0, %v17585_v5  ;;  %4738 = vrot.lane.b32.xlu0 %v17368_v32, %s21310_s6  ;;  %v1163_v5 = vsel %vm21400_vm4, %v17663_v23, %v17668_v25 }
 0x12b   : > { %1209 = vmatprep.mubr.bf16.mxu0 %v21296_v1 }
 0x12c   : > { %4734 = vrot.lane.b32.xlu1 %v17362_v27, %s21310_s6  ;;  %v17931_v26 = vpop.permute.xlu0 %2829 }
 0x12e   : > { %v17933_v38 = vpop.permute.xlu1 %2825  ;;  %4740 = vrot.lane.b32.xlu0 %v17374_v36, %s21310_s6 }
 0x12f   : > { %21490 = vst [vmem:[#allocation7_spill] sm:$0xff] %v17933_v38  ;;  %v21493_v38 = vmov 0  }
 0x130   : > { %4742 = vrot.lane.b32.xlu1 %v17364_v28, %s21310_s6  ;;  %v17939_v8 = vpop.permute.xlu0 %2821 }
 0x131   : > { %21491 = vst [vmem:[#allocation8_spill] sm:$0xff] %v17939_v8  ;;  %v1433_v8 = vsel %vm1431_vm5, %v17680_v29, %v17683_v30 }
 0x132   : > { %v17944_v1 = vpop.permute.xlu1 %2823  ;;  %14703 = vmatmul.mubr.msk.bf16.vlgmr.msra.gmra.mrb[0].mxu0 %vm408_vm0, %v17639_v17  ;;  %4744 = vrot.lane.b32.xlu0 %v17385_v40, %s21310_s6 }
 0x133   : > { %21492 = vst [vmem:[#allocation9_spill] sm:$0xff] %v17944_v1  ;;  %1231 = vmatpush1.bf16.msra.mxu0 %v1160_v4  ;;  %1219 = vmatprep.mubr.bf16.mxu0 %v21493_v38  ;;  %v17967_v4 = vld [vmem:[%s17345_s25 + $0x8] ss:$16 sps:$4 sm:$0xff]  }
 0x134   : > { %4746 = vrot.lane.b32.xlu1 %v17370_v34, %s21310_s6  ;;  %v17956_v25 = vpop.permute.xlu0 %2831  ;;  %1283 = vmatprep.subr.bf16.mxu0 %v1163_v5  ;;  %v17976_v5 = vld [vmem:[%s17345_s25 + $0x28] ss:$16 sps:$4 sm:$0xff]   ;;  %s21322_s6 = smov 107  }
 0x135   : > { %21494 = vst [vmem:[#allocation10_spill] sm:$0xff] %v17956_v25 }
 0x136   : > { %v17958_v1 = vpop.permute.xlu1 %2833  ;;  %5010 = vrot.lane.b32.xlu0 %v17381_v39, %s21316_s7 }
 0x137   : > { %21495 = vst [vmem:[#allocation11_spill] sm:$0xff] %v17958_v1 }
 0x138   : > { %5012 = vrot.lane.b32.xlu1 %v17368_v32, %s21316_s7  ;;  %v17964_v14 = vpop.permute.xlu0 %2835 }
 0x139   : > { %21496 = vst [vmem:[#allocation12_spill] sm:$0xff] %v17964_v14 }
 0x13a   : > { %v17969_v20 = vpop.permute.xlu1 %2837  ;;  %14704 = vmatmul.mubr.msk.bf16.gmra.mrb[4].mxu0 %vm408_vm0, %v17646_v19  ;;  %5008 = vrot.lane.b32.xlu0 %v17362_v27, %s21316_s7 }
 0x13b   : > { %21497 = vst [vmem:[#allocation13_spill] sm:$0xff] %v17969_v20  ;;  %1262 = vmatprep.mubr.bf16.mxu0 %v21493_v38 }
 0x13c   : > { %5004 = vrot.lane.b32.xlu1 %v17967_v4, %s17251_s9  ;;  %v17981_v25 = vpop.permute.xlu0 %3104 }
 0x13d   : > { %21498 = vst [vmem:[#allocation14_spill] sm:$0xff] %v17981_v25  ;;  %v1162_v25 = vsel %vm21400_vm4, %v17657_v21, %v17663_v23  ;;  %vm7478_vm4 = vcmask 257024  }
 0x13e   : > { %v17983_v14 = vpop.permute.xlu1 %3106  ;;  %5006 = vrot.lane.b32.xlu0 %v17976_v5, %s17251_s9 }
 0x13f   : > { %21499 = vst [vmem:[#allocation15_spill] sm:$0xff] %v17983_v14 }
 0x140   : > { %5014 = vrot.lane.b32.xlu1 %v17374_v36, %s21316_s7  ;;  %v17989_v1 = vpop.permute.xlu0 %3102 }
 0x141   : > { %21500 = vst [vmem:[#allocation16_spill] sm:$0xff] %v17989_v1 }
 0x142   : > { %v17994_v20 = vpop.permute.xlu1 %3098  ;;  %14705 = vmatmul.mubr.msk.bf16.vlgmr.msra.gmra.mrb[8].mxu0 %vm408_vm0, %v17639_v17  ;;  %5016 = vrot.lane.b32.xlu0 %v17364_v28, %s21316_s7 }
 0x143   : > { %1284 = vmatpush1.bf16.msra.mxu0 %v1162_v25  ;;  %1272 = vmatprep.mubr.bf16.mxu0 %v21493_v38 }
 0x144   : > { %5018 = vrot.lane.b32.xlu1 %v17385_v40, %s21316_s7  ;;  %v18006_v1 = vpop.permute.xlu0 %3100  ;;  %1451 = vmatprep.subr.bf16.mxu0 %v1433_v8 }
 0x145   : > { %21501 = vst [vmem:[#allocation17_spill] sm:$0xff] %v18006_v1 }
 0x146   : > { %v18008_v14 = vpop.permute.xlu1 %3108  ;;  %5020 = vrot.lane.b32.xlu0 %v17370_v34, %s21316_s7  ;;  %s21329_s7 = smov 106  }
 0x147   : > { %21502 = vst [vmem:[#allocation18_spill] sm:$0xff] %v18008_v14 }
 0x148   : > { %5284 = vrot.lane.b32.xlu1 %v17381_v39, %s21322_s6  ;;  %v18014_v21 = vpop.permute.xlu0 %3110 }
 0x149   : > { %21503 = vst [vmem:[#allocation19_spill] sm:$0xff] %v18014_v21  ;;  %v1435_v21 = vsel %vm1431_vm5, %v17707_v41, %v17713_v42 }
 0x14a   : > { %v18016_v23 = vpop.permute.xlu1 %3112  ;;  %14706 = vmatmul.mubr.msk.bf16.gmra.mrb[12].mxu0 %vm408_vm0, %v17646_v19  ;;  %5286 = vrot.lane.b32.xlu0 %v17368_v32, %s21322_s6 }
 0x14b   : > { %21504 = vst [vmem:[#allocation20_spill] sm:$0xff] %v18016_v23  ;;  %1315 = vmatprep.mubr.bf16.mxu0 %v21493_v38  ;;  %v1432_v23 = vsel %vm1431_vm5, %v17690_v31, %v17680_v29 }
 0x14c   : > { %5282 = vrot.lane.b32.xlu1 %v17362_v27, %s21322_s6  ;;  %v18025_v8 = vpop.permute.xlu0 %3114 }
 0x14e   : > { %v18027_v25 = vpop.permute.xlu1 %3381  ;;  %5278 = vrot.lane.b32.xlu0 %v17967_v4, %s17254_s12 }
 0x14f   : > { %21505 = vst [vmem:[#allocation21_spill] sm:$0xff] %v18027_v25 }
 0x150   : > { %5280 = vrot.lane.b32.xlu1 %v17976_v5, %s17254_s12  ;;  %v18036_v14 = vpop.permute.xlu0 %3383 }
 0x151   : > { %21506 = vst [vmem:[#allocation22_spill] sm:$0xff] %v18036_v14 }
 0x152   : > { %v18041_v1 = vpop.permute.xlu1 %3379  ;;  %14707 = vmatmul.mubr.msk.bf16.vlgmr.msra.gmra.mrb[16].mxu0 %vm408_vm0, %v17639_v17  ;;  %5288 = vrot.lane.b32.xlu0 %v17374_v36, %s21322_s6 }
 0x153   : > { %21507 = vst [vmem:[#allocation23_spill] sm:$0xff] %v18041_v1  ;;  %1452 = vmatpush1.bf16.msra.mxu0 %v1432_v23  ;;  %1325 = vmatprep.mubr.bf16.mxu0 %v21493_v38 }
 0x154   : > { %5290 = vrot.lane.b32.xlu1 %v17364_v28, %s21322_s6  ;;  %v18050_v29 = vpop.permute.xlu0 %3375  ;;  %1504 = vmatprep.subr.bf16.mxu0 %v1435_v21 }
 0x156   : > { %v18052_v31 = vpop.permute.xlu1 %3377  ;;  %5292 = vrot.lane.b32.xlu0 %v17385_v40, %s21322_s6 }
 0x158   : > { %5294 = vrot.lane.b32.xlu1 %v17370_v34, %s21322_s6  ;;  %v18058_v17 = vpop.permute.xlu0 %3385  ;;  %s21335_s6 = smov 90  }
 0x159   : > { %21508 = vst [vmem:[#allocation24_spill] sm:$0xff] %v18058_v17  ;;  %v1437_v17 = vsel %vm1431_vm5, %v17718_v44, %v17730_v35 }
 0x15a   : > { %v18060_v1 = vpop.permute.xlu1 %3387  ;;  %14708 = vmatmul.mubr.msk.bf16.gmra.mrb[20].mxu0 %vm408_vm0, %v17646_v19  ;;  %5558 = vrot.lane.b32.xlu0 %v17381_v39, %s21329_s7 }
 0x15b   : > { %21509 = vst [vmem:[#allocation25_spill] sm:$0xff] %v18060_v1  ;;  %1483 = vmatprep.mubr.bf16.mxu0 %v21493_v38 }
 0x15c   : > { %5560 = vrot.lane.b32.xlu1 %v17368_v32, %s21329_s7  ;;  %v18069_v21 = vpop.permute.xlu0 %3389 }
 0x15d   : > { %21510 = vst [vmem:[#allocation26_spill] sm:$0xff] %v18069_v21  ;;  %v1434_v21 = vsel %vm1431_vm5, %v17683_v30, %v17707_v41 }
 0x15e   : > { %v18071_v23 = vpop.permute.xlu1 %3391  ;;  %5556 = vrot.lane.b32.xlu0 %v17362_v27, %s21329_s7 }
 0x160   : > { %5552 = vrot.lane.b32.xlu1 %v17967_v4, %s17256_s14  ;;  %v18077_v19 = vpop.permute.xlu0 %3652 }
 0x162   : > { %v18082_v1 = vpop.permute.xlu1 %3654  ;;  %14711 = vmatmul.mubr.msk.bf16.vlgmr.msra.gmra.mrb[0].mxu0 %vm408_vm0, %v17694_v33  ;;  %5554 = vrot.lane.b32.xlu0 %v17976_v5, %s17256_s14 }
 0x163   : > { %1505 = vmatpush1.bf16.msra.mxu0 %v1434_v21  ;;  %1493 = vmatprep.mubr.bf16.mxu0 %v21493_v38 }
 0x164   : > { %5562 = vrot.lane.b32.xlu1 %v17374_v36, %s21329_s7  ;;  %v18094_v25 = vpop.permute.xlu0 %3904  ;;  %1557 = vmatprep.subr.bf16.mxu0 %v1437_v17 }
 0x165   : > { %21511 = vst [vmem:[#allocation27_spill] sm:$0xff] %v18094_v25  ;;  %v1725_v25 = vsel %vm1723_vm6, %v17733_v46, %v17740_v47 }
 0x166   : > { %v18096_v35 = vpop.permute.xlu1 %3906  ;;  %5564 = vrot.lane.b32.xlu0 %v17364_v28, %s21329_s7 }
 0x167   : > { %21512 = vst [vmem:[#allocation28_spill] sm:$0xff] %v18096_v35 }
 0x168   : > { %5566 = vrot.lane.b32.xlu1 %v17385_v40, %s21329_s7  ;;  %v18102_v30 = vpop.permute.xlu0 %3902 }
 0x169   : > { %21513 = vst [vmem:[#allocation29_spill] sm:$0xff] %v18102_v30 }
 0x16a   : > { %v18104_v41 = vpop.permute.xlu1 %3898  ;;  %14712 = vmatmul.mubr.msk.bf16.gmra.mrb[4].mxu0 %vm408_vm0, %v17705_v37  ;;  %5568 = vrot.lane.b32.xlu0 %v17370_v34, %s21329_s7  ;;  %s21354_s7 = smov 89  }
 0x16b   : > { %1536 = vmatprep.mubr.bf16.mxu0 %v21493_v38 }
 0x16c   : > { %5832 = vrot.lane.b32.xlu1 %v17381_v39, %s21335_s6  ;;  %v18113_v17 = vpop.permute.xlu0 %3900 }
 0x16e   : > { %v18115_v21 = vpop.permute.xlu1 %3908  ;;  %5834 = vrot.lane.b32.xlu0 %v17368_v32, %s21335_s6 }
 0x16f   : > { %21514 = vst [vmem:[#allocation30_spill] sm:$0xff] %v18115_v21  ;;  %v1436_v21 = vsel %vm1431_vm5, %v17713_v42, %v17718_v44 }
 0x170   : > { %5830 = vrot.lane.b32.xlu1 %v17362_v27, %s21335_s6  ;;  %v18121_v30 = vpop.permute.xlu0 %3910 }
 0x171   : > { %21515 = vst [vmem:[#allocation31_spill] sm:$0xff] %v18121_v30 }
 0x172   : > { %v18126_v35 = vpop.permute.xlu1 %3912  ;;  %14713 = vmatmul.mubr.msk.bf16.vlgmr.msra.gmra.mrb[8].mxu0 %vm408_vm0, %v17694_v33  ;;  %5826 = vrot.lane.b32.xlu0 %v17967_v4, %s17258_s16 }
 0x173   : > { %21516 = vst [vmem:[#allocation32_spill] sm:$0xff] %v18126_v35  ;;  %1558 = vmatpush1.bf16.msra.mxu0 %v1436_v21  ;;  %1546 = vmatprep.mubr.bf16.mxu0 %v21493_v38 }
 0x174   : > { %5828 = vrot.lane.b32.xlu1 %v17976_v5, %s17258_s16  ;;  %v18138_v30 = vpop.permute.xlu0 %3914  ;;  %1744 = vmatprep.subr.bf16.mxu0 %v1725_v25 }
 0x176   : > { %v18140_v35 = vpop.permute.xlu1 %4178  ;;  %5836 = vrot.lane.b32.xlu0 %v17374_v36, %s21335_s6 }
 0x177   : > { %21517 = vst [vmem:[#allocation33_spill] sm:$0xff] %v18140_v35 }
 0x178   : > { %5838 = vrot.lane.b32.xlu1 %v17364_v28, %s21335_s6  ;;  %v18146_v42 = vpop.permute.xlu0 %4180 }
 0x179   : > { %21518 = vst [vmem:[#allocation34_spill] sm:$0xff] %v18146_v42  ;;  %v1727_v42 = vsel %vm1723_vm6, %v17766_v52, %v17771_v54 }
 0x17a   : > { %v18148_v44 = vpop.permute.xlu1 %4176  ;;  %14714 = vmatmul.mubr.msk.bf16.gmra.mrb[12].mxu0 %vm408_vm0, %v17705_v37  ;;  %5840 = vrot.lane.b32.xlu0 %v17385_v40, %s21335_s6 }
 0x17b   : > { %21519 = vst [vmem:[#allocation35_spill] sm:$0xff] %v18148_v44  ;;  %1589 = vmatprep.mubr.bf16.mxu0 %v21493_v38  ;;  %v1724_v44 = vsel %vm1723_vm6, %v17744_v48, %v17733_v46 }
 0x17c   : > { %5842 = vrot.lane.b32.xlu1 %v17370_v34, %s21335_s6  ;;  %v18157_v25 = vpop.permute.xlu0 %4172  ;;  %s21347_s6 = smov 88  }
 0x17e   : > { %v18159_v21 = vpop.permute.xlu1 %4174  ;;  %6106 = vrot.lane.b32.xlu0 %v17381_v39, %s21354_s7 }
 0x180   : > { %6108 = vrot.lane.b32.xlu1 %v17368_v32, %s21354_s7  ;;  %v18168_v35 = vpop.permute.xlu0 %4182 }
 0x181   : > { %21520 = vst [vmem:[#allocation36_spill] sm:$0xff] %v18168_v35 }
 0x182   : > { %v18173_v14 = vpop.permute.xlu1 %4184  ;;  %14715 = vmatmul.mubr.msk.bf16.vlgmr.msra.gmra.mrb[16].mxu0 %vm408_vm0, %v17694_v33  ;;  %6104 = vrot.lane.b32.xlu0 %v17362_v27, %s21354_s7 }
 0x183   : > { %21521 = vst [vmem:[#allocation37_spill] sm:$0xff] %v18173_v14  ;;  %1745 = vmatpush1.bf16.msra.mxu0 %v1724_v44  ;;  %1599 = vmatprep.mubr.bf16.mxu0 %v21493_v38 }
 0x184   : > { %6100 = vrot.lane.b32.xlu1 %v17967_v4, %s17260_s20  ;;  %v18182_v46 = vpop.permute.xlu0 %4186  ;;  %1797 = vmatprep.subr.bf16.mxu0 %v1727_v42 }
 0x185   : > { %21522 = vst [vmem:[#allocation38_spill] sm:$0xff] %v18182_v46 }
 0x186   : > { %v18184_v48 = vpop.permute.xlu1 %4188  ;;  %6102 = vrot.lane.b32.xlu0 %v17976_v5, %s17260_s20 }
 0x188   : > { %6110 = vrot.lane.b32.xlu1 %v17374_v36, %s21354_s7  ;;  %v18190_v33 = vpop.permute.xlu0 %4452 }
 0x189   : > { %21523 = vst [vmem:[#allocation39_spill] sm:$0xff] %v18190_v33  ;;  %v1729_v33 = vsel %vm1723_vm6, %v17780_v55, %v17782_v56 }
 0x18a   : > { %v18192_v35 = vpop.permute.xlu1 %4454  ;;  %14716 = vmatmul.mubr.msk.bf16.gmra.mrb[20].mxu0 %vm408_vm0, %v17705_v37  ;;  %6112 = vrot.lane.b32.xlu0 %v17364_v28, %s21354_s7 }
 0x18b   : > { %21524 = vst [vmem:[#allocation40_spill] sm:$0xff] %v18192_v35  ;;  %1776 = vmatprep.mubr.bf16.mxu0 %v21493_v38 }
 0x18c   : > { %6114 = vrot.lane.b32.xlu1 %v17385_v40, %s21354_s7  ;;  %v18201_v42 = vpop.permute.xlu0 %4450 }
 0x18d   : > { %21525 = vst [vmem:[#allocation41_spill] sm:$0xff] %v18201_v42  ;;  %v1726_v42 = vsel %vm1723_vm6, %v17740_v47, %v17766_v52 }
 0x18e   : > { %v18203_v44 = vpop.permute.xlu1 %4446  ;;  %6116 = vrot.lane.b32.xlu0 %v17370_v34, %s21354_s7  ;;  %s21389_s7 = smov 86  }
 0x190   : > { %6380 = vrot.lane.b32.xlu1 %v17381_v39, %s21347_s6  ;;  %v18209_v37 = vpop.permute.xlu0 %4448 }
 0x191   : > { %21526 = vst [vmem:[#allocation42_spill] sm:$0xff] %v18209_v37 }
 0x192   : > { %v18214_v35 = vpop.permute.xlu1 %4456  ;;  %14719 = vmatmul.mubr.msk.bf16.vlgmr.msra.gmra.mrb[0].mxu0 %vm408_vm0, %v17753_v49  ;;  %6382 = vrot.lane.b32.xlu0 %v17368_v32, %s21347_s6 }
 0x193   : > { %21527 = vst [vmem:[#allocation43_spill] sm:$0xff] %v18214_v35  ;;  %1798 = vmatpush1.bf16.msra.mxu0 %v1726_v42  ;;  %1786 = vmatprep.mubr.bf16.mxu0 %v21493_v38 }
 0x194   : > { %6378 = vrot.lane.b32.xlu1 %v17362_v27, %s21347_s6  ;;  %v18226_v46 = vpop.permute.xlu0 %4458  ;;  %1850 = vmatprep.subr.bf16.mxu0 %v1729_v33 }
 0x195   : > { %21528 = vst [vmem:[#allocation44_spill] sm:$0xff] %v18226_v46 }
 0x196   : > { %v18228_v35 = vpop.permute.xlu1 %4460  ;;  %6374 = vrot.lane.b32.xlu0 %v17967_v4, %s17262_s22 }
 0x197   : > { %21529 = vst [vmem:[#allocation45_spill] sm:$0xff] %v18228_v35 }
 0x198   : > { %6376 = vrot.lane.b32.xlu1 %v17976_v5, %s17262_s22  ;;  %v18234_v47 = vpop.permute.xlu0 %4462 }
 0x19a   : > { %v18236_v52 = vpop.permute.xlu1 %4736  ;;  %14720 = vmatmul.mubr.msk.bf16.gmra.mrb[4].mxu0 %vm408_vm0, %v17757_v50  ;;  %6384 = vrot.lane.b32.xlu0 %v17374_v36, %s21347_s6 }
 0x19b   : > { %21530 = vst [vmem:[#allocation46_spill] sm:$0xff] %v18236_v52  ;;  %1829 = vmatprep.mubr.bf16.mxu0 %v21493_v38 }
 0x19c   : > { %6386 = vrot.lane.b32.xlu1 %v17364_v28, %s21347_s6  ;;  %v18245_v33 = vpop.permute.xlu0 %4738 }
 0x19d   : > { %21531 = vst [vmem:[#allocation47_spill] sm:$0xff] %v18245_v33  ;;  %v18247_v42 = vpop.f32.mrb[24].mxu0 }
 0x19e   : > { %21532 = vst [vmem:[#allocation48_spill] sm:$0xff] %v18247_v42  ;;  %v18249_v35 = vpop.permute.xlu1 %4734  ;;  %v18251_v46 = vpop.f32.mrb[25].mxu0  ;;  %6388 = vrot.lane.b32.xlu0 %v17385_v40, %s21347_s6  ;;  %v2002_v42 = vsel %vm2000_vm7, %v17788_v57, %v17790_v22 }
 0x19f   : > { %21533 = vst [vmem:[#allocation49_spill] sm:$0xff] %v18249_v35  ;;  %21534 = vst [vmem:[#allocation50_spill] sm:$0xff] %v18251_v46  ;;  %v18255_v52 = vpop.f32.mrb[26].mxu0 }
 0x1a0   : > { %21535 = vst [vmem:[#allocation51_spill] sm:$0xff] %v18255_v52  ;;  %6390 = vrot.lane.b32.xlu1 %v17370_v34, %s21347_s6  ;;  %v18259_v14 = vpop.f32.mrb[27].mxu0  ;;  %v18261_v37 = vpop.permute.xlu0 %4740  ;;  %v1728_v52 = vsel %vm1723_vm6, %v17771_v54, %v17780_v55  ;;  %s21391_s6 = smov 87  }
 0x1a1   : > { %21536 = vst [vmem:[#allocation52_spill] sm:$0xff] %v18259_v14  ;;  %21537 = vst [vmem:[#allocation53_spill] sm:$0xff] %v18261_v37 }
 0x1a2   : > { %v18266_v33 = vpop.permute.xlu1 %4742  ;;  %14721 = vmatmul.mubr.msk.bf16.vlgmr.msra.gmra.mrb[8].mxu0 %vm408_vm0, %v17753_v49  ;;  %1721 = vrot.lane.b32.xlu0 %v17370_v34, %s17259_s17 }
 0x1a3   : > { %21538 = vst [vmem:[#allocation54_spill] sm:$0xff] %v18266_v33  ;;  %1851 = vmatpush1.bf16.msra.mxu0 %v1728_v52  ;;  %1839 = vmatprep.mubr.bf16.mxu0 %v21493_v38 }
 0x1a4   : > { %6654 = vrot.lane.b32.xlu1 %v17381_v39, %s21391_s6  ;;  %v18278_v14 = vpop.permute.xlu0 %4744  ;;  %2021 = vmatprep.subr.bf16.mxu0 %v2002_v42 }
 0x1a5   : > { %21539 = vst [vmem:[#allocation55_spill] sm:$0xff] %v18278_v14  ;;  %v2004_v14 = vsel %vm2000_vm7, %v17812_v61, %v17824_v63 }
 0x1a6   : > { %v18280_v46 = vpop.permute.xlu1 %4746  ;;  %6656 = vrot.lane.b32.xlu0 %v17368_v32, %s21391_s6 }
 0x1a8   : > { %6652 = vrot.lane.b32.xlu1 %v17362_v27, %s21391_s6  ;;  %v18286_v54 = vpop.permute.xlu0 %5010 }
 0x1a9   : > { %21540 = vst [vmem:[#allocation56_spill] sm:$0xff] %v18286_v54  ;;  %v2001_v54 = vsel %vm2000_vm7, %v17799_v58, %v17788_v57 }
 0x1aa   : > { %v18288_v55 = vpop.permute.xlu1 %5012  ;;  %14722 = vmatmul.mubr.msk.bf16.gmra.mrb[12].mxu0 %vm408_vm0, %v17757_v50  ;;  %6648 = vrot.lane.b32.xlu0 %v17967_v4, %s17264_s24 }
 0x1ab   : > { %21541 = vst [vmem:[#allocation57_spill] sm:$0xff] %v18288_v55  ;;  %1882 = vmatprep.mubr.bf16.mxu0 %v21493_v38 }
 0x1ac   : > { %1998 = vrot.lane.b32.xlu1 %v17370_v34, %s17261_s21  ;;  %v18297_v52 = vpop.permute.xlu0 %5008 }
 0x1ad   : > { %21542 = vst [vmem:[#allocation58_spill] sm:$0xff] %v18297_v52 }
 0x1ae   : > { %v18299_v42 = vpop.permute.xlu1 %5004  ;;  %6650 = vrot.lane.b32.xlu0 %v17976_v5, %s17264_s24 }
 0x1b0   : > { %6658 = vrot.lane.b32.xlu1 %v17374_v36, %s21391_s6  ;;  %v18308_v55 = vpop.permute.xlu0 %5006 }
 0x1b2   : > { %v18313_v37 = vpop.permute.xlu1 %5014  ;;  %14723 = vmatmul.mubr.msk.bf16.vlgmr.msra.gmra.mrb[16].mxu0 %vm408_vm0, %v17753_v49  ;;  %6660 = vrot.lane.b32.xlu0 %v17364_v28, %s21391_s6 }
 0x1b3   : > { %21543 = vst [vmem:[#allocation59_spill] sm:$0xff] %v18313_v37  ;;  %2022 = vmatpush1.bf16.msra.mxu0 %v2001_v54  ;;  %1892 = vmatprep.mubr.bf16.mxu0 %v21493_v38 }
 0x1b4   : > { %2275 = vrot.lane.b32.xlu1 %v17370_v34, %s17263_s23  ;;  %v18322_v57 = vpop.permute.xlu0 %5016  ;;  %2074 = vmatprep.subr.bf16.mxu0 %v2004_v14 }
 0x1b5   : > { %21544 = vst [vmem:[#allocation60_spill] sm:$0xff] %v18322_v57 }
 0x1b6   : > { %v18324_v58 = vpop.permute.xlu1 %5018  ;;  %6662 = vrot.lane.b32.xlu0 %v17385_v40, %s21391_s6 }
 0x1b7   : > { %21545 = vst [vmem:[#allocation61_spill] sm:$0xff] %v18324_v58  ;;  %v2006_v58 = vsel %vm2000_vm7, %v17826_v2, %v17832_v6 }
 0x1b8   : > { %v18328_v37 = vpop.permute.xlu0 %5020  ;;  %6664 = vrot.lane.b32.xlu1 %v17370_v34, %s21391_s6 }
 0x1ba   : > { %v18332_v49 = vpop.permute.xlu1 %5284  ;;  %14724 = vmatmul.mubr.msk.bf16.gmra.mrb[20].mxu0 %vm408_vm0, %v17757_v50  ;;  %2562 = vrot.lane.b32.xlu0 %v17370_v34, %s17265_s26 }
 0x1bb   : > { %21546 = vst [vmem:[#allocation62_spill] sm:$0xff] %v18332_v49  ;;  %2053 = vmatprep.mubr.bf16.mxu0 %v21493_v38 }
 0x1bc   : > { %v18339_v14 = vpop.permute.xlu0 %5286  ;;  %2839 = vrot.lane.b32.xlu1 %v17370_v34, %s17266_s27 }
 0x1bd   : > { %21547 = vst [vmem:[#allocation63_spill] sm:$0xff] %v18339_v14 }
 0x1be   : > { %v18343_v54 = vpop.permute.xlu1 %5282  ;;  %6938 = vrot.lane.b32.xlu0 %v17381_v39, %s21389_s7 }
 0x1bf   : > { %21548 = vst [vmem:[#allocation64_spill] sm:$0xff] %v18343_v54  ;;  %v2003_v54 = vsel %vm2000_vm7, %v17790_v22, %v17812_v61 }
 0x1c0   : > { %v18347_v49 = vpop.permute.xlu0 %5278  ;;  %6940 = vrot.lane.b32.xlu1 %v17368_v32, %s21389_s7 }
 0x1c2   : > { %v18354_v57 = vpop.permute.xlu1 %5280  ;;  %14727 = vmatmul.mubr.msk.bf16.vlgmr.msra.gmra.mrb[0].mxu0 %vm408_vm0, %v17801_v59  ;;  %6936 = vrot.lane.b32.xlu0 %v17362_v27, %s21389_s7 }
 0x1c3   : > { %2075 = vmatpush1.bf16.msra.mxu0 %v2003_v54  ;;  %2063 = vmatprep.mubr.bf16.mxu0 %v21493_v38 }
 0x1c4   : > { %v18364_v14 = vpop.permute.xlu0 %5288  ;;  %2127 = vmatprep.subr.bf16.mxu0 %v2006_v58  ;;  %3116 = vrot.lane.b32.xlu1 %v17370_v34, %s17267_s28 }
 0x1c5   : > { %21549 = vst [vmem:[#allocation65_spill] sm:$0xff] %v18364_v14 }
 0x1c6   : > { %v18368_v52 = vpop.permute.xlu1 %5290  ;;  %6942 = vrot.lane.b32.xlu0 %v17374_v36, %s21389_s7 }
 0x1c7   : > { %21550 = vst [vmem:[#allocation66_spill] sm:$0xff] %v18368_v52 }
 0x1c8   : > { %v18372_v33 = vpop.permute.xlu0 %5292  ;;  %6944 = vrot.lane.b32.xlu1 %v17364_v28, %s21389_s7 }
 0x1c9   : > { %21551 = vst [vmem:[#allocation67_spill] sm:$0xff] %v18372_v33  ;;  %v2279_v33 = vsel %vm2277_vm8, %v17834_v0, %v17843_v7 }
 0x1ca   : > { %v18376_v22 = vpop.permute.xlu1 %5294  ;;  %14728 = vmatmul.mubr.msk.bf16.gmra.mrb[4].mxu0 %vm408_vm0, %v17807_v60  ;;  %3393 = vrot.lane.b32.xlu0 %v17370_v34, %s21395_s29 }
 0x1cb   : > { %2106 = vmatprep.mubr.bf16.mxu0 %v21493_v38 }
 0x1cc   : > { %v18383_v61 = vpop.permute.xlu0 %5558  ;;  %6946 = vrot.lane.b32.xlu1 %v17385_v40, %s21389_s7 }
 0x1cd   : > { %21552 = vst [vmem:[#allocation68_spill] sm:$0xff] %v18383_v61  ;;  %v2005_v61 = vsel %vm2000_vm7, %v17824_v63, %v17826_v2  ;;  %v2278_v2 = vsel %vm2277_vm8, %v17845_v12, %v17834_v0 }
 0x1ce   : > { %v18387_v58 = vpop.permute.xlu1 %5560  ;;  %6948 = vrot.lane.b32.xlu0 %v17370_v34, %s21389_s7  ;;  %s15143_s7 = sshll.u32 %s21944_s19, 5 }
 0x1cf   : > { %21553 = vst [vmem:[#allocation69_spill] sm:$0xff] %v18387_v58  ;;  %s259_s29 = scalar_lea.vmem %s21291_s3, %s15143_s7 }
 0x1d0   : > { %v18391_v54 = vpop.permute.xlu0 %5556 }
 0x1d1   : > { %21554 = vst [vmem:[#allocation70_spill] sm:$0xff] %v18391_v54 }
 0x1d2   : > { %v18396_v14 = vpop.permute.xlu1 %5552  ;;  %14729 = vmatmul.mubr.msk.bf16.vlgmr.msra.gmra.mrb[8].mxu0 %vm408_vm0, %v17801_v59 }
 0x1d3   : > { %2128 = vmatpush1.bf16.msra.mxu0 %v2005_v61  ;;  %2116 = vmatprep.mubr.bf16.mxu0 %v21493_v38  ;;  %v2281_v61 = vsel %vm2277_vm8, %v17868_v43, %v17870_v45 }
 0x1d4   : > { %v18404_v58 = vpop.permute.xlu0 %5554  ;;  %2298 = vmatprep.subr.bf16.mxu0 %v2279_v33 }
 0x1d6   : > { %v18406_v54 = vpop.permute.xlu1 %5562 }
 0x1d7   : > { %21555 = vst [vmem:[#allocation71_spill] sm:$0xff] %v18406_v54 }
 0x1d8   : > { %v18408_v52 = vpop.permute.xlu0 %5564 }
 0x1d9   : > { %21556 = vst [vmem:[#allocation72_spill] sm:$0xff] %v18408_v52 }
 0x1da   : > { %v18410_v35 = vpop.permute.xlu1 %5566  ;;  %14730 = vmatmul.mubr.msk.bf16.gmra.mrb[12].mxu0 %vm408_vm0, %v17807_v60 }
 0x1db   : > { %21557 = vst [vmem:[#allocation73_spill] sm:$0xff] %v18410_v35  ;;  %2159 = vmatprep.mubr.bf16.mxu0 %v21493_v38 }
 0x1dc   : > { %v18415_v28 = vpop.permute.xlu0 %5568 }
 0x1de   : > { %v18417_v63 = vpop.permute.xlu1 %5832 }
 0x1df   : > { %21558 = vst [vmem:[#allocation74_spill] sm:$0xff] %v18417_v63 }
 0x1e0   : > { %v18422_v33 = vpop.permute.xlu0 %5834 }
 0x1e1   : > { %21559 = vst [vmem:[#allocation75_spill] sm:$0xff] %v18422_v33 }
 0x1e2   : > { %v18427_v35 = vpop.permute.xlu1 %5830  ;;  %14731 = vmatmul.mubr.msk.bf16.vlgmr.msra.gmra.mrb[16].mxu0 %vm408_vm0, %v17801_v59 }
 0x1e3   : > { %21560 = vst [vmem:[#allocation76_spill] sm:$0xff] %v18427_v35  ;;  %2299 = vmatpush1.bf16.msra.mxu0 %v2278_v2  ;;  %2169 = vmatprep.mubr.bf16.mxu0 %v21493_v38 }
 0x1e4   : > { %v18432_v54 = vpop.permute.xlu0 %5826  ;;  %2351 = vmatprep.subr.bf16.mxu0 %v2281_v61  ;;  %v2283_v61 = vsel %vm2277_vm8, %v17876_v9, %v17878_v11 }
 0x1e6   : > { %v18434_v63 = vpop.permute.xlu1 %5828 }
 0x1e8   : > { %v18436_v0 = vpop.permute.xlu0 %5836 }
 0x1e9   : > { %21561 = vst [vmem:[#allocation77_spill] sm:$0xff] %v18436_v0  ;;  %v2280_v0 = vsel %vm2277_vm8, %v17843_v7, %v17868_v43 }
 0x1ea   : > { %v18438_v12 = vpop.permute.xlu1 %5838  ;;  %14732 = vmatmul.mubr.msk.bf16.gmra.mrb[20].mxu0 %vm408_vm0, %v17807_v60 }
 0x1eb   : > { %21562 = vst [vmem:[#allocation78_spill] sm:$0xff] %v18438_v12  ;;  %2330 = vmatprep.mubr.bf16.mxu0 %v21493_v38 }
 0x1ec   : > { %v18443_v35 = vpop.permute.xlu0 %5840 }
 0x1ed   : > { %21563 = vst [vmem:[#allocation79_spill] sm:$0xff] %v18443_v35 }
 0x1ee   : > { %v18445_v33 = vpop.permute.xlu1 %5842 }
 0x1f0   : > { %v18447_v2 = vpop.permute.xlu0 %6106 }
 0x1f1   : > { %21564 = vst [vmem:[#allocation80_spill] sm:$0xff] %v18447_v2 }
 0x1f2   : > { %v18452_v52 = vpop.permute.xlu1 %6108  ;;  %14735 = vmatmul.mubr.msk.bf16.vlgmr.msra.gmra.mrb[0].mxu0 %vm408_vm0, %v17851_v16 }
 0x1f3   : > { %21565 = vst [vmem:[#allocation81_spill] sm:$0xff] %v18452_v52  ;;  %2352 = vmatpush1.bf16.msra.mxu0 %v2280_v0  ;;  %2340 = vmatprep.mubr.bf16.mxu0 %v21493_v38  ;;  %v2566_v0 = vsel %vm2564_vm9, %v17887_v51, %v17889_v53 }
 0x1f4   : > { %v18460_v35 = vpop.permute.xlu0 %6104  ;;  %2404 = vmatprep.subr.bf16.mxu0 %v2283_v61 }
 0x1f5   : > { %21566 = vst [vmem:[#allocation82_spill] sm:$0xff] %v18460_v35 }
 0x1f6   : > { %v18462_v2 = vpop.permute.xlu1 %6100 }
 0x1f8   : > { %v18464_v12 = vpop.permute.xlu0 %6102 }
 0x1fa   : > { %v18466_v40 = vpop.permute.xlu1 %6110  ;;  %14736 = vmatmul.mubr.msk.bf16.gmra.mrb[4].mxu0 %vm408_vm0, %v17856_v24 }
 0x1fb   : > { %21567 = vst [vmem:[#allocation83_spill] sm:$0xff] %v18466_v40  ;;  %2383 = vmatprep.mubr.bf16.mxu0 %v21493_v38  ;;  %v2282_v40 = vsel %vm2277_vm8, %v17870_v45, %v17876_v9 }
 0x1fc   : > { %v18471_v52 = vpop.permute.xlu0 %6112 }
 0x1fd   : > { %21568 = vst [vmem:[#allocation84_spill] sm:$0xff] %v18471_v52 }
 0x1fe   : > { %v18473_v7 = vpop.permute.xlu1 %6114 }
 0x1ff   : > { %21569 = vst [vmem:[#allocation85_spill] sm:$0xff] %v18473_v7 }
 0x200   : > { %v18475_v43 = vpop.permute.xlu0 %6116 }
 0x202   : > { %v18480_v61 = vpop.permute.xlu1 %6380  ;;  %14737 = vmatmul.mubr.msk.bf16.vlgmr.msra.gmra.mrb[8].mxu0 %vm408_vm0, %v17851_v16 }
 0x203   : > { %21570 = vst [vmem:[#allocation86_spill] sm:$0xff] %v18480_v61  ;;  %2405 = vmatpush1.bf16.msra.mxu0 %v2282_v40  ;;  %2393 = vmatprep.mubr.bf16.mxu0 %v21493_v38  ;;  %v2565_v40 = vsel %vm2564_vm9, %v17898_v62, %v17887_v51 }
 0x204   : > { %v18488_v52 = vpop.permute.xlu0 %6382  ;;  %2585 = vmatprep.subr.bf16.mxu0 %v2566_v0  ;;  %v2568_v0 = vsel %vm2564_vm9, %v17903_v18, %v17912_v10 }
 0x206   : > { %v18490_v7 = vpop.permute.xlu1 %6378 }
 0x207   : > { %21571 = vst [vmem:[#allocation87_spill] sm:$0xff] %v18490_v7 }
 0x208   : > { %v18492_v35 = vpop.permute.xlu0 %6374 }
 0x20a   : > { %v18494_v32 = vpop.permute.xlu1 %6376  ;;  %14738 = vmatmul.mubr.msk.bf16.gmra.mrb[12].mxu0 %vm408_vm0, %v17856_v24 }
 0x20b   : > { %2436 = vmatprep.mubr.bf16.mxu0 %v21493_v38 }
 0x20c   : > { %v18499_v61 = vpop.permute.xlu0 %6384 }
 0x20d   : > { %21572 = vst [vmem:[#allocation88_spill] sm:$0xff] %v18499_v61 }
 0x20e   : > { %v18501_v45 = vpop.permute.xlu1 %6386 }
 0x20f   : > { %21573 = vst [vmem:[#allocation89_spill] sm:$0xff] %v18501_v45 }
 0x210   : > { %v18506_v9 = vpop.permute.xlu0 %6388 }
 0x211   : > { %21574 = vst [vmem:[#allocation90_spill] sm:$0xff] %v18506_v9 }
 0x212   : > { %v18511_v7 = vpop.permute.xlu1 %6390  ;;  %14739 = vmatmul.mubr.msk.bf16.vlgmr.msra.gmra.mrb[16].mxu0 %vm408_vm0, %v17851_v16 }
 0x213   : > { %2586 = vmatpush1.bf16.msra.mxu0 %v2565_v40  ;;  %2446 = vmatprep.mubr.bf16.mxu0 %v21493_v38 }
 0x214   : > { %v1722_v61 = vpop.permute.xlu0 %1721  ;;  %2638 = vmatprep.subr.bf16.mxu0 %v2568_v0 }
 0x215   : > { %v1730_v45 = vsel %vm1723_vm6, %v17782_v56, %v1722_v61 }
 0x216   : > { %v18518_v51 = vpop.permute.xlu1 %6654  ;;  %15324 = vmatprep.subr.bf16.mxu1 %v1730_v45 }
 0x217   : > { %15325 = vmatpush3.bf16.msra.mxu1 %v1730_v45 }
 0x218   : > { %v18520_v62 = vpop.permute.xlu0 %6656 }
 0x21a   : > { %v18522_v9 = vpop.permute.xlu1 %6652  ;;  %15327 = vmatmul.mubr.msk.bf16.vlgmr.msra.gmra.mrb[0].mxu1 %vm408_vm0, %v17757_v50  ;;  %14740 = vmatmul.mubr.msk.bf16.gmra.mrb[20].mxu0 %vm408_vm0, %v17856_v24  ;;  %v2570_v50 = vsel %vm2564_vm9, %v17914_v13, %v17920_v3 }
 0x21b   : > { %21575 = vst [vmem:[#allocation91_spill] sm:$0xff] %v18522_v9  ;;  %15332 = vmatprep.mubr.msk.bf16.mxu1 %vm408_vm0, %v17801_v59  ;;  %2617 = vmatprep.mubr.bf16.mxu0 %v21493_v38  ;;  %v17224_v59 = vld [vmem:[%s17345_s25 + $0x4] ss:$16 sps:$4 sm:$0xff]   ;;  %v2567_v9 = vsel %vm2564_vm9, %v17889_v53, %v17903_v18 }
 0x21c   : > { %v18531_v56 = vpop.permute.xlu0 %6648  ;;  %v17225_v53 = vld [vmem:[%s17345_s25 + $0x24] ss:$16 sps:$4 sm:$0xff]  }
 0x21e   : > { %v1999_v61 = vpop.permute.xlu1 %1998 }
 0x21f   : > { %v2007_v45 = vsel %vm2000_vm7, %v17832_v6, %v1999_v61 }
 0x220   : > { %15330 = vmatprep.subr.bf16.mxu1 %v2007_v45  ;;  %v18535_v40 = vpop.permute.xlu0 %6650 }
 0x221   : > { %15331 = vmatpush3.bf16.msra.mxu1 %v2007_v45 }
 0x222   : > { %v18540_v0 = vpop.permute.xlu1 %6658  ;;  %14745 = vmatmul.mubr.msk.bf16.vlgmr.msra.gmra.mrb[0].mxu0 %vm408_vm0, %v17224_v59 }
 0x223   : > { %21576 = vst [vmem:[#allocation92_spill] sm:$0xff] %v18540_v0  ;;  %2639 = vmatpush1.bf16.msra.mxu0 %v2567_v9  ;;  %2627 = vmatprep.mubr.bf16.mxu0 %v21493_v38 }
 0x224   : > { %v18548_v6 = vpop.permute.xlu0 %6660  ;;  %2691 = vmatprep.subr.bf16.mxu0 %v2570_v50  ;;  %v2843_v50 = vsel %vm2841_vm10, %v17922_v15, %v17931_v26 }
 0x226   : > { %v2276_v61 = vpop.permute.xlu1 %2275  ;;  %15333 = vmatmul.mubr.msk.bf16.vlgmr.msra.gmra.mrb[0].mxu1 %vm408_vm0, %v17807_v60 }
 0x227   : > { %15338 = vmatprep.mubr.msk.bf16.mxu1 %vm408_vm0, %v17851_v16  ;;  %v2284_v45 = vsel %vm2277_vm8, %v17878_v11, %v2276_v61  ;;  %v2569_v11 = vsel %vm2564_vm9, %v17912_v10, %v17914_v13  ;;  %v21577_v61 = vld [vmem:[#allocation13_spill] sm:$0xff] }
 0x228   : > { %15336 = vmatprep.subr.bf16.mxu1 %v2284_v45  ;;  %v18556_v0 = vpop.permute.xlu0 %6662 }
 0x229   : > { %15337 = vmatpush3.bf16.msra.mxu1 %v2284_v45 }
 0x22a   : > { %14746 = vmatmul.mubr.msk.bf16.gmra.mrb[4].mxu0 %vm408_vm0, %v17225_v53  ;;  %v18560_v18 = vpop.permute.xlu1 %6664 }
 0x22b   : > { %2670 = vmatprep.mubr.bf16.mxu0 %v21493_v38 }
 0x22c   : > { %v2563_v9 = vpop.permute.xlu0 %2562 }
 0x22d   : > { %v2571_v60 = vsel %vm2564_vm9, %v17920_v3, %v2563_v9 }
 0x22e   : > { %15342 = vmatprep.subr.bf16.mxu1 %v2571_v60  ;;  %v2840_v16 = vpop.permute.xlu1 %2839 }
 0x22f   : > { %v2848_v45 = vsel %vm2841_vm10, %v21577_v61, %v2840_v16  ;;  %v21582_v16 = vld [vmem:[#allocation7_spill] sm:$0xff] }
 0x230   : > { %v18580_v3 = vpop.permute.xlu0 %6938 }
 0x231   : > { %21579 = vst [vmem:[#allocation93_spill] sm:$0xff] %v18580_v3  ;;  %v21583_v3 = vld [vmem:[#allocation11_spill] sm:$0xff] }
 0x232   : > { %15339 = vmatmul.mubr.msk.bf16.vlgmr.msra.gmra.mrb[0].mxu1 %vm408_vm0, %v17856_v24  ;;  %14747 = vmatmul.mubr.msk.bf16.vlgmr.msra.gmra.mrb[8].mxu0 %vm408_vm0, %v17224_v59  ;;  %v18578_v24 = vpop.permute.xlu1 %6940 }
 0x233   : > { %2692 = vmatpush1.bf16.msra.mxu0 %v2569_v11  ;;  %15343 = vmatpush3.bf16.msra.mxu1 %v2571_v60  ;;  %21578 = vst [vmem:[#allocation13_spill] sm:$0xff] %v18578_v24  ;;  %v21581_v60 = vld [vmem:[#allocation8_spill] sm:$0xff]  ;;  %v2842_v11 = vsel %vm2841_vm10, %v21582_v16, %v17922_v15  ;;  %v21585_v15 = vld [vmem:[#allocation9_spill] sm:$0xff] }
 0x234   : > { %2680 = vmatprep.mubr.bf16.mxu0 %v21493_v38  ;;  %15344 = vmatprep.mubr.msk.bf16.mxu1 %vm408_vm0, %v17224_v59  ;;  %v18583_v13 = vpop.permute.xlu0 %6936 }
 0x235   : > { %2862 = vmatprep.subr.bf16.mxu0 %v2843_v50  ;;  %15348 = vmatprep.subr.bf16.mxu1 %v2848_v45  ;;  %21580 = vst [vmem:[#allocation94_spill] sm:$0xff] %v18583_v13  ;;  %v21584_v13 = vld [vmem:[#allocation10_spill] sm:$0xff] }
 0x236   : > { %v3117_v10 = vpop.permute.xlu1 %3116  ;;  %v2845_v24 = vsel %vm2841_vm10, %v21584_v13, %v21583_v3 }
 0x237   : > { %v3125_v9 = vsel %vm21404_vm11, %v18025_v8, %v3117_v10 }
 0x238   : > { %v18594_v50 = vpop.permute.xlu0 %6942 }
 0x23a   : > { %14748 = vmatmul.mubr.msk.bf16.gmra.mrb[12].mxu0 %vm408_vm0, %v17225_v53 }
 0x23b   : > { %2723 = vmatprep.mubr.bf16.mxu0 %v21493_v38 }
 0x23e   : > { %15345 = vmatmul.mubr.msk.bf16.vlgmr.msra.gmra.mrb[0].mxu1 %vm408_vm0, %v17225_v53 }
 0x23f   : > { %15349 = vmatpush3.bf16.msra.mxu1 %v2848_v45  ;;  %15350 = vmatprep.mubr.msk.bf16.mxu1 %vm408_vm0, %v21581_v60  ;;  %v3394_v45 = vpop.permute.xlu0 %3393 }
 0x240   : > { %15354 = vmatprep.subr.bf16.mxu1 %v3125_v9  ;;  %v3402_v10 = vsel %vm21401_vm12, %v18071_v23, %v3394_v45  ;;  %v21592_v45 = vld [vmem:[#allocation18_spill] sm:$0xff] }
 0x242   : > { %14749 = vmatmul.mubr.msk.bf16.vlgmr.msra.gmra.mrb[16].mxu0 %vm408_vm0, %v17224_v59  ;;  %v21586_v59 = vld [vmem:[#allocation12_spill] sm:$0xff] }
 0x243   : > { %2863 = vmatpush1.bf16.msra.mxu0 %v2842_v11  ;;  %2733 = vmatprep.mubr.bf16.mxu0 %v21493_v38  ;;  %v21591_v11 = vld [vmem:[#allocation19_spill] sm:$0xff] }
 0x244   : > { %2915 = vmatprep.subr.bf16.mxu0 %v2845_v24  ;;  %v2847_v24 = vsel %vm2841_vm10, %v21586_v59, %v21577_v61  ;;  %v21588_v61 = vld [vmem:[#allocation15_spill] sm:$0xff] }
 0x24a   : > { %14750 = vmatmul.mubr.msk.bf16.gmra.mrb[20].mxu0 %vm408_vm0, %v17225_v53  ;;  %15351 = vmatmul.mubr.msk.bf16.vlgmr.msra.gmra.mrb[0].mxu1 %vm408_vm0, %v21585_v15  ;;  %v2844_v53 = vsel %vm2841_vm10, %v17931_v26, %v21584_v13  ;;  %v2846_v26 = vsel %vm2841_vm10, %v21583_v3, %v21586_v59  ;;  %v21589_v13 = vld [vmem:[#allocation14_spill] sm:$0xff] }
 0x24b   : > { %2894 = vmatprep.mubr.bf16.mxu0 %v21493_v38  ;;  %15355 = vmatpush3.bf16.msra.mxu1 %v3125_v9  ;;  %v21587_v9 = vld [vmem:[#allocation17_spill] sm:$0xff]  ;;  %v3120_v16 = vsel %vm21404_vm11, %v21589_v13, %v21588_v61 }
 0x24c   : > { %15356 = vmatprep.mubr.msk.bf16.mxu1 %vm408_vm0, %v17994_v20  ;;  %15360 = vmatprep.subr.bf16.mxu1 %v3402_v10 }
 0x252   : > { %14753 = vmatmul.mubr.msk.bf16.vlgmr.msra.gmra.mrb[0].mxu0 %vm408_vm0, %v21581_v60 }
 0x253   : > { %2916 = vmatpush1.bf16.msra.mxu0 %v2844_v53  ;;  %2904 = vmatprep.mubr.bf16.mxu0 %v21493_v38  ;;  %v21595_v53 = vld [vmem:[#allocation22_spill] sm:$0xff] }
 0x254   : > { %2968 = vmatprep.subr.bf16.mxu0 %v2847_v24  ;;  %v21594_v24 = vld [vmem:[#allocation42_spill] sm:$0xff] }
 0x256   : > { %15357 = vmatmul.mubr.msk.bf16.vlgmr.msra.gmra.mrb[0].mxu1 %vm408_vm0, %v21587_v9 }
 0x257   : > { %15361 = vmatpush3.bf16.msra.mxu1 %v3402_v10  ;;  %15362 = vmatprep.mubr.msk.bf16.mxu1 %vm408_vm0, %v18050_v29  ;;  %v3122_v10 = vsel %vm21404_vm11, %v21592_v45, %v21591_v11 }
 0x258   : > { %15366 = vmatprep.subr.bf16.mxu1 %v17370_v34 }
 0x25a   : > { %14754 = vmatmul.mubr.msk.bf16.gmra.mrb[4].mxu0 %vm408_vm0, %v21585_v15 }
 0x25b   : > { %2947 = vmatprep.mubr.bf16.mxu0 %v21493_v38 }
 0x262   : > { %14755 = vmatmul.mubr.msk.bf16.vlgmr.msra.gmra.mrb[8].mxu0 %vm408_vm0, %v21581_v60  ;;  %15363 = vmatmul.mubr.msk.bf16.vlgmr.msra.gmra.mrb[0].mxu1 %vm408_vm0, %v18052_v31 }
 0x263   : > { %2969 = vmatpush1.bf16.msra.mxu0 %v2846_v26  ;;  %2957 = vmatprep.mubr.bf16.mxu0 %v21493_v38  ;;  %v21596_v26 = vld [vmem:[#allocation21_spill] sm:$0xff] }
 0x264   : > { %15367 = vmatpush3.bf16.msra.mxu1 %v17370_v34  ;;  %15368 = vmatprep.mubr.msk.bf16.mxu1 %vm408_vm0, %v18077_v19  ;;  %v21590_v34 = vld [vmem:[#allocation16_spill] sm:$0xff] }
 0x265   : > { %3139 = vmatprep.subr.bf16.mxu0 %v3120_v16  ;;  %15372 = vmatprep.subr.bf16.mxu1 %v18138_v30  ;;  %v3119_v3 = vsel %vm21404_vm11, %v21590_v34, %v21589_v13  ;;  %v21597_v13 = vld [vmem:[#allocation23_spill] sm:$0xff]  ;;  %v21598_v16 = vld [vmem:[#allocation25_spill] sm:$0xff]  ;;  %v21599_v34 = vld [vmem:[#allocation24_spill] sm:$0xff] }
 0x26a   : > { %14756 = vmatmul.mubr.msk.bf16.gmra.mrb[12].mxu0 %vm408_vm0, %v21585_v15 }
 0x26b   : > { %3000 = vmatprep.mubr.bf16.mxu0 %v21493_v38 }
 0x26e   : > { %15369 = vmatmul.mubr.msk.bf16.vlgmr.msra.gmra.mrb[0].mxu1 %vm408_vm0, %v18082_v1 }
 0x26f   : > { %15373 = vmatpush3.bf16.msra.mxu1 %v18138_v30  ;;  %15374 = vmatprep.mubr.msk.bf16.mxu1 %vm408_vm0, %v18104_v41 }
 0x270   : > { %15378 = vmatprep.subr.bf16.mxu1 %v18184_v48 }
 0x272   : > { %14757 = vmatmul.mubr.msk.bf16.vlgmr.msra.gmra.mrb[16].mxu0 %vm408_vm0, %v21581_v60  ;;  %v21593_v60 = vld [vmem:[#allocation20_spill] sm:$0xff] }
 0x273   : > { %3140 = vmatpush1.bf16.msra.mxu0 %v3119_v3  ;;  %3010 = vmatprep.mubr.bf16.mxu0 %v21493_v38  ;;  %v3124_v59 = vsel %vm21404_vm11, %v21593_v60, %v18025_v8  ;;  %v3123_v8 = vsel %vm21404_vm11, %v21591_v11, %v21593_v60  ;;  %v3399_v3 = vsel %vm21401_vm12, %v21599_v34, %v21598_v16  ;;  %v277_v11 = vld [vmem:[%s259_s29] sm:$0xff]  ;;  %v21603_v60 = vld [vmem:[#allocation28_spill] sm:$0xff] }
 0x274   : > { %3192 = vmatprep.subr.bf16.mxu0 %v3122_v10  ;;  %7208 = vperm.xlu1 %16981, %v277_v11   ;;  %v278_v10 = vld [vmem:[%s259_s29 + $0x8] sm:$0xff]  ;;  %v21613_v11 = vld [vmem:[#allocation37_spill] sm:$0xff] }
 0x275   : > { %7213 = vperm.xlu0 %16982, %v278_v10   ;;  %v21615_v10 = vld [vmem:[#allocation38_spill] sm:$0xff] }
 0x27a   : > { %14758 = vmatmul.mubr.msk.bf16.gmra.mrb[20].mxu0 %vm408_vm0, %v21585_v15  ;;  %15375 = vmatmul.mubr.msk.bf16.vlgmr.msra.gmra.mrb[0].mxu1 %vm408_vm0, %v18113_v17  ;;  %v3121_v15 = vsel %vm21404_vm11, %v21588_v61, %v21592_v45  ;;  %v3397_v61 = vsel %vm21401_vm12, %v21596_v26, %v21595_v53  ;;  %v279_v45 = vld [vmem:[%s259_s29 + $0x10] sm:$0xff]  ;;  %vm6666_vm11 = vcmask 711680  }
 0x27b   : > { %3171 = vmatprep.mubr.bf16.mxu0 %v21493_v38  ;;  %15379 = vmatpush3.bf16.msra.mxu1 %v18184_v48 }
 0x27c   : > { %15380 = vmatprep.mubr.msk.bf16.mxu1 %vm408_vm0, %v18157_v25  ;;  %15384 = vmatprep.subr.bf16.mxu1 %v18234_v47 }
 0x27d   : > { %7218 = vperm.xlu1 %16981, %v279_v45   ;;  %v21614_v45 = vld [vmem:[#allocation36_spill] sm:$0xff] }
 0x282   : > { %14761 = vmatmul.mubr.msk.bf16.vlgmr.msra.gmra.mrb[0].mxu0 %vm408_vm0, %v17994_v20 }
 0x283   : > { %3193 = vmatpush1.bf16.msra.mxu0 %v3121_v15  ;;  %3181 = vmatprep.mubr.bf16.mxu0 %v21493_v38 }
 0x284   : > { %3245 = vmatprep.subr.bf16.mxu0 %v3124_v59  ;;  %v21604_v59 = vld [vmem:[#allocation27_spill] sm:$0xff] }
 0x285   : > { %v3918_v15 = vsel %vm21399_vm13, %v21604_v59, %v21603_v60 }
 0x286   : > { %15381 = vmatmul.mubr.msk.bf16.vlgmr.msra.gmra.mrb[0].mxu1 %vm408_vm0, %v18159_v21 }
 0x287   : > { %15385 = vmatpush3.bf16.msra.mxu1 %v18234_v47  ;;  %15386 = vmatprep.mubr.msk.bf16.mxu1 %vm408_vm0, %v18203_v44 }
 0x288   : > { %15390 = vmatprep.subr.bf16.mxu1 %v18280_v46 }
 0x28a   : > { %14762 = vmatmul.mubr.msk.bf16.gmra.mrb[4].mxu0 %vm408_vm0, %v21587_v9 }
 0x28b   : > { %3224 = vmatprep.mubr.bf16.mxu0 %v21493_v38 }
 0x292   : > { %14763 = vmatmul.mubr.msk.bf16.vlgmr.msra.gmra.mrb[8].mxu0 %vm408_vm0, %v17994_v20  ;;  %15387 = vmatmul.mubr.msk.bf16.vlgmr.msra.gmra.mrb[0].mxu1 %vm408_vm0, %v21594_v24 }
 0x293   : > { %3246 = vmatpush1.bf16.msra.mxu0 %v3123_v8  ;;  %3234 = vmatprep.mubr.bf16.mxu0 %v21493_v38  ;;  %v21605_v8 = vld [vmem:[#allocation4_spill] sm:$0xff] }
 0x294   : > { %15391 = vmatpush3.bf16.msra.mxu1 %v18280_v46  ;;  %15392 = vmatprep.mubr.msk.bf16.mxu1 %vm408_vm0, %v17967_v4  ;;  %v3396_v4 = vsel %vm21401_vm12, %v21597_v13, %v21596_v26  ;;  %v21606_v26 = vld [vmem:[#allocation29_spill] sm:$0xff]  ;;  %v21607_v13 = vld [vmem:[#allocation31_spill] sm:$0xff] }
 0x295   : > { %3416 = vmatprep.subr.bf16.mxu0 %v3397_v61  ;;  %15396 = vmatprep.subr.bf16.mxu1 %v18328_v37  ;;  %v3917_v61 = vsel %vm21399_vm13, %v21606_v26, %v21604_v59  ;;  %v21618_v59 = vld [vmem:[#allocation41_spill] sm:$0xff]  ;;  %v21620_v26 = vld [vmem:[#allocation43_spill] sm:$0xff] }
 0x29a   : > { %14764 = vmatmul.mubr.msk.bf16.gmra.mrb[12].mxu0 %vm408_vm0, %v21587_v9 }
 0x29b   : > { %3277 = vmatprep.mubr.bf16.mxu0 %v21493_v38 }
 0x29e   : > { %15393 = vmatmul.mubr.msk.bf16.vlgmr.msra.gmra.mrb[0].mxu1 %vm408_vm0, %v17976_v5 }
 0x29f   : > { %15397 = vmatpush3.bf16.msra.mxu1 %v18328_v37  ;;  %15398 = vmatprep.mubr.msk.bf16.mxu1 %vm408_vm0, %v18299_v42 }
 0x2a0   : > { %15402 = vmatprep.subr.bf16.mxu1 %v18376_v22 }
 0x2a2   : > { %14765 = vmatmul.mubr.msk.bf16.vlgmr.msra.gmra.mrb[16].mxu0 %vm408_vm0, %v17994_v20  ;;  %v21600_v20 = vld [vmem:[#allocation26_spill] sm:$0xff] }
 0x2a3   : > { %3417 = vmatpush1.bf16.msra.mxu0 %v3396_v4  ;;  %3287 = vmatprep.mubr.bf16.mxu0 %v21493_v38  ;;  %v3401_v5 = vsel %vm21401_vm12, %v21600_v20, %v18071_v23  ;;  %v3400_v23 = vsel %vm21401_vm12, %v21598_v16, %v21600_v20  ;;  %v21608_v4 = vld [vmem:[#allocation30_spill] sm:$0xff]  ;;  %v21611_v20 = vld [vmem:[#allocation33_spill] sm:$0xff] }
 0x2a4   : > { %3469 = vmatprep.subr.bf16.mxu0 %v3399_v3  ;;  %v3920_v16 = vsel %vm21399_vm13, %v21608_v4, %v21607_v13 }
 0x2aa   : > { %14766 = vmatmul.mubr.msk.bf16.gmra.mrb[20].mxu0 %vm408_vm0, %v21587_v9  ;;  %15399 = vmatmul.mubr.msk.bf16.vlgmr.msra.gmra.mrb[0].mxu1 %vm408_vm0, %v18308_v55  ;;  %v3398_v9 = vsel %vm21401_vm12, %v21595_v53, %v21599_v34  ;;  %v18820_v53 = vld [vmem:[%s17345_s25 + $0x2c] ss:$16 sps:$4 sm:$0xff]   ;;  %v21609_v34 = vld [vmem:[#allocation32_spill] sm:$0xff]  ;;  %vm5570_vm12 = vcmask 867328  }
 0x2ab   : > { %3448 = vmatprep.mubr.bf16.mxu0 %v21493_v38  ;;  %15403 = vmatpush3.bf16.msra.mxu1 %v18376_v22  ;;  %v3922_v3 = vsel %vm21399_vm13, %v21609_v34, %v18138_v30 }
 0x2ac   : > { %15404 = vmatprep.mubr.msk.bf16.mxu1 %vm408_vm0, %v18347_v49  ;;  %15408 = vmatprep.subr.bf16.mxu1 %v18415_v28 }
 0x2b2   : > { %14769 = vmatmul.mubr.msk.bf16.vlgmr.msra.gmra.mrb[0].mxu0 %vm408_vm0, %v18050_v29 }
 0x2b3   : > { %3470 = vmatpush1.bf16.msra.mxu0 %v3398_v9  ;;  %3458 = vmatprep.mubr.bf16.mxu0 %v21493_v38  ;;  %v21612_v9 = vld [vmem:[#allocation35_spill] sm:$0xff] }
 0x2b4   : > { %3522 = vmatprep.subr.bf16.mxu0 %v3401_v5  ;;  %v3921_v5 = vsel %vm21399_vm13, %v21607_v13, %v21609_v34  ;;  %v21621_v13 = vld [vmem:[#allocation45_spill] sm:$0xff] }
 0x2b6   : > { %15405 = vmatmul.mubr.msk.bf16.vlgmr.msra.gmra.mrb[0].mxu1 %vm408_vm0, %v18354_v57 }
 0x2b7   : > { %15409 = vmatpush3.bf16.msra.mxu1 %v18415_v28  ;;  %15410 = vmatprep.mubr.msk.bf16.mxu1 %vm408_vm0, %v18396_v14 }
 0x2b8   : > { %15414 = vmatprep.subr.bf16.mxu1 %v18445_v33 }
 0x2ba   : > { %14770 = vmatmul.mubr.msk.bf16.gmra.mrb[4].mxu0 %vm408_vm0, %v18052_v31 }
 0x2bb   : > { %3501 = vmatprep.mubr.bf16.mxu0 %v21493_v38 }
 0x2c2   : > { %14771 = vmatmul.mubr.msk.bf16.vlgmr.msra.gmra.mrb[8].mxu0 %vm408_vm0, %v18050_v29  ;;  %15411 = vmatmul.mubr.msk.bf16.vlgmr.msra.gmra.mrb[0].mxu1 %vm408_vm0, %v18404_v58 }
 0x2c3   : > { %3523 = vmatpush1.bf16.msra.mxu0 %v3400_v23  ;;  %3511 = vmatprep.mubr.bf16.mxu0 %v21493_v38  ;;  %v4191_v23 = vsel %vm21397_vm14, %v21612_v9, %v21611_v20 }
 0x2c4   : > { %15415 = vmatpush3.bf16.msra.mxu1 %v18445_v33  ;;  %15416 = vmatprep.mubr.msk.bf16.mxu1 %vm408_vm0, %v18432_v54 }
 0x2c5   : > { %3662 = vmatprep.subr.bf16.mxu0 %v17381_v39  ;;  %15420 = vmatprep.subr.bf16.mxu1 %v18475_v43  ;;  %v280_v39 = vld [vmem:[%s259_s29 + $0x18] sm:$0xff] }
 0x2c6   : > { %7223 = vperm.xlu1 %16981, %v280_v39   ;;  %v4194_v39 = vsel %vm21397_vm14, %v21614_v45, %v21613_v11 }
 0x2ca   : > { %14772 = vmatmul.mubr.msk.bf16.gmra.mrb[12].mxu0 %vm408_vm0, %v18052_v31 }
 0x2cb   : > { %3554 = vmatprep.mubr.bf16.mxu0 %v21493_v38 }
 0x2ce   : > { %15417 = vmatmul.mubr.msk.bf16.vlgmr.msra.gmra.mrb[0].mxu1 %vm408_vm0, %v18434_v63 }
 0x2cf   : > { %15421 = vmatpush3.bf16.msra.mxu1 %v18475_v43  ;;  %15422 = vmatprep.mubr.msk.bf16.mxu1 %vm408_vm0, %v18462_v2 }
 0x2d0   : > { %15426 = vmatprep.subr.bf16.mxu1 %v18511_v7 }
 0x2d2   : > { %14773 = vmatmul.mubr.msk.bf16.vlgmr.msra.gmra.mrb[16].mxu0 %vm408_vm0, %v18050_v29  ;;  %v18791_v29 = vpop.permute.xlu0 %6948 }
 0x2d3   : > { %3663 = vmatpush1.bf16.msra.mxu0 %v17362_v27  ;;  %3564 = vmatprep.mubr.bf16.mxu0 %v21493_v38  ;;  %v21601_v27 = vld [vmem:[#allocation5_spill] sm:$0xff] }
 0x2d4   : > { %3715 = vmatprep.subr.bf16.mxu0 %v17374_v36  ;;  %v21602_v36 = vld [vmem:[#allocation6_spill] sm:$0xff] }
 0x2da   : > { %14774 = vmatmul.mubr.msk.bf16.gmra.mrb[20].mxu0 %vm408_vm0, %v18052_v31  ;;  %15423 = vmatmul.mubr.msk.bf16.vlgmr.msra.gmra.mrb[0].mxu1 %vm408_vm0, %v18464_v12  ;;  %v18803_v31 = vld [vmem:[%s17345_s25 + $0xc] ss:$16 sps:$4 sm:$0xff]  }
 0x2db   : > { %3694 = vmatprep.mubr.bf16.mxu0 %v21493_v38  ;;  %15427 = vmatpush3.bf16.msra.mxu1 %v18511_v7 }
 0x2dc   : > { %15428 = vmatprep.mubr.msk.bf16.mxu1 %vm408_vm0, %v18492_v35  ;;  %15432 = vmatprep.subr.bf16.mxu1 %v18560_v18 }
 0x2e2   : > { %14777 = vmatmul.mubr.msk.bf16.vlgmr.msra.gmra.mrb[0].mxu0 %vm408_vm0, %v18077_v19 }
 0x2e3   : > { %3716 = vmatpush1.bf16.msra.mxu0 %v21601_v27  ;;  %3704 = vmatprep.mubr.bf16.mxu0 %v21493_v38  ;;  %v4196_v27 = vsel %vm21397_vm14, %v21615_v10, %v18184_v48 }
 0x2e4   : > { %3768 = vmatprep.subr.bf16.mxu0 %v21602_v36  ;;  %v21617_v36 = vld [vmem:[#allocation39_spill] sm:$0xff] }
 0x2e6   : > { %15429 = vmatmul.mubr.msk.bf16.vlgmr.msra.gmra.mrb[0].mxu1 %vm408_vm0, %v18494_v32 }
 0x2e7   : > { %15433 = vmatpush3.bf16.msra.mxu1 %v18560_v18  ;;  %15434 = vmatprep.mubr.msk.bf16.mxu1 %vm408_vm0, %v18531_v56 }
 0x2e8   : > { %15438 = vmatprep.subr.bf16.mxu1 %v18791_v29 }
 0x2ea   : > { %14778 = vmatmul.mubr.msk.bf16.gmra.mrb[4].mxu0 %vm408_vm0, %v18082_v1 }
 0x2eb   : > { %3747 = vmatprep.mubr.bf16.mxu0 %v21493_v38 }
 0x2f2   : > { %14779 = vmatmul.mubr.msk.bf16.vlgmr.msra.gmra.mrb[8].mxu0 %vm408_vm0, %v18077_v19  ;;  %15435 = vmatmul.mubr.msk.bf16.vlgmr.msra.gmra.mrb[0].mxu1 %vm408_vm0, %v18535_v40 }
 0x2f3   : > { %3769 = vmatpush1.bf16.msra.mxu0 %v21605_v8  ;;  %3757 = vmatprep.mubr.bf16.mxu0 %v21493_v38  ;;  %v21619_v8 = vld [vmem:[#allocation44_spill] sm:$0xff] }
 0x2f4   : > { %15439 = vmatpush3.bf16.msra.mxu1 %v18791_v29  ;;  %15440 = vmatprep.mubr.msk.bf16.mxu1 %vm408_vm0, %v18803_v31  ;;  %v4469_v34 = vsel %vm21398_vm15, %v21619_v8, %v21621_v13 }
 0x2f5   : > { %3936 = vmatprep.subr.bf16.mxu0 %v3918_v15  ;;  %v4465_v15 = vsel %vm21398_vm15, %v21618_v59, %v21617_v36 }
 0x2fa   : > { %14780 = vmatmul.mubr.msk.bf16.gmra.mrb[12].mxu0 %vm408_vm0, %v18082_v1 }
 0x2fb   : > { %3800 = vmatprep.mubr.bf16.mxu0 %v21493_v38 }
 0x2fe   : > { %15441 = vmatmul.mubr.msk.bf16.vlgmr.msra.gmra.mrb[0].mxu1 %vm408_vm0, %v18820_v53 }
 0x302   : > { %14781 = vmatmul.mubr.msk.bf16.vlgmr.msra.gmra.mrb[16].mxu0 %vm408_vm0, %v18077_v19  ;;  %v3919_v19 = vsel %vm21399_vm13, %v21603_v60, %v21608_v4  ;;  %v4195_v60 = vsel %vm21397_vm14, %v21613_v11, %v21615_v10  ;;  %v4470_v4 = vsel %vm21398_vm15, %v21621_v13, %v18234_v47  ;;  %v17227_v11 = vld [vmem:[%s17345_s25 + $0x28] ss:$16 sps:$4 sm:$0xff]   ;;  %v21630_v10 = vld [vmem:[#allocation58_spill] sm:$0xff]  ;;  %vm5296_vm13 = vcmask 875520  }
 0x303   : > { %3937 = vmatpush1.bf16.msra.mxu0 %v3917_v61  ;;  %3810 = vmatprep.mubr.bf16.mxu0 %v21493_v38  ;;  %v4468_v61 = vsel %vm21398_vm15, %v21620_v26, %v21619_v8 }
 0x304   : > { %3989 = vmatprep.subr.bf16.mxu0 %v3920_v16  ;;  %v21623_v16 = vld [vmem:[#allocation46_spill] sm:$0xff] }
 0x30a   : > { %14782 = vmatmul.mubr.msk.bf16.gmra.mrb[20].mxu0 %vm408_vm0, %v18082_v1  ;;  %v21610_v1 = vld [vmem:[#allocation34_spill] sm:$0xff] }
 0x30b   : > { %3968 = vmatprep.mubr.bf16.mxu0 %v21493_v38  ;;  %v4192_v30 = vsel %vm21397_vm14, %v21611_v20, %v21610_v1  ;;  %v21626_v20 = vld [vmem:[#allocation53_spill] sm:$0xff] }
 0x312   : > { %14785 = vmatmul.mubr.msk.bf16.vlgmr.msra.gmra.mrb[0].mxu0 %vm408_vm0, %v18104_v41 }
 0x313   : > { %3990 = vmatpush1.bf16.msra.mxu0 %v3919_v19  ;;  %3978 = vmatprep.mubr.bf16.mxu0 %v21493_v38 }
 0x314   : > { %4042 = vmatprep.subr.bf16.mxu0 %v3922_v3  ;;  %v21624_v3 = vld [vmem:[#allocation49_spill] sm:$0xff] }
 0x31a   : > { %14786 = vmatmul.mubr.msk.bf16.gmra.mrb[4].mxu0 %vm408_vm0, %v18113_v17 }
 0x31b   : > { %4021 = vmatprep.mubr.bf16.mxu0 %v21493_v38 }
 0x322   : > { %14787 = vmatmul.mubr.msk.bf16.vlgmr.msra.gmra.mrb[8].mxu0 %vm408_vm0, %v18104_v41 }
 0x323   : > { %4043 = vmatpush1.bf16.msra.mxu0 %v3921_v5  ;;  %4031 = vmatprep.mubr.bf16.mxu0 %v21493_v38  ;;  %v21627_v5 = vld [vmem:[#allocation55_spill] sm:$0xff] }
 0x324   : > { %4210 = vmatprep.subr.bf16.mxu0 %v4192_v30 }
 0x32a   : > { %14788 = vmatmul.mubr.msk.bf16.gmra.mrb[12].mxu0 %vm408_vm0, %v18113_v17 }
 0x32b   : > { %4074 = vmatprep.mubr.bf16.mxu0 %v21493_v38 }
 0x332   : > { %14789 = vmatmul.mubr.msk.bf16.vlgmr.msra.gmra.mrb[16].mxu0 %vm408_vm0, %v18104_v41  ;;  %v4193_v41 = vsel %vm21397_vm14, %v21610_v1, %v21614_v45  ;;  %vm4748_vm14 = vcmask 891904   ;;  %v21625_v1 = vld [vmem:[#allocation54_spill] sm:$0xff]  ;;  %v21629_v45 = vld [vmem:[#allocation56_spill] sm:$0xff] }
 0x333   : > { %4211 = vmatpush1.bf16.msra.mxu0 %v4191_v23  ;;  %4084 = vmatprep.mubr.bf16.mxu0 %v21493_v38  ;;  %v4749_v19 = vsel %vm4748_vm14, %v21624_v3, %v21623_v16  ;;  %v4752_v30 = vsel %vm4748_vm14, %v21626_v20, %v21625_v1  ;;  %v4754_v9 = vsel %vm4748_vm14, %v21627_v5, %v18280_v46  ;;  %v17226_v23 = vld [vmem:[%s17345_s25 + $0x8] ss:$16 sps:$4 sm:$0xff]  }
 0x334   : > { %4263 = vmatprep.subr.bf16.mxu0 %v4194_v39  ;;  %v4753_v39 = vsel %vm4748_vm14, %v21625_v1, %v21627_v5 }
 0x33a   : > { %14790 = vmatmul.mubr.msk.bf16.gmra.mrb[20].mxu0 %vm408_vm0, %v18113_v17  ;;  %v21616_v17 = vld [vmem:[#allocation40_spill] sm:$0xff] }
 0x33b   : > { %4242 = vmatprep.mubr.bf16.mxu0 %v21493_v38  ;;  %v4466_v48 = vsel %vm21398_vm15, %v21617_v36, %v21616_v17 }
 0x342   : > { %14793 = vmatmul.mubr.msk.bf16.vlgmr.msra.gmra.mrb[0].mxu0 %vm408_vm0, %v18157_v25 }
 0x343   : > { %4264 = vmatpush1.bf16.msra.mxu0 %v4193_v41  ;;  %4252 = vmatprep.mubr.bf16.mxu0 %v21493_v38  ;;  %v21631_v41 = vld [vmem:[#allocation60_spill] sm:$0xff] }
 0x344   : > { %4316 = vmatprep.subr.bf16.mxu0 %v4196_v27 }
 0x34a   : > { %14794 = vmatmul.mubr.msk.bf16.gmra.mrb[4].mxu0 %vm408_vm0, %v18159_v21 }
 0x34b   : > { %4295 = vmatprep.mubr.bf16.mxu0 %v21493_v38 }
 0x352   : > { %14795 = vmatmul.mubr.msk.bf16.vlgmr.msra.gmra.mrb[8].mxu0 %vm408_vm0, %v18157_v25 }
 0x353   : > { %4317 = vmatpush1.bf16.msra.mxu0 %v4195_v60  ;;  %4305 = vmatprep.mubr.bf16.mxu0 %v21493_v38 }
 0x354   : > { %4484 = vmatprep.subr.bf16.mxu0 %v4466_v48  ;;  %v18975_v48 = vpop.permute.xlu1 %6944 }
 0x358   : > { %v18979_v60 = vpop.permute.xlu1 %6946 }
 0x35a   : > { %14796 = vmatmul.mubr.msk.bf16.gmra.mrb[12].mxu0 %vm408_vm0, %v18159_v21 }
 0x35b   : > { %4348 = vmatprep.mubr.bf16.mxu0 %v21493_v38 }
 0x362   : > { %14797 = vmatmul.mubr.msk.bf16.vlgmr.msra.gmra.mrb[16].mxu0 %vm408_vm0, %v18157_v25  ;;  %v4467_v25 = vsel %vm21398_vm15, %v21616_v17, %v21620_v26  ;;  %vm5022_vm15 = vcmask 883712   ;;  %v21632_v17 = vld [vmem:[#allocation59_spill] sm:$0xff]  ;;  %v18984_v26 = vpop.permute.xlu1 %7208 }
 0x363   : > { %4485 = vmatpush1.bf16.msra.mxu0 %v4465_v15  ;;  %4358 = vmatprep.mubr.bf16.mxu0 %v21493_v38  ;;  %v5023_v27 = vsel %vm5022_vm15, %v21630_v10, %v21629_v45  ;;  %v5026_v36 = vsel %vm5022_vm15, %v21632_v17, %v21631_v41  ;;  %v21633_v15 = vld [vmem:[#allocation61_spill] sm:$0xff]  ;;  %21634 = vst [vmem:[#allocation8_spill] sm:$0xff] %v18984_v26  ;;  %v21643_v10 = vld [vmem:[#allocation62_spill] sm:$0xff] }
 0x364   : > { %4537 = vmatprep.subr.bf16.mxu0 %v4468_v61  ;;  %v5028_v8 = vsel %vm5022_vm15, %v21633_v15, %v18328_v37  ;;  %v21635_v61 = vld [vmem:[#allocation48_spill] sm:$0xff] }
 0x36a   : > { %14798 = vmatmul.mubr.msk.bf16.gmra.mrb[20].mxu0 %vm408_vm0, %v18159_v21  ;;  %v21622_v21 = vld [vmem:[#allocation47_spill] sm:$0xff] }
 0x36b   : > { %4516 = vmatprep.mubr.bf16.mxu0 %v21493_v38  ;;  %v4750_v47 = vsel %vm4748_vm14, %v21623_v16, %v21622_v21 }
 0x372   : > { %14801 = vmatmul.mubr.msk.bf16.vlgmr.msra.gmra.mrb[0].mxu0 %vm408_vm0, %v18203_v44 }
 0x373   : > { %4538 = vmatpush1.bf16.msra.mxu0 %v4467_v25  ;;  %4526 = vmatprep.mubr.bf16.mxu0 %v21493_v38 }
 0x374   : > { %4590 = vmatprep.subr.bf16.mxu0 %v4470_v4 }
 0x37a   : > { %14802 = vmatmul.mubr.msk.bf16.gmra.mrb[4].mxu0 %vm408_vm0, %v21594_v24 }
 0x37b   : > { %4569 = vmatprep.mubr.bf16.mxu0 %v21493_v38 }
 0x382   : > { %14803 = vmatmul.mubr.msk.bf16.vlgmr.msra.gmra.mrb[8].mxu0 %vm408_vm0, %v18203_v44 }
 0x383   : > { %4591 = vmatpush1.bf16.msra.mxu0 %v4469_v34  ;;  %4579 = vmatprep.mubr.bf16.mxu0 %v21493_v38  ;;  %v21637_v34 = vld [vmem:[#allocation51_spill] sm:$0xff] }
 0x384   : > { %4768 = vmatprep.subr.bf16.mxu0 %v4750_v47 }
 0x38a   : > { %14804 = vmatmul.mubr.msk.bf16.gmra.mrb[12].mxu0 %vm408_vm0, %v21594_v24 }
 0x38b   : > { %4622 = vmatprep.mubr.bf16.mxu0 %v21493_v38 }
 0x392   : > { %14805 = vmatmul.mubr.msk.bf16.vlgmr.msra.gmra.mrb[16].mxu0 %vm408_vm0, %v18203_v44  ;;  %v4751_v44 = vsel %vm4748_vm14, %v21622_v21, %v21626_v20  ;;  %v21636_v21 = vld [vmem:[#allocation50_spill] sm:$0xff]  ;;  %v21639_v20 = vld [vmem:[#allocation52_spill] sm:$0xff] }
 0x393   : > { %4769 = vmatpush1.bf16.msra.mxu0 %v4749_v19  ;;  %4632 = vmatprep.mubr.bf16.mxu0 %v21493_v38  ;;  %v18995_v19 = vpop.permute.xlu0 %7213 }
 0x394   : > { %4821 = vmatprep.subr.bf16.mxu0 %v4752_v30  ;;  %21638 = vst [vmem:[#allocation7_spill] sm:$0xff] %v18995_v19 }
 0x39a   : > { %14806 = vmatmul.mubr.msk.bf16.gmra.mrb[20].mxu0 %vm408_vm0, %v21594_v24  ;;  %v21628_v24 = vld [vmem:[#allocation57_spill] sm:$0xff] }
 0x39b   : > { %4800 = vmatprep.mubr.bf16.mxu0 %v21493_v38  ;;  %v5024_v46 = vsel %vm5022_vm15, %v21629_v45, %v21628_v24  ;;  %v5025_v4 = vsel %vm5022_vm15, %v21628_v24, %v21632_v17  ;;  %v5027_v17 = vsel %vm5022_vm15, %v21631_v41, %v21633_v15  ;;  %v21644_v15 = vld [vmem:[#allocation64_spill] sm:$0xff] }
 0x3a2   : > { %14811 = vmatmul.mubr.msk.bf16.vlgmr.msra.gmra.mrb[0].mxu0 %vm408_vm0, %v17226_v23 }
 0x3a3   : > { %4822 = vmatpush1.bf16.msra.mxu0 %v4751_v44  ;;  %4810 = vmatprep.mubr.bf16.mxu0 %v21493_v38 }
 0x3a4   : > { %4874 = vmatprep.subr.bf16.mxu0 %v4754_v9 }
 0x3aa   : > { %14812 = vmatmul.mubr.msk.bf16.gmra.mrb[4].mxu0 %vm408_vm0, %v17227_v11 }
 0x3ab   : > { %4853 = vmatprep.mubr.bf16.mxu0 %v21493_v38 }
 0x3b2   : > { %14813 = vmatmul.mubr.msk.bf16.vlgmr.msra.gmra.mrb[8].mxu0 %vm408_vm0, %v17226_v23 }
 0x3b3   : > { %4875 = vmatpush1.bf16.msra.mxu0 %v4753_v39  ;;  %4863 = vmatprep.mubr.bf16.mxu0 %v21493_v38  ;;  %v21642_v39 = vld [vmem:[#allocation63_spill] sm:$0xff] }
 0x3b4   : > { %5042 = vmatprep.subr.bf16.mxu0 %v5024_v46 }
 0x3ba   : > { %14814 = vmatmul.mubr.msk.bf16.gmra.mrb[12].mxu0 %vm408_vm0, %v17227_v11 }
 0x3bb   : > { %4906 = vmatprep.mubr.bf16.mxu0 %v21493_v38 }
 0x3c2   : > { %14815 = vmatmul.mubr.msk.bf16.vlgmr.msra.gmra.mrb[16].mxu0 %vm408_vm0, %v17226_v23  ;;  %v19000_v23 = vpop.permute.xlu1 %7218 }
 0x3c3   : > { %5043 = vmatpush1.bf16.msra.mxu0 %v5023_v27  ;;  %4916 = vmatprep.mubr.bf16.mxu0 %v21493_v38  ;;  %21640 = vst [vmem:[#allocation11_spill] sm:$0xff] %v19000_v23  ;;  %v5298_v27 = vsel %vm5296_vm13, %v21643_v10, %v21642_v39 }
 0x3c4   : > { %5095 = vmatprep.subr.bf16.mxu0 %v5026_v36 }
 0x3c6   : > { %v19006_v24 = vpop.permute.xlu1 %7223 }
 0x3c7   : > { %21641 = vst [vmem:[#allocation10_spill] sm:$0xff] %v19006_v24 }
 0x3ca   : > { %14816 = vmatmul.mubr.msk.bf16.gmra.mrb[20].mxu0 %vm408_vm0, %v17227_v11 }
 0x3cb   : > { %5074 = vmatprep.mubr.bf16.mxu0 %v21493_v38 }
 0x3d1   : > { %v15442_v59 = vpop.f32.mrb[0].mxu1 }
 0x3d2   : > { %v15594_v13 = vadd.f32 %v15442_v59, %v21635_v61  ;;  %14819 = vmatmul.mubr.msk.bf16.vlgmr.msra.gmra.mrb[0].mxu0 %vm408_vm0, %v18299_v42  ;;  %v7163_v25 = vpop.f32.mrb[1].mxu1 }
 0x3d3   : > { %5096 = vmatpush1.bf16.msra.mxu0 %v5025_v4  ;;  %v15595_v16 = vadd.f32 %v7163_v25, %v21636_v21  ;;  %v15443_v47 = vpop.f32.mrb[2].mxu1  ;;  %5084 = vmatprep.mubr.bf16.mxu0 %v21493_v38  ;;  %v5297_v25 = vsel %vm5296_vm13, %v21644_v15, %v21643_v10  ;;  %v21645_v21 = vld [vmem:[#allocation66_spill] sm:$0xff]  ;;  %v21655_v15 = vld [vmem:[#allocation73_spill] sm:$0xff] }
 0x3d4   : > { %v15596_v37 = vadd.f32 %v15443_v47, %v21637_v34  ;;  %v7166_v3 = vpop.f32.mrb[3].mxu1  ;;  %5148 = vmatprep.subr.bf16.mxu0 %v5028_v8  ;;  %v7246_v11 = vadd.f32 %v15594_v13, %v19000_v23 }
 0x3d5   : > { %v7232_v1 = vadd.f32 %v15595_v16, %v18984_v26  ;;  %v15597_v30 = vadd.f32 %v7166_v3, %v21639_v20  ;;  %v21646_v16 = vld [vmem:[#allocation65_spill] sm:$0xff] }
 0x3d6   : > { %v14905_v45 = vmul.f32 -1.442695, %v7246_v11  ;;  %v7253_v46 = vadd.f32 %v15596_v37, %v19006_v24  ;;  %v5300_v47 = vsel %vm5296_vm13, %v21646_v16, %v21645_v21 }
 0x3d7   : > { %v14891_v5 = vmul.f32 -1.442695, %v7232_v1  ;;  %v7239_v9 = vadd.f32 %v15597_v30, %v18995_v19  ;;  %v21648_v30 = vld [vmem:[#allocation3_spill] sm:$0xff] }
 0x3d9   : > { %17000 = vpow2.f32 %v14891_v5  ;;  %v14898_v44 = vmul.f32 -1.442695, %v7239_v9  ;;  %v7449_v5 = vsub.s32 6, %v21648_v30 }
 0x3da   : > { %14820 = vmatmul.mubr.msk.bf16.gmra.mrb[4].mxu0 %vm408_vm0, %v18308_v55 }
 0x3db   : > { %17002 = vpow2.f32 %v14898_v44  ;;  %5127 = vmatprep.mubr.bf16.mxu0 %v21493_v38 }
 0x3dc   : > { %17004 = vpow2.f32 %v14905_v45  ;;  %v21649_v45 = vld [vmem:[#allocation67_spill] sm:$0xff] }
 0x3dd   : > { %17006 = vtanh.f32 %v7253_v46  ;;  %v5302_v46 = vsel %vm5296_vm13, %v21649_v45, %v18376_v22  ;;  %v21650_v22 = vld [vmem:[#allocation69_spill] sm:$0xff] }
 0x3e2   : > { %14821 = vmatmul.mubr.msk.bf16.vlgmr.msra.gmra.mrb[8].mxu0 %vm408_vm0, %v18299_v42 }
 0x3e3   : > { %v17001_v36 = vpop.eup %17000  ;;  %5149 = vmatpush1.bf16.msra.mxu0 %v5027_v17  ;;  %5137 = vmatprep.mubr.bf16.mxu0 %v21493_v38 }
 0x3e4   : > { %v7323_v59 = vadd.f32 1.0, %v17001_v36  ;;  %5316 = vmatprep.subr.bf16.mxu0 %v5298_v27  ;;  %v21651_v36 = vld [vmem:[#allocation68_spill] sm:$0xff] }
 0x3e5   : > { %v17003_v8 = vpop.eup %17002 }
 0x3e6   : > { %17008 = vrcp.f32 %v7323_v59  ;;  %v7330_v61 = vadd.f32 1.0, %v17003_v8  ;;  %v17005_v13 = vpop.eup %17004  ;;  %v5572_v59 = vsel %vm5570_vm12, %v21651_v36, %v21650_v22  ;;  %v21652_v8 = vld [vmem:[#allocation70_spill] sm:$0xff] }
 0x3e7   : > { %v17007_v4 = vpop.eup %17006  ;;  %v7337_v3 = vadd.f32 1.0, %v17005_v13  ;;  %v21653_v13 = vld [vmem:[#allocation72_spill] sm:$0xff] }
 0x3e8   : > { %17010 = vrcp.f32 %v7330_v61  ;;  %v5571_v61 = vsel %vm5570_vm12, %v21652_v8, %v21651_v36  ;;  %v21670_v8 = vld [vmem:[#allocation89_spill] sm:$0xff] }
 0x3e9   : > { %17012 = vrcp.f32 %v7337_v3  ;;  %v21660_v3 = vld [vmem:[#allocation77_spill] sm:$0xff] }
 0x3ea   : > { %14822 = vmatmul.mubr.msk.bf16.gmra.mrb[12].mxu0 %vm408_vm0, %v18308_v55 }
 0x3eb   : > { %5180 = vmatprep.mubr.bf16.mxu0 %v21493_v38 }
 0x3f0   : > { %v17009_v41 = vpop.eup %17008 }
 0x3f1   : > { %v7400_v34 = vmul.f32 %v17009_v41, %v17007_v4  ;;  %v21654_v4 = vld [vmem:[#allocation71_spill] sm:$0xff] }
 0x3f2   : > { %v17011_v37 = vpop.eup %17010  ;;  %14823 = vmatmul.mubr.msk.bf16.vlgmr.msra.gmra.mrb[16].mxu0 %vm408_vm0, %v18299_v42  ;;  %v19040_v42 = vld [vmem:[%s21292_s4] sm:$0x7f]  ;;  %v5574_v41 = vsel %vm5570_vm12, %v21654_v4, %v21653_v13 }
 0x3f3   : > { %v7393_v1 = vmul.f32 0.0, %v17011_v37  ;;  %5317 = vmatpush1.bf16.msra.mxu0 %v5297_v25  ;;  %5190 = vmatprep.mubr.bf16.mxu0 %v21493_v38  ;;  %v17013_v9 = vpop.eup %17012  ;;  %v7450_v44 = vrot.slane %v19040_v42, %v7449_v5  ;;  %v5576_v25 = vsel %vm5570_vm12, %v21655_v15, %v18415_v28  ;;  %v21659_v37 = vld [vmem:[#allocation78_spill] sm:$0xff]  ;;  %v21661_v5 = vld [vmem:[#allocation79_spill] sm:$0xff] }
 0x3f4   : > { %5369 = vmatprep.subr.bf16.mxu0 %v5300_v47  ;;  %v21658_v47 = vld [vmem:[#allocation76_spill] sm:$0xff] }
 0x3f5   : > { %v19030_v20 = vadd.f32 %v7400_v34, %v7393_v1 }
 0x3f7   : > { %21647 = vst [vmem:[#allocation9_spill] sm:$0xff] %v19030_v20  ;;  %17014 = vtanh.f32 %v19030_v20 }
 0x3fa   : > { %14824 = vmatmul.mubr.msk.bf16.gmra.mrb[20].mxu0 %vm408_vm0, %v18308_v55  ;;  %v5299_v55 = vsel %vm5296_vm13, %v21642_v39, %v21646_v16  ;;  %v5301_v39 = vsel %vm5296_vm13, %v21645_v21, %v21649_v45  ;;  %v21657_v21 = vld [vmem:[#allocation74_spill] sm:$0xff]  ;;  %v5575_v16 = vsel %vm5570_vm12, %v21653_v13, %v21655_v15 }
 0x3fb   : > { %5348 = vmatprep.mubr.bf16.mxu0 %v21493_v38  ;;  %v21664_v45 = vld [vmem:[#allocation82_spill] sm:$0xff] }
 0x401   : > { %v17015_v11 = vpop.eup %17014 }
 0x402   : > { %14827 = vmatmul.mubr.msk.bf16.vlgmr.msra.gmra.mrb[0].mxu0 %vm408_vm0, %v18347_v49  ;;  %v7421_v10 = vmul.f32 %v17015_v11, %v17013_v9 }
 0x403   : > { %5370 = vmatpush1.bf16.msra.mxu0 %v5299_v55  ;;  %5358 = vmatprep.mubr.bf16.mxu0 %v21493_v38  ;;  %v21665_v55 = vld [vmem:[#allocation84_spill] sm:$0xff] }
 0x404   : > { %5422 = vmatprep.subr.bf16.mxu0 %v5302_v46  ;;  %v7464_v27 = vmul.f32 %v7450_v44, %v7421_v10  ;;  %v21663_v44 = vld [vmem:[#allocation80_spill] sm:$0xff]  ;;  %v21666_v10 = vld [vmem:[#allocation83_spill] sm:$0xff] }
 0x405   : > { %v6119_v46 = vsel %vm6118_vm3, %v21664_v45, %v21663_v44 }
 0x406   : > { %v7471_v17 = vpack.c.bf16 %v7464_v27, %v7464_v27  ;;  %v6122_v27 = vsel %vm6118_vm3, %v21666_v10, %v21665_v55 }
 0x408   : > { %7479 = vst.msk [vmem:[#allocation2 + $0x38] sm:$0xf] %vm7478_vm4, %v7471_v17  ;;  %vm5844_vm4 = vcmask 736256   ;;  %v21667_v17 = vld [vmem:[#allocation85_spill] sm:$0xff] }
 0x409   : > { %v5845_v34 = vsel %vm5844_vm4, %v21658_v47, %v21657_v21  ;;  %v5848_v1 = vsel %vm5844_vm4, %v21660_v3, %v21659_v37  ;;  %v5850_v9 = vsel %vm5844_vm4, %v21661_v5, %v18445_v33  ;;  %v5849_v11 = vsel %vm5844_vm4, %v21659_v37, %v21661_v5 }
 0x40a   : > { %14828 = vmatmul.mubr.msk.bf16.gmra.mrb[4].mxu0 %vm408_vm0, %v18354_v57  ;;  %v6123_v36 = vsel %vm6118_vm3, %v21665_v55, %v21667_v17 }
 0x40b   : > { %5401 = vmatprep.mubr.bf16.mxu0 %v21493_v38 }
 0x412   : > { %14829 = vmatmul.mubr.msk.bf16.vlgmr.msra.gmra.mrb[8].mxu0 %vm408_vm0, %v18347_v49 }
 0x413   : > { %5423 = vmatpush1.bf16.msra.mxu0 %v5301_v39  ;;  %5411 = vmatprep.mubr.bf16.mxu0 %v21493_v38 }
 0x414   : > { %5590 = vmatprep.subr.bf16.mxu0 %v5572_v59  ;;  %v21669_v59 = vld [vmem:[#allocation87_spill] sm:$0xff] }
 0x41a   : > { %14830 = vmatmul.mubr.msk.bf16.gmra.mrb[12].mxu0 %vm408_vm0, %v18354_v57 }
 0x41b   : > { %5454 = vmatprep.mubr.bf16.mxu0 %v21493_v38 }
 0x422   : > { %14831 = vmatmul.mubr.msk.bf16.vlgmr.msra.gmra.mrb[16].mxu0 %vm408_vm0, %v18347_v49  ;;  %v5573_v49 = vsel %vm5570_vm12, %v21650_v22, %v21654_v4  ;;  %v6124_v22 = vsel %vm6118_vm3, %v21667_v17, %v18475_v43  ;;  %v21672_v4 = vld [vmem:[#allocation90_spill] sm:$0xff] }
 0x423   : > { %5591 = vmatpush1.bf16.msra.mxu0 %v5571_v61  ;;  %5464 = vmatprep.mubr.bf16.mxu0 %v21493_v38  ;;  %v21671_v61 = vld [vmem:[#allocation88_spill] sm:$0xff] }
 0x424   : > { %5643 = vmatprep.subr.bf16.mxu0 %v5574_v41  ;;  %v6396_v13 = vsel %vm21405_vm2, %v21671_v61, %v21670_v8  ;;  %v6398_v41 = vsel %vm21405_vm2, %v21672_v4, %v18511_v7  ;;  %v21673_v7 = vld [vmem:[#allocation91_spill] sm:$0xff] }
 0x425   : > { %v6667_v15 = vsel %vm6666_vm11, %v21673_v7, %v18518_v51 }
 0x42a   : > { %14832 = vmatmul.mubr.msk.bf16.gmra.mrb[20].mxu0 %vm408_vm0, %v18354_v57  ;;  %v21656_v57 = vld [vmem:[#allocation75_spill] sm:$0xff] }
 0x42b   : > { %5622 = vmatprep.mubr.bf16.mxu0 %v21493_v38  ;;  %v5846_v28 = vsel %vm5844_vm4, %v21657_v21, %v21656_v57  ;;  %v21677_v21 = vld [vmem:[#allocation94_spill] sm:$0xff] }
 0x432   : > { %14835 = vmatmul.mubr.msk.bf16.vlgmr.msra.gmra.mrb[0].mxu0 %vm408_vm0, %v18396_v14 }
 0x433   : > { %5644 = vmatpush1.bf16.msra.mxu0 %v5573_v49  ;;  %5632 = vmatprep.mubr.bf16.mxu0 %v21493_v38 }
 0x434   : > { %5696 = vmatprep.subr.bf16.mxu0 %v5576_v25  ;;  %v21674_v25 = vld [vmem:[#allocation92_spill] sm:$0xff] }
 0x435   : > { %v6670_v49 = vsel %vm6666_vm11, %v21674_v25, %v18548_v6 }
 0x43a   : > { %14836 = vmatmul.mubr.msk.bf16.gmra.mrb[4].mxu0 %vm408_vm0, %v18404_v58 }
 0x43b   : > { %5675 = vmatprep.mubr.bf16.mxu0 %v21493_v38 }
 0x442   : > { %14837 = vmatmul.mubr.msk.bf16.vlgmr.msra.gmra.mrb[8].mxu0 %vm408_vm0, %v18396_v14 }
 0x443   : > { %5697 = vmatpush1.bf16.msra.mxu0 %v5575_v16  ;;  %5685 = vmatprep.mubr.bf16.mxu0 %v21493_v38 }
 0x444   : > { %5864 = vmatprep.subr.bf16.mxu0 %v5846_v28 }
 0x44a   : > { %14838 = vmatmul.mubr.msk.bf16.gmra.mrb[12].mxu0 %vm408_vm0, %v18404_v58 }
 0x44b   : > { %5728 = vmatprep.mubr.bf16.mxu0 %v21493_v38 }
 0x452   : > { %14839 = vmatmul.mubr.msk.bf16.vlgmr.msra.gmra.mrb[16].mxu0 %vm408_vm0, %v18396_v14  ;;  %v5847_v14 = vsel %vm5844_vm4, %v21656_v57, %v21660_v3  ;;  %v21676_v57 = vld [vmem:[#allocation93_spill] sm:$0xff] }
 0x453   : > { %5865 = vmatpush1.bf16.msra.mxu0 %v5845_v34  ;;  %5738 = vmatprep.mubr.bf16.mxu0 %v21493_v38 }
 0x454   : > { %5917 = vmatprep.subr.bf16.mxu0 %v5848_v1 }
 0x45a   : > { %14840 = vmatmul.mubr.msk.bf16.gmra.mrb[20].mxu0 %vm408_vm0, %v18404_v58  ;;  %v21662_v58 = vld [vmem:[#allocation81_spill] sm:$0xff] }
 0x45b   : > { %5896 = vmatprep.mubr.bf16.mxu0 %v21493_v38  ;;  %v6120_v33 = vsel %vm6118_vm3, %v21663_v44, %v21662_v58 }
 0x462   : > { %14843 = vmatmul.mubr.msk.bf16.vlgmr.msra.gmra.mrb[0].mxu0 %vm408_vm0, %v18432_v54 }
 0x463   : > { %5918 = vmatpush1.bf16.msra.mxu0 %v5847_v14  ;;  %5906 = vmatprep.mubr.bf16.mxu0 %v21493_v38 }
 0x464   : > { %5970 = vmatprep.subr.bf16.mxu0 %v5850_v9 }
 0x46a   : > { %14844 = vmatmul.mubr.msk.bf16.gmra.mrb[4].mxu0 %vm408_vm0, %v18434_v63 }
 0x46b   : > { %5949 = vmatprep.mubr.bf16.mxu0 %v21493_v38 }
 0x472   : > { %14845 = vmatmul.mubr.msk.bf16.vlgmr.msra.gmra.mrb[8].mxu0 %vm408_vm0, %v18432_v54 }
 0x473   : > { %5971 = vmatpush1.bf16.msra.mxu0 %v5849_v11  ;;  %5959 = vmatprep.mubr.bf16.mxu0 %v21493_v38 }
 0x474   : > { %6138 = vmatprep.subr.bf16.mxu0 %v6120_v33 }
 0x47a   : > { %14846 = vmatmul.mubr.msk.bf16.gmra.mrb[12].mxu0 %vm408_vm0, %v18434_v63 }
 0x47b   : > { %6002 = vmatprep.mubr.bf16.mxu0 %v21493_v38 }
 0x482   : > { %14847 = vmatmul.mubr.msk.bf16.vlgmr.msra.gmra.mrb[16].mxu0 %vm408_vm0, %v18432_v54  ;;  %v6121_v54 = vsel %vm6118_vm3, %v21662_v58, %v21666_v10 }
 0x483   : > { %6139 = vmatpush1.bf16.msra.mxu0 %v6119_v46  ;;  %6012 = vmatprep.mubr.bf16.mxu0 %v21493_v38 }
 0x484   : > { %6191 = vmatprep.subr.bf16.mxu0 %v6122_v27 }
 0x48a   : > { %14848 = vmatmul.mubr.msk.bf16.gmra.mrb[20].mxu0 %vm408_vm0, %v18434_v63  ;;  %v21668_v63 = vld [vmem:[#allocation86_spill] sm:$0xff] }
 0x48b   : > { %6170 = vmatprep.mubr.bf16.mxu0 %v21493_v38  ;;  %v6394_v43 = vsel %vm21405_vm2, %v21668_v63, %v18488_v52  ;;  %v6393_v39 = vsel %vm21405_vm2, %v21669_v59, %v21668_v63 }
 0x492   : > { %14851 = vmatmul.mubr.msk.bf16.vlgmr.msra.gmra.mrb[0].mxu0 %vm408_vm0, %v18462_v2 }
 0x493   : > { %6192 = vmatpush1.bf16.msra.mxu0 %v6121_v54  ;;  %6180 = vmatprep.mubr.bf16.mxu0 %v21493_v38 }
 0x494   : > { %6244 = vmatprep.subr.bf16.mxu0 %v6124_v22 }
 0x49a   : > { %14852 = vmatmul.mubr.msk.bf16.gmra.mrb[4].mxu0 %vm408_vm0, %v18464_v12 }
 0x49b   : > { %6223 = vmatprep.mubr.bf16.mxu0 %v21493_v38 }
 0x4a2   : > { %14853 = vmatmul.mubr.msk.bf16.vlgmr.msra.gmra.mrb[8].mxu0 %vm408_vm0, %v18462_v2 }
 0x4a3   : > { %6245 = vmatpush1.bf16.msra.mxu0 %v6123_v36  ;;  %6233 = vmatprep.mubr.bf16.mxu0 %v21493_v38 }
 0x4a4   : > { %6412 = vmatprep.subr.bf16.mxu0 %v6394_v43 }
 0x4aa   : > { %14854 = vmatmul.mubr.msk.bf16.gmra.mrb[12].mxu0 %vm408_vm0, %v18464_v12 }
 0x4ab   : > { %6276 = vmatprep.mubr.bf16.mxu0 %v21493_v38 }
 0x4b2   : > { %14855 = vmatmul.mubr.msk.bf16.vlgmr.msra.gmra.mrb[16].mxu0 %vm408_vm0, %v18462_v2  ;;  %v6395_v2 = vsel %vm21405_vm2, %v18488_v52, %v21671_v61  ;;  %v6397_v52 = vsel %vm21405_vm2, %v21670_v8, %v21672_v4  ;;  %vm6950_vm2 = vcmask 703488  }
 0x4b3   : > { %6413 = vmatpush1.bf16.msra.mxu0 %v6393_v39  ;;  %6286 = vmatprep.mubr.bf16.mxu0 %v21493_v38  ;;  %v6951_v28 = vsel %vm6950_vm2, %v21677_v21, %v21676_v57  ;;  %v6954_v16 = vsel %vm6950_vm2, %v18594_v50, %v18975_v48 }
 0x4b4   : > { %6465 = vmatprep.subr.bf16.mxu0 %v6396_v13 }
 0x4ba   : > { %14856 = vmatmul.mubr.msk.bf16.gmra.mrb[20].mxu0 %vm408_vm0, %v18464_v12  ;;  %v6668_v12 = vsel %vm6666_vm11, %v18518_v51, %v18520_v62  ;;  %v6672_v51 = vsel %vm6666_vm11, %v18556_v0, %v18560_v18 }
 0x4bb   : > { %6444 = vmatprep.mubr.bf16.mxu0 %v21493_v38 }
 0x4c2   : > { %14859 = vmatmul.mubr.msk.bf16.vlgmr.msra.gmra.mrb[0].mxu0 %vm408_vm0, %v18492_v35 }
 0x4c3   : > { %6466 = vmatpush1.bf16.msra.mxu0 %v6395_v2  ;;  %6454 = vmatprep.mubr.bf16.mxu0 %v21493_v38 }
 0x4c4   : > { %6518 = vmatprep.subr.bf16.mxu0 %v6398_v41 }
 0x4ca   : > { %14860 = vmatmul.mubr.msk.bf16.gmra.mrb[4].mxu0 %vm408_vm0, %v18494_v32 }
 0x4cb   : > { %6497 = vmatprep.mubr.bf16.mxu0 %v21493_v38 }
 0x4d2   : > { %14861 = vmatmul.mubr.msk.bf16.vlgmr.msra.gmra.mrb[8].mxu0 %vm408_vm0, %v18492_v35 }
 0x4d3   : > { %6519 = vmatpush1.bf16.msra.mxu0 %v6397_v52  ;;  %6507 = vmatprep.mubr.bf16.mxu0 %v21493_v38 }
 0x4d4   : > { %6686 = vmatprep.subr.bf16.mxu0 %v6668_v12 }
 0x4da   : > { %14862 = vmatmul.mubr.msk.bf16.gmra.mrb[12].mxu0 %vm408_vm0, %v18494_v32 }
 0x4db   : > { %6550 = vmatprep.mubr.bf16.mxu0 %v21493_v38 }
 0x4e2   : > { %14863 = vmatmul.mubr.msk.bf16.vlgmr.msra.gmra.mrb[16].mxu0 %vm408_vm0, %v18492_v35  ;;  %v6669_v35 = vsel %vm6666_vm11, %v18520_v62, %v21674_v25  ;;  %v6671_v62 = vsel %vm6666_vm11, %v18548_v6, %v18556_v0  ;;  %v6956_v0 = vsel %vm6950_vm2, %v18979_v60, %v18791_v29  ;;  %v19287_v6 = vld [vmem:[%s17345_s25] ss:$16 sps:$4 sm:$0xff]  }
 0x4e3   : > { %6687 = vmatpush1.bf16.msra.mxu0 %v6667_v15  ;;  %6560 = vmatprep.mubr.bf16.mxu0 %v21493_v38 }
 0x4e4   : > { %6739 = vmatprep.subr.bf16.mxu0 %v6670_v49  ;;  %7567 = vrot.lane.b32.xlu1 %v19287_v6, %s17251_s9 }
 0x4ea   : > { %14864 = vmatmul.mubr.msk.bf16.gmra.mrb[20].mxu0 %vm408_vm0, %v18494_v32  ;;  %v21675_v32 = vld [vmem:[#allocation13_spill] sm:$0xff] }
 0x4eb   : > { %6718 = vmatprep.mubr.bf16.mxu0 %v21493_v38  ;;  %v6952_v18 = vsel %vm6950_vm2, %v21676_v57, %v21675_v32 }
 0x4f2   : > { %14867 = vmatmul.mubr.msk.bf16.vlgmr.msra.gmra.mrb[0].mxu0 %vm408_vm0, %v18531_v56 }
 0x4f3   : > { %6740 = vmatpush1.bf16.msra.mxu0 %v6669_v35  ;;  %6728 = vmatprep.mubr.bf16.mxu0 %v21493_v38 }
 0x4f4   : > { %6792 = vmatprep.subr.bf16.mxu0 %v6672_v51 }
 0x4fa   : > { %14868 = vmatmul.mubr.msk.bf16.gmra.mrb[4].mxu0 %vm408_vm0, %v18535_v40 }
 0x4fb   : > { %6771 = vmatprep.mubr.bf16.mxu0 %v21493_v38 }
 0x502   : > { %14869 = vmatmul.mubr.msk.bf16.vlgmr.msra.gmra.mrb[8].mxu0 %vm408_vm0, %v18531_v56 }
 0x503   : > { %6793 = vmatpush1.bf16.msra.mxu0 %v6671_v62  ;;  %6781 = vmatprep.mubr.bf16.mxu0 %v21493_v38 }
 0x504   : > { %6970 = vmatprep.subr.bf16.mxu0 %v6952_v18 }
 0x50a   : > { %14870 = vmatmul.mubr.msk.bf16.gmra.mrb[12].mxu0 %vm408_vm0, %v18535_v40 }
 0x50b   : > { %6824 = vmatprep.mubr.bf16.mxu0 %v21493_v38 }
 0x512   : > { %14871 = vmatmul.mubr.msk.bf16.vlgmr.msra.gmra.mrb[16].mxu0 %vm408_vm0, %v18531_v56  ;;  %v6953_v56 = vsel %vm6950_vm2, %v21675_v32, %v18594_v50 }
 0x513   : > { %6971 = vmatpush1.bf16.msra.mxu0 %v6951_v28  ;;  %6834 = vmatprep.mubr.bf16.mxu0 %v21493_v38 }
 0x514   : > { %7023 = vmatprep.subr.bf16.mxu0 %v6954_v16 }
 0x51a   : > { %14872 = vmatmul.mubr.msk.bf16.gmra.mrb[20].mxu0 %vm408_vm0, %v18535_v40  ;;  %v6955_v40 = vsel %vm6950_vm2, %v18975_v48, %v18979_v60 }
 0x51b   : > { %7002 = vmatprep.mubr.bf16.mxu0 %v21493_v38 }
 0x522   : > { %14877 = vmatmul.mubr.msk.bf16.vlgmr.msra.gmra.mrb[0].mxu0 %vm408_vm0, %v18803_v31 }
 0x523   : > { %7024 = vmatpush1.bf16.msra.mxu0 %v6953_v56  ;;  %7012 = vmatprep.mubr.bf16.mxu0 %v21493_v38 }
 0x524   : > { %7076 = vmatprep.subr.bf16.mxu0 %v6956_v0 }
 0x52a   : > { %14878 = vmatmul.mubr.msk.bf16.gmra.mrb[4].mxu0 %vm408_vm0, %v18820_v53 }
 0x52b   : > { %7055 = vmatprep.mubr.bf16.mxu0 %v21493_v38 }
 0x532   : > { %14879 = vmatmul.mubr.msk.bf16.vlgmr.msra.gmra.mrb[8].mxu0 %vm408_vm0, %v18803_v31 }
 0x533   : > { %7077 = vmatpush1.bf16.msra.mxu0 %v6955_v40  ;;  %7065 = vmatprep.mubr.bf16.mxu0 %v21493_v38 }
 0x53a   : > { %14880 = vmatmul.mubr.msk.bf16.gmra.mrb[12].mxu0 %vm408_vm0, %v18820_v53 }
 0x53b   : > { %7108 = vmatprep.mubr.bf16.mxu0 %v21493_v38 }
 0x542   : > { %14881 = vmatmul.mubr.msk.bf16.vlgmr.msra.gmra.mrb[16].mxu0 %vm408_vm0, %v18803_v31 }
 0x543   : > { %7118 = vmatprep.mubr.bf16.mxu0 %v21493_v38 }
 0x54a   : > { %14882 = vmatmul.mubr.msk.bf16.gmra.mrb[20].mxu0 %vm408_vm0, %v18820_v53 }
 0x54b   : > { %7643 = vmatprep.mubr.bf16.mxu0 %v21493_v38 }
 0x5f5   : > { %v7004_v50 = vpop.f32.mrb[0].mxu0 }
 0x5f6   : > { %v7226_v29 = vadd.f32 %v18984_v26, %v7004_v50  ;;  %v7006_v48 = vpop.f32.mrb[1].mxu0 }
 0x5f7   : > { %v7227_v60 = vadd.f32 %v18984_v26, %v7006_v48  ;;  %v7008_v47 = vpop.f32.mrb[2].mxu0 }
 0x5f8   : > { %v14885_v31 = vmul.f32 -1.442695, %v7226_v29  ;;  %v7233_v34 = vadd.f32 %v18995_v19, %v7008_v47  ;;  %v7010_v37 = vpop.f32.mrb[3].mxu0 }
 0x5f9   : > { %v14886_v3 = vmul.f32 -1.442695, %v7227_v60  ;;  %v7234_v53 = vadd.f32 %v18995_v19, %v7010_v37 }
 0x5fa   : > { %17016 = vpow2.f32 %v14885_v31  ;;  %v14892_v1 = vmul.f32 -1.442695, %v7233_v34 }
 0x5fb   : > { %17018 = vpow2.f32 %v14886_v3  ;;  %v14893_v5 = vmul.f32 -1.442695, %v7234_v53 }
 0x5fc   : > { %17020 = vpow2.f32 %v14892_v1 }
 0x5fd   : > { %17022 = vpow2.f32 %v14893_v5  ;;  %v7014_v9 = vpop.f32.mrb[4].mxu0 }
 0x5fe   : > { %v7240_v14 = vadd.f32 %v19000_v23, %v7014_v9  ;;  %v7016_v58 = vpop.f32.mrb[5].mxu0 }
 0x5ff   : > { %v7241_v44 = vadd.f32 %v19000_v23, %v7016_v58  ;;  %v7018_v33 = vpop.f32.mrb[6].mxu0 }
 0x600   : > { %v14899_v11 = vmul.f32 -1.442695, %v7240_v14  ;;  %v7020_v45 = vpop.f32.mrb[7].mxu0  ;;  %v7247_v55 = vadd.f32 %v19006_v24, %v7018_v33 }
 0x601   : > { %v14900_v46 = vmul.f32 -1.442695, %v7241_v44  ;;  %v7248_v10 = vadd.f32 %v19006_v24, %v7020_v45 }
 0x602   : > { %17024 = vpow2.f32 %v14899_v11 }
 0x603   : > { %17026 = vpow2.f32 %v14900_v46 }
 0x604   : > { %v17017_v27 = vpop.eup %17016  ;;  %17028 = vtanh.f32 %v7247_v55 }
 0x605   : > { %v17019_v17 = vpop.eup %17018  ;;  %v7317_v22 = vadd.f32 1.0, %v17017_v27  ;;  %v7057_v54 = vpop.f32.mrb[8].mxu0  ;;  %17030 = vtanh.f32 %v7248_v10 }
 0x606   : > { %v17021_v63 = vpop.eup %17020  ;;  %v7318_v43 = vadd.f32 1.0, %v17019_v17  ;;  %v7228_v36 = vadd.f32 %v18984_v26, %v7057_v54  ;;  %v7059_v59 = vpop.f32.mrb[9].mxu0 }
 0x607   : > { %v17023_v39 = vpop.eup %17022  ;;  %17032 = vrcp.f32 %v7317_v22  ;;  %v7324_v8 = vadd.f32 1.0, %v17021_v63  ;;  %v7229_v61 = vadd.f32 %v18984_v26, %v7059_v59  ;;  %v7061_v13 = vpop.f32.mrb[10].mxu0 }
 0x608   : > { %17034 = vrcp.f32 %v7318_v43  ;;  %v7325_v4 = vadd.f32 1.0, %v17023_v39  ;;  %v14887_v41 = vmul.f32 -1.442695, %v7228_v36  ;;  %v7235_v2 = vadd.f32 %v18995_v19, %v7061_v13  ;;  %v7063_v12 = vpop.f32.mrb[11].mxu0 }
 0x609   : > { %17036 = vrcp.f32 %v7324_v8  ;;  %v14888_v52 = vmul.f32 -1.442695, %v7229_v61  ;;  %v7236_v7 = vadd.f32 %v18995_v19, %v7063_v12  ;;  %v7425_v61 = vsub.s32 0, %v21648_v30 }
 0x60a   : > { %17038 = vrcp.f32 %v7325_v4  ;;  %v14894_v15 = vmul.f32 -1.442695, %v7235_v2  ;;  %v7429_v2 = vsub.s32 1, %v21648_v30 }
 0x60b   : > { %17040 = vpow2.f32 %v14887_v41  ;;  %v14895_v25 = vmul.f32 -1.442695, %v7236_v7 }
 0x60c   : > { %v17025_v49 = vpop.eup %17024  ;;  %17042 = vpow2.f32 %v14888_v52 }
 0x60d   : > { %v17027_v51 = vpop.eup %17026  ;;  %17044 = vpow2.f32 %v14894_v15  ;;  %v7067_v35 = vpop.f32.mrb[12].mxu0  ;;  %v7331_v32 = vadd.f32 1.0, %v17025_v49 }
 0x60e   : > { %17046 = vpow2.f32 %v14895_v25  ;;  %v7242_v57 = vadd.f32 %v19000_v23, %v7067_v35  ;;  %v7069_v18 = vpop.f32.mrb[13].mxu0  ;;  %v17029_v62 = vpop.eup %17028  ;;  %v7332_v21 = vadd.f32 1.0, %v17027_v51 }
 0x60f   : > { %v7243_v28 = vadd.f32 %v19000_v23, %v7069_v18  ;;  %v7071_v16 = vpop.f32.mrb[14].mxu0  ;;  %v17031_v0 = vpop.eup %17030  ;;  %17048 = vrcp.f32 %v7331_v32  ;;  %v7426_v18 = vrot.slane %v19040_v42, %v7425_v61  ;;  %v7437_v61 = vsub.s32 3, %v21648_v30 }
 0x610   : > { %v14901_v56 = vmul.f32 -1.442695, %v7242_v57  ;;  %v7073_v40 = vpop.f32.mrb[15].mxu0  ;;  %v7249_v47 = vadd.f32 %v19006_v24, %v7071_v16  ;;  %17050 = vrcp.f32 %v7332_v21 }
 0x611   : > { %v17033_v50 = vpop.eup %17032  ;;  %v14902_v29 = vmul.f32 -1.442695, %v7243_v28  ;;  %v7250_v37 = vadd.f32 %v19006_v24, %v7073_v40  ;;  %v7430_v28 = vrot.slane %v19040_v42, %v7429_v2 }
 0x612   : > { %v17035_v48 = vpop.eup %17034  ;;  %v7394_v60 = vmul.f32 %v17033_v50, %v17029_v62  ;;  %17052 = vpow2.f32 %v14901_v56 }
 0x613   : > { %v17037_v31 = vpop.eup %17036  ;;  %v7395_v34 = vmul.f32 %v17035_v48, %v17031_v0  ;;  %17054 = vpow2.f32 %v14902_v29 }
 0x614   : > { %v17039_v3 = vpop.eup %17038  ;;  %v7387_v53 = vmul.f32 0.0, %v17037_v31  ;;  %17056 = vtanh.f32 %v7249_v47 }
 0x615   : > { %v17041_v1 = vpop.eup %17040  ;;  %v7388_v5 = vmul.f32 0.0, %v17039_v3  ;;  %v7110_v9 = vpop.f32.mrb[16].mxu0  ;;  %17058 = vtanh.f32 %v7250_v37 }
 0x616   : > { %v17043_v14 = vpop.eup %17042  ;;  %v19307_v58 = vadd.f32 %v7394_v60, %v7387_v53  ;;  %v7319_v44 = vadd.f32 1.0, %v17041_v1  ;;  %v7230_v33 = vadd.f32 %v18984_v26, %v7110_v9  ;;  %v7112_v11 = vpop.f32.mrb[17].mxu0 }
 0x617   : > { %v17045_v45 = vpop.eup %17044  ;;  %v19310_v46 = vadd.f32 %v7395_v34, %v7388_v5  ;;  %v7320_v55 = vadd.f32 1.0, %v17043_v14  ;;  %v7114_v10 = vpop.f32.mrb[18].mxu0  ;;  %v7231_v63 = vadd.f32 %v18984_v26, %v7112_v11 }
 0x618   : > { %21678 = vst [vmem:[#allocation12_spill] sm:$0xff] %v19307_v58  ;;  %v17047_v27 = vpop.eup %17046  ;;  %17060 = vtanh.f32 %v19307_v58  ;;  %v7326_v17 = vadd.f32 1.0, %v17045_v45  ;;  %v7116_v22 = vpop.f32.mrb[19].mxu0  ;;  %v14889_v43 = vmul.f32 -1.442695, %v7230_v33  ;;  %v7237_v36 = vadd.f32 %v18995_v19, %v7114_v10 }
 0x619   : > { %21679 = vst [vmem:[#allocation17_spill] sm:$0xff] %v19310_v46  ;;  %17062 = vtanh.f32 %v19310_v46  ;;  %v7327_v54 = vadd.f32 1.0, %v17047_v27  ;;  %v7238_v59 = vadd.f32 %v18995_v19, %v7116_v22  ;;  %v17049_v39 = vpop.eup %17048  ;;  %v14890_v13 = vmul.f32 -1.442695, %v7231_v63 }
 0x61a   : > { %17064 = vrcp.f32 %v7319_v44  ;;  %v17051_v8 = vpop.eup %17050  ;;  %v14896_v12 = vmul.f32 -1.442695, %v7237_v36 }
 0x61b   : > { %17066 = vrcp.f32 %v7320_v55  ;;  %v14897_v15 = vmul.f32 -1.442695, %v7238_v59 }
 0x61c   : > { %17068 = vrcp.f32 %v7326_v17  ;;  %v17053_v41 = vpop.eup %17052 }
 0x61d   : > { %17070 = vrcp.f32 %v7327_v54  ;;  %v7120_v4 = vpop.f32.mrb[20].mxu0  ;;  %v17055_v7 = vpop.eup %17054  ;;  %v7333_v62 = vadd.f32 1.0, %v17053_v41 }
 0x61e   : > { %17072 = vpow2.f32 %v14889_v43  ;;  %v7122_v52 = vpop.f32.mrb[21].mxu0  ;;  %v7244_v25 = vadd.f32 %v19000_v23, %v7120_v4  ;;  %v17057_v51 = vpop.eup %17056  ;;  %v7334_v16 = vadd.f32 1.0, %v17055_v7 }
 0x61f   : > { %v7124_v49 = vpop.f32.mrb[22].mxu0  ;;  %v7245_v35 = vadd.f32 %v19000_v23, %v7122_v52  ;;  %v17059_v57 = vpop.eup %17058  ;;  %17074 = vpow2.f32 %v14890_v13  ;;  %v7438_v52 = vrot.slane %v19040_v42, %v7437_v61  ;;  %v19496_v61 = vld [vmem:[%s17345_s25 + $0x4] ss:$16 sps:$4 sm:$0xff]  }
 0x620   : > { %v7126_v32 = vpop.f32.mrb[23].mxu0  ;;  %17076 = vpow2.f32 %v14896_v12  ;;  %v14903_v40 = vmul.f32 -1.442695, %v7244_v25  ;;  %v7251_v34 = vadd.f32 %v19006_v24, %v7124_v49 }
 0x621   : > { %17078 = vpow2.f32 %v14897_v15  ;;  %v14904_v48 = vmul.f32 -1.442695, %v7245_v35  ;;  %v7252_v1 = vadd.f32 %v19006_v24, %v7126_v32 }
 0x622   : > { %v17061_v21 = vpop.eup %17060  ;;  %17080 = vrcp.f32 %v7333_v62 }
 0x623   : > { %v17063_v0 = vpop.eup %17062  ;;  %v7415_v56 = vmul.f32 %v17061_v21, %v17049_v39  ;;  %17082 = vrcp.f32 %v7334_v16  ;;  %v7433_v39 = vsub.s32 2, %v21648_v30 }
 0x624   : > { %v17065_v50 = vpop.eup %17064  ;;  %v7416_v29 = vmul.f32 %v17063_v0, %v17051_v8  ;;  %17084 = vpow2.f32 %v14903_v40 }
 0x625   : > { %v17067_v60 = vpop.eup %17066  ;;  %v7458_v47 = vmul.f32 %v7426_v18, %v7415_v56  ;;  %v7396_v31 = vmul.f32 %v17065_v50, %v17057_v51  ;;  %17086 = vpow2.f32 %v14904_v48  ;;  %v7434_v2 = vrot.slane %v19040_v42, %v7433_v39 }
 0x626   : > { %v17069_v37 = vpop.eup %17068  ;;  %v7459_v3 = vmul.f32 %v7430_v28, %v7416_v29  ;;  %v7397_v53 = vmul.f32 %v17067_v60, %v17059_v57  ;;  %17088 = vtanh.f32 %v7251_v34  ;;  %v7441_v60 = vsub.s32 4, %v21648_v30  ;;  %v19343_v34 = vpop.permute.xlu1 %7567 }
 0x627   : > { %v17071_v5 = vpop.eup %17070  ;;  %v7465_v9 = vpack.c.bf16 %v7458_v47, %v7458_v47  ;;  %v7389_v14 = vmul.f32 0.0, %v17069_v37  ;;  %17090 = vtanh.f32 %v7252_v1  ;;  %v7445_v47 = vsub.s32 5, %v21648_v30  ;;  %15446 = vmatprep.mubr.msk.bf16.mxu1 %vm408_vm0, %v19343_v34 }
 0x628   : > { %v17073_v44 = vpop.eup %17072  ;;  %v7466_v33 = vpack.c.bf16 %v7459_v3, %v7459_v3  ;;  %v7390_v11 = vmul.f32 0.0, %v17071_v5  ;;  %v7442_v3 = vrot.slane %v19040_v42, %v7441_v60 }
 0x629   : > { %7472 = vst [vmem:[#allocation2 + $0x8] sm:$0xf] %v7465_v9  ;;  %v19325_v45 = vadd.f32 %v7396_v31, %v7389_v14  ;;  %v7321_v55 = vadd.f32 1.0, %v17073_v44  ;;  %v17075_v27 = vpop.eup %17074  ;;  %v7446_v1 = vrot.slane %v19040_v42, %v7445_v47 }
 0x62a   : > { %7473 = vst [vmem:[#allocation2 + $0x10] sm:$0xf] %v7466_v33  ;;  %v19327_v10 = vadd.f32 %v7397_v53, %v7390_v11  ;;  %v17077_v17 = vpop.eup %17076  ;;  %v7322_v22 = vadd.f32 1.0, %v17075_v27  ;;  %v19356_v27 = vld [vmem:[%s17345_s25 + $0x20] ss:$16 sps:$4 sm:$0xff]  }
 0x62b   : > { %21680 = vst [vmem:[#allocation15_spill] sm:$0xff] %v19325_v45  ;;  %17092 = vtanh.f32 %v19325_v45  ;;  %v17079_v54 = vpop.eup %17078  ;;  %v7328_v63 = vadd.f32 1.0, %v17077_v17 }
 0x62c   : > { %21681 = vst [vmem:[#allocation14_spill] sm:$0xff] %v19327_v10  ;;  %17094 = vtanh.f32 %v19327_v10  ;;  %v7329_v43 = vadd.f32 1.0, %v17079_v54  ;;  %v17081_v36 = vpop.eup %17080 }
 0x62d   : > { %17096 = vrcp.f32 %v7321_v55  ;;  %v17083_v59 = vpop.eup %17082 }
 0x62e   : > { %17098 = vrcp.f32 %v7322_v22  ;;  %v17085_v8 = vpop.eup %17084  ;;  %v19382_v22 = vld [vmem:[#allocation2] sm:$0xff] }
 0x62f   : > { %17100 = vrcp.f32 %v7328_v63  ;;  %v17087_v13 = vpop.eup %17086  ;;  %v7335_v32 = vadd.f32 1.0, %v17085_v8 }
 0x630   : > { %17102 = vrcp.f32 %v7329_v43  ;;  %v17089_v4 = vpop.eup %17088  ;;  %v7336_v21 = vadd.f32 1.0, %v17087_v13  ;;  %v19376_v17 = vld [vmem:[#allocation2 + $0x8] sm:$0xff] }
 0x631   : > { %v17091_v41 = vpop.eup %17090  ;;  %17104 = vrcp.f32 %v7335_v32  ;;  %v19370_v42 = vld [vmem:[#allocation2 + $0x10] sm:$0xff] }
 0x632   : > { %17106 = vrcp.f32 %v7336_v21 }
 0x635   : > { %v17093_v12 = vpop.eup %17092 }
 0x636   : > { %v17095_v7 = vpop.eup %17094  ;;  %v7417_v15 = vmul.f32 %v17093_v12, %v17081_v36  ;;  %v19422_v36 = vld [vmem:[#allocation2 + $0x38] sm:$0xff] }
 0x637   : > { %v17097_v25 = vpop.eup %17096  ;;  %v7418_v49 = vmul.f32 %v17095_v7, %v17083_v59  ;;  %v19485_v59 = vld [vmem:[%s17345_s25 + $0x24] ss:$16 sps:$4 sm:$0xff]  }
 0x638   : > { %v17099_v51 = vpop.eup %17098  ;;  %v7460_v35 = vmul.f32 %v7434_v2, %v7417_v15  ;;  %v7398_v57 = vmul.f32 %v17097_v25, %v17089_v4 }
 0x639   : > { %v17101_v18 = vpop.eup %17100  ;;  %v7461_v62 = vmul.f32 %v7438_v52, %v7418_v49  ;;  %v7399_v28 = vmul.f32 %v17099_v51, %v17091_v41 }
 0x63a   : > { %v17103_v16 = vpop.eup %17102  ;;  %v7467_v0 = vpack.c.bf16 %v7460_v35, %v7460_v35  ;;  %v7391_v56 = vmul.f32 0.0, %v17101_v18 }
 0x63b   : > { %v7468_v40 = vpack.c.bf16 %v7461_v62, %v7461_v62  ;;  %v7392_v50 = vmul.f32 0.0, %v17103_v16  ;;  %v17105_v31 = vpop.eup %17104 }
 0x63c   : > { %7474 = vst [vmem:[#allocation2 + $0x18] sm:$0xf] %v7467_v0  ;;  %v19335_v29 = vadd.f32 %v7398_v57, %v7391_v56  ;;  %v17107_v37 = vpop.eup %17106 }
 0x63d   : > { %7475 = vst [vmem:[#allocation2 + $0x20] sm:$0xf] %v7468_v40  ;;  %v19337_v48 = vadd.f32 %v7399_v28, %v7392_v50 }
 0x63e   : > { %21682 = vst [vmem:[#allocation16_spill] sm:$0xff] %v19335_v29  ;;  %17108 = vtanh.f32 %v19335_v29 }
 0x63f   : > { %21683 = vst [vmem:[#allocation19_spill] sm:$0xff] %v19337_v48  ;;  %17110 = vtanh.f32 %v19337_v48 }
 0x643   : > { %v19384_v54 = vld [vmem:[#allocation2 + $0x18] sm:$0xff] }
 0x644   : > { %v19396_v43 = vld [vmem:[#allocation2 + $0x20] sm:$0xff] }
 0x648   : > { %v17109_v53 = vpop.eup %17108 }
 0x649   : > { %v17111_v5 = vpop.eup %17110  ;;  %v7419_v9 = vmul.f32 %v17109_v53, %v17105_v31 }
 0x64a   : > { %v7420_v14 = vmul.f32 %v17111_v5, %v17107_v37 }
 0x64b   : > { %v7462_v44 = vmul.f32 %v7442_v3, %v7419_v9 }
 0x64c   : > { %v7463_v33 = vmul.f32 %v7446_v1, %v7420_v14 }
 0x64d   : > { %v7469_v11 = vpack.c.bf16 %v7462_v44, %v7462_v44 }
 0x64e   : > { %v7470_v30 = vpack.c.bf16 %v7463_v33, %v7463_v33 }
 0x64f   : > { %7476 = vst [vmem:[#allocation2 + $0x28] sm:$0xf] %v7469_v11 }
 0x650   : > { %7477 = vst [vmem:[#allocation2 + $0x30] sm:$0xf] %v7470_v30 }
 0x656   : > { %v19390_v63 = vld [vmem:[#allocation2 + $0x28] sm:$0xff] }
 0x657   : > { %v19349_v55 = vld [vmem:[#allocation2 + $0x30] sm:$0xff] }
 0x658   : > { %7831 = vrot.lane.b32.xlu1 %v19349_v55, %s17252_s10  ;;  %7590 = vrot.lane.b32.xlu0 %v19349_v55, %s17250_s8 }
 0x65c   : > { %8060 = vrot.lane.b32.xlu1 %v19287_v6, %s17254_s12  ;;  %7569 = vrot.lane.b32.xlu0 %v19356_v27, %s17251_s9 }
 0x660   : > { %8349 = vrot.lane.b32.xlu1 %v19349_v55, %s17255_s13  ;;  %8076 = vrot.lane.b32.xlu0 %v19349_v55, %s17253_s11 }
 0x664   : > { %8335 = vrot.lane.b32.xlu1 %v19356_v27, %s17256_s14  ;;  %8062 = vrot.lane.b32.xlu0 %v19356_v27, %s17254_s12 }
 0x668   : > { %8333 = vrot.lane.b32.xlu0 %v19287_v6, %s17256_s14  ;;  %8614 = vrot.lane.b32.xlu1 %v19370_v42, %s17257_s15 }
 0x66c   : > { %8612 = vrot.lane.b32.xlu0 %v19376_v17, %s17257_s15  ;;  %8606 = vrot.lane.b32.xlu1 %v19287_v6, %s17258_s16 }
 0x670   : > { %8610 = vrot.lane.b32.xlu0 %v19382_v22, %s17257_s15  ;;  %8616 = vrot.lane.b32.xlu1 %v19384_v54, %s17257_s15 }
 0x674   : > { %8608 = vrot.lane.b32.xlu0 %v19356_v27, %s17258_s16  ;;  %8620 = vrot.lane.b32.xlu1 %v19390_v63, %s17257_s15 }
 0x678   : > { %8618 = vrot.lane.b32.xlu0 %v19396_v43, %s17257_s15  ;;  %8901 = vrot.lane.b32.xlu1 %v19376_v17, %s17259_s17 }
 0x67c   : > { %8622 = vrot.lane.b32.xlu0 %v19349_v55, %s17257_s15  ;;  %8899 = vrot.lane.b32.xlu1 %v19382_v22, %s17259_s17  ;;  %s21691_s15 = smov 1  }
 0x680   : > { %8903 = vrot.lane.b32.xlu0 %v19370_v42, %s17259_s17  ;;  %8889 = vrot.lane.b32.xlu1 %v19356_v27, %s17260_s20 }
 0x684   : > { %8887 = vrot.lane.b32.xlu0 %v19287_v6, %s17260_s20  ;;  %8907 = vrot.lane.b32.xlu1 %v19396_v43, %s17259_s17 }
 0x688   : > { %8905 = vrot.lane.b32.xlu0 %v19384_v54, %s17259_s17  ;;  %8911 = vrot.lane.b32.xlu1 %v19349_v55, %s17259_s17 }
 0x68c   : > { %8909 = vrot.lane.b32.xlu0 %v19390_v63, %s17259_s17  ;;  %9177 = vrot.lane.b32.xlu1 %v19376_v17, %s17261_s21 }
 0x690   : > { %8913 = vrot.lane.b32.xlu0 %v19422_v36, %s17259_s17  ;;  %9175 = vrot.lane.b32.xlu1 %v19382_v22, %s17261_s21  ;;  %s21692_s17 = smov 127  }
 0x694   : > { %9179 = vrot.lane.b32.xlu0 %v19370_v42, %s17261_s21  ;;  %9173 = vrot.lane.b32.xlu1 %v19356_v27, %s17262_s22 }
 0x698   : > { %9171 = vrot.lane.b32.xlu0 %v19287_v6, %s17262_s22  ;;  %9183 = vrot.lane.b32.xlu1 %v19396_v43, %s17261_s21 }
 0x69c   : > { %9181 = vrot.lane.b32.xlu0 %v19384_v54, %s17261_s21  ;;  %9187 = vrot.lane.b32.xlu1 %v19349_v55, %s17261_s21 }
 0x6a0   : > { %9185 = vrot.lane.b32.xlu0 %v19390_v63, %s17261_s21  ;;  %9453 = vrot.lane.b32.xlu1 %v19376_v17, %s17263_s23 }
 0x6a4   : > { %9189 = vrot.lane.b32.xlu0 %v19422_v36, %s17261_s21  ;;  %9451 = vrot.lane.b32.xlu1 %v19382_v22, %s17263_s23  ;;  %s21693_s21 = smov 126  }
 0x6a8   : > { %9455 = vrot.lane.b32.xlu0 %v19370_v42, %s17263_s23  ;;  %9449 = vrot.lane.b32.xlu1 %v19356_v27, %s17264_s24 }
 0x6ac   : > { %9447 = vrot.lane.b32.xlu0 %v19287_v6, %s17264_s24  ;;  %9459 = vrot.lane.b32.xlu1 %v19396_v43, %s17263_s23 }
 0x6b0   : > { %9457 = vrot.lane.b32.xlu0 %v19384_v54, %s17263_s23  ;;  %9463 = vrot.lane.b32.xlu1 %v19349_v55, %s17263_s23 }
 0x6b4   : > { %9461 = vrot.lane.b32.xlu0 %v19390_v63, %s17263_s23  ;;  %9739 = vrot.lane.b32.xlu1 %v19376_v17, %s17265_s26 }
 0x6b8   : > { %9465 = vrot.lane.b32.xlu0 %v19422_v36, %s17263_s23  ;;  %9737 = vrot.lane.b32.xlu1 %v19382_v22, %s17265_s26  ;;  %s21694_s23 = smov 110  }
 0x6bc   : > { %9741 = vrot.lane.b32.xlu0 %v19370_v42, %s17265_s26  ;;  %9745 = vrot.lane.b32.xlu1 %v19396_v43, %s17265_s26 }
 0x6c0   : > { %9743 = vrot.lane.b32.xlu0 %v19384_v54, %s17265_s26  ;;  %9749 = vrot.lane.b32.xlu1 %v19349_v55, %s17265_s26 }
 0x6c4   : > { %9747 = vrot.lane.b32.xlu0 %v19390_v63, %s17265_s26  ;;  %10015 = vrot.lane.b32.xlu1 %v19376_v17, %s17266_s27 }
 0x6c8   : > { %9751 = vrot.lane.b32.xlu0 %v19422_v36, %s17265_s26  ;;  %10013 = vrot.lane.b32.xlu1 %v19382_v22, %s17266_s27  ;;  %s21695_s26 = smov 109  }
 0x6ca   : > { %v19487_v39 = vpop.permute.xlu1 %7831  ;;  %v19489_v8 = vpop.permute.xlu0 %7590 }
 0x6cb   : > { %21684 = vst [vmem:[#allocation18_spill] sm:$0xff] %v19487_v39  ;;  %15444 = vmatprep.subr.bf16.mxu1 %v19489_v8 }
 0x6cc   : > { %15445 = vmatpush3.bf16.msra.mxu1 %v19489_v8  ;;  %10017 = vrot.lane.b32.xlu0 %v19370_v42, %s17266_s27 }
 0x6cd   : > { %10011 = vrot.lane.b32.xlu1 %v19485_v59, %s17251_s9  ;;  %15450 = vmatprep.subr.bf16.mxu1 %v19487_v39 }
 0x6ce   : > { %v19501_v13 = vpop.permute.xlu1 %8060  ;;  %v19503_v4 = vpop.permute.xlu0 %7569 }
 0x6cf   : > { %21685 = vst [vmem:[#allocation20_spill] sm:$0xff] %v19501_v13  ;;  %15447 = vmatmul.mubr.msk.bf16.vlgmr.msra.gmra.mrb[4].mxu1 %vm408_vm0, %v19503_v4 }
 0x6d0   : > { %15451 = vmatpush3.bf16.msra.mxu1 %v19487_v39  ;;  %10009 = vrot.lane.b32.xlu0 %v19496_v61, %s17251_s9 }
 0x6d1   : > { %10021 = vrot.lane.b32.xlu1 %v19396_v43, %s17266_s27  ;;  %15452 = vmatprep.mubr.msk.bf16.mxu1 %vm408_vm0, %v19287_v6 }
 0x6d2   : > { %v19514_v41 = vpop.permute.xlu1 %8349  ;;  %v19516_v2 = vpop.permute.xlu0 %8076 }
 0x6d3   : > { %21686 = vst [vmem:[#allocation42_spill] sm:$0xff] %v19514_v41  ;;  %21687 = vst [vmem:[#allocation22_spill] sm:$0xff] %v19516_v2  ;;  %15456 = vmatprep.subr.bf16.mxu1 %v19516_v2 }
 0x6d4   : > { %10019 = vrot.lane.b32.xlu0 %v19384_v54, %s17266_s27 }
 0x6d5   : > { %10025 = vrot.lane.b32.xlu1 %v19349_v55, %s17266_s27 }
 0x6d6   : > { %v19523_v12 = vpop.permute.xlu1 %8335  ;;  %v19525_v52 = vpop.permute.xlu0 %8062 }
 0x6d7   : > { %21688 = vst [vmem:[#allocation21_spill] sm:$0xff] %v19523_v12  ;;  %21689 = vst [vmem:[#allocation23_spill] sm:$0xff] %v19525_v52 }
 0x6d8   : > { %10023 = vrot.lane.b32.xlu0 %v19390_v63, %s17266_s27 }
 0x6d9   : > { %10291 = vrot.lane.b32.xlu1 %v19376_v17, %s17267_s28 }
 0x6da   : > { %v19531_v6 = vpop.permute.xlu0 %8333  ;;  %v8615_v7 = vpop.permute.xlu1 %8614 }
 0x6db   : > { %21690 = vst [vmem:[#allocation25_spill] sm:$0xff] %v19531_v6  ;;  %15453 = vmatmul.mubr.msk.bf16.vlgmr.msra.gmra.mrb[4].mxu1 %vm408_vm0, %v19356_v27 }
 0x6dc   : > { %15457 = vmatpush3.bf16.msra.mxu1 %v19516_v2  ;;  %10027 = vrot.lane.b32.xlu0 %v19422_v36, %s17266_s27  ;;  %s21696_s27 = smov 108  }
 0x6dd   : > { %15462 = vmatprep.subr.bf16.mxu1 %v19514_v41  ;;  %10289 = vrot.lane.b32.xlu1 %v19382_v22, %s17267_s28 }
 0x6de   : > { %v8613_v15 = vpop.permute.xlu0 %8612  ;;  %v19541_v25 = vpop.permute.xlu1 %8606  ;;  %15458 = vmatprep.mubr.msk.bf16.mxu1 %vm408_vm0, %v19501_v13 }
 0x6df   : > { %v8625_v57 = vsel %vm1431_vm5, %v8613_v15, %v8615_v7 }
 0x6e0   : > { %10293 = vrot.lane.b32.xlu0 %v19370_v42, %s17267_s28 }
 0x6e1   : > { %10287 = vrot.lane.b32.xlu1 %v19485_v59, %s17254_s12 }
 0x6e2   : > { %v8611_v49 = vpop.permute.xlu0 %8610  ;;  %v8617_v51 = vpop.permute.xlu1 %8616 }
 0x6e3   : > { %v8624_v56 = vsel %vm1431_vm5, %v8611_v49, %v8613_v15  ;;  %v8626_v37 = vsel %vm1431_vm5, %v8615_v7, %v8617_v51 }
 0x6e4   : > { %10285 = vrot.lane.b32.xlu0 %v19496_v61, %s17254_s12 }
 0x6e5   : > { %10297 = vrot.lane.b32.xlu1 %v19396_v43, %s17267_s28 }
 0x6e6   : > { %v19553_v35 = vpop.permute.xlu0 %8608  ;;  %v8621_v32 = vpop.permute.xlu1 %8620 }
 0x6e7   : > { %15459 = vmatmul.mubr.msk.bf16.vlgmr.msra.gmra.mrb[4].mxu1 %vm408_vm0, %v19525_v52 }
 0x6e8   : > { %15463 = vmatpush3.bf16.msra.mxu1 %v19514_v41  ;;  %10295 = vrot.lane.b32.xlu0 %v19384_v54, %s17267_s28  ;;  %v19839_v41 = vld [vmem:[%s17345_s25 + $0x8] ss:$16 sps:$4 sm:$0xff]  }
 0x6e9   : > { %10301 = vrot.lane.b32.xlu1 %v19349_v55, %s17267_s28  ;;  %8643 = vmatprep.subr.bf16.mxu1 %v8625_v57 }
 0x6ea   : > { %v8619_v18 = vpop.permute.xlu0 %8618  ;;  %v19563_v62 = vpop.permute.xlu1 %8901  ;;  %15464 = vmatprep.mubr.msk.bf16.mxu1 %vm408_vm0, %v19531_v6 }
 0x6eb   : > { %v8627_v40 = vsel %vm1431_vm5, %v8617_v51, %v8619_v18  ;;  %v8628_v30 = vsel %vm1431_vm5, %v8619_v18, %v8621_v32 }
 0x6ec   : > { %10299 = vrot.lane.b32.xlu0 %v19390_v63, %s17267_s28 }
 0x6ed   : > { %10567 = vrot.lane.b32.xlu1 %v19376_v17, %s21691_s15 }
 0x6ee   : > { %v19571_v21 = vpop.permute.xlu0 %8622  ;;  %v19573_v28 = vpop.permute.xlu1 %8899 }
 0x6ef   : > { %v8629_v3 = vsel %vm1431_vm5, %v8621_v32, %v19571_v21  ;;  %vm21770_vm5 = vcmask 719872  }
 0x6f0   : > { %10303 = vrot.lane.b32.xlu0 %v19422_v36, %s17267_s28  ;;  %s21720_s28 = smov 89  }
 0x6f1   : > { %10565 = vrot.lane.b32.xlu1 %v19382_v22, %s21691_s15 }
 0x6f2   : > { %v19579_v16 = vpop.permute.xlu0 %8903  ;;  %v19581_v0 = vpop.permute.xlu1 %8889 }
 0x6f3   : > { %15465 = vmatmul.mubr.msk.bf16.vlgmr.msra.gmra.mrb[4].mxu1 %vm408_vm0, %v19523_v12 }
 0x6f4   : > { %8644 = vmatpush1.bf16.msra.mxu1 %v8624_v56  ;;  %10569 = vrot.lane.b32.xlu0 %v19370_v42, %s21691_s15  ;;  %v8916_v56 = vsel %vm1723_vm6, %v19563_v62, %v19579_v16 }
 0x6f5   : > { %10563 = vrot.lane.b32.xlu1 %v19485_v59, %s17256_s14  ;;  %8696 = vmatprep.subr.bf16.mxu1 %v8627_v40 }
 0x6f6   : > { %v19591_v50 = vpop.permute.xlu0 %8887  ;;  %v19593_v60 = vpop.permute.xlu1 %8907  ;;  %8675 = vmatprep.mubr.bf16.mxu1 %v21493_v38 }
 0x6f8   : > { %10561 = vrot.lane.b32.xlu0 %v19496_v61, %s17256_s14 }
 0x6f9   : > { %10573 = vrot.lane.b32.xlu1 %v19396_v43, %s21691_s15 }
 0x6fa   : > { %v19600_v47 = vpop.permute.xlu0 %8905  ;;  %v19602_v31 = vpop.permute.xlu1 %8911 }
 0x6fb   : > { %14945 = vmatmul.mubr.msk.bf16.vlgmr.msra.gmra.mrb[8].mxu1 %vm408_vm0, %v19541_v25  ;;  %v8918_v29 = vsel %vm1723_vm6, %v19600_v47, %v19593_v60 }
 0x6fc   : > { %8697 = vmatpush1.bf16.msra.mxu1 %v8626_v37  ;;  %10571 = vrot.lane.b32.xlu0 %v19384_v54, %s21691_s15 }
 0x6fd   : > { %10577 = vrot.lane.b32.xlu1 %v19349_v55, %s21691_s15  ;;  %8749 = vmatprep.subr.bf16.mxu1 %v8629_v3 }
 0x6fe   : > { %v19613_v53 = vpop.permute.xlu0 %8909  ;;  %v19615_v1 = vpop.permute.xlu1 %9177  ;;  %8685 = vmatprep.mubr.bf16.mxu1 %v21493_v38 }
 0x6ff   : > { %v8919_v23 = vsel %vm1723_vm6, %v19593_v60, %v19613_v53 }
 0x700   : > { %10575 = vrot.lane.b32.xlu0 %v19390_v63, %s21691_s15 }
 0x701   : > { %10837 = vrot.lane.b32.xlu1 %v19496_v61, %s17258_s16 }
 0x702   : > { %v19622_v5 = vpop.permute.xlu0 %8913  ;;  %v19624_v9 = vpop.permute.xlu1 %9175 }
 0x703   : > { %14946 = vmatmul.mubr.msk.bf16.gmra.mrb[12].mxu1 %vm408_vm0, %v19553_v35  ;;  %v8921_v19 = vsel %vm1723_vm6, %v19602_v31, %v19622_v5 }
 0x704   : > { %10579 = vrot.lane.b32.xlu0 %v19422_v36, %s21691_s15  ;;  %8728 = vmatprep.mubr.bf16.mxu1 %v21493_v38 }
 0x705   : > { %11089 = vrot.lane.b32.xlu1 %v19370_v42, %s21692_s17 }
 0x706   : > { %v19633_v14 = vpop.permute.xlu0 %9179  ;;  %v19635_v44 = vpop.permute.xlu1 %9173 }
 0x707   : > { %v9192_v2 = vsel %vm2000_vm7, %v19615_v1, %v19633_v14 }
 0x708   : > { %10839 = vrot.lane.b32.xlu0 %v19485_v59, %s17258_s16 }
 0x709   : > { %11087 = vrot.lane.b32.xlu1 %v19376_v17, %s21692_s17 }
 0x70a   : > { %v19641_v33 = vpop.permute.xlu0 %9171  ;;  %v19643_v11 = vpop.permute.xlu1 %9183 }
 0x70b   : > { %14947 = vmatmul.mubr.msk.bf16.vlgmr.msra.gmra.mrb[16].mxu1 %vm408_vm0, %v19541_v25 }
 0x70c   : > { %8750 = vmatpush1.bf16.msra.mxu1 %v8628_v30  ;;  %11091 = vrot.lane.b32.xlu0 %v19384_v54, %s21692_s17 }
 0x70d   : > { %11085 = vrot.lane.b32.xlu1 %v19485_v59, %s17260_s20  ;;  %15468 = vmatprep.subr.bf16.mxu1 %v19571_v21 }
 0x70e   : > { %v19653_v27 = vpop.permute.xlu0 %9181  ;;  %v19655_v7 = vpop.permute.xlu1 %9187  ;;  %8738 = vmatprep.mubr.bf16.mxu1 %v21493_v38 }
 0x710   : > { %11083 = vrot.lane.b32.xlu0 %v19496_v61, %s17260_s20 }
 0x711   : > { %11095 = vrot.lane.b32.xlu1 %v19390_v63, %s21692_s17 }
 0x712   : > { %v19662_v15 = vpop.permute.xlu0 %9185  ;;  %v19664_v49 = vpop.permute.xlu1 %9453 }
 0x713   : > { %14948 = vmatmul.mubr.msk.bf16.gmra.mrb[20].mxu1 %vm408_vm0, %v19553_v35 }
 0x714   : > { %11093 = vrot.lane.b32.xlu0 %v19396_v43, %s21692_s17  ;;  %8781 = vmatprep.mubr.bf16.mxu1 %v21493_v38 }
 0x715   : > { %11099 = vrot.lane.b32.xlu1 %v19422_v36, %s21692_s17 }
 0x716   : > { %v19673_v51 = vpop.permute.xlu0 %9189  ;;  %v19675_v32 = vpop.permute.xlu1 %9451 }
 0x718   : > { %11097 = vrot.lane.b32.xlu0 %v19349_v55, %s21692_s17 }
 0x719   : > { %11364 = vrot.lane.b32.xlu1 %v19384_v54, %s21693_s21 }
 0x71a   : > { %v19681_v57 = vpop.permute.xlu0 %9455  ;;  %v19683_v18 = vpop.permute.xlu1 %9449 }
 0x71b   : > { %14949 = vmatmul.mubr.msk.bf16.vlgmr.msra.gmra.mrb[24].mxu1 %vm408_vm0, %v19541_v25 }
 0x71c   : > { %15469 = vmatpush3.bf16.msra.mxu1 %v19571_v21  ;;  %11362 = vrot.lane.b32.xlu0 %v19370_v42, %s21693_s21 }
 0x71d   : > { %11356 = vrot.lane.b32.xlu1 %v19496_v61, %s17262_s22  ;;  %8935 = vmatprep.subr.bf16.mxu1 %v8916_v56 }
 0x71e   : > { %v19695_v40 = vpop.permute.xlu0 %9447  ;;  %v19697_v37 = vpop.permute.xlu1 %9459  ;;  %8791 = vmatprep.mubr.bf16.mxu1 %v21493_v38 }
 0x720   : > { %11360 = vrot.lane.b32.xlu0 %v19376_v17, %s21693_s21 }
 0x721   : > { %11366 = vrot.lane.b32.xlu1 %v19396_v43, %s21693_s21 }
 0x722   : > { %v19704_v21 = vpop.permute.xlu0 %9457  ;;  %v19706_v3 = vpop.permute.xlu1 %9463 }
 0x723   : > { %14950 = vmatmul.mubr.msk.bf16.gmra.mrb[28].mxu1 %vm408_vm0, %v19553_v35 }
 0x724   : > { %11358 = vrot.lane.b32.xlu0 %v19485_v59, %s17262_s22  ;;  %15470 = vmatprep.mubr.msk.bf16.mxu1 %vm408_vm0, %v19541_v25  ;;  %v8915_v25 = vsel %vm1723_vm6, %v19573_v28, %v19563_v62  ;;  %v8920_v28 = vsel %vm1723_vm6, %v19613_v53, %v19602_v31  ;;  %v19830_v31 = vld [vmem:[%s17345_s25 + $0x28] ss:$16 sps:$4 sm:$0xff]  }
 0x725   : > { %11370 = vrot.lane.b32.xlu1 %v19349_v55, %s21693_s21 }
 0x726   : > { %v19716_v30 = vpop.permute.xlu0 %9461  ;;  %v19718_v56 = vpop.permute.xlu1 %9739 }
 0x728   : > { %11368 = vrot.lane.b32.xlu0 %v19390_v63, %s21693_s21 }
 0x729   : > { %11635 = vrot.lane.b32.xlu1 %v19370_v42, %s21694_s23 }
 0x72a   : > { %v19724_v20 = vpop.permute.xlu0 %9465  ;;  %v19726_v48 = vpop.permute.xlu1 %9737 }
 0x72b   : > { %15471 = vmatmul.mubr.msk.bf16.vlgmr.msra.gmra.mrb[4].mxu1 %vm408_vm0, %v19553_v35 }
 0x72c   : > { %8936 = vmatpush1.bf16.msra.mxu1 %v8915_v25  ;;  %11372 = vrot.lane.b32.xlu0 %v19422_v36, %s21693_s21 }
 0x72d   : > { %11633 = vrot.lane.b32.xlu1 %v19376_v17, %s21694_s23  ;;  %8988 = vmatprep.subr.bf16.mxu1 %v8918_v29  ;;  %v8917_v29 = vsel %vm1723_vm6, %v19579_v16, %v19600_v47  ;;  %vm21772_vm6 = vmmov %vm21770_vm5 }
 0x72e   : > { %v19740_v10 = vpop.permute.xlu0 %9741  ;;  %v19742_v45 = vpop.permute.xlu1 %9745  ;;  %8967 = vmatprep.mubr.bf16.mxu1 %v21493_v38 }
 0x730   : > { %11637 = vrot.lane.b32.xlu0 %v19384_v54, %s21694_s23 }
 0x731   : > { %11631 = vrot.lane.b32.xlu1 %v19485_v59, %s17264_s24 }
 0x732   : > { %v19749_v35 = vpop.permute.xlu0 %9743  ;;  %v19751_v62 = vpop.permute.xlu1 %9749 }
 0x733   : > { %14953 = vmatmul.mubr.msk.bf16.vlgmr.msra.gmra.mrb[8].mxu1 %vm408_vm0, %v19591_v50 }
 0x734   : > { %8989 = vmatpush1.bf16.msra.mxu1 %v8917_v29  ;;  %11629 = vrot.lane.b32.xlu0 %v19496_v61, %s17264_s24 }
 0x735   : > { %11641 = vrot.lane.b32.xlu1 %v19390_v63, %s21694_s23  ;;  %9041 = vmatprep.subr.bf16.mxu1 %v8920_v28 }
 0x736   : > { %v19765_v25 = vpop.permute.xlu0 %9747  ;;  %v19767_v46 = vpop.permute.xlu1 %10015  ;;  %8977 = vmatprep.mubr.bf16.mxu1 %v21493_v38 }
 0x738   : > { %11639 = vrot.lane.b32.xlu0 %v19396_v43, %s21694_s23 }
 0x739   : > { %11645 = vrot.lane.b32.xlu1 %v19422_v36, %s21694_s23 }
 0x73a   : > { %v19774_v16 = vpop.permute.xlu0 %9751  ;;  %v19776_v47 = vpop.permute.xlu1 %10013 }
 0x73b   : > { %14954 = vmatmul.mubr.msk.bf16.gmra.mrb[12].mxu1 %vm408_vm0, %v19581_v0 }
 0x73c   : > { %11643 = vrot.lane.b32.xlu0 %v19349_v55, %s21694_s23  ;;  %9020 = vmatprep.mubr.bf16.mxu1 %v21493_v38 }
 0x73d   : > { %11920 = vrot.lane.b32.xlu1 %v19384_v54, %s21695_s26 }
 0x73e   : > { %v19785_v29 = vpop.permute.xlu0 %10017 }
 0x73f   : > { %v19787_v28 = vpop.permute.xlu1 %10011 }
 0x740   : > { %11918 = vrot.lane.b32.xlu0 %v19370_v42, %s21695_s26 }
 0x741   : > { %11922 = vrot.lane.b32.xlu1 %v19396_v43, %s21695_s26 }
 0x742   : > { %v19793_v58 = vpop.permute.xlu0 %10009 }
 0x743   : > { %v19795_v24 = vpop.permute.xlu1 %10021  ;;  %14955 = vmatmul.mubr.msk.bf16.vlgmr.msra.gmra.mrb[16].mxu1 %vm408_vm0, %v19591_v50 }
 0x744   : > { %9042 = vmatpush1.bf16.msra.mxu1 %v8919_v23  ;;  %11916 = vrot.lane.b32.xlu0 %v19376_v17, %s21695_s26 }
 0x745   : > { %11926 = vrot.lane.b32.xlu1 %v19349_v55, %s21695_s26  ;;  %15474 = vmatprep.subr.bf16.mxu1 %v8921_v19 }
 0x746   : > { %v19809_v26 = vpop.permute.xlu0 %10019  ;;  %9030 = vmatprep.mubr.bf16.mxu1 %v21493_v38 }
 0x747   : > { %v19812_v12 = vpop.permute.xlu1 %10025 }
 0x748   : > { %11924 = vrot.lane.b32.xlu0 %v19390_v63, %s21695_s26 }
 0x749   : > { %12191 = vrot.lane.b32.xlu1 %v19370_v42, %s21696_s27 }
 0x74a   : > { %v19818_v23 = vpop.permute.xlu0 %10023 }
 0x74b   : > { %v19820_v60 = vpop.permute.xlu1 %10291  ;;  %14956 = vmatmul.mubr.msk.bf16.gmra.mrb[20].mxu1 %vm408_vm0, %v19581_v0 }
 0x74c   : > { %11928 = vrot.lane.b32.xlu0 %v19422_v36, %s21695_s26  ;;  %9073 = vmatprep.mubr.bf16.mxu1 %v21493_v38 }
 0x74d   : > { %12189 = vrot.lane.b32.xlu1 %v19376_v17, %s21696_s27 }
 0x74e   : > { %v19832_v53 = vpop.permute.xlu0 %10027 }
 0x74f   : > { %v19834_v5 = vpop.permute.xlu1 %10289 }
 0x750   : > { %12193 = vrot.lane.b32.xlu0 %v19384_v54, %s21696_s27 }
 0x751   : > { %12187 = vrot.lane.b32.xlu1 %v19830_v31, %s17251_s9 }
 0x752   : > { %v19843_v6 = vpop.permute.xlu0 %10293 }
 0x753   : > { %v19845_v52 = vpop.permute.xlu1 %10287  ;;  %14957 = vmatmul.mubr.msk.bf16.vlgmr.msra.gmra.mrb[24].mxu1 %vm408_vm0, %v19591_v50 }
 0x754   : > { %21697 = vst [vmem:[#allocation24_spill] sm:$0xff] %v19845_v52  ;;  %15475 = vmatpush3.bf16.msra.mxu1 %v8921_v19  ;;  %12185 = vrot.lane.b32.xlu0 %v19839_v41, %s17251_s9  ;;  %s21701_s9 = smov 107  }
 0x755   : > { %9211 = vmatprep.subr.bf16.mxu1 %v9192_v2  ;;  %12197 = vrot.lane.b32.xlu1 %v19390_v63, %s21696_s27 }
 0x756   : > { %v19856_v13 = vpop.permute.xlu0 %10285  ;;  %9083 = vmatprep.mubr.bf16.mxu1 %v21493_v38 }
 0x757   : > { %21698 = vst [vmem:[#allocation26_spill] sm:$0xff] %v19856_v13  ;;  %v19859_v39 = vpop.permute.xlu1 %10297 }
 0x758   : > { %12195 = vrot.lane.b32.xlu0 %v19396_v43, %s21696_s27 }
 0x759   : > { %12201 = vrot.lane.b32.xlu1 %v19422_v36, %s21696_s27 }
 0x75a   : > { %v19865_v19 = vpop.permute.xlu0 %10295 }
 0x75b   : > { %21699 = vst [vmem:[#allocation5_spill] sm:$0xff] %v19865_v19  ;;  %v19867_v52 = vpop.permute.xlu1 %10301  ;;  %14958 = vmatmul.mubr.msk.bf16.gmra.mrb[28].mxu1 %vm408_vm0, %v19581_v0  ;;  %v9191_v19 = vsel %vm2000_vm7, %v19624_v9, %v19615_v1 }
 0x75c   : > { %21700 = vst [vmem:[#allocation6_spill] sm:$0xff] %v19867_v52  ;;  %12199 = vrot.lane.b32.xlu0 %v19349_v55, %s21696_s27  ;;  %15476 = vmatprep.mubr.msk.bf16.mxu1 %vm408_vm0, %v19591_v50 }
 0x75d   : > { %12466 = vrot.lane.b32.xlu1 %v19384_v54, %s21701_s9 }
 0x75e   : > { %v19877_v2 = vpop.permute.xlu0 %10299 }
 0x75f   : > { %v19879_v13 = vpop.permute.xlu1 %10567 }
 0x760   : > { %21702 = vst [vmem:[#allocation28_spill] sm:$0xff] %v19879_v13  ;;  %12464 = vrot.lane.b32.xlu0 %v19370_v42, %s21701_s9  ;;  %v9194_v13 = vsel %vm2000_vm7, %v19653_v27, %v19643_v11 }
 0x761   : > { %12458 = vrot.lane.b32.xlu1 %v19839_v41, %s17254_s12 }
 0x762   : > { %v19885_v52 = vpop.permute.xlu0 %10303 }
 0x763   : > { %21703 = vst [vmem:[#allocation27_spill] sm:$0xff] %v19885_v52  ;;  %v19890_v50 = vpop.permute.xlu1 %10565  ;;  %15477 = vmatmul.mubr.msk.bf16.vlgmr.msra.gmra.mrb[4].mxu1 %vm408_vm0, %v19581_v0 }
 0x764   : > { %9212 = vmatpush1.bf16.msra.mxu1 %v9191_v19  ;;  %12462 = vrot.lane.b32.xlu0 %v19376_v17, %s21701_s9  ;;  %v9196_v19 = vsel %vm2000_vm7, %v19662_v15, %v19655_v7 }
 0x765   : > { %9264 = vmatprep.subr.bf16.mxu1 %v9194_v13  ;;  %12468 = vrot.lane.b32.xlu1 %v19396_v43, %s21701_s9  ;;  %v9193_v13 = vsel %vm2000_vm7, %v19633_v14, %v19653_v27 }
 0x766   : > { %v19901_v52 = vpop.permute.xlu0 %10569  ;;  %9243 = vmatprep.mubr.bf16.mxu1 %v21493_v38 }
 0x767   : > { %v19904_v1 = vpop.permute.xlu1 %10563 }
 0x768   : > { %21704 = vst [vmem:[#allocation4_spill] sm:$0xff] %v19904_v1  ;;  %12460 = vrot.lane.b32.xlu0 %v19830_v31, %s17254_s12  ;;  %s21706_s12 = smov 106  }
 0x769   : > { %12472 = vrot.lane.b32.xlu1 %v19349_v55, %s21701_s9 }
 0x76a   : > { %v19910_v0 = vpop.permute.xlu0 %10561 }
 0x76b   : > { %21705 = vst [vmem:[#allocation29_spill] sm:$0xff] %v19910_v0  ;;  %v19912_v9 = vpop.permute.xlu1 %10573  ;;  %14961 = vmatmul.mubr.msk.bf16.vlgmr.msra.gmra.mrb[8].mxu1 %vm408_vm0, %v19641_v33 }
 0x76c   : > { %9265 = vmatpush1.bf16.msra.mxu1 %v9193_v13  ;;  %12470 = vrot.lane.b32.xlu0 %v19390_v63, %s21701_s9 }
 0x76d   : > { %9317 = vmatprep.subr.bf16.mxu1 %v9196_v19  ;;  %12737 = vrot.lane.b32.xlu1 %v19370_v42, %s21706_s12 }
 0x76e   : > { %v19926_v1 = vpop.permute.xlu0 %10571  ;;  %9253 = vmatprep.mubr.bf16.mxu1 %v21493_v38 }
 0x76f   : > { %v19929_v0 = vpop.permute.xlu1 %10577 }
 0x770   : > { %21707 = vst [vmem:[#allocation31_spill] sm:$0xff] %v19929_v0  ;;  %12474 = vrot.lane.b32.xlu0 %v19422_v36, %s21701_s9  ;;  %v9195_v0 = vsel %vm2000_vm7, %v19643_v11, %v19662_v15 }
 0x771   : > { %12735 = vrot.lane.b32.xlu1 %v19376_v17, %s21706_s12 }
 0x772   : > { %v19935_v14 = vpop.permute.xlu0 %10575 }
 0x773   : > { %21708 = vst [vmem:[#allocation30_spill] sm:$0xff] %v19935_v14  ;;  %v19937_v27 = vpop.permute.xlu1 %10837  ;;  %14962 = vmatmul.mubr.msk.bf16.gmra.mrb[12].mxu1 %vm408_vm0, %v19635_v44 }
 0x774   : > { %21709 = vst [vmem:[#allocation32_spill] sm:$0xff] %v19937_v27  ;;  %12739 = vrot.lane.b32.xlu0 %v19384_v54, %s21706_s12  ;;  %9296 = vmatprep.mubr.bf16.mxu1 %v21493_v38 }
 0x775   : > { %12733 = vrot.lane.b32.xlu1 %v19830_v31, %s17256_s14 }
 0x776   : > { %v19946_v13 = vpop.permute.xlu0 %10579 }
 0x777   : > { %v19948_v19 = vpop.permute.xlu1 %11089 }
 0x778   : > { %21710 = vst [vmem:[#allocation34_spill] sm:$0xff] %v19948_v19  ;;  %12731 = vrot.lane.b32.xlu0 %v19839_v41, %s17256_s14  ;;  %v9197_v19 = vsel %vm2000_vm7, %v19655_v7, %v19673_v51  ;;  %s21714_s14 = smov 90   ;;  %vm21774_vm7 = vmmov %vm21770_vm5 }
 0x779   : > { %12743 = vrot.lane.b32.xlu1 %v19390_v63, %s21706_s12 }
 0x77a   : > { %v19954_v27 = vpop.permute.xlu0 %10839 }
 0x77b   : > { %21711 = vst [vmem:[#allocation33_spill] sm:$0xff] %v19954_v27  ;;  %v19956_v14 = vpop.permute.xlu1 %11087  ;;  %14963 = vmatmul.mubr.msk.bf16.vlgmr.msra.gmra.mrb[16].mxu1 %vm408_vm0, %v19641_v33 }
 0x77c   : > { %21712 = vst [vmem:[#allocation35_spill] sm:$0xff] %v19956_v14  ;;  %9318 = vmatpush1.bf16.msra.mxu1 %v9195_v0  ;;  %12741 = vrot.lane.b32.xlu0 %v19396_v43, %s21706_s12 }
 0x77d   : > { %15480 = vmatprep.subr.bf16.mxu1 %v9197_v19  ;;  %12747 = vrot.lane.b32.xlu1 %v19422_v36, %s21706_s12 }
 0x77e   : > { %v19970_v14 = vpop.permute.xlu0 %11091  ;;  %9306 = vmatprep.mubr.bf16.mxu1 %v21493_v38 }
 0x77f   : > { %v19973_v27 = vpop.permute.xlu1 %11085 }
 0x780   : > { %21713 = vst [vmem:[#allocation37_spill] sm:$0xff] %v19973_v27  ;;  %12745 = vrot.lane.b32.xlu0 %v19349_v55, %s21706_s12 }
 0x781   : > { %13012 = vrot.lane.b32.xlu1 %v19384_v54, %s21714_s14 }
 0x782   : > { %v19979_v11 = vpop.permute.xlu0 %11083 }
 0x783   : > { %21715 = vst [vmem:[#allocation36_spill] sm:$0xff] %v19979_v11  ;;  %v19981_v15 = vpop.permute.xlu1 %11095  ;;  %14964 = vmatmul.mubr.msk.bf16.gmra.mrb[20].mxu1 %vm408_vm0, %v19635_v44 }
 0x784   : > { %13010 = vrot.lane.b32.xlu0 %v19370_v42, %s21714_s14  ;;  %9349 = vmatprep.mubr.bf16.mxu1 %v21493_v38 }
 0x785   : > { %13004 = vrot.lane.b32.xlu1 %v19839_v41, %s17258_s16 }
 0x786   : > { %v19990_v7 = vpop.permute.xlu0 %11093 }
 0x787   : > { %v19992_v51 = vpop.permute.xlu1 %11099 }
 0x788   : > { %21716 = vst [vmem:[#allocation38_spill] sm:$0xff] %v19992_v51  ;;  %13008 = vrot.lane.b32.xlu0 %v19376_v17, %s21714_s14  ;;  %v9468_v51 = vsel %vm2277_vm8, %v19664_v49, %v19681_v57 }
 0x789   : > { %13014 = vrot.lane.b32.xlu1 %v19396_v43, %s21714_s14 }
 0x78a   : > { %v19998_v0 = vpop.permute.xlu0 %11097 }
 0x78b   : > { %21717 = vst [vmem:[#allocation40_spill] sm:$0xff] %v19998_v0  ;;  %v20000_v27 = vpop.permute.xlu1 %11364  ;;  %14965 = vmatmul.mubr.msk.bf16.vlgmr.msra.gmra.mrb[24].mxu1 %vm408_vm0, %v19641_v33 }
 0x78c   : > { %21718 = vst [vmem:[#allocation39_spill] sm:$0xff] %v20000_v27  ;;  %15481 = vmatpush3.bf16.msra.mxu1 %v9197_v19  ;;  %13006 = vrot.lane.b32.xlu0 %v19830_v31, %s17258_s16  ;;  %s21730_s16 = smov 88  }
 0x78d   : > { %9487 = vmatprep.subr.bf16.mxu1 %v9468_v51  ;;  %13018 = vrot.lane.b32.xlu1 %v19349_v55, %s21714_s14 }
 0x78e   : > { %v20011_v11 = vpop.permute.xlu0 %11362  ;;  %9359 = vmatprep.mubr.bf16.mxu1 %v21493_v38 }
 0x78f   : > { %v20014_v27 = vpop.permute.xlu1 %11356 }
 0x790   : > { %21719 = vst [vmem:[#allocation41_spill] sm:$0xff] %v20014_v27  ;;  %13016 = vrot.lane.b32.xlu0 %v19390_v63, %s21714_s14 }
 0x791   : > { %13283 = vrot.lane.b32.xlu1 %v19370_v42, %s21720_s28 }
 0x792   : > { %v20020_v19 = vpop.permute.xlu0 %11360 }
 0x793   : > { %21721 = vst [vmem:[#allocation44_spill] sm:$0xff] %v20020_v19  ;;  %v20022_v0 = vpop.permute.xlu1 %11366  ;;  %14966 = vmatmul.mubr.msk.bf16.gmra.mrb[28].mxu1 %vm408_vm0, %v19635_v44  ;;  %v9467_v19 = vsel %vm2277_vm8, %v19675_v32, %v19664_v49 }
 0x794   : > { %21722 = vst [vmem:[#allocation43_spill] sm:$0xff] %v20022_v0  ;;  %13020 = vrot.lane.b32.xlu0 %v19422_v36, %s21714_s14  ;;  %15482 = vmatprep.mubr.msk.bf16.mxu1 %vm408_vm0, %v19641_v33 }
 0x795   : > { %13281 = vrot.lane.b32.xlu1 %v19376_v17, %s21720_s28 }
 0x796   : > { %v20032_v51 = vpop.permute.xlu0 %11358 }
 0x797   : > { %21723 = vst [vmem:[#allocation45_spill] sm:$0xff] %v20032_v51  ;;  %v20034_v27 = vpop.permute.xlu1 %11370  ;;  %v9470_v51 = vsel %vm2277_vm8, %v19704_v21, %v19697_v37 }
 0x798   : > { %21724 = vst [vmem:[#allocation47_spill] sm:$0xff] %v20034_v27  ;;  %13285 = vrot.lane.b32.xlu0 %v19384_v54, %s21720_s28 }
 0x799   : > { %13279 = vrot.lane.b32.xlu1 %v19830_v31, %s17260_s20 }
 0x79a   : > { %v20040_v0 = vpop.permute.xlu0 %11368 }
 0x79b   : > { %v20045_v33 = vpop.permute.xlu1 %11635  ;;  %15483 = vmatmul.mubr.msk.bf16.vlgmr.msra.gmra.mrb[4].mxu1 %vm408_vm0, %v19635_v44 }
 0x79c   : > { %9488 = vmatpush1.bf16.msra.mxu1 %v9467_v19  ;;  %13277 = vrot.lane.b32.xlu0 %v19839_v41, %s17260_s20  ;;  %v9469_v19 = vsel %vm2277_vm8, %v19681_v57, %v19704_v21 }
 0x79d   : > { %9540 = vmatprep.subr.bf16.mxu1 %v9470_v51  ;;  %13289 = vrot.lane.b32.xlu1 %v19390_v63, %s21720_s28  ;;  %v9472_v51 = vsel %vm2277_vm8, %v19716_v30, %v19706_v3 }
 0x79e   : > { %v20056_v27 = vpop.permute.xlu0 %11372  ;;  %9519 = vmatprep.mubr.bf16.mxu1 %v21493_v38 }
 0x79f   : > { %v20059_v49 = vpop.permute.xlu1 %11633 }
 0x7a0   : > { %21725 = vst [vmem:[#allocation46_spill] sm:$0xff] %v20059_v49  ;;  %13287 = vrot.lane.b32.xlu0 %v19396_v43, %s21720_s28 }
 0x7a1   : > { %13293 = vrot.lane.b32.xlu1 %v19422_v36, %s21720_s28 }
 0x7a2   : > { %v20065_v44 = vpop.permute.xlu0 %11637 }
 0x7a3   : > { %v20067_v32 = vpop.permute.xlu1 %11631  ;;  %14969 = vmatmul.mubr.msk.bf16.vlgmr.msra.gmra.mrb[8].mxu1 %vm408_vm0, %v19695_v40 }
 0x7a4   : > { %21726 = vst [vmem:[#allocation49_spill] sm:$0xff] %v20067_v32  ;;  %9541 = vmatpush1.bf16.msra.mxu1 %v9469_v19  ;;  %13291 = vrot.lane.b32.xlu0 %v19349_v55, %s21720_s28 }
 0x7a5   : > { %9593 = vmatprep.subr.bf16.mxu1 %v9472_v51  ;;  %7582 = vrot.lane.b32.xlu1 %v19370_v42, %s17250_s8 }
 0x7a6   : > { %v20081_v32 = vpop.permute.xlu0 %11629  ;;  %9529 = vmatprep.mubr.bf16.mxu1 %v21493_v38 }
 0x7a7   : > { %21727 = vst [vmem:[#allocation54_spill] sm:$0xff] %v20081_v32  ;;  %v20084_v49 = vpop.permute.xlu1 %11641 }
 0x7a8   : > { %7580 = vrot.lane.b32.xlu0 %v19376_v17, %s17250_s8 }
 0x7a9   : > { %7584 = vrot.lane.b32.xlu1 %v19384_v54, %s17250_s8 }
 0x7aa   : > { %v20090_v57 = vpop.permute.xlu0 %11639 }
 0x7ab   : > { %21728 = vst [vmem:[#allocation53_spill] sm:$0xff] %v20090_v57  ;;  %v20092_v21 = vpop.permute.xlu1 %11645  ;;  %14970 = vmatmul.mubr.msk.bf16.gmra.mrb[12].mxu1 %vm408_vm0, %v19683_v18  ;;  %v9471_v57 = vsel %vm2277_vm8, %v19697_v37, %v19716_v30 }
 0x7ac   : > { %21729 = vst [vmem:[#allocation55_spill] sm:$0xff] %v20092_v21  ;;  %7578 = vrot.lane.b32.xlu0 %v19382_v22, %s17250_s8  ;;  %9572 = vmatprep.mubr.bf16.mxu1 %v21493_v38 }
 0x7ad   : > { %13556 = vrot.lane.b32.xlu1 %v19370_v42, %s21730_s16 }
 0x7ae   : > { %v20101_v19 = vpop.permute.xlu0 %11643 }
 0x7af   : > { %21731 = vst [vmem:[#allocation57_spill] sm:$0xff] %v20101_v19  ;;  %v20103_v51 = vpop.permute.xlu1 %11920 }
 0x7b0   : > { %21732 = vst [vmem:[#allocation56_spill] sm:$0xff] %v20103_v51  ;;  %7586 = vrot.lane.b32.xlu0 %v19396_v43, %s17250_s8  ;;  %v9473_v51 = vsel %vm2277_vm8, %v19706_v3, %v19724_v20  ;;  %vm21776_vm8 = vmmov %vm21770_vm5 }
 0x7b1   : > { %13554 = vrot.lane.b32.xlu1 %v19376_v17, %s21730_s16 }
 0x7b2   : > { %v20109_v21 = vpop.permute.xlu0 %11918 }
 0x7b3   : > { %21733 = vst [vmem:[#allocation58_spill] sm:$0xff] %v20109_v21  ;;  %v20111_v32 = vpop.permute.xlu1 %11922  ;;  %14971 = vmatmul.mubr.msk.bf16.vlgmr.msra.gmra.mrb[16].mxu1 %vm408_vm0, %v19695_v40 }
 0x7b4   : > { %21734 = vst [vmem:[#allocation60_spill] sm:$0xff] %v20111_v32  ;;  %9594 = vmatpush1.bf16.msra.mxu1 %v9471_v57  ;;  %13558 = vrot.lane.b32.xlu0 %v19384_v54, %s21730_s16 }
 0x7b5   : > { %15486 = vmatprep.subr.bf16.mxu1 %v9473_v51  ;;  %13552 = vrot.lane.b32.xlu1 %v19830_v31, %s17262_s22 }
 0x7b6   : > { %v20125_v21 = vpop.permute.xlu0 %11916  ;;  %9582 = vmatprep.mubr.bf16.mxu1 %v21493_v38 }
 0x7b7   : > { %v20128_v19 = vpop.permute.xlu1 %11926 }
 0x7b8   : > { %21735 = vst [vmem:[#allocation59_spill] sm:$0xff] %v20128_v19  ;;  %13550 = vrot.lane.b32.xlu0 %v19839_v41, %s17262_s22 }
 0x7b9   : > { %13560 = vrot.lane.b32.xlu1 %v19396_v43, %s21730_s16 }
 0x7ba   : > { %v11925_v37 = vpop.permute.xlu0 %11924 }
 0x7bb   : > { %v20136_v20 = vsel %vm4748_vm14, %v11925_v37, %v20128_v19  ;;  %v12192_v3 = vpop.permute.xlu1 %12191  ;;  %14972 = vmatmul.mubr.msk.bf16.gmra.mrb[20].mxu1 %vm408_vm0, %v19683_v18  ;;  %v20142_v30 = vsel %vm4748_vm14, %v20111_v32, %v11925_v37 }
 0x7bc   : > { %21736 = vst [vmem:[#allocation61_spill] sm:$0xff] %v20136_v20  ;;  %21737 = vst [vmem:[#allocation48_spill] sm:$0xff] %v20142_v30  ;;  %7588 = vrot.lane.b32.xlu0 %v19390_v63, %s17250_s8  ;;  %9625 = vmatprep.mubr.bf16.mxu1 %v21493_v38  ;;  %s21744_s8 = smov 87  }
 0x7bd   : > { %7821 = vrot.lane.b32.xlu1 %v19376_v17, %s17252_s10 }
 0x7be   : > { %v20149_v57 = vpop.permute.xlu0 %11928 }
 0x7bf   : > { %v12190_v19 = vpop.permute.xlu1 %12189 }
 0x7c0   : > { %v20152_v20 = vsel %vm5022_vm15, %v12190_v19, %v12192_v3  ;;  %13562 = vrot.lane.b32.xlu0 %v19390_v63, %s21730_s16  ;;  %v9754_v19 = vsel %vm2564_vm9, %v19718_v56, %v19740_v10 }
 0x7c1   : > { %21738 = vst [vmem:[#allocation50_spill] sm:$0xff] %v20152_v20  ;;  %7819 = vrot.lane.b32.xlu1 %v19382_v22, %s17252_s10 }
 0x7c2   : > { %v12194_v37 = vpop.permute.xlu0 %12193 }
 0x7c3   : > { %v20158_v32 = vpop.permute.xlu1 %12187  ;;  %14973 = vmatmul.mubr.msk.bf16.vlgmr.msra.gmra.mrb[24].mxu1 %vm408_vm0, %v19695_v40  ;;  %v20163_v30 = vsel %vm5022_vm15, %v12192_v3, %v12194_v37 }
 0x7c4   : > { %21739 = vst [vmem:[#allocation51_spill] sm:$0xff] %v20158_v32  ;;  %21740 = vst [vmem:[#allocation52_spill] sm:$0xff] %v20163_v30  ;;  %15487 = vmatpush3.bf16.msra.mxu1 %v9473_v51  ;;  %7823 = vrot.lane.b32.xlu0 %v19370_v42, %s17252_s10 }
 0x7c5   : > { %9773 = vmatprep.subr.bf16.mxu1 %v9754_v19  ;;  %13566 = vrot.lane.b32.xlu1 %v19422_v36, %s21730_s16 }
 0x7c6   : > { %v20172_v20 = vpop.permute.xlu0 %12185  ;;  %9635 = vmatprep.mubr.bf16.mxu1 %v21493_v38 }
 0x7c7   : > { %21741 = vst [vmem:[#allocation63_spill] sm:$0xff] %v20172_v20  ;;  %v12198_v32 = vpop.permute.xlu1 %12197 }
 0x7c8   : > { %13564 = vrot.lane.b32.xlu0 %v19349_v55, %s21730_s16 }
 0x7c9   : > { %7827 = vrot.lane.b32.xlu1 %v19396_v43, %s17252_s10 }
 0x7ca   : > { %v12196_v51 = vpop.permute.xlu0 %12195 }
 0x7cb   : > { %v20180_v3 = vsel %vm5022_vm15, %v12194_v37, %v12196_v51  ;;  %v20182_v30 = vpop.permute.xlu1 %12201  ;;  %14974 = vmatmul.mubr.msk.bf16.gmra.mrb[28].mxu1 %vm408_vm0, %v19683_v18  ;;  %v20187_v19 = vsel %vm5022_vm15, %v12196_v51, %v12198_v32 }
 0x7cc   : > { %21742 = vst [vmem:[#allocation62_spill] sm:$0xff] %v20180_v3  ;;  %21743 = vst [vmem:[#allocation64_spill] sm:$0xff] %v20182_v30  ;;  %7825 = vrot.lane.b32.xlu0 %v19384_v54, %s17252_s10  ;;  %15488 = vmatprep.mubr.msk.bf16.mxu1 %vm408_vm0, %v19695_v40  ;;  %v9753_v40 = vsel %vm2564_vm9, %v19726_v48, %v19718_v56 }
 0x7cd   : > { %13831 = vrot.lane.b32.xlu1 %v19384_v54, %s21744_s8 }
 0x7ce   : > { %v20195_v20 = vpop.permute.xlu0 %12199 }
 0x7cf   : > { %v20199_v37 = vsel %vm5022_vm15, %v12198_v32, %v20195_v20  ;;  %v12467_v30 = vpop.permute.xlu1 %12466 }
 0x7d0   : > { %13829 = vrot.lane.b32.xlu0 %v19370_v42, %s21744_s8 }
 0x7d1   : > { %13823 = vrot.lane.b32.xlu1 %v19839_v41, %s17264_s24  ;;  %v9756_v41 = vsel %vm2564_vm9, %v19749_v35, %v19742_v45 }
 0x7d2   : > { %v12465_v51 = vpop.permute.xlu0 %12464 }
 0x7d3   : > { %v20208_v3 = vpop.permute.xlu1 %12458  ;;  %15489 = vmatmul.mubr.msk.bf16.vlgmr.msra.gmra.mrb[4].mxu1 %vm408_vm0, %v19683_v18  ;;  %v20213_v32 = vsel %vm5296_vm13, %v12465_v51, %v12467_v30 }
 0x7d4   : > { %21745 = vst [vmem:[#allocation66_spill] sm:$0xff] %v20208_v3  ;;  %9774 = vmatpush1.bf16.msra.mxu1 %v9753_v40  ;;  %13827 = vrot.lane.b32.xlu0 %v19376_v17, %s21744_s8 }
 0x7d5   : > { %9826 = vmatprep.subr.bf16.mxu1 %v9756_v41  ;;  %13825 = vrot.lane.b32.xlu1 %v19830_v31, %s17264_s24  ;;  %v9755_v31 = vsel %vm2564_vm9, %v19740_v10, %v19749_v35 }
 0x7d6   : > { %v12463_v48 = vpop.permute.xlu0 %12462  ;;  %9805 = vmatprep.mubr.bf16.mxu1 %v21493_v38 }
 0x7d7   : > { %v20224_v18 = vsel %vm5296_vm13, %v12463_v48, %v12465_v51  ;;  %v12469_v56 = vpop.permute.xlu1 %12468 }
 0x7d8   : > { %v20227_v40 = vsel %vm5296_vm13, %v12467_v30, %v12469_v56  ;;  %7829 = vrot.lane.b32.xlu0 %v19390_v63, %s17252_s10  ;;  %v9758_v30 = vsel %vm2564_vm9, %v19765_v25, %v19751_v62  ;;  %s21749_s10 = smov 86  }
 0x7d9   : > { %13835 = vrot.lane.b32.xlu1 %v19390_v63, %s21744_s8 }
 0x7da   : > { %v20233_v41 = vpop.permute.xlu0 %12460 }
 0x7db   : > { %v20235_v3 = vpop.permute.xlu1 %12472  ;;  %14979 = vmatmul.mubr.msk.bf16.vlgmr.msra.gmra.mrb[8].mxu1 %vm408_vm0, %v19496_v61 }
 0x7dc   : > { %9827 = vmatpush1.bf16.msra.mxu1 %v9755_v31  ;;  %13833 = vrot.lane.b32.xlu0 %v19396_v43, %s21744_s8 }
 0x7dd   : > { %9879 = vmatprep.subr.bf16.mxu1 %v9758_v30  ;;  %8068 = vrot.lane.b32.xlu1 %v19370_v42, %s17253_s11 }
 0x7de   : > { %v12471_v51 = vpop.permute.xlu0 %12470  ;;  %9815 = vmatprep.mubr.bf16.mxu1 %v21493_v38 }
 0x7df   : > { %v20252_v48 = vsel %vm5296_vm13, %v12471_v51, %v20235_v3  ;;  %v12738_v10 = vpop.permute.xlu1 %12737  ;;  %v20255_v35 = vsel %vm5296_vm13, %v12469_v56, %v12471_v51 }
 0x7e0   : > { %8066 = vrot.lane.b32.xlu0 %v19376_v17, %s17253_s11 }
 0x7e1   : > { %13837 = vrot.lane.b32.xlu1 %v19349_v55, %s21744_s8 }
 0x7e2   : > { %v20261_v31 = vpop.permute.xlu0 %12474 }
 0x7e3   : > { %v12736_v42 = vpop.permute.xlu1 %12735  ;;  %14980 = vmatmul.mubr.msk.bf16.gmra.mrb[12].mxu1 %vm408_vm0, %v19485_v59 }
 0x7e4   : > { %v20266_v30 = vsel %vm5570_vm12, %v12736_v42, %v12738_v10  ;;  %8064 = vrot.lane.b32.xlu0 %v19382_v22, %s17253_s11  ;;  %9858 = vmatprep.mubr.bf16.mxu1 %v21493_v38  ;;  %v9757_v42 = vsel %vm2564_vm9, %v19742_v45, %v19765_v25 }
 0x7e5   : > { %21746 = vst [vmem:[#allocation65_spill] sm:$0xff] %v20266_v30  ;;  %8070 = vrot.lane.b32.xlu1 %v19384_v54, %s17253_s11 }
 0x7e6   : > { %v12740_v17 = vpop.permute.xlu0 %12739 }
 0x7e7   : > { %v20273_v56 = vpop.permute.xlu1 %12733  ;;  %v20276_v55 = vsel %vm5570_vm12, %v12738_v10, %v12740_v17 }
 0x7e8   : > { %21747 = vst [vmem:[#allocation3_spill] sm:$0xff] %v20273_v56  ;;  %13839 = vrot.lane.b32.xlu0 %v19422_v36, %s21744_s8  ;;  %v9759_v36 = vsel %vm2564_vm9, %v19751_v62, %v19774_v16  ;;  %v20309_v62 = vld [vmem:[#allocation2 + $0x8] sm:$0xff]  ;;  %vm21777_vm9 = vcmask 15360  }
 0x7e9   : > { %8074 = vrot.lane.b32.xlu1 %v19390_v63, %s17253_s11 }
 0x7ea   : > { %v20282_v51 = vpop.permute.xlu0 %12731 }
 0x7eb   : > { %21748 = vst [vmem:[#allocation67_spill] sm:$0xff] %v20282_v51  ;;  %v12744_v22 = vpop.permute.xlu1 %12743  ;;  %14981 = vmatmul.mubr.msk.bf16.vlgmr.msra.gmra.mrb[16].mxu1 %vm408_vm0, %v19496_v61  ;;  %v20375_v51 = vld [vmem:[#allocation2 + $0x30] sm:$0xff] }
 0x7ec   : > { %9880 = vmatpush1.bf16.msra.mxu1 %v9757_v42  ;;  %8072 = vrot.lane.b32.xlu0 %v19396_v43, %s17253_s11  ;;  %v20305_v43 = vld [vmem:[#allocation2 + $0x10] sm:$0xff] }
 0x7ed   : > { %15492 = vmatprep.subr.bf16.mxu1 %v9759_v36  ;;  %14114 = vrot.lane.b32.xlu1 %v19384_v54, %s21749_s10 }
 0x7ee   : > { %v12742_v63 = vpop.permute.xlu0 %12741  ;;  %9868 = vmatprep.mubr.bf16.mxu1 %v21493_v38 }
 0x7ef   : > { %v20298_v10 = vsel %vm5570_vm12, %v12740_v17, %v12742_v63  ;;  %v20300_v56 = vpop.permute.xlu1 %12747  ;;  %v20303_v45 = vsel %vm5570_vm12, %v12742_v63, %v12744_v22  ;;  %v17230_v17 = vld [vmem:[#allocation2] sm:$0xff] }
 0x7f0   : > { %21750 = vst [vmem:[#allocation69_spill] sm:$0xff] %v20298_v10  ;;  %21751 = vst [vmem:[#allocation68_spill] sm:$0xff] %v20300_v56  ;;  %14112 = vrot.lane.b32.xlu0 %v20305_v43, %s21749_s10 }
 0x7f1   : > { %21752 = vst [vmem:[#allocation70_spill] sm:$0xff] %v20303_v45  ;;  %8339 = vrot.lane.b32.xlu1 %v20309_v62, %s17255_s13 }
 0x7f2   : > { %v20313_v54 = vpop.permute.xlu0 %12745 }
 0x7f3   : > { %21753 = vst [vmem:[#allocation72_spill] sm:$0xff] %v20313_v54  ;;  %v20317_v25 = vsel %vm5570_vm12, %v12744_v22, %v20313_v54  ;;  %v13013_v16 = vpop.permute.xlu1 %13012  ;;  %14982 = vmatmul.mubr.msk.bf16.gmra.mrb[20].mxu1 %vm408_vm0, %v19485_v59  ;;  %v20332_v22 = vld [vmem:[#allocation2 + $0x28] sm:$0xff] }
 0x7f4   : > { %21754 = vst [vmem:[#allocation71_spill] sm:$0xff] %v20317_v25  ;;  %14110 = vrot.lane.b32.xlu0 %v20309_v62, %s21749_s10  ;;  %9911 = vmatprep.mubr.bf16.mxu1 %v21493_v38 }
 0x7f5   : > { %8337 = vrot.lane.b32.xlu1 %v17230_v17, %s17255_s13 }
 0x7f6   : > { %v13011_v42 = vpop.permute.xlu0 %13010 }
 0x7f7   : > { %v20325_v63 = vpop.permute.xlu1 %13004  ;;  %v20328_v56 = vsel %vm5844_vm4, %v13011_v42, %v13013_v16 }
 0x7f8   : > { %21755 = vst [vmem:[#allocation73_spill] sm:$0xff] %v20325_v63  ;;  %21756 = vst [vmem:[#allocation75_spill] sm:$0xff] %v20328_v56  ;;  %8341 = vrot.lane.b32.xlu0 %v20305_v43, %s17255_s13  ;;  %v20344_v63 = vld [vmem:[#allocation2 + $0x20] sm:$0xff]  ;;  %v10030_v56 = vsel %vm2841_vm10, %v19767_v46, %v19785_v29 }
 0x7f9   : > { %14118 = vrot.lane.b32.xlu1 %v20332_v22, %s21749_s10 }
 0x7fa   : > { %v13009_v25 = vpop.permute.xlu0 %13008 }
 0x7fb   : > { %v20337_v54 = vsel %vm5844_vm4, %v13009_v25, %v13011_v42  ;;  %v13015_v10 = vpop.permute.xlu1 %13014  ;;  %14983 = vmatmul.mubr.msk.bf16.vlgmr.msra.gmra.mrb[24].mxu1 %vm408_vm0, %v19496_v61  ;;  %v20362_v42 = vld [vmem:[#allocation2 + $0x38] sm:$0xff] }
 0x7fc   : > { %21757 = vst [vmem:[#allocation74_spill] sm:$0xff] %v20337_v54  ;;  %v20342_v17 = vsel %vm5844_vm4, %v13013_v16, %v13015_v10  ;;  %15493 = vmatpush3.bf16.msra.mxu1 %v9759_v36  ;;  %14116 = vrot.lane.b32.xlu0 %v20344_v63, %s21749_s10  ;;  %v20358_v36 = vld [vmem:[#allocation2 + $0x18] sm:$0xff] }
 0x7fd   : > { %21758 = vst [vmem:[#allocation76_spill] sm:$0xff] %v20342_v17  ;;  %10049 = vmatprep.subr.bf16.mxu1 %v10030_v56  ;;  %8345 = vrot.lane.b32.xlu1 %v20344_v63, %s17255_s13 }
 0x7fe   : > { %v20353_v25 = vpop.permute.xlu0 %13006  ;;  %9921 = vmatprep.mubr.bf16.mxu1 %v21493_v38 }
 0x7ff   : > { %21759 = vst [vmem:[#allocation78_spill] sm:$0xff] %v20353_v25  ;;  %v20356_v16 = vpop.permute.xlu1 %13018 }
 0x800   : > { %21760 = vst [vmem:[#allocation77_spill] sm:$0xff] %v20356_v16  ;;  %8343 = vrot.lane.b32.xlu0 %v20358_v36, %s17255_s13 }
 0x801   : > { %14122 = vrot.lane.b32.xlu1 %v20362_v42, %s21749_s10 }
 0x802   : > { %v13017_v56 = vpop.permute.xlu0 %13016 }
 0x803   : > { %v20368_v17 = vsel %vm5844_vm4, %v13017_v56, %v20356_v16  ;;  %v13284_v25 = vpop.permute.xlu1 %13283  ;;  %14984 = vmatmul.mubr.msk.bf16.gmra.mrb[28].mxu1 %vm408_vm0, %v19485_v59  ;;  %v20373_v54 = vsel %vm5844_vm4, %v13015_v10, %v13017_v56  ;;  %v10029_v10 = vsel %vm2841_vm10, %v19776_v47, %v19767_v46 }
 0x804   : > { %21761 = vst [vmem:[#allocation79_spill] sm:$0xff] %v20368_v17  ;;  %14120 = vrot.lane.b32.xlu0 %v20375_v51, %s21749_s10  ;;  %15494 = vmatprep.mubr.msk.bf16.mxu1 %vm408_vm0, %v19496_v61 }
 0x806   : > { %v20381_v45 = vpop.permute.xlu0 %13020 }
 0x807   : > { %21762 = vst [vmem:[#allocation81_spill] sm:$0xff] %v20381_v45  ;;  %v13282_v30 = vpop.permute.xlu1 %13281 }
 0x808   : > { %v20384_v17 = vsel %vm6118_vm3, %v13282_v30, %v13284_v25  ;;  %8347 = vrot.lane.b32.xlu0 %v20332_v22, %s17255_s13  ;;  %v10032_v30 = vsel %vm2841_vm10, %v19809_v26, %v19795_v24 }
 0x809   : > { %21763 = vst [vmem:[#allocation80_spill] sm:$0xff] %v20384_v17 }
 0x80a   : > { %v13286_v16 = vpop.permute.xlu0 %13285 }
 0x80b   : > { %v20391_v56 = vpop.permute.xlu1 %13279  ;;  %15495 = vmatmul.mubr.msk.bf16.vlgmr.msra.gmra.mrb[4].mxu1 %vm408_vm0, %v19485_v59  ;;  %v20396_v61 = vsel %vm6118_vm3, %v13284_v25, %v13286_v16  ;;  %v10031_v59 = vsel %vm2841_vm10, %v19785_v29, %v19809_v26 }
 0x80c   : > { %21764 = vst [vmem:[#allocation82_spill] sm:$0xff] %v20391_v56  ;;  %10050 = vmatpush1.bf16.msra.mxu1 %v10029_v10  ;;  %10081 = vmatprep.mubr.bf16.mxu1 %v21493_v38  ;;  %v10034_v10 = vsel %vm2841_vm10, %v19818_v23, %v19812_v12 }
 0x80d   : > { %10102 = vmatprep.subr.bf16.mxu1 %v10032_v30 }
 0x80e   : > { %v20402_v17 = vpop.permute.xlu0 %13277 }
 0x80f   : > { %21765 = vst [vmem:[#allocation84_spill] sm:$0xff] %v20402_v17  ;;  %v13290_v45 = vpop.permute.xlu1 %13289 }
 0x812   : > { %v13288_v46 = vpop.permute.xlu0 %13287 }
 0x813   : > { %v20405_v47 = vsel %vm6118_vm3, %v13286_v16, %v13288_v46  ;;  %v20407_v56 = vpop.permute.xlu1 %13293  ;;  %14987 = vmatmul.mubr.msk.bf16.vlgmr.msra.gmra.mrb[8].mxu1 %vm408_vm0, %v19793_v58  ;;  %v20415_v25 = vsel %vm6118_vm3, %v13288_v46, %v13290_v45 }
 0x814   : > { %21766 = vst [vmem:[#allocation83_spill] sm:$0xff] %v20405_v47  ;;  %21767 = vst [vmem:[#allocation85_spill] sm:$0xff] %v20407_v56  ;;  %10103 = vmatpush1.bf16.msra.mxu1 %v10031_v59  ;;  %10091 = vmatprep.mubr.bf16.mxu1 %v21493_v38 }
 0x815   : > { %21768 = vst [vmem:[#allocation86_spill] sm:$0xff] %v20415_v25  ;;  %10155 = vmatprep.subr.bf16.mxu1 %v10034_v10 }
 0x816   : > { %v20421_v16 = vpop.permute.xlu0 %13291 }
 0x817   : > { %v20425_v30 = vsel %vm6118_vm3, %v13290_v45, %v20421_v16  ;;  %v7583_v56 = vpop.permute.xlu1 %7582  ;;  %v10033_v45 = vsel %vm2841_vm10, %v19795_v24, %v19818_v23 }
 0x818   : > { %21769 = vst [vmem:[#allocation87_spill] sm:$0xff] %v20425_v30 }
 0x81a   : > { %v7581_v47 = vpop.permute.xlu0 %7580 }
 0x81b   : > { %v7585_v26 = vpop.permute.xlu1 %7584  ;;  %14988 = vmatmul.mubr.msk.bf16.gmra.mrb[12].mxu1 %vm408_vm0, %v19787_v28  ;;  %v7593_v29 = vsel %vm394_vm1, %v7581_v47, %v7583_v56 }
 0x81c   : > { %7611 = vmatprep.subr.bf16.mxu0 %v7593_v29  ;;  %10134 = vmatprep.mubr.bf16.mxu1 %v21493_v38  ;;  %v7594_v30 = vsel %vm394_vm1, %v7583_v56, %v7585_v26 }
 0x81e   : > { %v7579_v46 = vpop.permute.xlu0 %7578 }
 0x81f   : > { %v7592_v59 = vsel %vm394_vm1, %v7579_v46, %v7581_v47  ;;  %v13557_v10 = vpop.permute.xlu1 %13556  ;;  %v10035_v46 = vsel %vm2841_vm10, %v19812_v12, %v19832_v53  ;;  %vm21781_vm10 = vmmov %vm21770_vm5 }
 0x820   : > { %7612 = vmatpush1.bf16.msra.mxu0 %v7592_v59 }
 0x822   : > { %v7587_v17 = vpop.permute.xlu0 %7586 }
 0x823   : > { %v13555_v25 = vpop.permute.xlu1 %13554  ;;  %14913 = vmatmul.mubr.msk.bf16.vlgmr.msra.gmra.mrb[28].mxu0 %vm408_vm0, %v19343_v34  ;;  %14989 = vmatmul.mubr.msk.bf16.vlgmr.msra.gmra.mrb[16].mxu1 %vm408_vm0, %v19793_v58  ;;  %v7595_v29 = vsel %vm394_vm1, %v7585_v26, %v7587_v17 }
 0x824   : > { %v20442_v47 = vsel %vm21770_vm5, %v13555_v25, %v13557_v10  ;;  %10156 = vmatpush1.bf16.msra.mxu1 %v10033_v45  ;;  %7664 = vmatprep.subr.bf16.mxu0 %v7595_v29  ;;  %vm21783_vm5 = vmmov %vm21777_vm9 }
 0x825   : > { %15498 = vmatprep.subr.bf16.mxu1 %v10035_v46  ;;  %7665 = vmatpush1.bf16.msra.mxu0 %v7594_v30 }
 0x826   : > { %v13559_v59 = vpop.permute.xlu0 %13558  ;;  %7653 = vmatprep.mubr.bf16.mxu0 %v21493_v38  ;;  %10144 = vmatprep.mubr.bf16.mxu1 %v21493_v38 }
 0x827   : > { %v20449_v24 = vpop.permute.xlu1 %13552  ;;  %v20452_v23 = vsel %vm21772_vm6, %v13557_v10, %v13559_v59 }
 0x828   : > { %21771 = vst [vmem:[#allocation89_spill] sm:$0xff] %v20449_v24 }
 0x82a   : > { %v20454_v56 = vpop.permute.xlu0 %13550 }
 0x82b   : > { %21773 = vst [vmem:[#allocation88_spill] sm:$0xff] %v20454_v56  ;;  %v13561_v25 = vpop.permute.xlu1 %13560  ;;  %14914 = vmatmul.mubr.msk.bf16.gmra.mrb[32].mxu0 %vm408_vm0, %v19503_v4  ;;  %14990 = vmatmul.mubr.msk.bf16.gmra.mrb[20].mxu1 %vm408_vm0, %v19787_v28 }
 0x82c   : > { %v20461_v12 = vsel %vm21774_vm7, %v13559_v59, %v13561_v25  ;;  %7696 = vmatprep.mubr.bf16.mxu0 %v21493_v38  ;;  %10187 = vmatprep.mubr.bf16.mxu1 %v21493_v38 }
 0x82d   : > { %21775 = vst [vmem:[#allocation90_spill] sm:$0xff] %v20461_v12  ;;  %v17237_v12 = vld [vmem:[%s17345_s25 + $0x20] ss:$16 sps:$4 sm:$0xff]  }
 0x82e   : > { %v7589_v53 = vpop.permute.xlu0 %7588 }
 0x82f   : > { %v7822_v30 = vpop.permute.xlu1 %7821  ;;  %v7597_v26 = vsel %vm394_vm1, %v7589_v53, %v19489_v8  ;;  %v7596_v45 = vsel %vm394_vm1, %v7587_v17, %v7589_v53  ;;  %v10306_v8 = vsel %vm21777_vm9, %v19820_v60, %v19843_v6  ;;  %vm21779_vm1 = vcmask 343040   ;;  %vm21793_vm9 = vmmov %vm21783_vm5 }
 0x830   : > { %7717 = vmatprep.subr.bf16.mxu0 %v7597_v26  ;;  %vm21784_vm6 = vmmov %vm21779_vm1 }
 0x831   : > { %vm21787_vm7 = vmmov %vm21779_vm1 }
 0x832   : > { %v13563_v10 = vpop.permute.xlu0 %13562 }
 0x833   : > { %v7820_v29 = vpop.permute.xlu1 %7819  ;;  %14915 = vmatmul.mubr.msk.bf16.vlgmr.msra.gmra.mrb[36].mxu0 %vm408_vm0, %v19343_v34  ;;  %14991 = vmatmul.mubr.msk.bf16.vlgmr.msra.gmra.mrb[24].mxu1 %vm408_vm0, %v19793_v58  ;;  %v20473_v59 = vsel %vm21776_vm8, %v13561_v25, %v13563_v10  ;;  %vm21789_vm8 = vmmov %vm21783_vm5 }
 0x834   : > { %7718 = vmatpush1.bf16.msra.mxu0 %v7596_v45  ;;  %15499 = vmatpush3.bf16.msra.mxu1 %v10035_v46 }
 0x835   : > { %10325 = vmatprep.subr.bf16.mxu1 %v10306_v8  ;;  %7706 = vmatprep.mubr.bf16.mxu0 %v21493_v38 }
 0x836   : > { %v7824_v17 = vpop.permute.xlu0 %7823  ;;  %10197 = vmatprep.mubr.bf16.mxu1 %v21493_v38 }
 0x837   : > { %v20480_v53 = vpop.permute.xlu1 %13566  ;;  %v7834_v26 = vsel %vm21779_vm1, %v7822_v30, %v7824_v17  ;;  %vm21795_vm1 = vmmov %vm21783_vm5 }
 0x838   : > { %21778 = vst [vmem:[#allocation91_spill] sm:$0xff] %v20480_v53  ;;  %7852 = vmatprep.subr.bf16.mxu0 %v7834_v26 }
 0x83a   : > { %v20483_v24 = vpop.permute.xlu0 %13564 }
 0x83b   : > { %21780 = vst [vmem:[#allocation92_spill] sm:$0xff] %v20483_v24  ;;  %v20487_v46 = vsel %vm21781_vm10, %v13563_v10, %v20483_v24  ;;  %v20489_v25 = vpop.permute.xlu1 %7827  ;;  %14916 = vmatmul.mubr.msk.bf16.gmra.mrb[40].mxu0 %vm408_vm0, %v19503_v4  ;;  %14992 = vmatmul.mubr.msk.bf16.gmra.mrb[28].mxu1 %vm408_vm0, %v19787_v28  ;;  %v10305_v10 = vsel %vm21783_vm5, %v19834_v5, %v19820_v60  ;;  %v21788_v60 = vld [vmem:[#allocation5_spill] sm:$0xff]  ;;  %vm21798_vm10 = vmmov %vm21784_vm6 }
 0x83c   : > { %21782 = vst [vmem:[#allocation13_spill] sm:$0xff] %v20487_v46  ;;  %15500 = vmatprep.mubr.msk.bf16.mxu1 %vm408_vm0, %v19793_v58  ;;  %7749 = vmatprep.mubr.bf16.mxu0 %v21493_v38  ;;  %v7833_v46 = vsel %vm21784_vm6, %v7820_v29, %v7822_v30  ;;  %v10308_v5 = vsel %vm21789_vm8, %v21788_v60, %v19859_v39  ;;  %vm21803_vm5 = vmmov %vm21784_vm6 }
 0x83d   : > { %vm21805_vm6 = vmmov %vm21795_vm1 }
 0x83e   : > { %v7826_v45 = vpop.permute.xlu0 %7825  ;;  %vm21808_vm8 = vmmov %vm21803_vm5 }
 0x83f   : > { %v13832_v8 = vpop.permute.xlu1 %13831  ;;  %v7836_v53 = vsel %vm21787_vm7, %v7826_v45, %v20489_v25  ;;  %vm21807_vm7 = vmmov %vm21795_vm1 }
 0x842   : > { %v13830_v26 = vpop.permute.xlu0 %13829 }
 0x843   : > { %v20502_v24 = vpop.permute.xlu1 %13823  ;;  %14917 = vmatmul.mubr.msk.bf16.vlgmr.msra.gmra.mrb[44].mxu0 %vm408_vm0, %v19343_v34  ;;  %15501 = vmatmul.mubr.msk.bf16.vlgmr.msra.gmra.mrb[4].mxu1 %vm408_vm0, %v19787_v28  ;;  %v20509_v58 = vsel %vm6666_vm11, %v13830_v26, %v13832_v8 }
 0x844   : > { %21785 = vst [vmem:[#allocation93_spill] sm:$0xff] %v20502_v24  ;;  %21786 = vst [vmem:[#allocation94_spill] sm:$0xff] %v20509_v58  ;;  %7853 = vmatpush1.bf16.msra.mxu0 %v7833_v46  ;;  %10326 = vmatpush1.bf16.msra.mxu1 %v10305_v10  ;;  %v21792_v10 = vld [vmem:[#allocation26_spill] sm:$0xff] }
 0x845   : > { %7905 = vmatprep.subr.bf16.mxu0 %v7836_v53  ;;  %10378 = vmatprep.subr.bf16.mxu1 %v10308_v5  ;;  %v10307_v53 = vsel %vm21793_vm9, %v19843_v6, %v21788_v60  ;;  %v21794_v5 = vld [vmem:[#allocation6_spill] sm:$0xff]  ;;  %v7835_v60 = vsel %vm21798_vm10, %v7824_v17, %v7826_v45  ;;  %vm21810_vm9 = vcmask 326656  }
 0x846   : > { %v13828_v30 = vpop.permute.xlu0 %13827  ;;  %7759 = vmatprep.mubr.bf16.mxu0 %v21493_v38  ;;  %10357 = vmatprep.mubr.bf16.mxu1 %v21493_v38  ;;  %vm21814_vm10 = vmmov %vm21810_vm9 }
 0x847   : > { %v20519_v34 = vsel %vm6666_vm11, %v13828_v30, %v13830_v26  ;;  %v20521_v28 = vpop.permute.xlu1 %13825  ;;  %v10310_v26 = vsel %vm21795_vm1, %v19877_v2, %v21794_v5  ;;  %vm21813_vm1 = vcmask 7168  }
 0x848   : > { %21790 = vst [vmem:[#allocation5_spill] sm:$0xff] %v20519_v34  ;;  %21791 = vst [vmem:[#allocation95_spill] sm:$0xff] %v20521_v28  ;;  %v17236_v34 = vld [vmem:[%s17345_s25] ss:$16 sps:$4 sm:$0xff]  }
 0x84a   : > { %v7830_v29 = vpop.permute.xlu0 %7829 }
 0x84b   : > { %v13836_v46 = vpop.permute.xlu1 %13835  ;;  %14918 = vmatmul.mubr.msk.bf16.gmra.mrb[48].mxu0 %vm408_vm0, %v19503_v4  ;;  %14995 = vmatmul.mubr.msk.bf16.vlgmr.msra.gmra.mrb[8].mxu1 %vm408_vm0, %v21792_v10 }
 0x84c   : > { %10379 = vmatpush1.bf16.msra.mxu1 %v10307_v53  ;;  %7884 = vmatprep.mubr.bf16.mxu0 %v21493_v38 }
 0x84d   : > { %10431 = vmatprep.subr.bf16.mxu1 %v10310_v26  ;;  %10367 = vmatprep.mubr.bf16.mxu1 %v21493_v38  ;;  %v21800_v26 = vld [vmem:[#allocation24_spill] sm:$0xff] }
 0x84e   : > { %v13834_v30 = vpop.permute.xlu0 %13833 }
 0x84f   : > { %v20536_v4 = vsel %vm6666_vm11, %v13832_v8, %v13834_v30  ;;  %v20538_v28 = vpop.permute.xlu1 %8068  ;;  %v20541_v24 = vsel %vm6666_vm11, %v13834_v30, %v13836_v46 }
 0x850   : > { %21796 = vst [vmem:[#allocation26_spill] sm:$0xff] %v20536_v4  ;;  %21797 = vst [vmem:[#allocation6_spill] sm:$0xff] %v20541_v24  ;;  %v21802_v4 = vld [vmem:[#allocation18_spill] sm:$0xff] }
 0x851   : > { %v7838_v30 = vsel %vm21803_vm5, %v7830_v29, %v21802_v4  ;;  %v21806_v4 = vld [vmem:[#allocation27_spill] sm:$0xff]  ;;  %vm21815_vm5 = vmmov %vm21810_vm9 }
 0x852   : > { %v8067_v6 = vpop.permute.xlu0 %8066 }
 0x853   : > { %v20544_v53 = vpop.permute.xlu1 %13837  ;;  %14921 = vmatmul.mubr.msk.bf16.vlgmr.msra.gmra.mrb[28].mxu0 %vm408_vm0, %v17236_v34  ;;  %14996 = vmatmul.mubr.msk.bf16.gmra.mrb[12].mxu1 %vm408_vm0, %v21800_v26 }
 0x854   : > { %21799 = vst [vmem:[#allocation96_spill] sm:$0xff] %v20544_v53  ;;  %v20552_v8 = vsel %vm6666_vm11, %v13836_v46, %v20544_v53  ;;  %7906 = vmatpush1.bf16.msra.mxu0 %v7835_v60  ;;  %7894 = vmatprep.mubr.bf16.mxu0 %v21493_v38  ;;  %v10309_v46 = vsel %vm21805_vm6, %v19859_v39, %v19877_v2  ;;  %vm21816_vm6 = vmmov %vm21813_vm1 }
 0x855   : > { %21801 = vst [vmem:[#allocation24_spill] sm:$0xff] %v20552_v8  ;;  %7958 = vmatprep.subr.bf16.mxu0 %v7838_v30  ;;  %10410 = vmatprep.mubr.bf16.mxu1 %v21493_v38  ;;  %v10311_v60 = vsel %vm21807_vm7, %v21794_v5, %v21806_v4  ;;  %v8079_v2 = vsel %vm21810_vm9, %v8067_v6, %v20538_v28  ;;  %vm21817_vm7 = vmmov %vm21813_vm1 }
 0x856   : > { %v8065_v17 = vpop.permute.xlu0 %8064  ;;  %vm21821_vm9 = vmmov %vm21813_vm1 }
 0x857   : > { %v8071_v45 = vpop.permute.xlu1 %8070 }
 0x85a   : > { %v20558_v24 = vpop.permute.xlu0 %13839 }
 0x85b   : > { %21804 = vst [vmem:[#allocation18_spill] sm:$0xff] %v20558_v24  ;;  %v20560_v58 = vpop.permute.xlu1 %8074  ;;  %14922 = vmatmul.mubr.msk.bf16.gmra.mrb[32].mxu0 %vm408_vm0, %v17237_v12  ;;  %14997 = vmatmul.mubr.msk.bf16.vlgmr.msra.gmra.mrb[16].mxu1 %vm408_vm0, %v21792_v10  ;;  %v7837_v24 = vsel %vm21808_vm8, %v20489_v25, %v7830_v29  ;;  %vm21818_vm8 = vmmov %vm21815_vm5 }
 0x85c   : > { %10432 = vmatpush1.bf16.msra.mxu1 %v10309_v46  ;;  %7937 = vmatprep.mubr.bf16.mxu0 %v21493_v38 }
 0x85d   : > { %15504 = vmatprep.subr.bf16.mxu1 %v10311_v60  ;;  %10420 = vmatprep.mubr.bf16.mxu1 %v21493_v38 }
 0x85e   : > { %v20574_v30 = vpop.permute.xlu0 %8072 }
 0x85f   : > { %v14115_v8 = vpop.permute.xlu1 %14114 }
 0x862   : > { %v14113_v53 = vpop.permute.xlu0 %14112 }
 0x863   : > { %v20578_v56 = vpop.permute.xlu1 %8339  ;;  %14923 = vmatmul.mubr.msk.bf16.vlgmr.msra.gmra.mrb[36].mxu0 %vm408_vm0, %v17236_v34  ;;  %14998 = vmatmul.mubr.msk.bf16.gmra.mrb[20].mxu1 %vm408_vm0, %v21800_v26  ;;  %v20584_v39 = vsel %vm6950_vm2, %v14113_v53, %v14115_v8 }
 0x864   : > { %21809 = vst [vmem:[#allocation27_spill] sm:$0xff] %v20584_v39  ;;  %7959 = vmatpush1.bf16.msra.mxu0 %v7837_v24  ;;  %7947 = vmatprep.mubr.bf16.mxu0 %v21493_v38  ;;  %v21812_v24 = vld [vmem:[#allocation28_spill] sm:$0xff] }
 0x865   : > { %8097 = vmatprep.subr.bf16.mxu0 %v8079_v2  ;;  %10463 = vmatprep.mubr.bf16.mxu1 %v21493_v38  ;;  %v10582_v4 = vsel %vm21813_vm1, %v21812_v24, %v19901_v52  ;;  %vm21823_vm1 = vmmov %vm21815_vm5 }
 0x866   : > { %v14111_v25 = vpop.permute.xlu0 %14110 }
 0x867   : > { %v20591_v29 = vsel %vm6950_vm2, %v14111_v25, %v14113_v53  ;;  %v20593_v5 = vpop.permute.xlu1 %8337 }
 0x868   : > { %21811 = vst [vmem:[#allocation97_spill] sm:$0xff] %v20591_v29 }
 0x86a   : > { %v20595_v46 = vpop.permute.xlu0 %8341 }
 0x86b   : > { %14924 = vmatmul.mubr.msk.bf16.gmra.mrb[40].mxu0 %vm408_vm0, %v17237_v12  ;;  %14999 = vmatmul.mubr.msk.bf16.vlgmr.msra.gmra.mrb[24].mxu1 %vm408_vm0, %v21792_v10  ;;  %v14119_v53 = vpop.permute.xlu1 %14118 }
 0x86c   : > { %15505 = vmatpush3.bf16.msra.mxu1 %v10311_v60  ;;  %7990 = vmatprep.mubr.bf16.mxu0 %v21493_v38  ;;  %v8078_v60 = vsel %vm21814_vm10, %v8065_v17, %v8067_v6  ;;  %v8080_v17 = vsel %vm21818_vm8, %v20538_v28, %v8071_v45  ;;  %vm21826_vm10 = vmmov %vm21816_vm6 }
 0x86d   : > { %10601 = vmatprep.subr.bf16.mxu1 %v10582_v4  ;;  %10473 = vmatprep.mubr.bf16.mxu1 %v21493_v38  ;;  %v8081_v4 = vsel %vm21815_vm5, %v8071_v45, %v20574_v30  ;;  %v21827_v45 = vld [vmem:[#allocation23_spill] sm:$0xff]  ;;  %vm21829_vm5 = vmmov %vm21823_vm1 }
 0x86e   : > { %v14117_v2 = vpop.permute.xlu0 %14116  ;;  %vm21831_vm8 = vmmov %vm21816_vm6 }
 0x86f   : > { %v20606_v25 = vsel %vm6950_vm2, %v14115_v8, %v14117_v2  ;;  %v20609_v29 = vsel %vm6950_vm2, %v14117_v2, %v14119_v53  ;;  %v21824_v2 = vld [vmem:[#allocation31_spill] sm:$0xff] }
 0x872   : > { %v20611_v39 = vpop.permute.xlu0 %8343 }
 0x873   : > { %14925 = vmatmul.mubr.msk.bf16.vlgmr.msra.gmra.mrb[44].mxu0 %vm408_vm0, %v17236_v34  ;;  %15000 = vmatmul.mubr.msk.bf16.gmra.mrb[28].mxu1 %vm408_vm0, %v21800_v26  ;;  %v10581_v34 = vsel %vm21816_vm6, %v19890_v50, %v21812_v24  ;;  %v21820_v50 = vld [vmem:[#allocation29_spill] sm:$0xff] }
 0x874   : > { %8098 = vmatpush1.bf16.msra.mxu0 %v8078_v60  ;;  %15506 = vmatprep.mubr.msk.bf16.mxu1 %vm408_vm0, %v21792_v10  ;;  %v10584_v10 = vsel %vm21817_vm7, %v19926_v1, %v19912_v9  ;;  %v21825_v60 = vld [vmem:[#allocation30_spill] sm:$0xff]  ;;  %vm21830_vm7 = vcmask 318464  }
 0x875   : > { %8150 = vmatprep.subr.bf16.mxu0 %v8081_v4  ;;  %8000 = vmatprep.mubr.bf16.mxu0 %v21493_v38  ;;  %v10586_v28 = vsel %vm21826_vm10, %v21825_v60, %v21824_v2  ;;  %v10585_v4 = vsel %vm21816_vm6, %v19912_v9, %v21825_v60  ;;  %v21852_v60 = vld [vmem:[#allocation37_spill] sm:$0xff] }
 0x876   : > { %v20622_v8 = vpop.permute.xlu0 %14120 }
 0x877   : > { %v20626_v6 = vsel %vm6950_vm2, %v14119_v53, %v20622_v8  ;;  %v21819_v53 = vld [vmem:[#allocation20_spill] sm:$0xff] }
 0x87b   : > { %14926 = vmatmul.mubr.msk.bf16.gmra.mrb[48].mxu0 %vm408_vm0, %v17237_v12  ;;  %15507 = vmatmul.mubr.msk.bf16.vlgmr.msra.gmra.mrb[4].mxu1 %vm408_vm0, %v21800_v26  ;;  %v10583_v12 = vsel %vm21821_vm9, %v19901_v52, %v19926_v1  ;;  %v21822_v26 = vld [vmem:[#allocation22_spill] sm:$0xff]  ;;  %v21828_v52 = vld [vmem:[#allocation4_spill] sm:$0xff]  ;;  %v8082_v1 = vsel %vm21829_vm5, %v20574_v30, %v20560_v58  ;;  %vm21832_vm9 = vmmov %vm21830_vm7 }
 0x87c   : > { %10602 = vmatpush1.bf16.msra.mxu1 %v10581_v34  ;;  %8129 = vmatprep.mubr.bf16.mxu0 %v21493_v38  ;;  %v8083_v24 = vsel %vm21823_vm1, %v20560_v58, %v21822_v26  ;;  %v8352_v34 = vsel %vm21830_vm7, %v20578_v56, %v20595_v46  ;;  %v10587_v58 = vsel %vm21831_vm8, %v21824_v2, %v19946_v13  ;;  %v8346_v13 = vpop.permute.xlu1 %8345  ;;  %vm21833_vm1 = vmmov %vm21830_vm7  ;;  %vm21843_vm7 = vcmask 1039360   ;;  %v21849_v26 = vld [vmem:[#allocation38_spill] sm:$0xff] }
 0x87d   : > { %10654 = vmatprep.subr.bf16.mxu1 %v10584_v10  ;;  %10633 = vmatprep.mubr.bf16.mxu1 %v21493_v38  ;;  %v8351_v9 = vsel %vm21832_vm9, %v20593_v5, %v20578_v56  ;;  %v8354_v30 = vsel %vm21833_vm1, %v20611_v39, %v8346_v13  ;;  %v8348_v56 = vpop.permute.xlu0 %8347  ;;  %vm21834_vm10 = vmmov %vm21833_vm1  ;;  %v21835_v5 = vld [vmem:[#allocation25_spill] sm:$0xff]  ;;  %v21836_v10 = vld [vmem:[#allocation42_spill] sm:$0xff] }
 0x87e   : > { %vm21837_vm5 = vmmov %vm21833_vm1 }
 0x87f   : > { %vm21840_vm6 = vmmov %vm21833_vm1 }
 0x880   : > { %vm21845_vm8 = vmmov %vm21843_vm7 }
 0x881   : > { %vm21846_vm9 = vmmov %vm21843_vm7 }
 0x882   : > { %vm21848_vm1 = vmmov %vm21843_vm7 }
 0x883   : > { %14929 = vmatmul.mubr.msk.bf16.vlgmr.msra.gmra.mrb[28].mxu0 %vm408_vm0, %v21819_v53  ;;  %15003 = vmatmul.mubr.msk.bf16.vlgmr.msra.gmra.mrb[8].mxu1 %vm408_vm0, %v21820_v50 }
 0x884   : > { %8151 = vmatpush1.bf16.msra.mxu0 %v8080_v17  ;;  %10655 = vmatpush1.bf16.msra.mxu1 %v10583_v12  ;;  %v8356_v17 = vsel %vm21837_vm5, %v8348_v56, %v21836_v10  ;;  %v11103_v12 = vsel %vm21848_vm1, %v19970_v14, %v19990_v7  ;;  %vm21853_vm5 = vmmov %vm21848_vm1 }
 0x885   : > { %8203 = vmatprep.subr.bf16.mxu0 %v8083_v24  ;;  %10707 = vmatprep.subr.bf16.mxu1 %v10586_v28  ;;  %v21850_v24 = vld [vmem:[#allocation40_spill] sm:$0xff] }
 0x886   : > { %8139 = vmatprep.mubr.bf16.mxu0 %v21493_v38  ;;  %10643 = vmatprep.mubr.bf16.mxu1 %v21493_v38 }
 0x88b   : > { %14930 = vmatmul.mubr.msk.bf16.gmra.mrb[32].mxu0 %vm408_vm0, %v21827_v45  ;;  %15004 = vmatmul.mubr.msk.bf16.gmra.mrb[12].mxu1 %vm408_vm0, %v21828_v52 }
 0x88c   : > { %8182 = vmatprep.mubr.bf16.mxu0 %v21493_v38  ;;  %10686 = vmatprep.mubr.bf16.mxu1 %v21493_v38 }
 0x893   : > { %14931 = vmatmul.mubr.msk.bf16.vlgmr.msra.gmra.mrb[36].mxu0 %vm408_vm0, %v21819_v53  ;;  %15005 = vmatmul.mubr.msk.bf16.vlgmr.msra.gmra.mrb[16].mxu1 %vm408_vm0, %v21820_v50 }
 0x894   : > { %8204 = vmatpush1.bf16.msra.mxu0 %v8082_v1  ;;  %10708 = vmatpush1.bf16.msra.mxu1 %v10585_v4  ;;  %v21860_v4 = vld [vmem:[#allocation41_spill] sm:$0xff] }
 0x895   : > { %8370 = vmatprep.subr.bf16.mxu0 %v8352_v34  ;;  %15510 = vmatprep.subr.bf16.mxu1 %v10587_v58 }
 0x896   : > { %8192 = vmatprep.mubr.bf16.mxu0 %v21493_v38  ;;  %10696 = vmatprep.mubr.bf16.mxu1 %v21493_v38 }
 0x89b   : > { %14932 = vmatmul.mubr.msk.bf16.gmra.mrb[40].mxu0 %vm408_vm0, %v21827_v45  ;;  %15006 = vmatmul.mubr.msk.bf16.gmra.mrb[20].mxu1 %vm408_vm0, %v21828_v52 }
 0x89c   : > { %8235 = vmatprep.mubr.bf16.mxu0 %v21493_v38  ;;  %10739 = vmatprep.mubr.bf16.mxu1 %v21493_v38 }
 0x8a3   : > { %14933 = vmatmul.mubr.msk.bf16.vlgmr.msra.gmra.mrb[44].mxu0 %vm408_vm0, %v21819_v53  ;;  %15007 = vmatmul.mubr.msk.bf16.vlgmr.msra.gmra.mrb[24].mxu1 %vm408_vm0, %v21820_v50 }
 0x8a4   : > { %8371 = vmatpush1.bf16.msra.mxu0 %v8351_v9  ;;  %15511 = vmatpush3.bf16.msra.mxu1 %v10587_v58  ;;  %v21864_v9 = vld [vmem:[#allocation45_spill] sm:$0xff] }
 0x8a5   : > { %8423 = vmatprep.subr.bf16.mxu0 %v8354_v30  ;;  %10847 = vmatprep.subr.bf16.mxu1 %v20305_v43  ;;  %v8353_v43 = vsel %vm21834_vm10, %v20595_v46, %v20611_v39  ;;  %v21838_v39 = vld [vmem:[#allocation21_spill] sm:$0xff]  ;;  %v21839_v46 = vld [vmem:[#allocation32_spill] sm:$0xff]  ;;  %vm21851_vm10 = vmmov %vm21848_vm1 }
 0x8a6   : > { %8245 = vmatprep.mubr.bf16.mxu0 %v21493_v38  ;;  %10749 = vmatprep.mubr.bf16.mxu1 %v21493_v38  ;;  %v11106_v2 = vsel %vm21851_vm10, %v21850_v24, %v21849_v26 }
 0x8ab   : > { %14934 = vmatmul.mubr.msk.bf16.gmra.mrb[48].mxu0 %vm408_vm0, %v21827_v45  ;;  %15008 = vmatmul.mubr.msk.bf16.gmra.mrb[28].mxu1 %vm408_vm0, %v21828_v52 }
 0x8ac   : > { %15512 = vmatprep.mubr.msk.bf16.mxu1 %vm408_vm0, %v21820_v50  ;;  %8402 = vmatprep.mubr.bf16.mxu0 %v21493_v38  ;;  %v21847_v50 = vld [vmem:[#allocation36_spill] sm:$0xff] }
 0x8b3   : > { %14937 = vmatmul.mubr.msk.bf16.vlgmr.msra.gmra.mrb[28].mxu0 %vm408_vm0, %v21835_v5  ;;  %15513 = vmatmul.mubr.msk.bf16.vlgmr.msra.gmra.mrb[4].mxu1 %vm408_vm0, %v21828_v52  ;;  %v21858_v52 = vld [vmem:[#allocation43_spill] sm:$0xff] }
 0x8b4   : > { %8424 = vmatpush1.bf16.msra.mxu0 %v8353_v43  ;;  %10848 = vmatpush1.bf16.msra.mxu1 %v20309_v62  ;;  %v8355_v62 = vsel %vm21840_vm6, %v8346_v13, %v8348_v56  ;;  %vm21855_vm6 = vcmask 1031168  }
 0x8b5   : > { %8476 = vmatprep.subr.bf16.mxu0 %v8356_v17  ;;  %10900 = vmatprep.subr.bf16.mxu1 %v20344_v63  ;;  %v21841_v63 = vld [vmem:[#allocation33_spill] sm:$0xff]  ;;  %vm21863_vm1 = vmmov %vm21855_vm6 }
 0x8b6   : > { %8412 = vmatprep.mubr.bf16.mxu0 %v21493_v38  ;;  %10879 = vmatprep.mubr.bf16.mxu1 %v21493_v38  ;;  %vm21865_vm10 = vmmov %vm21863_vm1  ;;  %v21874_v17 = vld [vmem:[#allocation57_spill] sm:$0xff] }
 0x8bb   : > { %14938 = vmatmul.mubr.msk.bf16.gmra.mrb[32].mxu0 %vm408_vm0, %v21838_v39  ;;  %15011 = vmatmul.mubr.msk.bf16.vlgmr.msra.gmra.mrb[8].mxu1 %vm408_vm0, %v21839_v46 }
 0x8bc   : > { %10901 = vmatpush1.bf16.msra.mxu1 %v20358_v36  ;;  %8455 = vmatprep.mubr.bf16.mxu0 %v21493_v38  ;;  %v21844_v36 = vld [vmem:[#allocation35_spill] sm:$0xff] }
 0x8bd   : > { %10953 = vmatprep.subr.bf16.mxu1 %v20375_v51  ;;  %10889 = vmatprep.mubr.bf16.mxu1 %v21493_v38  ;;  %v21842_v51 = vld [vmem:[#allocation34_spill] sm:$0xff] }
 0x8be   : > { %v11101_v53 = vsel %vm21845_vm8, %v21844_v36, %v21842_v51  ;;  %vm21859_vm8 = vmmov %vm21855_vm6 }
 0x8bf   : > { %v11377_v1 = vsel %vm21859_vm8, %v21858_v52, %v20040_v0 }
 0x8c3   : > { %14939 = vmatmul.mubr.msk.bf16.vlgmr.msra.gmra.mrb[36].mxu0 %vm408_vm0, %v21835_v5  ;;  %15012 = vmatmul.mubr.msk.bf16.gmra.mrb[12].mxu1 %vm408_vm0, %v21841_v63 }
 0x8c4   : > { %8477 = vmatpush1.bf16.msra.mxu0 %v8355_v62  ;;  %8465 = vmatprep.mubr.bf16.mxu0 %v21493_v38  ;;  %v21878_v62 = vld [vmem:[#allocation56_spill] sm:$0xff] }
 0x8c5   : > { %10932 = vmatprep.mubr.bf16.mxu1 %v21493_v38 }
 0x8cb   : > { %14940 = vmatmul.mubr.msk.bf16.gmra.mrb[40].mxu0 %vm408_vm0, %v21838_v39  ;;  %15013 = vmatmul.mubr.msk.bf16.vlgmr.msra.gmra.mrb[16].mxu1 %vm408_vm0, %v21839_v46 }
 0x8cc   : > { %10954 = vmatpush1.bf16.msra.mxu1 %v20332_v22  ;;  %8508 = vmatprep.mubr.bf16.mxu0 %v21493_v38  ;;  %v11102_v22 = vsel %vm21843_vm7, %v21842_v51, %v19970_v14  ;;  %v11105_v14 = vsel %vm21853_vm5, %v19981_v15, %v21850_v24  ;;  %vm21857_vm7 = vmmov %vm21855_vm6  ;;  %vm21866_vm5 = vcmask 900096  }
 0x8cd   : > { %15516 = vmatprep.subr.bf16.mxu1 %v20362_v42  ;;  %10942 = vmatprep.mubr.bf16.mxu1 %v21493_v38  ;;  %v11648_v30 = vsel %vm21866_vm5, %v20045_v33, %v20065_v44  ;;  %vm21872_vm8 = vmmov %vm21866_vm5 }
 0x8d3   : > { %14941 = vmatmul.mubr.msk.bf16.vlgmr.msra.gmra.mrb[44].mxu0 %vm408_vm0, %v21835_v5  ;;  %15014 = vmatmul.mubr.msk.bf16.gmra.mrb[20].mxu1 %vm408_vm0, %v21841_v63  ;;  %v21871_v5 = vld [vmem:[#allocation54_spill] sm:$0xff] }
 0x8d4   : > { %8518 = vmatprep.mubr.bf16.mxu0 %v21493_v38  ;;  %10985 = vmatprep.mubr.bf16.mxu1 %v21493_v38 }
 0x8db   : > { %14942 = vmatmul.mubr.msk.bf16.gmra.mrb[48].mxu0 %vm408_vm0, %v21838_v39  ;;  %15015 = vmatmul.mubr.msk.bf16.vlgmr.msra.gmra.mrb[24].mxu1 %vm408_vm0, %v21839_v46 }
 0x8dc   : > { %15517 = vmatpush3.bf16.msra.mxu1 %v20362_v42  ;;  %10995 = vmatprep.mubr.bf16.mxu1 %v21493_v38  ;;  %v11104_v42 = vsel %vm21846_vm9, %v19990_v7, %v19981_v15  ;;  %v21854_v7 = vld [vmem:[#allocation39_spill] sm:$0xff]  ;;  %v21856_v15 = vld [vmem:[#allocation44_spill] sm:$0xff]  ;;  %vm21861_vm9 = vmmov %vm21855_vm6 }
 0x8dd   : > { %11120 = vmatprep.subr.bf16.mxu1 %v11102_v22  ;;  %v11375_v28 = vsel %vm21855_vm6, %v20011_v11, %v21854_v7  ;;  %v11374_v45 = vsel %vm21857_vm7, %v21856_v15, %v20011_v11  ;;  %v11376_v34 = vsel %vm21861_vm9, %v21854_v7, %v21858_v52  ;;  %v21862_v11 = vld [vmem:[#allocation47_spill] sm:$0xff]  ;;  %vm21868_vm6 = vmmov %vm21866_vm5  ;;  %v21881_v15 = vld [vmem:[#allocation60_spill] sm:$0xff] }
 0x8de   : > { %v11379_v58 = vsel %vm21863_vm1, %v21862_v11, %v20056_v27  ;;  %v11378_v13 = vsel %vm21865_vm10, %v20040_v0, %v21862_v11  ;;  %v21867_v0 = vld [vmem:[#allocation46_spill] sm:$0xff]  ;;  %vm21870_vm7 = vmmov %vm21866_vm5  ;;  %v21882_v52 = vld [vmem:[#allocation59_spill] sm:$0xff] }
 0x8df   : > { %v11647_v56 = vsel %vm21868_vm6, %v21867_v0, %v20045_v33  ;;  %v21873_v33 = vld [vmem:[#allocation55_spill] sm:$0xff]  ;;  %vm21875_vm9 = vmmov %vm21866_vm5 }
 0x8e0   : > { %v11652_v39 = vsel %vm21875_vm9, %v21874_v17, %v21873_v33  ;;  %vm21877_vm1 = vmmov %vm21866_vm5 }
 0x8e3   : > { %15016 = vmatmul.mubr.msk.bf16.gmra.mrb[28].mxu1 %vm408_vm0, %v21841_v63 }
 0x8e4   : > { %15518 = vmatprep.mubr.msk.bf16.mxu1 %vm408_vm0, %v21839_v46  ;;  %v21876_v46 = vld [vmem:[#allocation49_spill] sm:$0xff] }
 0x8eb   : > { %15519 = vmatmul.mubr.msk.bf16.vlgmr.msra.gmra.mrb[4].mxu1 %vm408_vm0, %v21841_v63  ;;  %v21879_v63 = vld [vmem:[#allocation58_spill] sm:$0xff] }
 0x8ec   : > { %11121 = vmatpush1.bf16.msra.mxu1 %v11101_v53  ;;  %11152 = vmatprep.mubr.bf16.mxu1 %v21493_v38  ;;  %v11931_v51 = vsel %vm4748_vm14, %v21879_v63, %v21878_v62  ;;  %v11930_v24 = vsel %vm4748_vm14, %v20125_v21, %v21879_v63  ;;  %v11932_v21 = vsel %vm4748_vm14, %v21878_v62, %v21881_v15  ;;  %v21889_v63 = vld [vmem:[#allocation51_spill] sm:$0xff]  ;;  %v21903_v15 = vld [vmem:[#allocation81_spill] sm:$0xff] }
 0x8ed   : > { %11173 = vmatprep.subr.bf16.mxu1 %v11104_v42 }
 0x8f3   : > { %15019 = vmatmul.mubr.msk.bf16.vlgmr.msra.gmra.mrb[8].mxu1 %vm408_vm0, %v21847_v50 }
 0x8f4   : > { %11174 = vmatpush1.bf16.msra.mxu1 %v11103_v12  ;;  %11162 = vmatprep.mubr.bf16.mxu1 %v21493_v38 }
 0x8f5   : > { %11226 = vmatprep.subr.bf16.mxu1 %v11106_v2  ;;  %v21880_v2 = vld [vmem:[#allocation48_spill] sm:$0xff] }
 0x8fb   : > { %15020 = vmatmul.mubr.msk.bf16.gmra.mrb[12].mxu1 %vm408_vm0, %v21852_v60 }
 0x8fc   : > { %11205 = vmatprep.mubr.bf16.mxu1 %v21493_v38 }
 0x903   : > { %15021 = vmatmul.mubr.msk.bf16.vlgmr.msra.gmra.mrb[16].mxu1 %vm408_vm0, %v21847_v50 }
 0x904   : > { %11227 = vmatpush1.bf16.msra.mxu1 %v11105_v14  ;;  %11215 = vmatprep.mubr.bf16.mxu1 %v21493_v38 }
 0x905   : > { %15522 = vmatprep.subr.bf16.mxu1 %v21849_v26 }
 0x90b   : > { %15022 = vmatmul.mubr.msk.bf16.gmra.mrb[20].mxu1 %vm408_vm0, %v21852_v60 }
 0x90c   : > { %11258 = vmatprep.mubr.bf16.mxu1 %v21493_v38 }
 0x913   : > { %15023 = vmatmul.mubr.msk.bf16.vlgmr.msra.gmra.mrb[24].mxu1 %vm408_vm0, %v21847_v50 }
 0x914   : > { %15523 = vmatpush3.bf16.msra.mxu1 %v21849_v26  ;;  %11268 = vmatprep.mubr.bf16.mxu1 %v21493_v38 }
 0x915   : > { %11393 = vmatprep.subr.bf16.mxu1 %v11375_v28 }
 0x91b   : > { %15024 = vmatmul.mubr.msk.bf16.gmra.mrb[28].mxu1 %vm408_vm0, %v21852_v60 }
 0x91c   : > { %15524 = vmatprep.mubr.msk.bf16.mxu1 %vm408_vm0, %v21847_v50 }
 0x923   : > { %15525 = vmatmul.mubr.msk.bf16.vlgmr.msra.gmra.mrb[4].mxu1 %vm408_vm0, %v21852_v60 }
 0x924   : > { %11394 = vmatpush1.bf16.msra.mxu1 %v11374_v45  ;;  %11425 = vmatprep.mubr.bf16.mxu1 %v21493_v38  ;;  %v17238_v45 = vld [vmem:[%s17345_s25 + $0x8] ss:$16 sps:$4 sm:$0xff]  }
 0x925   : > { %11446 = vmatprep.subr.bf16.mxu1 %v11377_v1  ;;  %v11935_v1 = vsel %vm4748_vm14, %v21882_v52, %v20149_v57  ;;  %v21905_v52 = vld [vmem:[#allocation78_spill] sm:$0xff] }
 0x92b   : > { %15027 = vmatmul.mubr.msk.bf16.vlgmr.msra.gmra.mrb[8].mxu1 %vm408_vm0, %v21860_v4 }
 0x92c   : > { %11447 = vmatpush1.bf16.msra.mxu1 %v11376_v34  ;;  %11435 = vmatprep.mubr.bf16.mxu1 %v21493_v38 }
 0x92d   : > { %11499 = vmatprep.subr.bf16.mxu1 %v11379_v58 }
 0x933   : > { %15028 = vmatmul.mubr.msk.bf16.gmra.mrb[12].mxu1 %vm408_vm0, %v21864_v9 }
 0x934   : > { %11478 = vmatprep.mubr.bf16.mxu1 %v21493_v38 }
 0x93b   : > { %15029 = vmatmul.mubr.msk.bf16.vlgmr.msra.gmra.mrb[16].mxu1 %vm408_vm0, %v21860_v4 }
 0x93c   : > { %11500 = vmatpush1.bf16.msra.mxu1 %v11378_v13  ;;  %11488 = vmatprep.mubr.bf16.mxu1 %v21493_v38 }
 0x93d   : > { %15528 = vmatprep.subr.bf16.mxu1 %v20056_v27 }
 0x943   : > { %15030 = vmatmul.mubr.msk.bf16.gmra.mrb[20].mxu1 %vm408_vm0, %v21864_v9 }
 0x944   : > { %11531 = vmatprep.mubr.bf16.mxu1 %v21493_v38 }
 0x94b   : > { %15031 = vmatmul.mubr.msk.bf16.vlgmr.msra.gmra.mrb[24].mxu1 %vm408_vm0, %v21860_v4 }
 0x94c   : > { %15529 = vmatpush3.bf16.msra.mxu1 %v20056_v27  ;;  %11541 = vmatprep.mubr.bf16.mxu1 %v21493_v38  ;;  %v21869_v27 = vld [vmem:[#allocation53_spill] sm:$0xff] }
 0x94d   : > { %11666 = vmatprep.subr.bf16.mxu1 %v11648_v30  ;;  %v11650_v43 = vsel %vm21870_vm7, %v21869_v27, %v20084_v49  ;;  %v11649_v10 = vsel %vm21872_vm8, %v20065_v44, %v21869_v27  ;;  %v11651_v44 = vsel %vm21877_vm1, %v20084_v49, %v21874_v17  ;;  %v21883_v27 = vld [vmem:[#allocation61_spill] sm:$0xff]  ;;  %v21884_v17 = vld [vmem:[#allocation52_spill] sm:$0xff] }
 0x953   : > { %15032 = vmatmul.mubr.msk.bf16.gmra.mrb[28].mxu1 %vm408_vm0, %v21864_v9 }
 0x954   : > { %15530 = vmatprep.mubr.msk.bf16.mxu1 %vm408_vm0, %v21860_v4 }
 0x95b   : > { %15531 = vmatmul.mubr.msk.bf16.vlgmr.msra.gmra.mrb[4].mxu1 %vm408_vm0, %v21864_v9  ;;  %v17239_v9 = vld [vmem:[%s17345_s25 + $0x28] ss:$16 sps:$4 sm:$0xff]  }
 0x95c   : > { %11667 = vmatpush1.bf16.msra.mxu1 %v11647_v56  ;;  %11698 = vmatprep.mubr.bf16.mxu1 %v21493_v38 }
 0x95d   : > { %11719 = vmatprep.subr.bf16.mxu1 %v11650_v43 }
 0x963   : > { %15035 = vmatmul.mubr.msk.bf16.vlgmr.msra.gmra.mrb[8].mxu1 %vm408_vm0, %v21871_v5 }
 0x964   : > { %11720 = vmatpush1.bf16.msra.mxu1 %v11649_v10  ;;  %11708 = vmatprep.mubr.bf16.mxu1 %v21493_v38 }
 0x965   : > { %11772 = vmatprep.subr.bf16.mxu1 %v11652_v39  ;;  %v21885_v39 = vld [vmem:[#allocation50_spill] sm:$0xff] }
 0x96b   : > { %15036 = vmatmul.mubr.msk.bf16.gmra.mrb[12].mxu1 %vm408_vm0, %v21876_v46 }
 0x96c   : > { %11751 = vmatprep.mubr.bf16.mxu1 %v21493_v38 }
 0x973   : > { %15037 = vmatmul.mubr.msk.bf16.vlgmr.msra.gmra.mrb[16].mxu1 %vm408_vm0, %v21871_v5 }
 0x974   : > { %11773 = vmatpush1.bf16.msra.mxu1 %v11651_v44  ;;  %11761 = vmatprep.mubr.bf16.mxu1 %v21493_v38  ;;  %v21888_v44 = vld [vmem:[#allocation64_spill] sm:$0xff] }
 0x975   : > { %15534 = vmatprep.subr.bf16.mxu1 %v21873_v33  ;;  %v12208_v62 = vsel %vm5022_vm15, %v20195_v20, %v21888_v44  ;;  %v21890_v20 = vld [vmem:[#allocation66_spill] sm:$0xff] }
 0x97b   : > { %15038 = vmatmul.mubr.msk.bf16.gmra.mrb[20].mxu1 %vm408_vm0, %v21876_v46 }
 0x97c   : > { %11804 = vmatprep.mubr.bf16.mxu1 %v21493_v38 }
 0x983   : > { %15039 = vmatmul.mubr.msk.bf16.vlgmr.msra.gmra.mrb[24].mxu1 %vm408_vm0, %v21871_v5 }
 0x984   : > { %15535 = vmatpush3.bf16.msra.mxu1 %v21873_v33  ;;  %11814 = vmatprep.mubr.bf16.mxu1 %v21493_v38 }
 0x985   : > { %11949 = vmatprep.subr.bf16.mxu1 %v11931_v51  ;;  %v21900_v51 = vld [vmem:[#allocation74_spill] sm:$0xff] }
 0x986   : > { %v20882_v49 = vpop.f32.mrb[28].mxu0 }
 0x987   : > { %v20884_v22 = vpop.f32.mrb[29].mxu0 }
 0x988   : > { %v20886_v36 = vpop.f32.mrb[30].mxu0 }
 0x989   : > { %v20888_v53 = vpop.f32.mrb[31].mxu0 }
 0x98b   : > { %15040 = vmatmul.mubr.msk.bf16.gmra.mrb[28].mxu1 %vm408_vm0, %v21876_v46 }
 0x98c   : > { %15536 = vmatprep.mubr.msk.bf16.mxu1 %vm408_vm0, %v21871_v5 }
 0x98e   : > { %v20894_v42 = vpop.f32.mrb[32].mxu0 }
 0x98f   : > { %v20896_v50 = vpop.f32.mrb[33].mxu0 }
 0x990   : > { %v20898_v12 = vpop.f32.mrb[34].mxu0 }
 0x991   : > { %v20900_v26 = vpop.f32.mrb[35].mxu0 }
 0x993   : > { %15537 = vmatmul.mubr.msk.bf16.vlgmr.msra.gmra.mrb[4].mxu1 %vm408_vm0, %v21876_v46  ;;  %v21886_v46 = vld [vmem:[#allocation63_spill] sm:$0xff] }
 0x994   : > { %11950 = vmatpush1.bf16.msra.mxu1 %v11930_v24  ;;  %11981 = vmatprep.mubr.bf16.mxu1 %v21493_v38  ;;  %v21901_v24 = vld [vmem:[#allocation73_spill] sm:$0xff] }
 0x995   : > { %12002 = vmatprep.subr.bf16.mxu1 %v21880_v2  ;;  %v21902_v2 = vld [vmem:[#allocation76_spill] sm:$0xff] }
 0x996   : > { %v20909_v60 = vpop.f32.mrb[36].mxu0 }
 0x997   : > { %v20911_v14 = vpop.f32.mrb[37].mxu0 }
 0x998   : > { %v20913_v7 = vpop.f32.mrb[38].mxu0 }
 0x999   : > { %v20915_v28 = vpop.f32.mrb[39].mxu0 }
 0x99b   : > { %15045 = vmatmul.mubr.msk.bf16.vlgmr.msra.gmra.mrb[8].mxu1 %vm408_vm0, %v17238_v45 }
 0x99c   : > { %12003 = vmatpush1.bf16.msra.mxu1 %v11932_v21  ;;  %11991 = vmatprep.mubr.bf16.mxu1 %v21493_v38  ;;  %v21904_v21 = vld [vmem:[#allocation77_spill] sm:$0xff] }
 0x99d   : > { %12055 = vmatprep.subr.bf16.mxu1 %v11935_v1  ;;  %v21907_v1 = vld [vmem:[#allocation80_spill] sm:$0xff] }
 0x99e   : > { %v20926_v4 = vpop.f32.mrb[40].mxu0 }
 0x99f   : > { %v20928_v34 = vpop.f32.mrb[41].mxu0 }
 0x9a0   : > { %v20930_v11 = vpop.f32.mrb[42].mxu0 }
 0x9a1   : > { %v20932_v58 = vpop.f32.mrb[43].mxu0 }
 0x9a3   : > { %15046 = vmatmul.mubr.msk.bf16.gmra.mrb[12].mxu1 %vm408_vm0, %v17239_v9 }
 0x9a4   : > { %12034 = vmatprep.mubr.bf16.mxu1 %v21493_v38 }
 0x9a6   : > { %v20937_v13 = vpop.f32.mrb[44].mxu0 }
 0x9a7   : > { %v20939_v30 = vpop.f32.mrb[45].mxu0 }
 0x9a8   : > { %v20941_v0 = vpop.f32.mrb[46].mxu0 }
 0x9a9   : > { %v20943_v56 = vpop.f32.mrb[47].mxu0 }
 0x9ab   : > { %15047 = vmatmul.mubr.msk.bf16.vlgmr.msra.gmra.mrb[16].mxu1 %vm408_vm0, %v17238_v45 }
 0x9ac   : > { %12056 = vmatpush1.bf16.msra.mxu1 %v21883_v27  ;;  %12044 = vmatprep.mubr.bf16.mxu1 %v21493_v38  ;;  %v21909_v27 = vld [vmem:[#allocation84_spill] sm:$0xff] }
 0x9ad   : > { %15540 = vmatprep.subr.bf16.mxu1 %v20149_v57 }
 0x9ae   : > { %v20949_v43 = vpop.f32.mrb[48].mxu0 }
 0x9af   : > { %v20951_v5 = vpop.f32.mrb[49].mxu0 }
 0x9b0   : > { %v20953_v10 = vpop.f32.mrb[50].mxu0 }
 0x9b1   : > { %v20955_v33 = vpop.f32.mrb[51].mxu0 }
 0x9b3   : > { %15048 = vmatmul.mubr.msk.bf16.gmra.mrb[20].mxu1 %vm408_vm0, %v17239_v9 }
 0x9b4   : > { %12087 = vmatprep.mubr.bf16.mxu1 %v21493_v38 }
 0x9bb   : > { %15049 = vmatmul.mubr.msk.bf16.vlgmr.msra.gmra.mrb[24].mxu1 %vm408_vm0, %v17238_v45 }
 0x9bc   : > { %15541 = vmatpush3.bf16.msra.mxu1 %v20149_v57  ;;  %12097 = vmatprep.mubr.bf16.mxu1 %v21493_v38  ;;  %v21887_v57 = vld [vmem:[#allocation62_spill] sm:$0xff] }
 0x9bd   : > { %12222 = vmatprep.subr.bf16.mxu1 %v21884_v17  ;;  %v21910_v17 = vld [vmem:[#allocation83_spill] sm:$0xff] }
 0x9c3   : > { %15050 = vmatmul.mubr.msk.bf16.gmra.mrb[28].mxu1 %vm408_vm0, %v17239_v9 }
 0x9c4   : > { %15542 = vmatprep.mubr.msk.bf16.mxu1 %vm408_vm0, %v17238_v45  ;;  %v13027_v45 = vsel %vm5844_vm4, %v21904_v21, %v21903_v15 }
 0x9cb   : > { %15543 = vmatmul.mubr.msk.bf16.vlgmr.msra.gmra.mrb[4].mxu1 %vm408_vm0, %v17239_v9  ;;  %v21908_v9 = vld [vmem:[#allocation86_spill] sm:$0xff] }
 0x9cc   : > { %12223 = vmatpush1.bf16.msra.mxu1 %v21885_v39  ;;  %12254 = vmatprep.mubr.bf16.mxu1 %v21493_v38 }
 0x9cd   : > { %12275 = vmatprep.subr.bf16.mxu1 %v20187_v19  ;;  %v12481_v19 = vsel %vm5296_vm13, %v20235_v3, %v20261_v31  ;;  %v21891_v3 = vld [vmem:[#allocation65_spill] sm:$0xff] }
 0x9d3   : > { %15053 = vmatmul.mubr.msk.bf16.vlgmr.msra.gmra.mrb[8].mxu1 %vm408_vm0, %v21886_v46 }
 0x9d4   : > { %12276 = vmatpush1.bf16.msra.mxu1 %v21887_v57  ;;  %12264 = vmatprep.mubr.bf16.mxu1 %v21493_v38  ;;  %v21913_v57 = vld [vmem:[#allocation87_spill] sm:$0xff] }
 0x9d5   : > { %12328 = vmatprep.subr.bf16.mxu1 %v12208_v62  ;;  %v21917_v62 = vld [vmem:[#allocation92_spill] sm:$0xff] }
 0x9db   : > { %15054 = vmatmul.mubr.msk.bf16.gmra.mrb[12].mxu1 %vm408_vm0, %v21889_v63 }
 0x9dc   : > { %12307 = vmatprep.mubr.bf16.mxu1 %v21493_v38 }
 0x9e3   : > { %15055 = vmatmul.mubr.msk.bf16.vlgmr.msra.gmra.mrb[16].mxu1 %vm408_vm0, %v21886_v46 }
 0x9e4   : > { %12329 = vmatpush1.bf16.msra.mxu1 %v20199_v37  ;;  %12317 = vmatprep.mubr.bf16.mxu1 %v21493_v38  ;;  %v21892_v37 = vld [vmem:[#allocation70_spill] sm:$0xff] }
 0x9e5   : > { %15546 = vmatprep.subr.bf16.mxu1 %v21888_v44 }
 0x9eb   : > { %15056 = vmatmul.mubr.msk.bf16.gmra.mrb[20].mxu1 %vm408_vm0, %v21889_v63 }
 0x9ec   : > { %12360 = vmatprep.mubr.bf16.mxu1 %v21493_v38 }
 0x9f3   : > { %15057 = vmatmul.mubr.msk.bf16.vlgmr.msra.gmra.mrb[24].mxu1 %vm408_vm0, %v21886_v46 }
 0x9f4   : > { %15547 = vmatpush3.bf16.msra.mxu1 %v21888_v44  ;;  %12370 = vmatprep.mubr.bf16.mxu1 %v21493_v38  ;;  %v21915_v44 = vld [vmem:[#allocation90_spill] sm:$0xff] }
 0x9f5   : > { %12495 = vmatprep.subr.bf16.mxu1 %v20213_v32  ;;  %v21893_v32 = vld [vmem:[#allocation67_spill] sm:$0xff] }
 0x9fb   : > { %15058 = vmatmul.mubr.msk.bf16.gmra.mrb[28].mxu1 %vm408_vm0, %v21889_v63 }
 0x9fc   : > { %15548 = vmatprep.mubr.msk.bf16.mxu1 %vm408_vm0, %v21886_v46  ;;  %v21912_v46 = vld [vmem:[#allocation82_spill] sm:$0xff] }
 0xa03   : > { %15549 = vmatmul.mubr.msk.bf16.vlgmr.msra.gmra.mrb[4].mxu1 %vm408_vm0, %v21889_v63 }
 0xa04   : > { %12496 = vmatpush1.bf16.msra.mxu1 %v20224_v18  ;;  %12527 = vmatprep.mubr.bf16.mxu1 %v21493_v38  ;;  %v21894_v18 = vld [vmem:[#allocation69_spill] sm:$0xff] }
 0xa05   : > { %12548 = vmatprep.subr.bf16.mxu1 %v20255_v35 }
 0xa0b   : > { %15061 = vmatmul.mubr.msk.bf16.vlgmr.msra.gmra.mrb[8].mxu1 %vm408_vm0, %v21890_v20 }
 0xa0c   : > { %12549 = vmatpush1.bf16.msra.mxu1 %v20227_v40  ;;  %12537 = vmatprep.mubr.bf16.mxu1 %v21493_v38  ;;  %v21895_v40 = vld [vmem:[#allocation68_spill] sm:$0xff] }
 0xa0d   : > { %12601 = vmatprep.subr.bf16.mxu1 %v12481_v19  ;;  %v21922_v19 = vld [vmem:[#allocation5_spill] sm:$0xff] }
 0xa13   : > { %15062 = vmatmul.mubr.msk.bf16.gmra.mrb[12].mxu1 %vm408_vm0, %v20233_v41 }
 0xa14   : > { %12580 = vmatprep.mubr.bf16.mxu1 %v21493_v38 }
 0xa1b   : > { %15063 = vmatmul.mubr.msk.bf16.vlgmr.msra.gmra.mrb[16].mxu1 %vm408_vm0, %v21890_v20 }
 0xa1c   : > { %12602 = vmatpush1.bf16.msra.mxu1 %v20252_v48  ;;  %12590 = vmatprep.mubr.bf16.mxu1 %v21493_v38  ;;  %v21896_v48 = vld [vmem:[#allocation72_spill] sm:$0xff] }
 0xa1d   : > { %15552 = vmatprep.subr.bf16.mxu1 %v20261_v31  ;;  %v12754_v35 = vsel %vm5570_vm12, %v21896_v48, %v21895_v40 }
 0xa23   : > { %15064 = vmatmul.mubr.msk.bf16.gmra.mrb[20].mxu1 %vm408_vm0, %v20233_v41 }
 0xa24   : > { %12633 = vmatprep.mubr.bf16.mxu1 %v21493_v38 }
 0xa2b   : > { %15065 = vmatmul.mubr.msk.bf16.vlgmr.msra.gmra.mrb[24].mxu1 %vm408_vm0, %v21890_v20 }
 0xa2c   : > { %15553 = vmatpush3.bf16.msra.mxu1 %v20261_v31  ;;  %12643 = vmatprep.mubr.bf16.mxu1 %v21493_v38  ;;  %v21897_v31 = vld [vmem:[#allocation3_spill] sm:$0xff] }
 0xa2d   : > { %12768 = vmatprep.subr.bf16.mxu1 %v20276_v55  ;;  %v21899_v55 = vld [vmem:[#allocation75_spill] sm:$0xff] }
 0xa33   : > { %15066 = vmatmul.mubr.msk.bf16.gmra.mrb[28].mxu1 %vm408_vm0, %v20233_v41 }
 0xa34   : > { %15554 = vmatprep.mubr.msk.bf16.mxu1 %vm408_vm0, %v21890_v20  ;;  %v21919_v20 = vld [vmem:[#allocation89_spill] sm:$0xff] }
 0xa3b   : > { %15555 = vmatmul.mubr.msk.bf16.vlgmr.msra.gmra.mrb[4].mxu1 %vm408_vm0, %v20233_v41  ;;  %v21898_v41 = vld [vmem:[#allocation71_spill] sm:$0xff] }
 0xa3c   : > { %12769 = vmatpush1.bf16.msra.mxu1 %v21891_v3  ;;  %12800 = vmatprep.mubr.bf16.mxu1 %v21493_v38  ;;  %v21923_v3 = vld [vmem:[#allocation6_spill] sm:$0xff] }
 0xa3d   : > { %12821 = vmatprep.subr.bf16.mxu1 %v21892_v37  ;;  %v21924_v37 = vld [vmem:[#allocation93_spill] sm:$0xff] }
 0xa43   : > { %15069 = vmatmul.mubr.msk.bf16.vlgmr.msra.gmra.mrb[8].mxu1 %vm408_vm0, %v21893_v32 }
 0xa44   : > { %12822 = vmatpush1.bf16.msra.mxu1 %v21894_v18  ;;  %12810 = vmatprep.mubr.bf16.mxu1 %v21493_v38  ;;  %v21926_v18 = vld [vmem:[#allocation18_spill] sm:$0xff] }
 0xa45   : > { %12874 = vmatprep.subr.bf16.mxu1 %v12754_v35  ;;  %v21928_v35 = vld [vmem:[#allocation95_spill] sm:$0xff] }
 0xa4b   : > { %15070 = vmatmul.mubr.msk.bf16.gmra.mrb[12].mxu1 %vm408_vm0, %v21897_v31 }
 0xa4c   : > { %12853 = vmatprep.mubr.bf16.mxu1 %v21493_v38 }
 0xa53   : > { %15071 = vmatmul.mubr.msk.bf16.vlgmr.msra.gmra.mrb[16].mxu1 %vm408_vm0, %v21893_v32 }
 0xa54   : > { %12875 = vmatpush1.bf16.msra.mxu1 %v21898_v41  ;;  %12863 = vmatprep.mubr.bf16.mxu1 %v21493_v38  ;;  %v21930_v41 = vld [vmem:[#allocation27_spill] sm:$0xff] }
 0xa55   : > { %15558 = vmatprep.subr.bf16.mxu1 %v21895_v40 }
 0xa5b   : > { %15072 = vmatmul.mubr.msk.bf16.gmra.mrb[20].mxu1 %vm408_vm0, %v21897_v31 }
 0xa5c   : > { %12906 = vmatprep.mubr.bf16.mxu1 %v21493_v38 }
 0xa63   : > { %15073 = vmatmul.mubr.msk.bf16.vlgmr.msra.gmra.mrb[24].mxu1 %vm408_vm0, %v21893_v32 }
 0xa64   : > { %15559 = vmatpush3.bf16.msra.mxu1 %v21895_v40  ;;  %12916 = vmatprep.mubr.bf16.mxu1 %v21493_v38  ;;  %v21927_v40 = vld [vmem:[#allocation96_spill] sm:$0xff] }
 0xa65   : > { %13041 = vmatprep.subr.bf16.mxu1 %v21899_v55  ;;  %v13846_v48 = vsel %vm6666_vm11, %v21927_v40, %v21926_v18  ;;  %v21931_v55 = vld [vmem:[#allocation97_spill] sm:$0xff] }
 0xa6b   : > { %15074 = vmatmul.mubr.msk.bf16.gmra.mrb[28].mxu1 %vm408_vm0, %v21897_v31 }
 0xa6c   : > { %15560 = vmatprep.mubr.msk.bf16.mxu1 %vm408_vm0, %v21893_v32  ;;  %v21925_v32 = vld [vmem:[#allocation26_spill] sm:$0xff] }
 0xa73   : > { %15561 = vmatmul.mubr.msk.bf16.vlgmr.msra.gmra.mrb[4].mxu1 %vm408_vm0, %v21897_v31  ;;  %v21929_v31 = vld [vmem:[#allocation24_spill] sm:$0xff] }
 0xa74   : > { %13042 = vmatpush1.bf16.msra.mxu1 %v21900_v51  ;;  %13073 = vmatprep.mubr.bf16.mxu1 %v21493_v38  ;;  %v16998_v51 = vld [vmem:[%s17345_s25 + $0xc] ss:$16 sps:$4 sm:$0xff]  }
 0xa75   : > { %13094 = vmatprep.subr.bf16.mxu1 %v20373_v54  ;;  %v21906_v54 = vld [vmem:[#allocation79_spill] sm:$0xff] }
 0xa7b   : > { %15077 = vmatmul.mubr.msk.bf16.vlgmr.msra.gmra.mrb[8].mxu1 %vm408_vm0, %v21901_v24 }
 0xa7c   : > { %13095 = vmatpush1.bf16.msra.mxu1 %v21902_v2  ;;  %13083 = vmatprep.mubr.bf16.mxu1 %v21493_v38 }
 0xa7d   : > { %13147 = vmatprep.subr.bf16.mxu1 %v13027_v45  ;;  %v21932_v45 = vld [vmem:[#allocation8_spill] sm:$0xff] }
 0xa83   : > { %15078 = vmatmul.mubr.msk.bf16.gmra.mrb[12].mxu1 %vm408_vm0, %v21905_v52 }
 0xa84   : > { %13126 = vmatprep.mubr.bf16.mxu1 %v21493_v38 }
 0xa8b   : > { %15079 = vmatmul.mubr.msk.bf16.vlgmr.msra.gmra.mrb[16].mxu1 %vm408_vm0, %v21901_v24 }
 0xa8c   : > { %13148 = vmatpush1.bf16.msra.mxu1 %v21906_v54  ;;  %13136 = vmatprep.mubr.bf16.mxu1 %v21493_v38 }
 0xa8d   : > { %15564 = vmatprep.subr.bf16.mxu1 %v21903_v15 }
 0xa93   : > { %15080 = vmatmul.mubr.msk.bf16.gmra.mrb[20].mxu1 %vm408_vm0, %v21905_v52 }
 0xa94   : > { %13179 = vmatprep.mubr.bf16.mxu1 %v21493_v38 }
 0xa9b   : > { %15081 = vmatmul.mubr.msk.bf16.vlgmr.msra.gmra.mrb[24].mxu1 %vm408_vm0, %v21901_v24 }
 0xa9c   : > { %15565 = vmatpush3.bf16.msra.mxu1 %v21903_v15  ;;  %13189 = vmatprep.mubr.bf16.mxu1 %v21493_v38  ;;  %v16999_v15 = vld [vmem:[%s17345_s25 + $0x2c] ss:$16 sps:$4 sm:$0xff]   ;;  %s16939_s25 = smul.u32 56, %s21944_s19 }
 0xa9d   : > { %13314 = vmatprep.subr.bf16.mxu1 %v20396_v61  ;;  %v21911_v61 = vld [vmem:[#allocation85_spill] sm:$0xff] }
 0xa9e   : > { %v13300_v39 = vsel %vm6118_vm3, %v20421_v16, %v21911_v61  ;;  %v21914_v16 = vld [vmem:[#allocation88_spill] sm:$0xff]  ;;  %vm21918_vm3 = vcmask 719872   ;;  %s21264_s13 = scalar_lea.vmem %s21293_s5, %s16939_s25 }
 0xaa3   : > { %15082 = vmatmul.mubr.msk.bf16.gmra.mrb[28].mxu1 %vm408_vm0, %v21905_v52 }
 0xaa4   : > { %15566 = vmatprep.mubr.msk.bf16.mxu1 %vm408_vm0, %v21901_v24  ;;  %v14123_v24 = vpop.permute.xlu1 %14122 }
 0xaa5   : > { %v14129_v2 = vsel %vm6950_vm2, %v20622_v8, %v14123_v24  ;;  %vm274_vm2 = vcmask 261120  }
 0xaab   : > { %15567 = vmatmul.mubr.msk.bf16.vlgmr.msra.gmra.mrb[4].mxu1 %vm408_vm0, %v21905_v52 }
 0xaac   : > { %13315 = vmatpush1.bf16.msra.mxu1 %v21907_v1  ;;  %13346 = vmatprep.mubr.bf16.mxu1 %v21493_v38 }
 0xaad   : > { %13367 = vmatprep.subr.bf16.mxu1 %v21908_v9 }
 0xab3   : > { %15085 = vmatmul.mubr.msk.bf16.vlgmr.msra.gmra.mrb[8].mxu1 %vm408_vm0, %v21909_v27 }
 0xab4   : > { %13368 = vmatpush1.bf16.msra.mxu1 %v21910_v17  ;;  %13356 = vmatprep.mubr.bf16.mxu1 %v21493_v38  ;;  %v21933_v17 = vld [vmem:[#allocation7_spill] sm:$0xff] }
 0xab5   : > { %13420 = vmatprep.subr.bf16.mxu1 %v13300_v39 }
 0xabb   : > { %15086 = vmatmul.mubr.msk.bf16.gmra.mrb[12].mxu1 %vm408_vm0, %v21912_v46 }
 0xabc   : > { %13399 = vmatprep.mubr.bf16.mxu1 %v21493_v38 }
 0xac3   : > { %15087 = vmatmul.mubr.msk.bf16.vlgmr.msra.gmra.mrb[16].mxu1 %vm408_vm0, %v21909_v27 }
 0xac4   : > { %13421 = vmatpush1.bf16.msra.mxu1 %v21913_v57  ;;  %13409 = vmatprep.mubr.bf16.mxu1 %v21493_v38 }
 0xac5   : > { %15570 = vmatprep.subr.bf16.mxu1 %v21911_v61 }
 0xacb   : > { %15088 = vmatmul.mubr.msk.bf16.gmra.mrb[20].mxu1 %vm408_vm0, %v21912_v46 }
 0xacc   : > { %13452 = vmatprep.mubr.bf16.mxu1 %v21493_v38 }
 0xad3   : > { %15089 = vmatmul.mubr.msk.bf16.vlgmr.msra.gmra.mrb[24].mxu1 %vm408_vm0, %v21909_v27 }
 0xad4   : > { %15571 = vmatpush3.bf16.msra.mxu1 %v21911_v61  ;;  %13462 = vmatprep.mubr.bf16.mxu1 %v21493_v38 }
 0xad5   : > { %13587 = vmatprep.subr.bf16.mxu1 %v20452_v23  ;;  %v21916_v23 = vld [vmem:[#allocation91_spill] sm:$0xff] }
 0xad6   : > { %v13573_v63 = vsel %vm21918_vm3, %v21917_v62, %v21916_v23 }
 0xadb   : > { %15090 = vmatmul.mubr.msk.bf16.gmra.mrb[28].mxu1 %vm408_vm0, %v21912_v46 }
 0xadc   : > { %15572 = vmatprep.mubr.msk.bf16.mxu1 %vm408_vm0, %v21909_v27 }
 0xae3   : > { %15573 = vmatmul.mubr.msk.bf16.vlgmr.msra.gmra.mrb[4].mxu1 %vm408_vm0, %v21912_v46 }
 0xae4   : > { %13588 = vmatpush1.bf16.msra.mxu1 %v20442_v47  ;;  %13619 = vmatprep.mubr.bf16.mxu1 %v21493_v38  ;;  %v21920_v47 = vld [vmem:[#allocation13_spill] sm:$0xff] }
 0xae5   : > { %13640 = vmatprep.subr.bf16.mxu1 %v20473_v59  ;;  %v21921_v59 = vld [vmem:[#allocation94_spill] sm:$0xff] }
 0xaeb   : > { %15093 = vmatmul.mubr.msk.bf16.vlgmr.msra.gmra.mrb[8].mxu1 %vm408_vm0, %v21914_v16 }
 0xaec   : > { %13641 = vmatpush1.bf16.msra.mxu1 %v21915_v44  ;;  %13629 = vmatprep.mubr.bf16.mxu1 %v21493_v38 }
 0xaed   : > { %13693 = vmatprep.subr.bf16.mxu1 %v13573_v63 }
 0xaf3   : > { %15094 = vmatmul.mubr.msk.bf16.gmra.mrb[12].mxu1 %vm408_vm0, %v21919_v20 }
 0xaf4   : > { %13672 = vmatprep.mubr.bf16.mxu1 %v21493_v38 }
 0xafb   : > { %15095 = vmatmul.mubr.msk.bf16.vlgmr.msra.gmra.mrb[16].mxu1 %vm408_vm0, %v21914_v16 }
 0xafc   : > { %13694 = vmatpush1.bf16.msra.mxu1 %v21920_v47  ;;  %13682 = vmatprep.mubr.bf16.mxu1 %v21493_v38 }
 0xafd   : > { %15576 = vmatprep.subr.bf16.mxu1 %v21916_v23 }
 0xb03   : > { %15096 = vmatmul.mubr.msk.bf16.gmra.mrb[20].mxu1 %vm408_vm0, %v21919_v20 }
 0xb04   : > { %13725 = vmatprep.mubr.bf16.mxu1 %v21493_v38 }
 0xb0b   : > { %15097 = vmatmul.mubr.msk.bf16.vlgmr.msra.gmra.mrb[24].mxu1 %vm408_vm0, %v21914_v16 }
 0xb0c   : > { %15577 = vmatpush3.bf16.msra.mxu1 %v21916_v23  ;;  %13735 = vmatprep.mubr.bf16.mxu1 %v21493_v38 }
 0xb0d   : > { %13860 = vmatprep.subr.bf16.mxu1 %v21921_v59 }
 0xb13   : > { %15098 = vmatmul.mubr.msk.bf16.gmra.mrb[28].mxu1 %vm408_vm0, %v21919_v20 }
 0xb14   : > { %15578 = vmatprep.mubr.msk.bf16.mxu1 %vm408_vm0, %v21914_v16 }
 0xb1b   : > { %15579 = vmatmul.mubr.msk.bf16.vlgmr.msra.gmra.mrb[4].mxu1 %vm408_vm0, %v21919_v20 }
 0xb1c   : > { %13861 = vmatpush1.bf16.msra.mxu1 %v21922_v19  ;;  %13892 = vmatprep.mubr.bf16.mxu1 %v21493_v38 }
 0xb1d   : > { %13913 = vmatprep.subr.bf16.mxu1 %v21923_v3 }
 0xb23   : > { %15101 = vmatmul.mubr.msk.bf16.vlgmr.msra.gmra.mrb[8].mxu1 %vm408_vm0, %v21924_v37 }
 0xb24   : > { %13914 = vmatpush1.bf16.msra.mxu1 %v21925_v32  ;;  %13902 = vmatprep.mubr.bf16.mxu1 %v21493_v38 }
 0xb25   : > { %13966 = vmatprep.subr.bf16.mxu1 %v13846_v48 }
 0xb2b   : > { %15102 = vmatmul.mubr.msk.bf16.gmra.mrb[12].mxu1 %vm408_vm0, %v21928_v35 }
 0xb2c   : > { %13945 = vmatprep.mubr.bf16.mxu1 %v21493_v38 }
 0xb33   : > { %15103 = vmatmul.mubr.msk.bf16.vlgmr.msra.gmra.mrb[16].mxu1 %vm408_vm0, %v21924_v37 }
 0xb34   : > { %13967 = vmatpush1.bf16.msra.mxu1 %v21929_v31  ;;  %13955 = vmatprep.mubr.bf16.mxu1 %v21493_v38 }
 0xb35   : > { %15582 = vmatprep.subr.bf16.mxu1 %v21926_v18 }
 0xb3b   : > { %15104 = vmatmul.mubr.msk.bf16.gmra.mrb[20].mxu1 %vm408_vm0, %v21928_v35 }
 0xb3c   : > { %13998 = vmatprep.mubr.bf16.mxu1 %v21493_v38 }
 0xb43   : > { %15105 = vmatmul.mubr.msk.bf16.vlgmr.msra.gmra.mrb[24].mxu1 %vm408_vm0, %v21924_v37 }
 0xb44   : > { %15583 = vmatpush3.bf16.msra.mxu1 %v21926_v18  ;;  %14008 = vmatprep.mubr.bf16.mxu1 %v21493_v38 }
 0xb45   : > { %14143 = vmatprep.subr.bf16.mxu1 %v21930_v41 }
 0xb4b   : > { %15106 = vmatmul.mubr.msk.bf16.gmra.mrb[28].mxu1 %vm408_vm0, %v21928_v35 }
 0xb4c   : > { %15584 = vmatprep.mubr.msk.bf16.mxu1 %vm408_vm0, %v21924_v37  ;;  %v21935_v37 = vld [vmem:[#allocation10_spill] sm:$0xff] }
 0xb53   : > { %15585 = vmatmul.mubr.msk.bf16.vlgmr.msra.gmra.mrb[4].mxu1 %vm408_vm0, %v21928_v35 }
 0xb54   : > { %14144 = vmatpush1.bf16.msra.mxu1 %v21931_v55  ;;  %14175 = vmatprep.mubr.bf16.mxu1 %v21493_v38 }
 0xb55   : > { %14196 = vmatprep.subr.bf16.mxu1 %v20609_v29 }
 0xb5b   : > { %15111 = vmatmul.mubr.msk.bf16.vlgmr.msra.gmra.mrb[8].mxu1 %vm408_vm0, %v16998_v51 }
 0xb5c   : > { %14197 = vmatpush1.bf16.msra.mxu1 %v20606_v25  ;;  %14185 = vmatprep.mubr.bf16.mxu1 %v21493_v38 }
 0xb5d   : > { %14249 = vmatprep.subr.bf16.mxu1 %v14129_v2 }
 0xb63   : > { %15112 = vmatmul.mubr.msk.bf16.gmra.mrb[12].mxu1 %vm408_vm0, %v16999_v15 }
 0xb64   : > { %14228 = vmatprep.mubr.bf16.mxu1 %v21493_v38 }
 0xb6b   : > { %15113 = vmatmul.mubr.msk.bf16.vlgmr.msra.gmra.mrb[16].mxu1 %vm408_vm0, %v16998_v51 }
 0xb6c   : > { %14250 = vmatpush1.bf16.msra.mxu1 %v20626_v6  ;;  %14238 = vmatprep.mubr.bf16.mxu1 %v21493_v38 }
 0xb6d   : > { %15588 = vmatprep.subr.bf16.mxu1 %v14123_v24 }
 0xb73   : > { %15114 = vmatmul.mubr.msk.bf16.gmra.mrb[20].mxu1 %vm408_vm0, %v16999_v15 }
 0xb74   : > { %14281 = vmatprep.mubr.bf16.mxu1 %v21493_v38 }
 0xb7b   : > { %15115 = vmatmul.mubr.msk.bf16.vlgmr.msra.gmra.mrb[24].mxu1 %vm408_vm0, %v16998_v51 }
 0xb7c   : > { %15589 = vmatpush3.bf16.msra.mxu1 %v14123_v24  ;;  %14291 = vmatprep.mubr.bf16.mxu1 %v21493_v38 }
 0xb83   : > { %15116 = vmatmul.mubr.msk.bf16.gmra.mrb[28].mxu1 %vm408_vm0, %v16999_v15 }
 0xb84   : > { %15590 = vmatprep.mubr.msk.bf16.mxu1 %vm408_vm0, %v16998_v51 }
 0xb8b   : > { %15591 = vmatmul.mubr.msk.bf16.vlgmr.msra.gmra.mrb[4].mxu1 %vm408_vm0, %v16999_v15 }
 0xc2e   : > { %v14177_v29 = vpop.f32.mrb[8].mxu1 }
 0xc2f   : > { %v15598_v25 = vadd.f32 %v14177_v29, %v20882_v49  ;;  %v14179_v8 = vpop.f32.mrb[9].mxu1 }
 0xc30   : > { %v15599_v6 = vadd.f32 %v14179_v8, %v20884_v22  ;;  %v14181_v21 = vpop.f32.mrb[10].mxu1 }
 0xc31   : > { %v14379_v52 = vadd.f32 %v15598_v25, %v21932_v45  ;;  %v15600_v54 = vadd.f32 %v14181_v21, %v20886_v36  ;;  %v14183_v1 = vpop.f32.mrb[11].mxu1 }
 0xc32   : > { %v14380_v38 = vadd.f32 %v15599_v6, %v21932_v45  ;;  %v15601_v9 = vadd.f32 %v14183_v1, %v20888_v53  ;;  %v21934_v53 = vld [vmem:[#allocation11_spill] sm:$0xff] }
 0xc33   : > { %v15119_v27 = vmul.f32 -1.442695, %v14379_v52  ;;  %v14386_v61 = vadd.f32 %v15600_v54, %v21933_v17 }
 0xc34   : > { %v15120_v39 = vmul.f32 -1.442695, %v14380_v38  ;;  %v14387_v46 = vadd.f32 %v15601_v9, %v21933_v17 }
 0xc35   : > { %17112 = vpow2.f32 %v15119_v27  ;;  %v15126_v49 = vmul.f32 -1.442695, %v14386_v61 }
 0xc36   : > { %17114 = vpow2.f32 %v15120_v39  ;;  %v15127_v22 = vmul.f32 -1.442695, %v14387_v46  ;;  %v14187_v57 = vpop.f32.mrb[12].mxu1 }
 0xc37   : > { %17116 = vpow2.f32 %v15126_v49  ;;  %v15602_v16 = vadd.f32 %v14187_v57, %v20894_v42  ;;  %v14189_v36 = vpop.f32.mrb[13].mxu1 }
 0xc38   : > { %17118 = vpow2.f32 %v15127_v22  ;;  %v15603_v44 = vadd.f32 %v14189_v36, %v20896_v50  ;;  %v14191_v23 = vpop.f32.mrb[14].mxu1 }
 0xc39   : > { %v14393_v62 = vadd.f32 %v15602_v16, %v21934_v53  ;;  %v15604_v63 = vadd.f32 %v14191_v23, %v20898_v12  ;;  %v14193_v20 = vpop.f32.mrb[15].mxu1 }
 0xc3a   : > { %v14394_v47 = vadd.f32 %v15603_v44, %v21934_v53  ;;  %v15605_v59 = vadd.f32 %v14193_v20, %v20900_v26 }
 0xc3b   : > { %v15133_v19 = vmul.f32 -1.442695, %v14393_v62  ;;  %v14400_v32 = vadd.f32 %v15604_v63, %v21935_v37 }
 0xc3c   : > { %v15134_v3 = vmul.f32 -1.442695, %v14394_v47  ;;  %v14401_v42 = vadd.f32 %v15605_v59, %v21935_v37 }
 0xc3d   : > { %17120 = vpow2.f32 %v15133_v19 }
 0xc3e   : > { %17122 = vpow2.f32 %v15134_v3  ;;  %v14230_v18 = vpop.f32.mrb[16].mxu1 }
 0xc3f   : > { %v17113_v50 = vpop.eup %17112  ;;  %v15606_v40 = vadd.f32 %v14230_v18, %v20909_v60  ;;  %v14232_v48 = vpop.f32.mrb[17].mxu1  ;;  %17124 = vtanh.f32 %v14400_v32  ;;  %v21936_v18 = vld [vmem:[#allocation12_spill] sm:$0xff] }
 0xc40   : > { %v17115_v35 = vpop.eup %17114  ;;  %v14470_v12 = vadd.f32 1.0, %v17113_v50  ;;  %v15607_v31 = vadd.f32 %v14232_v48, %v20911_v14  ;;  %v14234_v41 = vpop.f32.mrb[18].mxu1  ;;  %17126 = vtanh.f32 %v14401_v42 }
 0xc41   : > { %v17117_v26 = vpop.eup %17116  ;;  %v14471_v55 = vadd.f32 1.0, %v17115_v35  ;;  %v14381_v51 = vadd.f32 %v15606_v40, %v21932_v45  ;;  %v15608_v24 = vadd.f32 %v14234_v41, %v20913_v7  ;;  %v14236_v2 = vpop.f32.mrb[19].mxu1  ;;  %v21937_v35 = vld [vmem:[#allocation17_spill] sm:$0xff] }
 0xc42   : > { %v17119_v15 = vpop.eup %17118  ;;  %17128 = vrcp.f32 %v14470_v12  ;;  %v14477_v29 = vadd.f32 1.0, %v17117_v26  ;;  %v14382_v60 = vadd.f32 %v15607_v31, %v21932_v45  ;;  %v15609_v25 = vadd.f32 %v14236_v2, %v20915_v28 }
 0xc43   : > { %17130 = vrcp.f32 %v14471_v55  ;;  %v14478_v8 = vadd.f32 1.0, %v17119_v15  ;;  %v15121_v6 = vmul.f32 -1.442695, %v14381_v51  ;;  %v14388_v14 = vadd.f32 %v15608_v24, %v21933_v17 }
 0xc44   : > { %17132 = vrcp.f32 %v14477_v29  ;;  %v15122_v21 = vmul.f32 -1.442695, %v14382_v60  ;;  %v14389_v52 = vadd.f32 %v15609_v25, %v21933_v17 }
 0xc45   : > { %17134 = vrcp.f32 %v14478_v8  ;;  %v15128_v54 = vmul.f32 -1.442695, %v14388_v14 }
 0xc46   : > { %17136 = vpow2.f32 %v15121_v6  ;;  %v15129_v7 = vmul.f32 -1.442695, %v14389_v52  ;;  %v14240_v1 = vpop.f32.mrb[20].mxu1 }
 0xc47   : > { %v17121_v38 = vpop.eup %17120  ;;  %17138 = vpow2.f32 %v15122_v21  ;;  %v15610_v9 = vadd.f32 %v14240_v1, %v20926_v4  ;;  %v14242_v27 = vpop.f32.mrb[21].mxu1 }
 0xc48   : > { %v17123_v28 = vpop.eup %17122  ;;  %v14484_v61 = vadd.f32 1.0, %v17121_v38  ;;  %17140 = vpow2.f32 %v15128_v54  ;;  %v15611_v39 = vadd.f32 %v14242_v27, %v20928_v34  ;;  %v14244_v46 = vpop.f32.mrb[22].mxu1 }
 0xc49   : > { %v14485_v49 = vadd.f32 1.0, %v17123_v28  ;;  %17142 = vpow2.f32 %v15129_v7  ;;  %v14395_v22 = vadd.f32 %v15610_v9, %v21934_v53  ;;  %v15612_v57 = vadd.f32 %v14244_v46, %v20930_v11  ;;  %v14246_v16 = vpop.f32.mrb[23].mxu1  ;;  %v17125_v36 = vpop.eup %17124 }
 0xc4a   : > { %v14396_v44 = vadd.f32 %v15611_v39, %v21934_v53  ;;  %v15613_v23 = vadd.f32 %v14246_v16, %v20932_v58  ;;  %v17127_v4 = vpop.eup %17126  ;;  %17144 = vrcp.f32 %v14484_v61 }
 0xc4b   : > { %v15135_v62 = vmul.f32 -1.442695, %v14395_v22  ;;  %v14402_v34 = vadd.f32 %v15612_v57, %v21935_v37  ;;  %17146 = vrcp.f32 %v14485_v49 }
 0xc4c   : > { %v17129_v63 = vpop.eup %17128  ;;  %v15136_v20 = vmul.f32 -1.442695, %v14396_v44  ;;  %v14403_v11 = vadd.f32 %v15613_v23, %v21935_v37 }
 0xc4d   : > { %v17131_v47 = vpop.eup %17130  ;;  %v14547_v59 = vmul.f32 %v17129_v63, %v17125_v36  ;;  %17148 = vpow2.f32 %v15135_v62 }
 0xc4e   : > { %v17133_v19 = vpop.eup %17132  ;;  %v14548_v3 = vmul.f32 %v17131_v47, %v17127_v4  ;;  %v14283_v32 = vpop.f32.mrb[24].mxu1  ;;  %17150 = vpow2.f32 %v15136_v20 }
 0xc4f   : > { %v17135_v42 = vpop.eup %17134  ;;  %v14540_v50 = vmul.f32 %v17133_v19, %v21936_v18  ;;  %v15614_v58 = vadd.f32 %v14283_v32, %v20937_v13  ;;  %v14285_v40 = vpop.f32.mrb[25].mxu1  ;;  %17152 = vtanh.f32 %v14402_v34 }
 0xc50   : > { %v17137_v48 = vpop.eup %17136  ;;  %v14541_v12 = vmul.f32 %v17135_v42, %v21937_v35  ;;  %v15615_v31 = vadd.f32 %v14285_v40, %v20939_v30  ;;  %v14287_v41 = vpop.f32.mrb[26].mxu1  ;;  %17154 = vtanh.f32 %v14403_v11 }
 0xc51   : > { %v17139_v26 = vpop.eup %17138  ;;  %v14554_v55 = vadd.f32 %v14547_v59, %v14540_v50  ;;  %v14472_v51 = vadd.f32 1.0, %v17137_v48  ;;  %v14383_v24 = vadd.f32 %v15614_v58, %v21932_v45  ;;  %v15616_v2 = vadd.f32 %v14287_v41, %v20941_v0  ;;  %v14289_v15 = vpop.f32.mrb[27].mxu1 }
 0xc52   : > { %v17141_v29 = vpop.eup %17140  ;;  %v14555_v60 = vadd.f32 %v14548_v3, %v14541_v12  ;;  %v14473_v25 = vadd.f32 1.0, %v17139_v26  ;;  %v15617_v13 = vadd.f32 %v14289_v15, %v20943_v56  ;;  %v14384_v14 = vadd.f32 %v15615_v31, %v21932_v45  ;;  %v21938_v12 = vld [vmem:[#allocation15_spill] sm:$0xff] }
 0xc53   : > { %v17143_v8 = vpop.eup %17142  ;;  %17156 = vtanh.f32 %v14554_v55  ;;  %v14479_v6 = vadd.f32 1.0, %v17141_v29  ;;  %v15123_v21 = vmul.f32 -1.442695, %v14383_v24  ;;  %v14390_v52 = vadd.f32 %v15616_v2, %v21933_v17  ;;  %v21939_v55 = vld [vmem:[#allocation14_spill] sm:$0xff] }
 0xc54   : > { %17158 = vtanh.f32 %v14555_v60  ;;  %v14480_v30 = vadd.f32 1.0, %v17143_v8  ;;  %v17145_v0 = vpop.eup %17144  ;;  %v14391_v54 = vadd.f32 %v15617_v13, %v21933_v17  ;;  %v15124_v27 = vmul.f32 -1.442695, %v14384_v14 }
 0xc55   : > { %17160 = vrcp.f32 %v14472_v51  ;;  %v17147_v1 = vpop.eup %17146  ;;  %v15130_v46 = vmul.f32 -1.442695, %v14390_v52 }
 0xc56   : > { %17162 = vrcp.f32 %v14473_v25  ;;  %v14293_v7 = vpop.f32.mrb[28].mxu1  ;;  %v15131_v36 = vmul.f32 -1.442695, %v14391_v54 }
 0xc57   : > { %17164 = vrcp.f32 %v14479_v6  ;;  %v15618_v56 = vadd.f32 %v14293_v7, %v20949_v43  ;;  %v14295_v38 = vpop.f32.mrb[29].mxu1  ;;  %v17149_v9 = vpop.eup %17148 }
 0xc58   : > { %17166 = vrcp.f32 %v14480_v30  ;;  %v15619_v28 = vadd.f32 %v14295_v38, %v20951_v5  ;;  %v14297_v61 = vpop.f32.mrb[30].mxu1  ;;  %v17151_v39 = vpop.eup %17150  ;;  %v14486_v23 = vadd.f32 1.0, %v17149_v9 }
 0xc59   : > { %17168 = vpow2.f32 %v15123_v21  ;;  %v14397_v49 = vadd.f32 %v15618_v56, %v21934_v53  ;;  %v15620_v22 = vadd.f32 %v14297_v61, %v20953_v10  ;;  %v14299_v57 = vpop.f32.mrb[31].mxu1  ;;  %v17153_v16 = vpop.eup %17152  ;;  %v14487_v62 = vadd.f32 1.0, %v17151_v39 }
 0xc5a   : > { %v14398_v43 = vadd.f32 %v15619_v28, %v21934_v53  ;;  %v15621_v44 = vadd.f32 %v14299_v57, %v20955_v33  ;;  %v17155_v4 = vpop.eup %17154  ;;  %17170 = vpow2.f32 %v15124_v27 }
 0xc5b   : > { %17172 = vpow2.f32 %v15130_v46  ;;  %v15137_v10 = vmul.f32 -1.442695, %v14397_v49  ;;  %v14404_v19 = vadd.f32 %v15620_v22, %v21935_v37 }
 0xc5c   : > { %17174 = vpow2.f32 %v15131_v36  ;;  %v15138_v34 = vmul.f32 -1.442695, %v14398_v43  ;;  %v14405_v40 = vadd.f32 %v15621_v44, %v21935_v37  ;;  %v21940_v43 = vld [vmem:[#allocation16_spill] sm:$0xff] }
 0xc5d   : > { %v17157_v5 = vpop.eup %17156  ;;  %17176 = vrcp.f32 %v14486_v23  ;;  %v21941_v23 = vld [vmem:[#allocation19_spill] sm:$0xff] }
 0xc5e   : > { %v17159_v63 = vpop.eup %17158  ;;  %v14568_v20 = vmul.f32 %v17157_v5, %v17145_v0  ;;  %v15592_v47 = vpop.f32.mrb[4].mxu1  ;;  %17178 = vrcp.f32 %v14487_v62 }
 0xc5f   : > { %v17161_v33 = vpop.eup %17160  ;;  %v14569_v59 = vmul.f32 %v17159_v63, %v17147_v1  ;;  %v14336_v3 = vpop.f32.mrb[5].mxu1  ;;  %17180 = vpow2.f32 %v15137_v10  ;;  %v14399_v1 = vadd.f32 %v15592_v47, %v21934_v53 }
 0xc60   : > { %v17163_v11 = vpop.eup %17162  ;;  %14575 = vst [vmem:[%s21264_s13] sm:$0xff] %v14568_v20  ;;  %v14549_v32 = vmul.f32 %v17161_v33, %v17153_v16  ;;  %v14385_v42 = vadd.f32 %v14336_v3, %v21932_v45  ;;  %v15593_v18 = vpop.f32.mrb[6].mxu1  ;;  %17182 = vpow2.f32 %v15138_v34 }
 0xc61   : > { %v17165_v50 = vpop.eup %17164  ;;  %14576 = vst [vmem:[%s21264_s13 + $0x8] sm:$0xff] %v14569_v59  ;;  %v14550_v58 = vmul.f32 %v17163_v11, %v17155_v4  ;;  %v14339_v48 = vpop.f32.mrb[7].mxu1  ;;  %17184 = vtanh.f32 %v14404_v19  ;;  %v14406_v54 = vadd.f32 %v15593_v18, %v21935_v37  ;;  %v15139_v46 = vmul.f32 -1.442695, %v14399_v1 }
 0xc62   : > { %v17167_v35 = vpop.eup %17166  ;;  %v14542_v31 = vmul.f32 %v17165_v50, %v21938_v12  ;;  %v15125_v41 = vmul.f32 -1.442695, %v14385_v42  ;;  %v14392_v29 = vadd.f32 %v14339_v48, %v21933_v17 }
 0xc63   : > { %v17169_v26 = vpop.eup %17168  ;;  %v14543_v51 = vmul.f32 %v17167_v35, %v21939_v55 }
 0xc64   : > { %v14556_v24 = vadd.f32 %v14549_v32, %v14542_v31  ;;  %v14474_v2 = vadd.f32 1.0, %v17169_v26  ;;  %17186 = vpow2.f32 %v15125_v41  ;;  %v17171_v15 = vpop.eup %17170  ;;  %v15132_v21 = vmul.f32 -1.442695, %v14392_v29 }
 0xc65   : > { %v14557_v45 = vadd.f32 %v14550_v58, %v14543_v51  ;;  %17188 = vtanh.f32 %v14405_v40  ;;  %v17173_v60 = vpop.eup %17172  ;;  %v14475_v25 = vadd.f32 1.0, %v17171_v15  ;;  %v21942_v58 = vld [vmem:[#allocation9_spill] sm:$0xff] }
 0xc66   : > { %17190 = vtanh.f32 %v14556_v24  ;;  %v17175_v13 = vpop.eup %17174  ;;  %v14481_v8 = vadd.f32 1.0, %v17173_v60 }
 0xc67   : > { %17192 = vtanh.f32 %v14557_v45  ;;  %v17177_v6 = vpop.eup %17176  ;;  %v14482_v30 = vadd.f32 1.0, %v17175_v13 }
 0xc68   : > { %17194 = vrcp.f32 %v14474_v2  ;;  %v17179_v14 = vpop.eup %17178 }
 0xc69   : > { %17196 = vrcp.f32 %v14475_v25  ;;  %v17181_v52 = vpop.eup %17180 }
 0xc6a   : > { %17198 = vrcp.f32 %v14481_v8  ;;  %v17183_v0 = vpop.eup %17182  ;;  %v14488_v37 = vadd.f32 1.0, %v17181_v52 }
 0xc6b   : > { %17200 = vrcp.f32 %v14482_v30  ;;  %v17185_v7 = vpop.eup %17184  ;;  %v14489_v16 = vadd.f32 1.0, %v17183_v0 }
 0xc6c   : > { %17202 = vpow2.f32 %v15132_v21 }
 0xc6d   : > { %17204 = vtanh.f32 %v14406_v54 }
 0xc6e   : > { %v17187_v17 = vpop.eup %17186 }
 0xc6f   : > { %v17189_v56 = vpop.eup %17188  ;;  %v14476_v38 = vadd.f32 1.0, %v17187_v17 }
 0xc70   : > { %v17191_v9 = vpop.eup %17190 }
 0xc71   : > { %v17193_v27 = vpop.eup %17192  ;;  %v14570_v28 = vmul.f32 %v17191_v9, %v17177_v6  ;;  %17206 = vrcp.f32 %v14476_v38 }
 0xc72   : > { %v17195_v61 = vpop.eup %17194  ;;  %v14571_v39 = vmul.f32 %v17193_v27, %v17179_v14  ;;  %17208 = vpow2.f32 %v15139_v46 }
 0xc73   : > { %v17197_v49 = vpop.eup %17196  ;;  %14577 = vst [vmem:[%s21264_s13 + $0x10] sm:$0xff] %v14570_v28  ;;  %v14551_v22 = vmul.f32 %v17195_v61, %v17185_v7  ;;  %17210 = vrcp.f32 %v14488_v37 }
 0xc74   : > { %v17199_v57 = vpop.eup %17198  ;;  %14578 = vst [vmem:[%s21264_s13 + $0x18] sm:$0xff] %v14571_v39  ;;  %v14552_v53 = vmul.f32 %v17197_v49, %v17189_v56  ;;  %17212 = vrcp.f32 %v14489_v16 }
 0xc75   : > { %v17201_v36 = vpop.eup %17200  ;;  %v14544_v44 = vmul.f32 %v17199_v57, %v21940_v43 }
 0xc76   : > { %v14545_v4 = vmul.f32 %v17201_v36, %v21941_v23  ;;  %v17203_v5 = vpop.eup %17202 }
 0xc77   : > { %v14558_v62 = vadd.f32 %v14551_v22, %v14544_v44  ;;  %v14483_v63 = vadd.f32 1.0, %v17203_v5  ;;  %v17205_v20 = vpop.eup %17204 }
 0xc78   : > { %v14559_v10 = vadd.f32 %v14552_v53, %v14545_v4 }
 0xc79   : > { %17214 = vtanh.f32 %v14558_v62 }
 0xc7a   : > { %17216 = vtanh.f32 %v14559_v10 }
 0xc7b   : > { %v17207_v34 = vpop.eup %17206  ;;  %17218 = vrcp.f32 %v14483_v63 }
 0xc7c   : > { %v14553_v47 = vmul.f32 %v17207_v34, %v17205_v20  ;;  %v17209_v33 = vpop.eup %17208 }
 0xc7d   : > { %v17211_v59 = vpop.eup %17210  ;;  %v14490_v50 = vadd.f32 1.0, %v17209_v33 }
 0xc7e   : > { %v17213_v19 = vpop.eup %17212 }
 0xc7f   : > { %17220 = vrcp.f32 %v14490_v50 }
 0xc83   : > { %v17215_v3 = vpop.eup %17214 }
 0xc84   : > { %v17217_v11 = vpop.eup %17216  ;;  %v14572_v32 = vmul.f32 %v17215_v3, %v17211_v59 }
 0xc85   : > { %v17219_v42 = vpop.eup %17218  ;;  %v14573_v18 = vmul.f32 %v17217_v11, %v17213_v19 }
 0xc86   : > { %14579 = vst [vmem:[%s21264_s13 + $0x20] sm:$0xff] %v14572_v32  ;;  %v14546_v40 = vmul.f32 %v17219_v42, %v21942_v58 }
 0xc87   : > { %14580 = vst [vmem:[%s21264_s13 + $0x28] sm:$0xff] %v14573_v18 }
 0xc88   : > { %v14560_v48 = vadd.f32 %v14553_v47, %v14546_v40 }
 0xc89   : > { %v17221_v35 = vpop.eup %17220 }
 0xc8a   : > { %17222 = vtanh.f32 %v14560_v48 }
 0xc94   : > { %v17223_v12 = vpop.eup %17222 }
 0xc95   : > { %v14574_v31 = vmul.f32 %v17223_v12, %v17221_v35 }
 0xc97   : > { %14581 = vst.msk [vmem:[%s21264_s13 + $0x30] sm:$0xff] %vm274_vm2, %v14574_v31 }
 0xc98 PF: > { %s15_s18 = sadd.s32 1, %s17246_s18  }
 0xc99   : > { %p12_p4 = scmp.ge.s32.totalorder %s15_s18, 4  }
 0xc9b   :  { %14 = sbr.rel (!%p12_p4) target bundleno = 1 (0x1), region = 76 }

</bundles_post_ra>
